<compile_context>
chip_gen: v7x
topology: tpu7x:2x2x1
jax: 0.10.0
libtpu: 0.0.40
codegen_flags: <defaults>
</compile_context>

<pallas_src>
import functools
import math

import jax
import jax.numpy as jnp
import numpy as np
from jax.experimental import pallas as pl
from jax.experimental.pallas import tpu as pltpu


# ------------------------------ small helpers -------------------------------


def _replicated_spec(shape):
    """BlockSpec for an operand that is identical for every grid step."""
    if len(shape) == 2:
        return pl.BlockSpec(shape, lambda b: (0, 0))
    if len(shape) == 3:
        return pl.BlockSpec(shape, lambda b: (0, 0, 0))
    raise ValueError(f"unsupported operand rank: {shape}")


def _layernorm(x, g, b, eps):
    mu = jnp.mean(x, axis=-1, keepdims=True)
    var = jnp.mean(jnp.square(x - mu), axis=-1, keepdims=True)
    return (x - mu) * jax.lax.rsqrt(var + eps) * g + b


def _softmax_rows(s):
    s = s - jnp.max(s, axis=-1, keepdims=True)
    p = jnp.exp(s)
    return p * pl.reciprocal(jnp.sum(p, axis=-1, keepdims=True), approx=False)


_ENC_KEYS = ("wqkv", "bqkv", "wo", "bo", "ln1_g", "ln1_b",
             "w1", "b1", "w2", "b2", "ln2_g", "ln2_b")
_XA_KEYS = ("wq", "bq", "wkv", "bkv", "wo", "bo")
_CLS_KEYS = ("w1", "b1", "w2", "b2", "w3", "b3")


# --------------------------- the single fused kernel --------------------------


def _poger_kernel(
    # per-batch data
    ctx_raw_ref, patches_ref,
    # reducer MLP(768, [384], emb)
    rw1, rb1, rw2, rb2,
    # conv stack + reassembly + posenc + pre-norm
    shifts, cw0, cw1, cw2, cw3, cw4, emat, pos, ng, nb,
    # 2-layer transformer encoder (weights stacked on a leading layer axis)
    e_wqkv, e_bqkv, e_wo, e_bo, e_g1, e_b1ln, e_w1, e_fb1, e_w2, e_fb2, e_g2, e_b2ln,
    # single-head cross attention (prob)
    p_wq, p_bq, p_wkv, p_bkv, p_wo, p_bo,
    # single-head cross attention (context)
    c_wq, c_bq, c_wkv, c_bkv, c_wo, c_bo,
    # classifier MLP(2*emb, [128, 32], ncls)
    k_w1, k_b1, k_w2, k_b2, k_w3, k_b3,
    # output
    o_ref,
    *, nfeat, k_len, nhead, nlayers, eps):
    emb = pos.shape[-1]

    # ------------------------- reducer MLP on context -------------------------
    h = jnp.dot(ctx_raw_ref[...], rw1[...], preferred_element_type=jnp.float32) + rb1[...]
    h = jnp.maximum(h, 0.0)
    ctx = jnp.dot(h, rw2[...], preferred_element_type=jnp.float32) + rb2[...]   # (k, emb)

    # --------------------------- conv feature stack ---------------------------
    # layer 0: 5-tap conv on the single input channel, pre-unfolded to
    #          (nfeat*k, 5) patches in the wrapper.
    x = jnp.dot(patches_ref[...], cw0[...], preferred_element_type=jnp.float32)
    x = jnp.maximum(x, 0.0)                                       # (nfeat*k, 64)
    # layers 1..4: 3-tap convs as sum over taps of (block-diag shift) @ x @ W_tap
    for w_ref in (cw1, cw2, cw3, cw4):
        acc = None
        for dt in range(3):
            shifted = jnp.dot(shifts[dt], x, preferred_element_type=jnp.float32)
            tap = jnp.dot(shifted, w_ref[dt], preferred_element_type=jnp.float32)
            acc = tap if acc is None else acc + tap
        x = jnp.maximum(acc, 0.0)
    # reassemble nfeat per-stream 64-wide outputs into one lane-dense (k, emb) row
    pf = None
    for f in range(nfeat):
        blk = x[f * k_len:(f + 1) * k_len, :]                     # (k, 64)
        placed = jnp.dot(blk, emat[f], preferred_element_type=jnp.float32)
        pf = placed if pf is None else pf + placed
    pf = _layernorm(pf + pos[...], ng[...], nb[...], eps)         # (k, emb)

    # ----------------------- 2-layer transformer encoder ----------------------
    D = emb
    dk = D // nhead
    xe = pf
    for l in range(nlayers):
        # fused QKV projection (1/sqrt(dk) already folded into the Q weights)
        qkv = jnp.dot(xe, e_wqkv[l], preferred_element_type=jnp.float32) + e_bqkv[l]
        attn = None
        for hh in range(nhead):
            q = qkv[:, hh * dk:(hh + 1) * dk]
            kk = qkv[:, D + hh * dk:D + (hh + 1) * dk]
            v = qkv[:, 2 * D + hh * dk:2 * D + (hh + 1) * dk]
            pmat = _softmax_rows(jnp.dot(q, kk.T, preferred_element_type=jnp.float32))
            ctx_h = jnp.dot(pmat, v, preferred_element_type=jnp.float32)
            # accumulate the out-projection per head (avoids a head concat)
            contrib = jnp.dot(ctx_h, e_wo[l, hh * dk:(hh + 1) * dk, :],
                              preferred_element_type=jnp.float32)
            attn = contrib if attn is None else attn + contrib
        xe = _layernorm(xe + attn + e_bo[l], e_g1[l], e_b1ln[l], eps)
        ff = jnp.dot(xe, e_w1[l], preferred_element_type=jnp.float32) + e_fb1[l]
        ff = jnp.maximum(ff, 0.0)
        ff = jnp.dot(ff, e_w2[l], preferred_element_type=jnp.float32) + e_fb2[l]
        xe = _layernorm(xe + ff, e_g2[l], e_b2ln[l], eps)

    # ------------- cross attentions + classifier MLP + mean over k ------------
    def xattn(query, kv, wq, bq, wkv, bkv, wo, bo):
        # single-head attention; 1/sqrt(d_model) is folded into wq/bq
        q = jnp.dot(query, wq[...], preferred_element_type=jnp.float32) + bq[...]
        kvp = jnp.dot(kv, wkv[...], preferred_element_type=jnp.float32) + bkv[...]
        kkk = kvp[:, :emb]
        vv = kvp[:, emb:]
        pmat = _softmax_rows(jnp.dot(q, kkk.T, preferred_element_type=jnp.float32))
        o = jnp.dot(pmat, vv, preferred_element_type=jnp.float32)
        return jnp.dot(o, wo[...], preferred_element_type=jnp.float32) + bo[...]

    pf_new = xattn(ctx, xe, p_wq, p_bq, p_wkv, p_bkv, p_wo, p_bo)
    ctx_new = xattn(pf_new, ctx, c_wq, c_bq, c_wkv, c_bkv, c_wo, c_bo)

    # classifier on merged = concat([pf_new, ctx_new], -1) via split weights
    hc = (jnp.dot(pf_new, k_w1[0:emb, :], preferred_element_type=jnp.float32)
          + jnp.dot(ctx_new, k_w1[emb:2 * emb, :], preferred_element_type=jnp.float32)
          + k_b1[...])
    hc = jnp.maximum(hc, 0.0)
    hc = jnp.maximum(jnp.dot(hc, k_w2[...], preferred_element_type=jnp.float32)
                     + k_b2[...], 0.0)
    hc = jnp.dot(hc, k_w3[...], preferred_element_type=jnp.float32) + k_b3[...]
    o_ref[...] = jnp.mean(hc, axis=0, keepdims=True)              # mean over k


def poger_forward(ctx_raw, patches0, params, *, nfeat, k_len, nhead=4):
    B = ctx_raw.shape[0]
    ncls = params["cls"]["w3"].shape[1]
    enc = params["enc"]
    nlayers = enc["wqkv"].shape[0]

    weights = (
        [params["red_w1"], params["red_b1"], params["red_w2"], params["red_b2"],
         params["shifts3"]]
        + list(params["conv_w"])
        + [params["emat"], params["pos_enc"], params["norm_g"], params["norm_b"]]
        + [enc[n] for n in _ENC_KEYS]
        + [params["xattn_prob"][n] for n in _XA_KEYS]
        + [params["xattn_ctx"][n] for n in _XA_KEYS]
        + [params["cls"][n] for n in _CLS_KEYS]
    )

    in_specs = [
        pl.BlockSpec((None,) + ctx_raw.shape[1:], lambda b: (b, 0, 0)),
        pl.BlockSpec((None,) + patches0.shape[1:], lambda b: (b, 0, 0)),
    ] + [_replicated_spec(w.shape) for w in weights]

    out = pl.pallas_call(
        functools.partial(_poger_kernel, nfeat=nfeat, k_len=k_len,
                          nhead=nhead, nlayers=nlayers, eps=1e-5),
        grid=(B,),
        in_specs=in_specs,
        out_specs=pl.BlockSpec((None, 1, ncls), lambda b: (b, 0, 0)),
        out_shape=jax.ShapeDtypeStruct((B, 1, ncls), jnp.float32),
        compiler_params=pltpu.CompilerParams(dimension_semantics=("parallel",)),
    )(ctx_raw, patches0, *weights)
    return out[:, 0, :]


# ------------------------------ constants ------------------------------------


def _shift_matrices(nfeat, k_len):
    """(3, nfeat*k, nfeat*k) block-diagonal row-shift operators for 3-tap convs."""
    n = nfeat * k_len
    s = np.zeros((3, n, n), np.float32)
    for dt in range(3):
        off = dt - 1
        for f in range(nfeat):
            for t in range(k_len):
                t2 = t + off
                if 0 <= t2 < k_len:
                    s[dt, f * k_len + t, f * k_len + t2] = 1.0
    return jnp.asarray(s)


def _placement_matrices(nfeat, emb):
    """(nfeat, 64, emb): place stream f's 64 channels at output cols f*64.."""
    e = np.zeros((nfeat, 64, emb), np.float32)
    for f in range(nfeat):
        for c in range(64):
            e[f, c, f * 64 + c] = 1.0
    return jnp.asarray(e)


def position_encoding(seq_len, emb):
    # NOTE: deliberately reproduces the reference module's exponent scheme
    # (sin uses 2*i/emb, cos uses 2*(i+1)/emb), not the canonical formula.
    pe = np.zeros((seq_len, emb), np.float32)
    for pos in range(seq_len):
        for i in range(0, emb, 2):
            pe[pos, i] = math.sin(pos / 10000 ** (2 * i / emb))
            pe[pos, i + 1] = math.cos(pos / 10000 ** (2 * (i + 1) / emb))
    return jnp.asarray(pe)


# ------------------------------ parameters -----------------------------------


def init_params(key, nfeat, nclasses, k_len, nhead=4):
    emb = nfeat * 64
    keys = iter(jax.random.split(key, 128))

    def rn(shape, scale=0.05):
        return jax.random.normal(next(keys), shape, jnp.float32) * scale

    p = {}
    # Conv1d weights stored tap-major: layer 0 flattened (k*C_in, C_out);
    # layers 1-4 as (k, C_in, C_out).  [(64,5,1)] + [(128,3,1)]*3 + [(64,3,1)]
    p["conv_w"] = [rn((5, 64)), rn((3, 64, 128)), rn((3, 128, 128)),
                   rn((3, 128, 128)), rn((3, 128, 64))]
    p["shifts3"] = _shift_matrices(nfeat, k_len)
    p["emat"] = _placement_matrices(nfeat, emb)
    p["pos_enc"] = position_encoding(k_len, emb)
    p["norm_g"] = jnp.ones((1, emb), jnp.float32)
    p["norm_b"] = jnp.zeros((1, emb), jnp.float32)
    # reducer MLP(768, [384], emb)
    p["red_w1"] = rn((768, 384)); p["red_b1"] = rn((1, 384))
    p["red_w2"] = rn((384, emb)); p["red_b2"] = rn((1, emb))

    # transformer encoder: 2 layers, weights stacked on a leading axis.
    q_scale = 1.0 / math.sqrt(emb // nhead)     # folded into the Q projection

    def enc_layer():
        wq, wk, wv = rn((emb, emb)), rn((emb, emb)), rn((emb, emb))
        bq, bk, bv = rn((1, emb)), rn((1, emb)), rn((1, emb))
        return dict(
            wqkv=jnp.concatenate([wq * q_scale, wk, wv], axis=1),
            bqkv=jnp.concatenate([bq * q_scale, bk, bv], axis=1),
            wo=rn((emb, emb)), bo=rn((1, emb)),
            ln1_g=jnp.ones((1, emb), jnp.float32),
            ln1_b=jnp.zeros((1, emb), jnp.float32),
            w1=rn((emb, 256)), b1=rn((1, 256)),
            w2=rn((256, emb)), b2=rn((1, emb)),
            ln2_g=jnp.ones((1, emb), jnp.float32),
            ln2_b=jnp.zeros((1, emb), jnp.float32),
        )

    layers = [enc_layer() for _ in range(2)]
    p["enc"] = {name: jnp.stack([lyr[name] for lyr in layers]) for name in layers[0]}

    # single-head cross-attention blocks: 1/sqrt(d_model) folded into Q, K/V fused
    x_scale = 1.0 / math.sqrt(emb)

    def xattn_params():
        wq, wk, wv = rn((emb, emb)), rn((emb, emb)), rn((emb, emb))
        bq, bk, bv = rn((1, emb)), rn((1, emb)), rn((1, emb))
        return dict(wq=wq * x_scale, bq=bq * x_scale,
                    wkv=jnp.concatenate([wk, wv], axis=1),
                    bkv=jnp.concatenate([bk, bv], axis=1),
                    wo=rn((emb, emb)), bo=rn((1, emb)))

    p["xattn_prob"] = xattn_params()
    p["xattn_ctx"] = xattn_params()
    # classifier MLP(2*emb, [128, 32], nclasses)
    p["cls"] = dict(w1=rn((2 * emb, 128)), b1=rn((1, 128)),
                    w2=rn((128, 32)), b2=rn((1, 32)),
                    w3=rn((32, nclasses)), b3=rn((1, nclasses)))
    return p


# -------------------------------- forward ------------------------------------


def model_forward(params, prob_feature, sem_feature, target_idx, *, nfeat):
    B, k_len, _ = prob_feature.shape

    # glue: gather the per-position RoBERTa rows (B, k, 768)
    # TODO(synk): the gather stays in plain JAX; an in-kernel scalar-prefetch
    # gather is possible but not worth it at these shapes.
    ctx_raw = jnp.take_along_axis(sem_feature, target_idx[..., None], axis=1)

    # glue: first-layer im2col on the raw 1-channel signals (tiny, one-time)
    sig = jnp.transpose(prob_feature, (0, 2, 1))                 # (B, nfeat, k)
    sigp = jnp.pad(sig, ((0, 0), (0, 0), (2, 2)))
    patches0 = jnp.stack([sigp[:, :, dt:dt + k_len] for dt in range(5)], axis=-1)
    patches0 = patches0.reshape(B, nfeat * k_len, 5)

    # single fused kernel: reducer MLP + conv stack + posenc + pre-norm +
    # 2-layer encoder + both cross-attentions + classifier + mean over k
    return poger_forward(ctx_raw, patches0, params, nfeat=nfeat, k_len=k_len)


# ---------------------------------- main --------------------------------------

if __name__ == "__main__":
    B, k_len, nfeat, nclasses, S_sem = 2, 8, 2, 3, 12

    key = jax.random.PRNGKey(0)
    kp, ks, ki, kw = jax.random.split(key, 4)
    prob_feature = jax.random.normal(kp, (B, k_len, nfeat), jnp.float32)
    sem_feature = jax.random.normal(ks, (B, S_sem, 768), jnp.float32)
    target_roberta_idx = jax.random.randint(ki, (B, k_len), 0, S_sem, jnp.int32)

    params = init_params(kw, nfeat, nclasses, k_len)

    fwd = jax.jit(functools.partial(model_forward, nfeat=nfeat))
    out = jax.block_until_ready(fwd(params, prob_feature, sem_feature,
                                    target_roberta_idx))

    assert out.shape == (B, nclasses)
    assert bool(jnp.all(jnp.isfinite(out)))
    print("KERNEL_OK")
</pallas_src>

<mosaic_0001>
module attributes {stable_mosaic.version = 11 : i64} {
  func.func @_poger_kernel(%arg0: i32, %arg1: memref<1x8x768xf32, #tpu.memory_space<vmem>>, %arg2: memref<1x16x5xf32, #tpu.memory_space<vmem>>, %arg3: memref<768x384xf32, #tpu.memory_space<vmem>>, %arg4: memref<1x384xf32, #tpu.memory_space<vmem>>, %arg5: memref<384x128xf32, #tpu.memory_space<vmem>>, %arg6: memref<1x128xf32, #tpu.memory_space<vmem>>, %arg7: memref<3x16x16xf32, #tpu.memory_space<vmem>>, %arg8: memref<5x64xf32, #tpu.memory_space<vmem>>, %arg9: memref<3x64x128xf32, #tpu.memory_space<vmem>>, %arg10: memref<3x128x128xf32, #tpu.memory_space<vmem>>, %arg11: memref<3x128x128xf32, #tpu.memory_space<vmem>>, %arg12: memref<3x128x64xf32, #tpu.memory_space<vmem>>, %arg13: memref<2x64x128xf32, #tpu.memory_space<vmem>>, %arg14: memref<8x128xf32, #tpu.memory_space<vmem>>, %arg15: memref<1x128xf32, #tpu.memory_space<vmem>>, %arg16: memref<1x128xf32, #tpu.memory_space<vmem>>, %arg17: memref<2x128x384xf32, #tpu.memory_space<vmem>>, %arg18: memref<2x1x384xf32, #tpu.memory_space<vmem>>, %arg19: memref<2x128x128xf32, #tpu.memory_space<vmem>>, %arg20: memref<2x1x128xf32, #tpu.memory_space<vmem>>, %arg21: memref<2x1x128xf32, #tpu.memory_space<vmem>>, %arg22: memref<2x1x128xf32, #tpu.memory_space<vmem>>, %arg23: memref<2x128x256xf32, #tpu.memory_space<vmem>>, %arg24: memref<2x1x256xf32, #tpu.memory_space<vmem>>, %arg25: memref<2x256x128xf32, #tpu.memory_space<vmem>>, %arg26: memref<2x1x128xf32, #tpu.memory_space<vmem>>, %arg27: memref<2x1x128xf32, #tpu.memory_space<vmem>>, %arg28: memref<2x1x128xf32, #tpu.memory_space<vmem>>, %arg29: memref<128x128xf32, #tpu.memory_space<vmem>>, %arg30: memref<1x128xf32, #tpu.memory_space<vmem>>, %arg31: memref<128x256xf32, #tpu.memory_space<vmem>>, %arg32: memref<1x256xf32, #tpu.memory_space<vmem>>, %arg33: memref<128x128xf32, #tpu.memory_space<vmem>>, %arg34: memref<1x128xf32, #tpu.memory_space<vmem>>, %arg35: memref<128x128xf32, #tpu.memory_space<vmem>>, %arg36: memref<1x128xf32, #tpu.memory_space<vmem>>, %arg37: memref<128x256xf32, #tpu.memory_space<vmem>>, %arg38: memref<1x256xf32, #tpu.memory_space<vmem>>, %arg39: memref<128x128xf32, #tpu.memory_space<vmem>>, %arg40: memref<1x128xf32, #tpu.memory_space<vmem>>, %arg41: memref<256x128xf32, #tpu.memory_space<vmem>>, %arg42: memref<1x128xf32, #tpu.memory_space<vmem>>, %arg43: memref<128x32xf32, #tpu.memory_space<vmem>>, %arg44: memref<1x32xf32, #tpu.memory_space<vmem>>, %arg45: memref<32x3xf32, #tpu.memory_space<vmem>>, %arg46: memref<1x3xf32, #tpu.memory_space<vmem>>, %arg47: memref<1x1x3xf32, #tpu.memory_space<vmem>>) attributes {dimension_semantics = [#tpu.dimension_semantics<parallel>], iteration_bounds = array<i64: 2>, scalar_prefetch = 0 : i64, scratch_operands = 0 : i64, tpu.core_type = #tpu.core_type<tc>, window_params = [{transform_indices = @transform_0, window_bounds = array<i64: 1, 8, 768>}, {transform_indices = @transform_1, window_bounds = array<i64: 1, 16, 5>}, {pipeline_mode = #tpu.pipeline_mode<synchronous>, transform_indices = @transform_2, window_bounds = array<i64: 768, 384>}, {pipeline_mode = #tpu.pipeline_mode<synchronous>, transform_indices = @transform_3, window_bounds = array<i64: 1, 384>}, {pipeline_mode = #tpu.pipeline_mode<synchronous>, transform_indices = @transform_4, window_bounds = array<i64: 384, 128>}, {pipeline_mode = #tpu.pipeline_mode<synchronous>, transform_indices = @transform_5, window_bounds = array<i64: 1, 128>}, {pipeline_mode = #tpu.pipeline_mode<synchronous>, transform_indices = @transform_6, window_bounds = array<i64: 3, 16, 16>}, {pipeline_mode = #tpu.pipeline_mode<synchronous>, transform_indices = @transform_7, window_bounds = array<i64: 5, 64>}, {pipeline_mode = #tpu.pipeline_mode<synchronous>, transform_indices = @transform_8, window_bounds = array<i64: 3, 64, 128>}, {pipeline_mode = #tpu.pipeline_mode<synchronous>, transform_indices = @transform_9, window_bounds = array<i64: 3, 128, 128>}, {pipeline_mode = #tpu.pipeline_mode<synchronous>, transform_indices = @transform_10, window_bounds = array<i64: 3, 128, 128>}, {pipeline_mode = #tpu.pipeline_mode<synchronous>, transform_indices = @transform_11, window_bounds = array<i64: 3, 128, 64>}, {pipeline_mode = #tpu.pipeline_mode<synchronous>, transform_indices = @transform_12, window_bounds = array<i64: 2, 64, 128>}, {pipeline_mode = #tpu.pipeline_mode<synchronous>, transform_indices = @transform_13, window_bounds = array<i64: 8, 128>}, {pipeline_mode = #tpu.pipeline_mode<synchronous>, transform_indices = @transform_14, window_bounds = array<i64: 1, 128>}, {pipeline_mode = #tpu.pipeline_mode<synchronous>, transform_indices = @transform_15, window_bounds = array<i64: 1, 128>}, {pipeline_mode = #tpu.pipeline_mode<synchronous>, transform_indices = @transform_16, window_bounds = array<i64: 2, 128, 384>}, {pipeline_mode = #tpu.pipeline_mode<synchronous>, transform_indices = @transform_17, window_bounds = array<i64: 2, 1, 384>}, {pipeline_mode = #tpu.pipeline_mode<synchronous>, transform_indices = @transform_18, window_bounds = array<i64: 2, 128, 128>}, {pipeline_mode = #tpu.pipeline_mode<synchronous>, transform_indices = @transform_19, window_bounds = array<i64: 2, 1, 128>}, {pipeline_mode = #tpu.pipeline_mode<synchronous>, transform_indices = @transform_20, window_bounds = array<i64: 2, 1, 128>}, {pipeline_mode = #tpu.pipeline_mode<synchronous>, transform_indices = @transform_21, window_bounds = array<i64: 2, 1, 128>}, {pipeline_mode = #tpu.pipeline_mode<synchronous>, transform_indices = @transform_22, window_bounds = array<i64: 2, 128, 256>}, {pipeline_mode = #tpu.pipeline_mode<synchronous>, transform_indices = @transform_23, window_bounds = array<i64: 2, 1, 256>}, {pipeline_mode = #tpu.pipeline_mode<synchronous>, transform_indices = @transform_24, window_bounds = array<i64: 2, 256, 128>}, {pipeline_mode = #tpu.pipeline_mode<synchronous>, transform_indices = @transform_25, window_bounds = array<i64: 2, 1, 128>}, {pipeline_mode = #tpu.pipeline_mode<synchronous>, transform_indices = @transform_26, window_bounds = array<i64: 2, 1, 128>}, {pipeline_mode = #tpu.pipeline_mode<synchronous>, transform_indices = @transform_27, window_bounds = array<i64: 2, 1, 128>}, {pipeline_mode = #tpu.pipeline_mode<synchronous>, transform_indices = @transform_28, window_bounds = array<i64: 128, 128>}, {pipeline_mode = #tpu.pipeline_mode<synchronous>, transform_indices = @transform_29, window_bounds = array<i64: 1, 128>}, {pipeline_mode = #tpu.pipeline_mode<synchronous>, transform_indices = @transform_30, window_bounds = array<i64: 128, 256>}, {pipeline_mode = #tpu.pipeline_mode<synchronous>, transform_indices = @transform_31, window_bounds = array<i64: 1, 256>}, {pipeline_mode = #tpu.pipeline_mode<synchronous>, transform_indices = @transform_32, window_bounds = array<i64: 128, 128>}, {pipeline_mode = #tpu.pipeline_mode<synchronous>, transform_indices = @transform_33, window_bounds = array<i64: 1, 128>}, {pipeline_mode = #tpu.pipeline_mode<synchronous>, transform_indices = @transform_34, window_bounds = array<i64: 128, 128>}, {pipeline_mode = #tpu.pipeline_mode<synchronous>, transform_indices = @transform_35, window_bounds = array<i64: 1, 128>}, {pipeline_mode = #tpu.pipeline_mode<synchronous>, transform_indices = @transform_36, window_bounds = array<i64: 128, 256>}, {pipeline_mode = #tpu.pipeline_mode<synchronous>, transform_indices = @transform_37, window_bounds = array<i64: 1, 256>}, {pipeline_mode = #tpu.pipeline_mode<synchronous>, transform_indices = @transform_38, window_bounds = array<i64: 128, 128>}, {pipeline_mode = #tpu.pipeline_mode<synchronous>, transform_indices = @transform_39, window_bounds = array<i64: 1, 128>}, {pipeline_mode = #tpu.pipeline_mode<synchronous>, transform_indices = @transform_40, window_bounds = array<i64: 256, 128>}, {pipeline_mode = #tpu.pipeline_mode<synchronous>, transform_indices = @transform_41, window_bounds = array<i64: 1, 128>}, {pipeline_mode = #tpu.pipeline_mode<synchronous>, transform_indices = @transform_42, window_bounds = array<i64: 128, 32>}, {pipeline_mode = #tpu.pipeline_mode<synchronous>, transform_indices = @transform_43, window_bounds = array<i64: 1, 32>}, {pipeline_mode = #tpu.pipeline_mode<synchronous>, transform_indices = @transform_44, window_bounds = array<i64: 32, 3>}, {pipeline_mode = #tpu.pipeline_mode<synchronous>, transform_indices = @transform_45, window_bounds = array<i64: 1, 3>}, {transform_indices = @transform_46, window_bounds = array<i64: 1, 1, 3>}]} {
    %c0 = arith.constant 0 : index
    %c0_0 = arith.constant 0 : index
    %c0_1 = arith.constant 0 : index
    %0 = vector.load %arg1[%c0, %c0_0, %c0_1] : memref<1x8x768xf32, #tpu.memory_space<vmem>>, vector<1x8x768xf32>
    %1 = vector.shape_cast %0 : vector<1x8x768xf32> to vector<8x768xf32>
    %c0_2 = arith.constant 0 : index
    %c0_3 = arith.constant 0 : index
    %2 = vector.load %arg3[%c0_2, %c0_3] : memref<768x384xf32, #tpu.memory_space<vmem>>, vector<768x384xf32>
    %cst = arith.constant dense<0.000000e+00> : vector<8x384xf32>
    %3 = tpu.matmul %1, %2, %cst {dimension_numbers = #tpu.dot_dimension_numbers<[1], [0], [0], [1], [0, 0, 1, 1], [], []>} : vector<8x768xf32>, vector<768x384xf32>, vector<8x384xf32> -> vector<8x384xf32>
    %c0_4 = arith.constant 0 : index
    %c0_5 = arith.constant 0 : index
    %4 = vector.load %arg4[%c0_4, %c0_5] : memref<1x384xf32, #tpu.memory_space<vmem>>, vector<1x384xf32>
    %5 = vector.broadcast %4 : vector<1x384xf32> to vector<8x384xf32>
    %6 = arith.addf %3, %5 : vector<8x384xf32>
    %cst_6 = arith.constant 0.000000e+00 : f32
    %7 = vector.broadcast %cst_6 : f32 to vector<8x384xf32>
    %8 = arith.maximumf %6, %7 : vector<8x384xf32>
    %c0_7 = arith.constant 0 : index
    %c0_8 = arith.constant 0 : index
    %9 = vector.load %arg5[%c0_7, %c0_8] : memref<384x128xf32, #tpu.memory_space<vmem>>, vector<384x128xf32>
    %cst_9 = arith.constant dense<0.000000e+00> : vector<8x128xf32>
    %10 = tpu.matmul %8, %9, %cst_9 {dimension_numbers = #tpu.dot_dimension_numbers<[1], [0], [0], [1], [0, 0, 1, 1], [], []>} : vector<8x384xf32>, vector<384x128xf32>, vector<8x128xf32> -> vector<8x128xf32>
    %c0_10 = arith.constant 0 : index
    %c0_11 = arith.constant 0 : index
    %11 = vector.load %arg6[%c0_10, %c0_11] : memref<1x128xf32, #tpu.memory_space<vmem>>, vector<1x128xf32>
    %12 = vector.broadcast %11 : vector<1x128xf32> to vector<8x128xf32>
    %13 = arith.addf %10, %12 : vector<8x128xf32>
    %c0_12 = arith.constant 0 : index
    %c0_13 = arith.constant 0 : index
    %c0_14 = arith.constant 0 : index
    %14 = vector.load %arg2[%c0_12, %c0_13, %c0_14] : memref<1x16x5xf32, #tpu.memory_space<vmem>>, vector<1x16x5xf32>
    %15 = vector.shape_cast %14 : vector<1x16x5xf32> to vector<16x5xf32>
    %c0_15 = arith.constant 0 : index
    %c0_16 = arith.constant 0 : index
    %16 = vector.load %arg8[%c0_15, %c0_16] : memref<5x64xf32, #tpu.memory_space<vmem>>, vector<5x64xf32>
    %cst_17 = arith.constant dense<0.000000e+00> : vector<16x64xf32>
    %17 = tpu.matmul %15, %16, %cst_17 {dimension_numbers = #tpu.dot_dimension_numbers<[1], [0], [0], [1], [0, 0, 1, 1], [], []>} : vector<16x5xf32>, vector<5x64xf32>, vector<16x64xf32> -> vector<16x64xf32>
    %cst_18 = arith.constant 0.000000e+00 : f32
    %18 = vector.broadcast %cst_18 : f32 to vector<16x64xf32>
    %19 = arith.maximumf %17, %18 : vector<16x64xf32>
    %c0_19 = arith.constant 0 : index
    %c0_20 = arith.constant 0 : index
    %c0_21 = arith.constant 0 : index
    %20 = vector.load %arg7[%c0_19, %c0_20, %c0_21] : memref<3x16x16xf32, #tpu.memory_space<vmem>>, vector<1x16x16xf32>
    %21 = vector.shape_cast %20 : vector<1x16x16xf32> to vector<16x16xf32>
    %cst_22 = arith.constant dense<0.000000e+00> : vector<16x64xf32>
    %22 = tpu.matmul %21, %19, %cst_22 {dimension_numbers = #tpu.dot_dimension_numbers<[1], [0], [0], [1], [0, 0, 1, 1], [], []>} : vector<16x16xf32>, vector<16x64xf32>, vector<16x64xf32> -> vector<16x64xf32>
    %c0_23 = arith.constant 0 : index
    %c0_24 = arith.constant 0 : index
    %c0_25 = arith.constant 0 : index
    %23 = vector.load %arg9[%c0_23, %c0_24, %c0_25] : memref<3x64x128xf32, #tpu.memory_space<vmem>>, vector<1x64x128xf32>
    %24 = vector.shape_cast %23 : vector<1x64x128xf32> to vector<64x128xf32>
    %cst_26 = arith.constant dense<0.000000e+00> : vector<16x128xf32>
    %25 = tpu.matmul %22, %24, %cst_26 {dimension_numbers = #tpu.dot_dimension_numbers<[1], [0], [0], [1], [0, 0, 1, 1], [], []>} : vector<16x64xf32>, vector<64x128xf32>, vector<16x128xf32> -> vector<16x128xf32>
    %c1 = arith.constant 1 : index
    %c0_27 = arith.constant 0 : index
    %c0_28 = arith.constant 0 : index
    %26 = vector.load %arg7[%c1, %c0_27, %c0_28] : memref<3x16x16xf32, #tpu.memory_space<vmem>>, vector<1x16x16xf32>
    %27 = vector.shape_cast %26 : vector<1x16x16xf32> to vector<16x16xf32>
    %cst_29 = arith.constant dense<0.000000e+00> : vector<16x64xf32>
    %28 = tpu.matmul %27, %19, %cst_29 {dimension_numbers = #tpu.dot_dimension_numbers<[1], [0], [0], [1], [0, 0, 1, 1], [], []>} : vector<16x16xf32>, vector<16x64xf32>, vector<16x64xf32> -> vector<16x64xf32>
    %c1_30 = arith.constant 1 : index
    %c0_31 = arith.constant 0 : index
    %c0_32 = arith.constant 0 : index
    %29 = vector.load %arg9[%c1_30, %c0_31, %c0_32] : memref<3x64x128xf32, #tpu.memory_space<vmem>>, vector<1x64x128xf32>
    %30 = vector.shape_cast %29 : vector<1x64x128xf32> to vector<64x128xf32>
    %cst_33 = arith.constant dense<0.000000e+00> : vector<16x128xf32>
    %31 = tpu.matmul %28, %30, %cst_33 {dimension_numbers = #tpu.dot_dimension_numbers<[1], [0], [0], [1], [0, 0, 1, 1], [], []>} : vector<16x64xf32>, vector<64x128xf32>, vector<16x128xf32> -> vector<16x128xf32>
    %32 = arith.addf %25, %31 : vector<16x128xf32>
    %c2 = arith.constant 2 : index
    %c0_34 = arith.constant 0 : index
    %c0_35 = arith.constant 0 : index
    %33 = vector.load %arg7[%c2, %c0_34, %c0_35] : memref<3x16x16xf32, #tpu.memory_space<vmem>>, vector<1x16x16xf32>
    %34 = vector.shape_cast %33 : vector<1x16x16xf32> to vector<16x16xf32>
    %cst_36 = arith.constant dense<0.000000e+00> : vector<16x64xf32>
    %35 = tpu.matmul %34, %19, %cst_36 {dimension_numbers = #tpu.dot_dimension_numbers<[1], [0], [0], [1], [0, 0, 1, 1], [], []>} : vector<16x16xf32>, vector<16x64xf32>, vector<16x64xf32> -> vector<16x64xf32>
    %c2_37 = arith.constant 2 : index
    %c0_38 = arith.constant 0 : index
    %c0_39 = arith.constant 0 : index
    %36 = vector.load %arg9[%c2_37, %c0_38, %c0_39] : memref<3x64x128xf32, #tpu.memory_space<vmem>>, vector<1x64x128xf32>
    %37 = vector.shape_cast %36 : vector<1x64x128xf32> to vector<64x128xf32>
    %cst_40 = arith.constant dense<0.000000e+00> : vector<16x128xf32>
    %38 = tpu.matmul %35, %37, %cst_40 {dimension_numbers = #tpu.dot_dimension_numbers<[1], [0], [0], [1], [0, 0, 1, 1], [], []>} : vector<16x64xf32>, vector<64x128xf32>, vector<16x128xf32> -> vector<16x128xf32>
    %39 = arith.addf %32, %38 : vector<16x128xf32>
    %cst_41 = arith.constant 0.000000e+00 : f32
    %40 = vector.broadcast %cst_41 : f32 to vector<16x128xf32>
    %41 = arith.maximumf %39, %40 : vector<16x128xf32>
    %c0_42 = arith.constant 0 : index
    %c0_43 = arith.constant 0 : index
    %c0_44 = arith.constant 0 : index
    %42 = vector.load %arg7[%c0_42, %c0_43, %c0_44] : memref<3x16x16xf32, #tpu.memory_space<vmem>>, vector<1x16x16xf32>
    %43 = vector.shape_cast %42 : vector<1x16x16xf32> to vector<16x16xf32>
    %cst_45 = arith.constant dense<0.000000e+00> : vector<16x128xf32>
    %44 = tpu.matmul %43, %41, %cst_45 {dimension_numbers = #tpu.dot_dimension_numbers<[1], [0], [0], [1], [0, 0, 1, 1], [], []>} : vector<16x16xf32>, vector<16x128xf32>, vector<16x128xf32> -> vector<16x128xf32>
    %c0_46 = arith.constant 0 : index
    %c0_47 = arith.constant 0 : index
    %c0_48 = arith.constant 0 : index
    %45 = vector.load %arg10[%c0_46, %c0_47, %c0_48] : memref<3x128x128xf32, #tpu.memory_space<vmem>>, vector<1x128x128xf32>
    %46 = vector.shape_cast %45 : vector<1x128x128xf32> to vector<128x128xf32>
    %cst_49 = arith.constant dense<0.000000e+00> : vector<16x128xf32>
    %47 = tpu.matmul %44, %46, %cst_49 {dimension_numbers = #tpu.dot_dimension_numbers<[1], [0], [0], [1], [0, 0, 1, 1], [], []>} : vector<16x128xf32>, vector<128x128xf32>, vector<16x128xf32> -> vector<16x128xf32>
    %c1_50 = arith.constant 1 : index
    %c0_51 = arith.constant 0 : index
    %c0_52 = arith.constant 0 : index
    %48 = vector.load %arg7[%c1_50, %c0_51, %c0_52] : memref<3x16x16xf32, #tpu.memory_space<vmem>>, vector<1x16x16xf32>
    %49 = vector.shape_cast %48 : vector<1x16x16xf32> to vector<16x16xf32>
    %cst_53 = arith.constant dense<0.000000e+00> : vector<16x128xf32>
    %50 = tpu.matmul %49, %41, %cst_53 {dimension_numbers = #tpu.dot_dimension_numbers<[1], [0], [0], [1], [0, 0, 1, 1], [], []>} : vector<16x16xf32>, vector<16x128xf32>, vector<16x128xf32> -> vector<16x128xf32>
    %c1_54 = arith.constant 1 : index
    %c0_55 = arith.constant 0 : index
    %c0_56 = arith.constant 0 : index
    %51 = vector.load %arg10[%c1_54, %c0_55, %c0_56] : memref<3x128x128xf32, #tpu.memory_space<vmem>>, vector<1x128x128xf32>
    %52 = vector.shape_cast %51 : vector<1x128x128xf32> to vector<128x128xf32>
    %cst_57 = arith.constant dense<0.000000e+00> : vector<16x128xf32>
    %53 = tpu.matmul %50, %52, %cst_57 {dimension_numbers = #tpu.dot_dimension_numbers<[1], [0], [0], [1], [0, 0, 1, 1], [], []>} : vector<16x128xf32>, vector<128x128xf32>, vector<16x128xf32> -> vector<16x128xf32>
    %54 = arith.addf %47, %53 : vector<16x128xf32>
    %c2_58 = arith.constant 2 : index
    %c0_59 = arith.constant 0 : index
    %c0_60 = arith.constant 0 : index
    %55 = vector.load %arg7[%c2_58, %c0_59, %c0_60] : memref<3x16x16xf32, #tpu.memory_space<vmem>>, vector<1x16x16xf32>
    %56 = vector.shape_cast %55 : vector<1x16x16xf32> to vector<16x16xf32>
    %cst_61 = arith.constant dense<0.000000e+00> : vector<16x128xf32>
    %57 = tpu.matmul %56, %41, %cst_61 {dimension_numbers = #tpu.dot_dimension_numbers<[1], [0], [0], [1], [0, 0, 1, 1], [], []>} : vector<16x16xf32>, vector<16x128xf32>, vector<16x128xf32> -> vector<16x128xf32>
    %c2_62 = arith.constant 2 : index
    %c0_63 = arith.constant 0 : index
    %c0_64 = arith.constant 0 : index
    %58 = vector.load %arg10[%c2_62, %c0_63, %c0_64] : memref<3x128x128xf32, #tpu.memory_space<vmem>>, vector<1x128x128xf32>
    %59 = vector.shape_cast %58 : vector<1x128x128xf32> to vector<128x128xf32>
    %cst_65 = arith.constant dense<0.000000e+00> : vector<16x128xf32>
    %60 = tpu.matmul %57, %59, %cst_65 {dimension_numbers = #tpu.dot_dimension_numbers<[1], [0], [0], [1], [0, 0, 1, 1], [], []>} : vector<16x128xf32>, vector<128x128xf32>, vector<16x128xf32> -> vector<16x128xf32>
    %61 = arith.addf %54, %60 : vector<16x128xf32>
    %cst_66 = arith.constant 0.000000e+00 : f32
    %62 = vector.broadcast %cst_66 : f32 to vector<16x128xf32>
    %63 = arith.maximumf %61, %62 : vector<16x128xf32>
    %c0_67 = arith.constant 0 : index
    %c0_68 = arith.constant 0 : index
    %c0_69 = arith.constant 0 : index
    %64 = vector.load %arg7[%c0_67, %c0_68, %c0_69] : memref<3x16x16xf32, #tpu.memory_space<vmem>>, vector<1x16x16xf32>
    %65 = vector.shape_cast %64 : vector<1x16x16xf32> to vector<16x16xf32>
    %cst_70 = arith.constant dense<0.000000e+00> : vector<16x128xf32>
    %66 = tpu.matmul %65, %63, %cst_70 {dimension_numbers = #tpu.dot_dimension_numbers<[1], [0], [0], [1], [0, 0, 1, 1], [], []>} : vector<16x16xf32>, vector<16x128xf32>, vector<16x128xf32> -> vector<16x128xf32>
    %c0_71 = arith.constant 0 : index
    %c0_72 = arith.constant 0 : index
    %c0_73 = arith.constant 0 : index
    %67 = vector.load %arg11[%c0_71, %c0_72, %c0_73] : memref<3x128x128xf32, #tpu.memory_space<vmem>>, vector<1x128x128xf32>
    %68 = vector.shape_cast %67 : vector<1x128x128xf32> to vector<128x128xf32>
    %cst_74 = arith.constant dense<0.000000e+00> : vector<16x128xf32>
    %69 = tpu.matmul %66, %68, %cst_74 {dimension_numbers = #tpu.dot_dimension_numbers<[1], [0], [0], [1], [0, 0, 1, 1], [], []>} : vector<16x128xf32>, vector<128x128xf32>, vector<16x128xf32> -> vector<16x128xf32>
    %c1_75 = arith.constant 1 : index
    %c0_76 = arith.constant 0 : index
    %c0_77 = arith.constant 0 : index
    %70 = vector.load %arg7[%c1_75, %c0_76, %c0_77] : memref<3x16x16xf32, #tpu.memory_space<vmem>>, vector<1x16x16xf32>
    %71 = vector.shape_cast %70 : vector<1x16x16xf32> to vector<16x16xf32>
    %cst_78 = arith.constant dense<0.000000e+00> : vector<16x128xf32>
    %72 = tpu.matmul %71, %63, %cst_78 {dimension_numbers = #tpu.dot_dimension_numbers<[1], [0], [0], [1], [0, 0, 1, 1], [], []>} : vector<16x16xf32>, vector<16x128xf32>, vector<16x128xf32> -> vector<16x128xf32>
    %c1_79 = arith.constant 1 : index
    %c0_80 = arith.constant 0 : index
    %c0_81 = arith.constant 0 : index
    %73 = vector.load %arg11[%c1_79, %c0_80, %c0_81] : memref<3x128x128xf32, #tpu.memory_space<vmem>>, vector<1x128x128xf32>
    %74 = vector.shape_cast %73 : vector<1x128x128xf32> to vector<128x128xf32>
    %cst_82 = arith.constant dense<0.000000e+00> : vector<16x128xf32>
    %75 = tpu.matmul %72, %74, %cst_82 {dimension_numbers = #tpu.dot_dimension_numbers<[1], [0], [0], [1], [0, 0, 1, 1], [], []>} : vector<16x128xf32>, vector<128x128xf32>, vector<16x128xf32> -> vector<16x128xf32>
    %76 = arith.addf %69, %75 : vector<16x128xf32>
    %c2_83 = arith.constant 2 : index
    %c0_84 = arith.constant 0 : index
    %c0_85 = arith.constant 0 : index
    %77 = vector.load %arg7[%c2_83, %c0_84, %c0_85] : memref<3x16x16xf32, #tpu.memory_space<vmem>>, vector<1x16x16xf32>
    %78 = vector.shape_cast %77 : vector<1x16x16xf32> to vector<16x16xf32>
    %cst_86 = arith.constant dense<0.000000e+00> : vector<16x128xf32>
    %79 = tpu.matmul %78, %63, %cst_86 {dimension_numbers = #tpu.dot_dimension_numbers<[1], [0], [0], [1], [0, 0, 1, 1], [], []>} : vector<16x16xf32>, vector<16x128xf32>, vector<16x128xf32> -> vector<16x128xf32>
    %c2_87 = arith.constant 2 : index
    %c0_88 = arith.constant 0 : index
    %c0_89 = arith.constant 0 : index
    %80 = vector.load %arg11[%c2_87, %c0_88, %c0_89] : memref<3x128x128xf32, #tpu.memory_space<vmem>>, vector<1x128x128xf32>
    %81 = vector.shape_cast %80 : vector<1x128x128xf32> to vector<128x128xf32>
    %cst_90 = arith.constant dense<0.000000e+00> : vector<16x128xf32>
    %82 = tpu.matmul %79, %81, %cst_90 {dimension_numbers = #tpu.dot_dimension_numbers<[1], [0], [0], [1], [0, 0, 1, 1], [], []>} : vector<16x128xf32>, vector<128x128xf32>, vector<16x128xf32> -> vector<16x128xf32>
    %83 = arith.addf %76, %82 : vector<16x128xf32>
    %cst_91 = arith.constant 0.000000e+00 : f32
    %84 = vector.broadcast %cst_91 : f32 to vector<16x128xf32>
    %85 = arith.maximumf %83, %84 : vector<16x128xf32>
    %c0_92 = arith.constant 0 : index
    %c0_93 = arith.constant 0 : index
    %c0_94 = arith.constant 0 : index
    %86 = vector.load %arg7[%c0_92, %c0_93, %c0_94] : memref<3x16x16xf32, #tpu.memory_space<vmem>>, vector<1x16x16xf32>
    %87 = vector.shape_cast %86 : vector<1x16x16xf32> to vector<16x16xf32>
    %cst_95 = arith.constant dense<0.000000e+00> : vector<16x128xf32>
    %88 = tpu.matmul %87, %85, %cst_95 {dimension_numbers = #tpu.dot_dimension_numbers<[1], [0], [0], [1], [0, 0, 1, 1], [], []>} : vector<16x16xf32>, vector<16x128xf32>, vector<16x128xf32> -> vector<16x128xf32>
    %c0_96 = arith.constant 0 : index
    %c0_97 = arith.constant 0 : index
    %c0_98 = arith.constant 0 : index
    %89 = vector.load %arg12[%c0_96, %c0_97, %c0_98] : memref<3x128x64xf32, #tpu.memory_space<vmem>>, vector<1x128x64xf32>
    %90 = vector.shape_cast %89 : vector<1x128x64xf32> to vector<128x64xf32>
    %cst_99 = arith.constant dense<0.000000e+00> : vector<16x64xf32>
    %91 = tpu.matmul %88, %90, %cst_99 {dimension_numbers = #tpu.dot_dimension_numbers<[1], [0], [0], [1], [0, 0, 1, 1], [], []>} : vector<16x128xf32>, vector<128x64xf32>, vector<16x64xf32> -> vector<16x64xf32>
    %c1_100 = arith.constant 1 : index
    %c0_101 = arith.constant 0 : index
    %c0_102 = arith.constant 0 : index
    %92 = vector.load %arg7[%c1_100, %c0_101, %c0_102] : memref<3x16x16xf32, #tpu.memory_space<vmem>>, vector<1x16x16xf32>
    %93 = vector.shape_cast %92 : vector<1x16x16xf32> to vector<16x16xf32>
    %cst_103 = arith.constant dense<0.000000e+00> : vector<16x128xf32>
    %94 = tpu.matmul %93, %85, %cst_103 {dimension_numbers = #tpu.dot_dimension_numbers<[1], [0], [0], [1], [0, 0, 1, 1], [], []>} : vector<16x16xf32>, vector<16x128xf32>, vector<16x128xf32> -> vector<16x128xf32>
    %c1_104 = arith.constant 1 : index
    %c0_105 = arith.constant 0 : index
    %c0_106 = arith.constant 0 : index
    %95 = vector.load %arg12[%c1_104, %c0_105, %c0_106] : memref<3x128x64xf32, #tpu.memory_space<vmem>>, vector<1x128x64xf32>
    %96 = vector.shape_cast %95 : vector<1x128x64xf32> to vector<128x64xf32>
    %cst_107 = arith.constant dense<0.000000e+00> : vector<16x64xf32>
    %97 = tpu.matmul %94, %96, %cst_107 {dimension_numbers = #tpu.dot_dimension_numbers<[1], [0], [0], [1], [0, 0, 1, 1], [], []>} : vector<16x128xf32>, vector<128x64xf32>, vector<16x64xf32> -> vector<16x64xf32>
    %98 = arith.addf %91, %97 : vector<16x64xf32>
    %c2_108 = arith.constant 2 : index
    %c0_109 = arith.constant 0 : index
    %c0_110 = arith.constant 0 : index
    %99 = vector.load %arg7[%c2_108, %c0_109, %c0_110] : memref<3x16x16xf32, #tpu.memory_space<vmem>>, vector<1x16x16xf32>
    %100 = vector.shape_cast %99 : vector<1x16x16xf32> to vector<16x16xf32>
    %cst_111 = arith.constant dense<0.000000e+00> : vector<16x128xf32>
    %101 = tpu.matmul %100, %85, %cst_111 {dimension_numbers = #tpu.dot_dimension_numbers<[1], [0], [0], [1], [0, 0, 1, 1], [], []>} : vector<16x16xf32>, vector<16x128xf32>, vector<16x128xf32> -> vector<16x128xf32>
    %c2_112 = arith.constant 2 : index
    %c0_113 = arith.constant 0 : index
    %c0_114 = arith.constant 0 : index
    %102 = vector.load %arg12[%c2_112, %c0_113, %c0_114] : memref<3x128x64xf32, #tpu.memory_space<vmem>>, vector<1x128x64xf32>
    %103 = vector.shape_cast %102 : vector<1x128x64xf32> to vector<128x64xf32>
    %cst_115 = arith.constant dense<0.000000e+00> : vector<16x64xf32>
    %104 = tpu.matmul %101, %103, %cst_115 {dimension_numbers = #tpu.dot_dimension_numbers<[1], [0], [0], [1], [0, 0, 1, 1], [], []>} : vector<16x128xf32>, vector<128x64xf32>, vector<16x64xf32> -> vector<16x64xf32>
    %105 = arith.addf %98, %104 : vector<16x64xf32>
    %cst_116 = arith.constant 0.000000e+00 : f32
    %106 = vector.broadcast %cst_116 : f32 to vector<16x64xf32>
    %107 = arith.maximumf %105, %106 : vector<16x64xf32>
    %108 = vector.extract_strided_slice %107 {offsets = [0, 0], sizes = [8, 64], strides = [1, 1]} : vector<16x64xf32> to vector<8x64xf32>
    %c0_117 = arith.constant 0 : index
    %c0_118 = arith.constant 0 : index
    %c0_119 = arith.constant 0 : index
    %109 = vector.load %arg13[%c0_117, %c0_118, %c0_119] : memref<2x64x128xf32, #tpu.memory_space<vmem>>, vector<1x64x128xf32>
    %110 = vector.shape_cast %109 : vector<1x64x128xf32> to vector<64x128xf32>
    %cst_120 = arith.constant dense<0.000000e+00> : vector<8x128xf32>
    %111 = tpu.matmul %108, %110, %cst_120 {dimension_numbers = #tpu.dot_dimension_numbers<[1], [0], [0], [1], [0, 0, 1, 1], [], []>} : vector<8x64xf32>, vector<64x128xf32>, vector<8x128xf32> -> vector<8x128xf32>
    %112 = vector.extract_strided_slice %107 {offsets = [8, 0], sizes = [8, 64], strides = [1, 1]} : vector<16x64xf32> to vector<8x64xf32>
    %c1_121 = arith.constant 1 : index
    %c0_122 = arith.constant 0 : index
    %c0_123 = arith.constant 0 : index
    %113 = vector.load %arg13[%c1_121, %c0_122, %c0_123] : memref<2x64x128xf32, #tpu.memory_space<vmem>>, vector<1x64x128xf32>
    %114 = vector.shape_cast %113 : vector<1x64x128xf32> to vector<64x128xf32>
    %cst_124 = arith.constant dense<0.000000e+00> : vector<8x128xf32>
    %115 = tpu.matmul %112, %114, %cst_124 {dimension_numbers = #tpu.dot_dimension_numbers<[1], [0], [0], [1], [0, 0, 1, 1], [], []>} : vector<8x64xf32>, vector<64x128xf32>, vector<8x128xf32> -> vector<8x128xf32>
    %116 = arith.addf %111, %115 : vector<8x128xf32>
    %c0_125 = arith.constant 0 : index
    %c0_126 = arith.constant 0 : index
    %117 = vector.load %arg14[%c0_125, %c0_126] : memref<8x128xf32, #tpu.memory_space<vmem>>, vector<8x128xf32>
    %118 = arith.addf %116, %117 : vector<8x128xf32>
    %c0_127 = arith.constant 0 : index
    %c0_128 = arith.constant 0 : index
    %119 = vector.load %arg15[%c0_127, %c0_128] : memref<1x128xf32, #tpu.memory_space<vmem>>, vector<1x128xf32>
    %c0_129 = arith.constant 0 : index
    %c0_130 = arith.constant 0 : index
    %120 = vector.load %arg16[%c0_129, %c0_130] : memref<1x128xf32, #tpu.memory_space<vmem>>, vector<1x128xf32>
    %cst_131 = arith.constant dense<0.000000e+00> : vector<8xf32>
    %121 = vector.multi_reduction <add>, %118, %cst_131 [1] : vector<8x128xf32> to vector<8xf32>
    %122 = vector.shape_cast %121 : vector<8xf32> to vector<8x1xf32>
    %cst_132 = arith.constant 1.280000e+02 : f32
    %123 = vector.broadcast %cst_132 : f32 to vector<8x1xf32>
    %124 = arith.divf %122, %123 : vector<8x1xf32>
    %125 = vector.broadcast %124 : vector<8x1xf32> to vector<8x128xf32>
    %126 = arith.subf %118, %125 : vector<8x128xf32>
    %127 = arith.mulf %126, %126 : vector<8x128xf32>
    %cst_133 = arith.constant dense<0.000000e+00> : vector<8xf32>
    %128 = vector.multi_reduction <add>, %127, %cst_133 [1] : vector<8x128xf32> to vector<8xf32>
    %129 = vector.shape_cast %128 : vector<8xf32> to vector<8x1xf32>
    %cst_134 = arith.constant 1.280000e+02 : f32
    %130 = vector.broadcast %cst_134 : f32 to vector<8x1xf32>
    %131 = arith.divf %129, %130 : vector<8x1xf32>
    %132 = vector.broadcast %124 : vector<8x1xf32> to vector<8x128xf32>
    %133 = arith.subf %118, %132 : vector<8x128xf32>
    %cst_135 = arith.constant 9.99999974E-6 : f32
    %134 = vector.broadcast %cst_135 : f32 to vector<8x1xf32>
    %135 = arith.addf %131, %134 : vector<8x1xf32>
    %136 = math.rsqrt %135 : vector<8x1xf32>
    %137 = vector.broadcast %136 : vector<8x1xf32> to vector<8x128xf32>
    %138 = arith.mulf %133, %137 : vector<8x128xf32>
    %139 = vector.broadcast %119 : vector<1x128xf32> to vector<8x128xf32>
    %140 = arith.mulf %138, %139 : vector<8x128xf32>
    %141 = vector.broadcast %120 : vector<1x128xf32> to vector<8x128xf32>
    %142 = arith.addf %140, %141 : vector<8x128xf32>
    %c0_136 = arith.constant 0 : index
    %c0_137 = arith.constant 0 : index
    %c0_138 = arith.constant 0 : index
    %143 = vector.load %arg17[%c0_136, %c0_137, %c0_138] : memref<2x128x384xf32, #tpu.memory_space<vmem>>, vector<1x128x384xf32>
    %144 = vector.shape_cast %143 : vector<1x128x384xf32> to vector<128x384xf32>
    %cst_139 = arith.constant dense<0.000000e+00> : vector<8x384xf32>
    %145 = tpu.matmul %142, %144, %cst_139 {dimension_numbers = #tpu.dot_dimension_numbers<[1], [0], [0], [1], [0, 0, 1, 1], [], []>} : vector<8x128xf32>, vector<128x384xf32>, vector<8x384xf32> -> vector<8x384xf32>
    %c0_140 = arith.constant 0 : index
    %c0_141 = arith.constant 0 : index
    %c0_142 = arith.constant 0 : index
    %146 = vector.load %arg18[%c0_140, %c0_141, %c0_142] : memref<2x1x384xf32, #tpu.memory_space<vmem>>, vector<1x1x384xf32>
    %147 = vector.shape_cast %146 : vector<1x1x384xf32> to vector<1x384xf32>
    %148 = vector.broadcast %147 : vector<1x384xf32> to vector<8x384xf32>
    %149 = arith.addf %145, %148 : vector<8x384xf32>
    %150 = vector.extract_strided_slice %149 {offsets = [0, 0], sizes = [8, 32], strides = [1, 1]} : vector<8x384xf32> to vector<8x32xf32>
    %151 = vector.extract_strided_slice %149 {offsets = [0, 128], sizes = [8, 32], strides = [1, 1]} : vector<8x384xf32> to vector<8x32xf32>
    %152 = vector.extract_strided_slice %149 {offsets = [0, 256], sizes = [8, 32], strides = [1, 1]} : vector<8x384xf32> to vector<8x32xf32>
    %153 = tpu.transpose %151, [1, 0] : vector<8x32xf32> -> vector<32x8xf32>
    %cst_143 = arith.constant dense<0.000000e+00> : vector<8x8xf32>
    %154 = tpu.matmul %150, %153, %cst_143 {dimension_numbers = #tpu.dot_dimension_numbers<[1], [0], [0], [1], [0, 0, 1, 1], [], []>} : vector<8x32xf32>, vector<32x8xf32>, vector<8x8xf32> -> vector<8x8xf32>
    %cst_144 = arith.constant dense<0xFF800000> : vector<8xf32>
    %155 = vector.multi_reduction <maximumf>, %154, %cst_144 [1] : vector<8x8xf32> to vector<8xf32>
    %156 = vector.shape_cast %155 : vector<8xf32> to vector<8x1xf32>
    %157 = vector.broadcast %156 : vector<8x1xf32> to vector<8x8xf32>
    %158 = arith.subf %154, %157 : vector<8x8xf32>
    %159 = math.exp %158 : vector<8x8xf32>
    %cst_145 = arith.constant dense<0.000000e+00> : vector<8xf32>
    %160 = vector.multi_reduction <add>, %159, %cst_145 [1] : vector<8x8xf32> to vector<8xf32>
    %161 = vector.shape_cast %160 : vector<8xf32> to vector<8x1xf32>
    %162 = tpu.reciprocal %161 : vector<8x1xf32> -> vector<8x1xf32>
    %163 = vector.broadcast %162 : vector<8x1xf32> to vector<8x8xf32>
    %164 = arith.mulf %159, %163 : vector<8x8xf32>
    %cst_146 = arith.constant dense<0.000000e+00> : vector<8x32xf32>
    %165 = tpu.matmul %164, %152, %cst_146 {dimension_numbers = #tpu.dot_dimension_numbers<[1], [0], [0], [1], [0, 0, 1, 1], [], []>} : vector<8x8xf32>, vector<8x32xf32>, vector<8x32xf32> -> vector<8x32xf32>
    %c0_147 = arith.constant 0 : index
    %c0_148 = arith.constant 0 : index
    %c0_149 = arith.constant 0 : index
    %166 = vector.load %arg19[%c0_147, %c0_148, %c0_149] : memref<2x128x128xf32, #tpu.memory_space<vmem>>, vector<1x32x128xf32>
    %167 = vector.shape_cast %166 : vector<1x32x128xf32> to vector<32x128xf32>
    %cst_150 = arith.constant dense<0.000000e+00> : vector<8x128xf32>
    %168 = tpu.matmul %165, %167, %cst_150 {dimension_numbers = #tpu.dot_dimension_numbers<[1], [0], [0], [1], [0, 0, 1, 1], [], []>} : vector<8x32xf32>, vector<32x128xf32>, vector<8x128xf32> -> vector<8x128xf32>
    %169 = vector.extract_strided_slice %149 {offsets = [0, 32], sizes = [8, 32], strides = [1, 1]} : vector<8x384xf32> to vector<8x32xf32>
    %170 = vector.extract_strided_slice %149 {offsets = [0, 160], sizes = [8, 32], strides = [1, 1]} : vector<8x384xf32> to vector<8x32xf32>
    %171 = vector.extract_strided_slice %149 {offsets = [0, 288], sizes = [8, 32], strides = [1, 1]} : vector<8x384xf32> to vector<8x32xf32>
    %172 = tpu.transpose %170, [1, 0] : vector<8x32xf32> -> vector<32x8xf32>
    %cst_151 = arith.constant dense<0.000000e+00> : vector<8x8xf32>
    %173 = tpu.matmul %169, %172, %cst_151 {dimension_numbers = #tpu.dot_dimension_numbers<[1], [0], [0], [1], [0, 0, 1, 1], [], []>} : vector<8x32xf32>, vector<32x8xf32>, vector<8x8xf32> -> vector<8x8xf32>
    %cst_152 = arith.constant dense<0xFF800000> : vector<8xf32>
    %174 = vector.multi_reduction <maximumf>, %173, %cst_152 [1] : vector<8x8xf32> to vector<8xf32>
    %175 = vector.shape_cast %174 : vector<8xf32> to vector<8x1xf32>
    %176 = vector.broadcast %175 : vector<8x1xf32> to vector<8x8xf32>
    %177 = arith.subf %173, %176 : vector<8x8xf32>
    %178 = math.exp %177 : vector<8x8xf32>
    %cst_153 = arith.constant dense<0.000000e+00> : vector<8xf32>
    %179 = vector.multi_reduction <add>, %178, %cst_153 [1] : vector<8x8xf32> to vector<8xf32>
    %180 = vector.shape_cast %179 : vector<8xf32> to vector<8x1xf32>
    %181 = tpu.reciprocal %180 : vector<8x1xf32> -> vector<8x1xf32>
    %182 = vector.broadcast %181 : vector<8x1xf32> to vector<8x8xf32>
    %183 = arith.mulf %178, %182 : vector<8x8xf32>
    %cst_154 = arith.constant dense<0.000000e+00> : vector<8x32xf32>
    %184 = tpu.matmul %183, %171, %cst_154 {dimension_numbers = #tpu.dot_dimension_numbers<[1], [0], [0], [1], [0, 0, 1, 1], [], []>} : vector<8x8xf32>, vector<8x32xf32>, vector<8x32xf32> -> vector<8x32xf32>
    %c0_155 = arith.constant 0 : index
    %c32 = arith.constant 32 : index
    %c0_156 = arith.constant 0 : index
    %185 = vector.load %arg19[%c0_155, %c32, %c0_156] : memref<2x128x128xf32, #tpu.memory_space<vmem>>, vector<1x32x128xf32>
    %186 = vector.shape_cast %185 : vector<1x32x128xf32> to vector<32x128xf32>
    %cst_157 = arith.constant dense<0.000000e+00> : vector<8x128xf32>
    %187 = tpu.matmul %184, %186, %cst_157 {dimension_numbers = #tpu.dot_dimension_numbers<[1], [0], [0], [1], [0, 0, 1, 1], [], []>} : vector<8x32xf32>, vector<32x128xf32>, vector<8x128xf32> -> vector<8x128xf32>
    %188 = arith.addf %168, %187 : vector<8x128xf32>
    %189 = vector.extract_strided_slice %149 {offsets = [0, 64], sizes = [8, 32], strides = [1, 1]} : vector<8x384xf32> to vector<8x32xf32>
    %190 = vector.extract_strided_slice %149 {offsets = [0, 192], sizes = [8, 32], strides = [1, 1]} : vector<8x384xf32> to vector<8x32xf32>
    %191 = vector.extract_strided_slice %149 {offsets = [0, 320], sizes = [8, 32], strides = [1, 1]} : vector<8x384xf32> to vector<8x32xf32>
    %192 = tpu.transpose %190, [1, 0] : vector<8x32xf32> -> vector<32x8xf32>
    %cst_158 = arith.constant dense<0.000000e+00> : vector<8x8xf32>
    %193 = tpu.matmul %189, %192, %cst_158 {dimension_numbers = #tpu.dot_dimension_numbers<[1], [0], [0], [1], [0, 0, 1, 1], [], []>} : vector<8x32xf32>, vector<32x8xf32>, vector<8x8xf32> -> vector<8x8xf32>
    %cst_159 = arith.constant dense<0xFF800000> : vector<8xf32>
    %194 = vector.multi_reduction <maximumf>, %193, %cst_159 [1] : vector<8x8xf32> to vector<8xf32>
    %195 = vector.shape_cast %194 : vector<8xf32> to vector<8x1xf32>
    %196 = vector.broadcast %195 : vector<8x1xf32> to vector<8x8xf32>
    %197 = arith.subf %193, %196 : vector<8x8xf32>
    %198 = math.exp %197 : vector<8x8xf32>
    %cst_160 = arith.constant dense<0.000000e+00> : vector<8xf32>
    %199 = vector.multi_reduction <add>, %198, %cst_160 [1] : vector<8x8xf32> to vector<8xf32>
    %200 = vector.shape_cast %199 : vector<8xf32> to vector<8x1xf32>
    %201 = tpu.reciprocal %200 : vector<8x1xf32> -> vector<8x1xf32>
    %202 = vector.broadcast %201 : vector<8x1xf32> to vector<8x8xf32>
    %203 = arith.mulf %198, %202 : vector<8x8xf32>
    %cst_161 = arith.constant dense<0.000000e+00> : vector<8x32xf32>
    %204 = tpu.matmul %203, %191, %cst_161 {dimension_numbers = #tpu.dot_dimension_numbers<[1], [0], [0], [1], [0, 0, 1, 1], [], []>} : vector<8x8xf32>, vector<8x32xf32>, vector<8x32xf32> -> vector<8x32xf32>
    %c0_162 = arith.constant 0 : index
    %c64 = arith.constant 64 : index
    %c0_163 = arith.constant 0 : index
    %205 = vector.load %arg19[%c0_162, %c64, %c0_163] : memref<2x128x128xf32, #tpu.memory_space<vmem>>, vector<1x32x128xf32>
    %206 = vector.shape_cast %205 : vector<1x32x128xf32> to vector<32x128xf32>
    %cst_164 = arith.constant dense<0.000000e+00> : vector<8x128xf32>
    %207 = tpu.matmul %204, %206, %cst_164 {dimension_numbers = #tpu.dot_dimension_numbers<[1], [0], [0], [1], [0, 0, 1, 1], [], []>} : vector<8x32xf32>, vector<32x128xf32>, vector<8x128xf32> -> vector<8x128xf32>
    %208 = arith.addf %188, %207 : vector<8x128xf32>
    %209 = vector.extract_strided_slice %149 {offsets = [0, 96], sizes = [8, 32], strides = [1, 1]} : vector<8x384xf32> to vector<8x32xf32>
    %210 = vector.extract_strided_slice %149 {offsets = [0, 224], sizes = [8, 32], strides = [1, 1]} : vector<8x384xf32> to vector<8x32xf32>
    %211 = vector.extract_strided_slice %149 {offsets = [0, 352], sizes = [8, 32], strides = [1, 1]} : vector<8x384xf32> to vector<8x32xf32>
    %212 = tpu.transpose %210, [1, 0] : vector<8x32xf32> -> vector<32x8xf32>
    %cst_165 = arith.constant dense<0.000000e+00> : vector<8x8xf32>
    %213 = tpu.matmul %209, %212, %cst_165 {dimension_numbers = #tpu.dot_dimension_numbers<[1], [0], [0], [1], [0, 0, 1, 1], [], []>} : vector<8x32xf32>, vector<32x8xf32>, vector<8x8xf32> -> vector<8x8xf32>
    %cst_166 = arith.constant dense<0xFF800000> : vector<8xf32>
    %214 = vector.multi_reduction <maximumf>, %213, %cst_166 [1] : vector<8x8xf32> to vector<8xf32>
    %215 = vector.shape_cast %214 : vector<8xf32> to vector<8x1xf32>
    %216 = vector.broadcast %215 : vector<8x1xf32> to vector<8x8xf32>
    %217 = arith.subf %213, %216 : vector<8x8xf32>
    %218 = math.exp %217 : vector<8x8xf32>
    %cst_167 = arith.constant dense<0.000000e+00> : vector<8xf32>
    %219 = vector.multi_reduction <add>, %218, %cst_167 [1] : vector<8x8xf32> to vector<8xf32>
    %220 = vector.shape_cast %219 : vector<8xf32> to vector<8x1xf32>
    %221 = tpu.reciprocal %220 : vector<8x1xf32> -> vector<8x1xf32>
    %222 = vector.broadcast %221 : vector<8x1xf32> to vector<8x8xf32>
    %223 = arith.mulf %218, %222 : vector<8x8xf32>
    %cst_168 = arith.constant dense<0.000000e+00> : vector<8x32xf32>
    %224 = tpu.matmul %223, %211, %cst_168 {dimension_numbers = #tpu.dot_dimension_numbers<[1], [0], [0], [1], [0, 0, 1, 1], [], []>} : vector<8x8xf32>, vector<8x32xf32>, vector<8x32xf32> -> vector<8x32xf32>
    %c0_169 = arith.constant 0 : index
    %c96 = arith.constant 96 : index
    %c0_170 = arith.constant 0 : index
    %225 = vector.load %arg19[%c0_169, %c96, %c0_170] : memref<2x128x128xf32, #tpu.memory_space<vmem>>, vector<1x32x128xf32>
    %226 = vector.shape_cast %225 : vector<1x32x128xf32> to vector<32x128xf32>
    %cst_171 = arith.constant dense<0.000000e+00> : vector<8x128xf32>
    %227 = tpu.matmul %224, %226, %cst_171 {dimension_numbers = #tpu.dot_dimension_numbers<[1], [0], [0], [1], [0, 0, 1, 1], [], []>} : vector<8x32xf32>, vector<32x128xf32>, vector<8x128xf32> -> vector<8x128xf32>
    %228 = arith.addf %208, %227 : vector<8x128xf32>
    %229 = arith.addf %142, %228 : vector<8x128xf32>
    %c0_172 = arith.constant 0 : index
    %c0_173 = arith.constant 0 : index
    %c0_174 = arith.constant 0 : index
    %230 = vector.load %arg20[%c0_172, %c0_173, %c0_174] : memref<2x1x128xf32, #tpu.memory_space<vmem>>, vector<1x1x128xf32>
    %231 = vector.shape_cast %230 : vector<1x1x128xf32> to vector<1x128xf32>
    %232 = vector.broadcast %231 : vector<1x128xf32> to vector<8x128xf32>
    %233 = arith.addf %229, %232 : vector<8x128xf32>
    %c0_175 = arith.constant 0 : index
    %c0_176 = arith.constant 0 : index
    %c0_177 = arith.constant 0 : index
    %234 = vector.load %arg21[%c0_175, %c0_176, %c0_177] : memref<2x1x128xf32, #tpu.memory_space<vmem>>, vector<1x1x128xf32>
    %235 = vector.shape_cast %234 : vector<1x1x128xf32> to vector<1x128xf32>
    %c0_178 = arith.constant 0 : index
    %c0_179 = arith.constant 0 : index
    %c0_180 = arith.constant 0 : index
    %236 = vector.load %arg22[%c0_178, %c0_179, %c0_180] : memref<2x1x128xf32, #tpu.memory_space<vmem>>, vector<1x1x128xf32>
    %237 = vector.shape_cast %236 : vector<1x1x128xf32> to vector<1x128xf32>
    %cst_181 = arith.constant dense<0.000000e+00> : vector<8xf32>
    %238 = vector.multi_reduction <add>, %233, %cst_181 [1] : vector<8x128xf32> to vector<8xf32>
    %239 = vector.shape_cast %238 : vector<8xf32> to vector<8x1xf32>
    %cst_182 = arith.constant 1.280000e+02 : f32
    %240 = vector.broadcast %cst_182 : f32 to vector<8x1xf32>
    %241 = arith.divf %239, %240 : vector<8x1xf32>
    %242 = vector.broadcast %241 : vector<8x1xf32> to vector<8x128xf32>
    %243 = arith.subf %233, %242 : vector<8x128xf32>
    %244 = arith.mulf %243, %243 : vector<8x128xf32>
    %cst_183 = arith.constant dense<0.000000e+00> : vector<8xf32>
    %245 = vector.multi_reduction <add>, %244, %cst_183 [1] : vector<8x128xf32> to vector<8xf32>
    %246 = vector.shape_cast %245 : vector<8xf32> to vector<8x1xf32>
    %cst_184 = arith.constant 1.280000e+02 : f32
    %247 = vector.broadcast %cst_184 : f32 to vector<8x1xf32>
    %248 = arith.divf %246, %247 : vector<8x1xf32>
    %249 = vector.broadcast %241 : vector<8x1xf32> to vector<8x128xf32>
    %250 = arith.subf %233, %249 : vector<8x128xf32>
    %cst_185 = arith.constant 9.99999974E-6 : f32
    %251 = vector.broadcast %cst_185 : f32 to vector<8x1xf32>
    %252 = arith.addf %248, %251 : vector<8x1xf32>
    %253 = math.rsqrt %252 : vector<8x1xf32>
    %254 = vector.broadcast %253 : vector<8x1xf32> to vector<8x128xf32>
    %255 = arith.mulf %250, %254 : vector<8x128xf32>
    %256 = vector.broadcast %235 : vector<1x128xf32> to vector<8x128xf32>
    %257 = arith.mulf %255, %256 : vector<8x128xf32>
    %258 = vector.broadcast %237 : vector<1x128xf32> to vector<8x128xf32>
    %259 = arith.addf %257, %258 : vector<8x128xf32>
    %c0_186 = arith.constant 0 : index
    %c0_187 = arith.constant 0 : index
    %c0_188 = arith.constant 0 : index
    %260 = vector.load %arg23[%c0_186, %c0_187, %c0_188] : memref<2x128x256xf32, #tpu.memory_space<vmem>>, vector<1x128x256xf32>
    %261 = vector.shape_cast %260 : vector<1x128x256xf32> to vector<128x256xf32>
    %cst_189 = arith.constant dense<0.000000e+00> : vector<8x256xf32>
    %262 = tpu.matmul %259, %261, %cst_189 {dimension_numbers = #tpu.dot_dimension_numbers<[1], [0], [0], [1], [0, 0, 1, 1], [], []>} : vector<8x128xf32>, vector<128x256xf32>, vector<8x256xf32> -> vector<8x256xf32>
    %c0_190 = arith.constant 0 : index
    %c0_191 = arith.constant 0 : index
    %c0_192 = arith.constant 0 : index
    %263 = vector.load %arg24[%c0_190, %c0_191, %c0_192] : memref<2x1x256xf32, #tpu.memory_space<vmem>>, vector<1x1x256xf32>
    %264 = vector.shape_cast %263 : vector<1x1x256xf32> to vector<1x256xf32>
    %265 = vector.broadcast %264 : vector<1x256xf32> to vector<8x256xf32>
    %266 = arith.addf %262, %265 : vector<8x256xf32>
    %cst_193 = arith.constant 0.000000e+00 : f32
    %267 = vector.broadcast %cst_193 : f32 to vector<8x256xf32>
    %268 = arith.maximumf %266, %267 : vector<8x256xf32>
    %c0_194 = arith.constant 0 : index
    %c0_195 = arith.constant 0 : index
    %c0_196 = arith.constant 0 : index
    %269 = vector.load %arg25[%c0_194, %c0_195, %c0_196] : memref<2x256x128xf32, #tpu.memory_space<vmem>>, vector<1x256x128xf32>
    %270 = vector.shape_cast %269 : vector<1x256x128xf32> to vector<256x128xf32>
    %cst_197 = arith.constant dense<0.000000e+00> : vector<8x128xf32>
    %271 = tpu.matmul %268, %270, %cst_197 {dimension_numbers = #tpu.dot_dimension_numbers<[1], [0], [0], [1], [0, 0, 1, 1], [], []>} : vector<8x256xf32>, vector<256x128xf32>, vector<8x128xf32> -> vector<8x128xf32>
    %c0_198 = arith.constant 0 : index
    %c0_199 = arith.constant 0 : index
    %c0_200 = arith.constant 0 : index
    %272 = vector.load %arg26[%c0_198, %c0_199, %c0_200] : memref<2x1x128xf32, #tpu.memory_space<vmem>>, vector<1x1x128xf32>
    %273 = vector.shape_cast %272 : vector<1x1x128xf32> to vector<1x128xf32>
    %274 = vector.broadcast %273 : vector<1x128xf32> to vector<8x128xf32>
    %275 = arith.addf %271, %274 : vector<8x128xf32>
    %276 = arith.addf %259, %275 : vector<8x128xf32>
    %c0_201 = arith.constant 0 : index
    %c0_202 = arith.constant 0 : index
    %c0_203 = arith.constant 0 : index
    %277 = vector.load %arg27[%c0_201, %c0_202, %c0_203] : memref<2x1x128xf32, #tpu.memory_space<vmem>>, vector<1x1x128xf32>
    %278 = vector.shape_cast %277 : vector<1x1x128xf32> to vector<1x128xf32>
    %c0_204 = arith.constant 0 : index
    %c0_205 = arith.constant 0 : index
    %c0_206 = arith.constant 0 : index
    %279 = vector.load %arg28[%c0_204, %c0_205, %c0_206] : memref<2x1x128xf32, #tpu.memory_space<vmem>>, vector<1x1x128xf32>
    %280 = vector.shape_cast %279 : vector<1x1x128xf32> to vector<1x128xf32>
    %cst_207 = arith.constant dense<0.000000e+00> : vector<8xf32>
    %281 = vector.multi_reduction <add>, %276, %cst_207 [1] : vector<8x128xf32> to vector<8xf32>
    %282 = vector.shape_cast %281 : vector<8xf32> to vector<8x1xf32>
    %cst_208 = arith.constant 1.280000e+02 : f32
    %283 = vector.broadcast %cst_208 : f32 to vector<8x1xf32>
    %284 = arith.divf %282, %283 : vector<8x1xf32>
    %285 = vector.broadcast %284 : vector<8x1xf32> to vector<8x128xf32>
    %286 = arith.subf %276, %285 : vector<8x128xf32>
    %287 = arith.mulf %286, %286 : vector<8x128xf32>
    %cst_209 = arith.constant dense<0.000000e+00> : vector<8xf32>
    %288 = vector.multi_reduction <add>, %287, %cst_209 [1] : vector<8x128xf32> to vector<8xf32>
    %289 = vector.shape_cast %288 : vector<8xf32> to vector<8x1xf32>
    %cst_210 = arith.constant 1.280000e+02 : f32
    %290 = vector.broadcast %cst_210 : f32 to vector<8x1xf32>
    %291 = arith.divf %289, %290 : vector<8x1xf32>
    %292 = vector.broadcast %284 : vector<8x1xf32> to vector<8x128xf32>
    %293 = arith.subf %276, %292 : vector<8x128xf32>
    %cst_211 = arith.constant 9.99999974E-6 : f32
    %294 = vector.broadcast %cst_211 : f32 to vector<8x1xf32>
    %295 = arith.addf %291, %294 : vector<8x1xf32>
    %296 = math.rsqrt %295 : vector<8x1xf32>
    %297 = vector.broadcast %296 : vector<8x1xf32> to vector<8x128xf32>
    %298 = arith.mulf %293, %297 : vector<8x128xf32>
    %299 = vector.broadcast %278 : vector<1x128xf32> to vector<8x128xf32>
    %300 = arith.mulf %298, %299 : vector<8x128xf32>
    %301 = vector.broadcast %280 : vector<1x128xf32> to vector<8x128xf32>
    %302 = arith.addf %300, %301 : vector<8x128xf32>
    %c1_212 = arith.constant 1 : index
    %c0_213 = arith.constant 0 : index
    %c0_214 = arith.constant 0 : index
    %303 = vector.load %arg17[%c1_212, %c0_213, %c0_214] : memref<2x128x384xf32, #tpu.memory_space<vmem>>, vector<1x128x384xf32>
    %304 = vector.shape_cast %303 : vector<1x128x384xf32> to vector<128x384xf32>
    %cst_215 = arith.constant dense<0.000000e+00> : vector<8x384xf32>
    %305 = tpu.matmul %302, %304, %cst_215 {dimension_numbers = #tpu.dot_dimension_numbers<[1], [0], [0], [1], [0, 0, 1, 1], [], []>} : vector<8x128xf32>, vector<128x384xf32>, vector<8x384xf32> -> vector<8x384xf32>
    %c1_216 = arith.constant 1 : index
    %c0_217 = arith.constant 0 : index
    %c0_218 = arith.constant 0 : index
    %306 = vector.load %arg18[%c1_216, %c0_217, %c0_218] : memref<2x1x384xf32, #tpu.memory_space<vmem>>, vector<1x1x384xf32>
    %307 = vector.shape_cast %306 : vector<1x1x384xf32> to vector<1x384xf32>
    %308 = vector.broadcast %307 : vector<1x384xf32> to vector<8x384xf32>
    %309 = arith.addf %305, %308 : vector<8x384xf32>
    %310 = vector.extract_strided_slice %309 {offsets = [0, 0], sizes = [8, 32], strides = [1, 1]} : vector<8x384xf32> to vector<8x32xf32>
    %311 = vector.extract_strided_slice %309 {offsets = [0, 128], sizes = [8, 32], strides = [1, 1]} : vector<8x384xf32> to vector<8x32xf32>
    %312 = vector.extract_strided_slice %309 {offsets = [0, 256], sizes = [8, 32], strides = [1, 1]} : vector<8x384xf32> to vector<8x32xf32>
    %313 = tpu.transpose %311, [1, 0] : vector<8x32xf32> -> vector<32x8xf32>
    %cst_219 = arith.constant dense<0.000000e+00> : vector<8x8xf32>
    %314 = tpu.matmul %310, %313, %cst_219 {dimension_numbers = #tpu.dot_dimension_numbers<[1], [0], [0], [1], [0, 0, 1, 1], [], []>} : vector<8x32xf32>, vector<32x8xf32>, vector<8x8xf32> -> vector<8x8xf32>
    %cst_220 = arith.constant dense<0xFF800000> : vector<8xf32>
    %315 = vector.multi_reduction <maximumf>, %314, %cst_220 [1] : vector<8x8xf32> to vector<8xf32>
    %316 = vector.shape_cast %315 : vector<8xf32> to vector<8x1xf32>
    %317 = vector.broadcast %316 : vector<8x1xf32> to vector<8x8xf32>
    %318 = arith.subf %314, %317 : vector<8x8xf32>
    %319 = math.exp %318 : vector<8x8xf32>
    %cst_221 = arith.constant dense<0.000000e+00> : vector<8xf32>
    %320 = vector.multi_reduction <add>, %319, %cst_221 [1] : vector<8x8xf32> to vector<8xf32>
    %321 = vector.shape_cast %320 : vector<8xf32> to vector<8x1xf32>
    %322 = tpu.reciprocal %321 : vector<8x1xf32> -> vector<8x1xf32>
    %323 = vector.broadcast %322 : vector<8x1xf32> to vector<8x8xf32>
    %324 = arith.mulf %319, %323 : vector<8x8xf32>
    %cst_222 = arith.constant dense<0.000000e+00> : vector<8x32xf32>
    %325 = tpu.matmul %324, %312, %cst_222 {dimension_numbers = #tpu.dot_dimension_numbers<[1], [0], [0], [1], [0, 0, 1, 1], [], []>} : vector<8x8xf32>, vector<8x32xf32>, vector<8x32xf32> -> vector<8x32xf32>
    %c1_223 = arith.constant 1 : index
    %c0_224 = arith.constant 0 : index
    %c0_225 = arith.constant 0 : index
    %326 = vector.load %arg19[%c1_223, %c0_224, %c0_225] : memref<2x128x128xf32, #tpu.memory_space<vmem>>, vector<1x32x128xf32>
    %327 = vector.shape_cast %326 : vector<1x32x128xf32> to vector<32x128xf32>
    %cst_226 = arith.constant dense<0.000000e+00> : vector<8x128xf32>
    %328 = tpu.matmul %325, %327, %cst_226 {dimension_numbers = #tpu.dot_dimension_numbers<[1], [0], [0], [1], [0, 0, 1, 1], [], []>} : vector<8x32xf32>, vector<32x128xf32>, vector<8x128xf32> -> vector<8x128xf32>
    %329 = vector.extract_strided_slice %309 {offsets = [0, 32], sizes = [8, 32], strides = [1, 1]} : vector<8x384xf32> to vector<8x32xf32>
    %330 = vector.extract_strided_slice %309 {offsets = [0, 160], sizes = [8, 32], strides = [1, 1]} : vector<8x384xf32> to vector<8x32xf32>
    %331 = vector.extract_strided_slice %309 {offsets = [0, 288], sizes = [8, 32], strides = [1, 1]} : vector<8x384xf32> to vector<8x32xf32>
    %332 = tpu.transpose %330, [1, 0] : vector<8x32xf32> -> vector<32x8xf32>
    %cst_227 = arith.constant dense<0.000000e+00> : vector<8x8xf32>
    %333 = tpu.matmul %329, %332, %cst_227 {dimension_numbers = #tpu.dot_dimension_numbers<[1], [0], [0], [1], [0, 0, 1, 1], [], []>} : vector<8x32xf32>, vector<32x8xf32>, vector<8x8xf32> -> vector<8x8xf32>
    %cst_228 = arith.constant dense<0xFF800000> : vector<8xf32>
    %334 = vector.multi_reduction <maximumf>, %333, %cst_228 [1] : vector<8x8xf32> to vector<8xf32>
    %335 = vector.shape_cast %334 : vector<8xf32> to vector<8x1xf32>
    %336 = vector.broadcast %335 : vector<8x1xf32> to vector<8x8xf32>
    %337 = arith.subf %333, %336 : vector<8x8xf32>
    %338 = math.exp %337 : vector<8x8xf32>
    %cst_229 = arith.constant dense<0.000000e+00> : vector<8xf32>
    %339 = vector.multi_reduction <add>, %338, %cst_229 [1] : vector<8x8xf32> to vector<8xf32>
    %340 = vector.shape_cast %339 : vector<8xf32> to vector<8x1xf32>
    %341 = tpu.reciprocal %340 : vector<8x1xf32> -> vector<8x1xf32>
    %342 = vector.broadcast %341 : vector<8x1xf32> to vector<8x8xf32>
    %343 = arith.mulf %338, %342 : vector<8x8xf32>
    %cst_230 = arith.constant dense<0.000000e+00> : vector<8x32xf32>
    %344 = tpu.matmul %343, %331, %cst_230 {dimension_numbers = #tpu.dot_dimension_numbers<[1], [0], [0], [1], [0, 0, 1, 1], [], []>} : vector<8x8xf32>, vector<8x32xf32>, vector<8x32xf32> -> vector<8x32xf32>
    %c1_231 = arith.constant 1 : index
    %c32_232 = arith.constant 32 : index
    %c0_233 = arith.constant 0 : index
    %345 = vector.load %arg19[%c1_231, %c32_232, %c0_233] : memref<2x128x128xf32, #tpu.memory_space<vmem>>, vector<1x32x128xf32>
    %346 = vector.shape_cast %345 : vector<1x32x128xf32> to vector<32x128xf32>
    %cst_234 = arith.constant dense<0.000000e+00> : vector<8x128xf32>
    %347 = tpu.matmul %344, %346, %cst_234 {dimension_numbers = #tpu.dot_dimension_numbers<[1], [0], [0], [1], [0, 0, 1, 1], [], []>} : vector<8x32xf32>, vector<32x128xf32>, vector<8x128xf32> -> vector<8x128xf32>
    %348 = arith.addf %328, %347 : vector<8x128xf32>
    %349 = vector.extract_strided_slice %309 {offsets = [0, 64], sizes = [8, 32], strides = [1, 1]} : vector<8x384xf32> to vector<8x32xf32>
    %350 = vector.extract_strided_slice %309 {offsets = [0, 192], sizes = [8, 32], strides = [1, 1]} : vector<8x384xf32> to vector<8x32xf32>
    %351 = vector.extract_strided_slice %309 {offsets = [0, 320], sizes = [8, 32], strides = [1, 1]} : vector<8x384xf32> to vector<8x32xf32>
    %352 = tpu.transpose %350, [1, 0] : vector<8x32xf32> -> vector<32x8xf32>
    %cst_235 = arith.constant dense<0.000000e+00> : vector<8x8xf32>
    %353 = tpu.matmul %349, %352, %cst_235 {dimension_numbers = #tpu.dot_dimension_numbers<[1], [0], [0], [1], [0, 0, 1, 1], [], []>} : vector<8x32xf32>, vector<32x8xf32>, vector<8x8xf32> -> vector<8x8xf32>
    %cst_236 = arith.constant dense<0xFF800000> : vector<8xf32>
    %354 = vector.multi_reduction <maximumf>, %353, %cst_236 [1] : vector<8x8xf32> to vector<8xf32>
    %355 = vector.shape_cast %354 : vector<8xf32> to vector<8x1xf32>
    %356 = vector.broadcast %355 : vector<8x1xf32> to vector<8x8xf32>
    %357 = arith.subf %353, %356 : vector<8x8xf32>
    %358 = math.exp %357 : vector<8x8xf32>
    %cst_237 = arith.constant dense<0.000000e+00> : vector<8xf32>
    %359 = vector.multi_reduction <add>, %358, %cst_237 [1] : vector<8x8xf32> to vector<8xf32>
    %360 = vector.shape_cast %359 : vector<8xf32> to vector<8x1xf32>
    %361 = tpu.reciprocal %360 : vector<8x1xf32> -> vector<8x1xf32>
    %362 = vector.broadcast %361 : vector<8x1xf32> to vector<8x8xf32>
    %363 = arith.mulf %358, %362 : vector<8x8xf32>
    %cst_238 = arith.constant dense<0.000000e+00> : vector<8x32xf32>
    %364 = tpu.matmul %363, %351, %cst_238 {dimension_numbers = #tpu.dot_dimension_numbers<[1], [0], [0], [1], [0, 0, 1, 1], [], []>} : vector<8x8xf32>, vector<8x32xf32>, vector<8x32xf32> -> vector<8x32xf32>
    %c1_239 = arith.constant 1 : index
    %c64_240 = arith.constant 64 : index
    %c0_241 = arith.constant 0 : index
    %365 = vector.load %arg19[%c1_239, %c64_240, %c0_241] : memref<2x128x128xf32, #tpu.memory_space<vmem>>, vector<1x32x128xf32>
    %366 = vector.shape_cast %365 : vector<1x32x128xf32> to vector<32x128xf32>
    %cst_242 = arith.constant dense<0.000000e+00> : vector<8x128xf32>
    %367 = tpu.matmul %364, %366, %cst_242 {dimension_numbers = #tpu.dot_dimension_numbers<[1], [0], [0], [1], [0, 0, 1, 1], [], []>} : vector<8x32xf32>, vector<32x128xf32>, vector<8x128xf32> -> vector<8x128xf32>
    %368 = arith.addf %348, %367 : vector<8x128xf32>
    %369 = vector.extract_strided_slice %309 {offsets = [0, 96], sizes = [8, 32], strides = [1, 1]} : vector<8x384xf32> to vector<8x32xf32>
    %370 = vector.extract_strided_slice %309 {offsets = [0, 224], sizes = [8, 32], strides = [1, 1]} : vector<8x384xf32> to vector<8x32xf32>
    %371 = vector.extract_strided_slice %309 {offsets = [0, 352], sizes = [8, 32], strides = [1, 1]} : vector<8x384xf32> to vector<8x32xf32>
    %372 = tpu.transpose %370, [1, 0] : vector<8x32xf32> -> vector<32x8xf32>
    %cst_243 = arith.constant dense<0.000000e+00> : vector<8x8xf32>
    %373 = tpu.matmul %369, %372, %cst_243 {dimension_numbers = #tpu.dot_dimension_numbers<[1], [0], [0], [1], [0, 0, 1, 1], [], []>} : vector<8x32xf32>, vector<32x8xf32>, vector<8x8xf32> -> vector<8x8xf32>
    %cst_244 = arith.constant dense<0xFF800000> : vector<8xf32>
    %374 = vector.multi_reduction <maximumf>, %373, %cst_244 [1] : vector<8x8xf32> to vector<8xf32>
    %375 = vector.shape_cast %374 : vector<8xf32> to vector<8x1xf32>
    %376 = vector.broadcast %375 : vector<8x1xf32> to vector<8x8xf32>
    %377 = arith.subf %373, %376 : vector<8x8xf32>
    %378 = math.exp %377 : vector<8x8xf32>
    %cst_245 = arith.constant dense<0.000000e+00> : vector<8xf32>
    %379 = vector.multi_reduction <add>, %378, %cst_245 [1] : vector<8x8xf32> to vector<8xf32>
    %380 = vector.shape_cast %379 : vector<8xf32> to vector<8x1xf32>
    %381 = tpu.reciprocal %380 : vector<8x1xf32> -> vector<8x1xf32>
    %382 = vector.broadcast %381 : vector<8x1xf32> to vector<8x8xf32>
    %383 = arith.mulf %378, %382 : vector<8x8xf32>
    %cst_246 = arith.constant dense<0.000000e+00> : vector<8x32xf32>
    %384 = tpu.matmul %383, %371, %cst_246 {dimension_numbers = #tpu.dot_dimension_numbers<[1], [0], [0], [1], [0, 0, 1, 1], [], []>} : vector<8x8xf32>, vector<8x32xf32>, vector<8x32xf32> -> vector<8x32xf32>
    %c1_247 = arith.constant 1 : index
    %c96_248 = arith.constant 96 : index
    %c0_249 = arith.constant 0 : index
    %385 = vector.load %arg19[%c1_247, %c96_248, %c0_249] : memref<2x128x128xf32, #tpu.memory_space<vmem>>, vector<1x32x128xf32>
    %386 = vector.shape_cast %385 : vector<1x32x128xf32> to vector<32x128xf32>
    %cst_250 = arith.constant dense<0.000000e+00> : vector<8x128xf32>
    %387 = tpu.matmul %384, %386, %cst_250 {dimension_numbers = #tpu.dot_dimension_numbers<[1], [0], [0], [1], [0, 0, 1, 1], [], []>} : vector<8x32xf32>, vector<32x128xf32>, vector<8x128xf32> -> vector<8x128xf32>
    %388 = arith.addf %368, %387 : vector<8x128xf32>
    %389 = arith.addf %302, %388 : vector<8x128xf32>
    %c1_251 = arith.constant 1 : index
    %c0_252 = arith.constant 0 : index
    %c0_253 = arith.constant 0 : index
    %390 = vector.load %arg20[%c1_251, %c0_252, %c0_253] : memref<2x1x128xf32, #tpu.memory_space<vmem>>, vector<1x1x128xf32>
    %391 = vector.shape_cast %390 : vector<1x1x128xf32> to vector<1x128xf32>
    %392 = vector.broadcast %391 : vector<1x128xf32> to vector<8x128xf32>
    %393 = arith.addf %389, %392 : vector<8x128xf32>
    %c1_254 = arith.constant 1 : index
    %c0_255 = arith.constant 0 : index
    %c0_256 = arith.constant 0 : index
    %394 = vector.load %arg21[%c1_254, %c0_255, %c0_256] : memref<2x1x128xf32, #tpu.memory_space<vmem>>, vector<1x1x128xf32>
    %395 = vector.shape_cast %394 : vector<1x1x128xf32> to vector<1x128xf32>
    %c1_257 = arith.constant 1 : index
    %c0_258 = arith.constant 0 : index
    %c0_259 = arith.constant 0 : index
    %396 = vector.load %arg22[%c1_257, %c0_258, %c0_259] : memref<2x1x128xf32, #tpu.memory_space<vmem>>, vector<1x1x128xf32>
    %397 = vector.shape_cast %396 : vector<1x1x128xf32> to vector<1x128xf32>
    %cst_260 = arith.constant dense<0.000000e+00> : vector<8xf32>
    %398 = vector.multi_reduction <add>, %393, %cst_260 [1] : vector<8x128xf32> to vector<8xf32>
    %399 = vector.shape_cast %398 : vector<8xf32> to vector<8x1xf32>
    %cst_261 = arith.constant 1.280000e+02 : f32
    %400 = vector.broadcast %cst_261 : f32 to vector<8x1xf32>
    %401 = arith.divf %399, %400 : vector<8x1xf32>
    %402 = vector.broadcast %401 : vector<8x1xf32> to vector<8x128xf32>
    %403 = arith.subf %393, %402 : vector<8x128xf32>
    %404 = arith.mulf %403, %403 : vector<8x128xf32>
    %cst_262 = arith.constant dense<0.000000e+00> : vector<8xf32>
    %405 = vector.multi_reduction <add>, %404, %cst_262 [1] : vector<8x128xf32> to vector<8xf32>
    %406 = vector.shape_cast %405 : vector<8xf32> to vector<8x1xf32>
    %cst_263 = arith.constant 1.280000e+02 : f32
    %407 = vector.broadcast %cst_263 : f32 to vector<8x1xf32>
    %408 = arith.divf %406, %407 : vector<8x1xf32>
    %409 = vector.broadcast %401 : vector<8x1xf32> to vector<8x128xf32>
    %410 = arith.subf %393, %409 : vector<8x128xf32>
    %cst_264 = arith.constant 9.99999974E-6 : f32
    %411 = vector.broadcast %cst_264 : f32 to vector<8x1xf32>
    %412 = arith.addf %408, %411 : vector<8x1xf32>
    %413 = math.rsqrt %412 : vector<8x1xf32>
    %414 = vector.broadcast %413 : vector<8x1xf32> to vector<8x128xf32>
    %415 = arith.mulf %410, %414 : vector<8x128xf32>
    %416 = vector.broadcast %395 : vector<1x128xf32> to vector<8x128xf32>
    %417 = arith.mulf %415, %416 : vector<8x128xf32>
    %418 = vector.broadcast %397 : vector<1x128xf32> to vector<8x128xf32>
    %419 = arith.addf %417, %418 : vector<8x128xf32>
    %c1_265 = arith.constant 1 : index
    %c0_266 = arith.constant 0 : index
    %c0_267 = arith.constant 0 : index
    %420 = vector.load %arg23[%c1_265, %c0_266, %c0_267] : memref<2x128x256xf32, #tpu.memory_space<vmem>>, vector<1x128x256xf32>
    %421 = vector.shape_cast %420 : vector<1x128x256xf32> to vector<128x256xf32>
    %cst_268 = arith.constant dense<0.000000e+00> : vector<8x256xf32>
    %422 = tpu.matmul %419, %421, %cst_268 {dimension_numbers = #tpu.dot_dimension_numbers<[1], [0], [0], [1], [0, 0, 1, 1], [], []>} : vector<8x128xf32>, vector<128x256xf32>, vector<8x256xf32> -> vector<8x256xf32>
    %c1_269 = arith.constant 1 : index
    %c0_270 = arith.constant 0 : index
    %c0_271 = arith.constant 0 : index
    %423 = vector.load %arg24[%c1_269, %c0_270, %c0_271] : memref<2x1x256xf32, #tpu.memory_space<vmem>>, vector<1x1x256xf32>
    %424 = vector.shape_cast %423 : vector<1x1x256xf32> to vector<1x256xf32>
    %425 = vector.broadcast %424 : vector<1x256xf32> to vector<8x256xf32>
    %426 = arith.addf %422, %425 : vector<8x256xf32>
    %cst_272 = arith.constant 0.000000e+00 : f32
    %427 = vector.broadcast %cst_272 : f32 to vector<8x256xf32>
    %428 = arith.maximumf %426, %427 : vector<8x256xf32>
    %c1_273 = arith.constant 1 : index
    %c0_274 = arith.constant 0 : index
    %c0_275 = arith.constant 0 : index
    %429 = vector.load %arg25[%c1_273, %c0_274, %c0_275] : memref<2x256x128xf32, #tpu.memory_space<vmem>>, vector<1x256x128xf32>
    %430 = vector.shape_cast %429 : vector<1x256x128xf32> to vector<256x128xf32>
    %cst_276 = arith.constant dense<0.000000e+00> : vector<8x128xf32>
    %431 = tpu.matmul %428, %430, %cst_276 {dimension_numbers = #tpu.dot_dimension_numbers<[1], [0], [0], [1], [0, 0, 1, 1], [], []>} : vector<8x256xf32>, vector<256x128xf32>, vector<8x128xf32> -> vector<8x128xf32>
    %c1_277 = arith.constant 1 : index
    %c0_278 = arith.constant 0 : index
    %c0_279 = arith.constant 0 : index
    %432 = vector.load %arg26[%c1_277, %c0_278, %c0_279] : memref<2x1x128xf32, #tpu.memory_space<vmem>>, vector<1x1x128xf32>
    %433 = vector.shape_cast %432 : vector<1x1x128xf32> to vector<1x128xf32>
    %434 = vector.broadcast %433 : vector<1x128xf32> to vector<8x128xf32>
    %435 = arith.addf %431, %434 : vector<8x128xf32>
    %436 = arith.addf %419, %435 : vector<8x128xf32>
    %c1_280 = arith.constant 1 : index
    %c0_281 = arith.constant 0 : index
    %c0_282 = arith.constant 0 : index
    %437 = vector.load %arg27[%c1_280, %c0_281, %c0_282] : memref<2x1x128xf32, #tpu.memory_space<vmem>>, vector<1x1x128xf32>
    %438 = vector.shape_cast %437 : vector<1x1x128xf32> to vector<1x128xf32>
    %c1_283 = arith.constant 1 : index
    %c0_284 = arith.constant 0 : index
    %c0_285 = arith.constant 0 : index
    %439 = vector.load %arg28[%c1_283, %c0_284, %c0_285] : memref<2x1x128xf32, #tpu.memory_space<vmem>>, vector<1x1x128xf32>
    %440 = vector.shape_cast %439 : vector<1x1x128xf32> to vector<1x128xf32>
    %cst_286 = arith.constant dense<0.000000e+00> : vector<8xf32>
    %441 = vector.multi_reduction <add>, %436, %cst_286 [1] : vector<8x128xf32> to vector<8xf32>
    %442 = vector.shape_cast %441 : vector<8xf32> to vector<8x1xf32>
    %cst_287 = arith.constant 1.280000e+02 : f32
    %443 = vector.broadcast %cst_287 : f32 to vector<8x1xf32>
    %444 = arith.divf %442, %443 : vector<8x1xf32>
    %445 = vector.broadcast %444 : vector<8x1xf32> to vector<8x128xf32>
    %446 = arith.subf %436, %445 : vector<8x128xf32>
    %447 = arith.mulf %446, %446 : vector<8x128xf32>
    %cst_288 = arith.constant dense<0.000000e+00> : vector<8xf32>
    %448 = vector.multi_reduction <add>, %447, %cst_288 [1] : vector<8x128xf32> to vector<8xf32>
    %449 = vector.shape_cast %448 : vector<8xf32> to vector<8x1xf32>
    %cst_289 = arith.constant 1.280000e+02 : f32
    %450 = vector.broadcast %cst_289 : f32 to vector<8x1xf32>
    %451 = arith.divf %449, %450 : vector<8x1xf32>
    %452 = vector.broadcast %444 : vector<8x1xf32> to vector<8x128xf32>
    %453 = arith.subf %436, %452 : vector<8x128xf32>
    %cst_290 = arith.constant 9.99999974E-6 : f32
    %454 = vector.broadcast %cst_290 : f32 to vector<8x1xf32>
    %455 = arith.addf %451, %454 : vector<8x1xf32>
    %456 = math.rsqrt %455 : vector<8x1xf32>
    %457 = vector.broadcast %456 : vector<8x1xf32> to vector<8x128xf32>
    %458 = arith.mulf %453, %457 : vector<8x128xf32>
    %459 = vector.broadcast %438 : vector<1x128xf32> to vector<8x128xf32>
    %460 = arith.mulf %458, %459 : vector<8x128xf32>
    %461 = vector.broadcast %440 : vector<1x128xf32> to vector<8x128xf32>
    %462 = arith.addf %460, %461 : vector<8x128xf32>
    %c0_291 = arith.constant 0 : index
    %c0_292 = arith.constant 0 : index
    %463 = vector.load %arg29[%c0_291, %c0_292] : memref<128x128xf32, #tpu.memory_space<vmem>>, vector<128x128xf32>
    %cst_293 = arith.constant dense<0.000000e+00> : vector<8x128xf32>
    %464 = tpu.matmul %13, %463, %cst_293 {dimension_numbers = #tpu.dot_dimension_numbers<[1], [0], [0], [1], [0, 0, 1, 1], [], []>} : vector<8x128xf32>, vector<128x128xf32>, vector<8x128xf32> -> vector<8x128xf32>
    %c0_294 = arith.constant 0 : index
    %c0_295 = arith.constant 0 : index
    %465 = vector.load %arg30[%c0_294, %c0_295] : memref<1x128xf32, #tpu.memory_space<vmem>>, vector<1x128xf32>
    %466 = vector.broadcast %465 : vector<1x128xf32> to vector<8x128xf32>
    %467 = arith.addf %464, %466 : vector<8x128xf32>
    %c0_296 = arith.constant 0 : index
    %c0_297 = arith.constant 0 : index
    %468 = vector.load %arg31[%c0_296, %c0_297] : memref<128x256xf32, #tpu.memory_space<vmem>>, vector<128x256xf32>
    %cst_298 = arith.constant dense<0.000000e+00> : vector<8x256xf32>
    %469 = tpu.matmul %462, %468, %cst_298 {dimension_numbers = #tpu.dot_dimension_numbers<[1], [0], [0], [1], [0, 0, 1, 1], [], []>} : vector<8x128xf32>, vector<128x256xf32>, vector<8x256xf32> -> vector<8x256xf32>
    %c0_299 = arith.constant 0 : index
    %c0_300 = arith.constant 0 : index
    %470 = vector.load %arg32[%c0_299, %c0_300] : memref<1x256xf32, #tpu.memory_space<vmem>>, vector<1x256xf32>
    %471 = vector.broadcast %470 : vector<1x256xf32> to vector<8x256xf32>
    %472 = arith.addf %469, %471 : vector<8x256xf32>
    %473 = vector.extract_strided_slice %472 {offsets = [0, 0], sizes = [8, 128], strides = [1, 1]} : vector<8x256xf32> to vector<8x128xf32>
    %474 = vector.extract_strided_slice %472 {offsets = [0, 128], sizes = [8, 128], strides = [1, 1]} : vector<8x256xf32> to vector<8x128xf32>
    %475 = tpu.transpose %473, [1, 0] : vector<8x128xf32> -> vector<128x8xf32>
    %cst_301 = arith.constant dense<0.000000e+00> : vector<8x8xf32>
    %476 = tpu.matmul %467, %475, %cst_301 {dimension_numbers = #tpu.dot_dimension_numbers<[1], [0], [0], [1], [0, 0, 1, 1], [], []>} : vector<8x128xf32>, vector<128x8xf32>, vector<8x8xf32> -> vector<8x8xf32>
    %cst_302 = arith.constant dense<0xFF800000> : vector<8xf32>
    %477 = vector.multi_reduction <maximumf>, %476, %cst_302 [1] : vector<8x8xf32> to vector<8xf32>
    %478 = vector.shape_cast %477 : vector<8xf32> to vector<8x1xf32>
    %479 = vector.broadcast %478 : vector<8x1xf32> to vector<8x8xf32>
    %480 = arith.subf %476, %479 : vector<8x8xf32>
    %481 = math.exp %480 : vector<8x8xf32>
    %cst_303 = arith.constant dense<0.000000e+00> : vector<8xf32>
    %482 = vector.multi_reduction <add>, %481, %cst_303 [1] : vector<8x8xf32> to vector<8xf32>
    %483 = vector.shape_cast %482 : vector<8xf32> to vector<8x1xf32>
    %484 = tpu.reciprocal %483 : vector<8x1xf32> -> vector<8x1xf32>
    %485 = vector.broadcast %484 : vector<8x1xf32> to vector<8x8xf32>
    %486 = arith.mulf %481, %485 : vector<8x8xf32>
    %cst_304 = arith.constant dense<0.000000e+00> : vector<8x128xf32>
    %487 = tpu.matmul %486, %474, %cst_304 {dimension_numbers = #tpu.dot_dimension_numbers<[1], [0], [0], [1], [0, 0, 1, 1], [], []>} : vector<8x8xf32>, vector<8x128xf32>, vector<8x128xf32> -> vector<8x128xf32>
    %c0_305 = arith.constant 0 : index
    %c0_306 = arith.constant 0 : index
    %488 = vector.load %arg33[%c0_305, %c0_306] : memref<128x128xf32, #tpu.memory_space<vmem>>, vector<128x128xf32>
    %cst_307 = arith.constant dense<0.000000e+00> : vector<8x128xf32>
    %489 = tpu.matmul %487, %488, %cst_307 {dimension_numbers = #tpu.dot_dimension_numbers<[1], [0], [0], [1], [0, 0, 1, 1], [], []>} : vector<8x128xf32>, vector<128x128xf32>, vector<8x128xf32> -> vector<8x128xf32>
    %c0_308 = arith.constant 0 : index
    %c0_309 = arith.constant 0 : index
    %490 = vector.load %arg34[%c0_308, %c0_309] : memref<1x128xf32, #tpu.memory_space<vmem>>, vector<1x128xf32>
    %491 = vector.broadcast %490 : vector<1x128xf32> to vector<8x128xf32>
    %492 = arith.addf %489, %491 : vector<8x128xf32>
    %c0_310 = arith.constant 0 : index
    %c0_311 = arith.constant 0 : index
    %493 = vector.load %arg35[%c0_310, %c0_311] : memref<128x128xf32, #tpu.memory_space<vmem>>, vector<128x128xf32>
    %cst_312 = arith.constant dense<0.000000e+00> : vector<8x128xf32>
    %494 = tpu.matmul %492, %493, %cst_312 {dimension_numbers = #tpu.dot_dimension_numbers<[1], [0], [0], [1], [0, 0, 1, 1], [], []>} : vector<8x128xf32>, vector<128x128xf32>, vector<8x128xf32> -> vector<8x128xf32>
    %c0_313 = arith.constant 0 : index
    %c0_314 = arith.constant 0 : index
    %495 = vector.load %arg36[%c0_313, %c0_314] : memref<1x128xf32, #tpu.memory_space<vmem>>, vector<1x128xf32>
    %496 = vector.broadcast %495 : vector<1x128xf32> to vector<8x128xf32>
    %497 = arith.addf %494, %496 : vector<8x128xf32>
    %c0_315 = arith.constant 0 : index
    %c0_316 = arith.constant 0 : index
    %498 = vector.load %arg37[%c0_315, %c0_316] : memref<128x256xf32, #tpu.memory_space<vmem>>, vector<128x256xf32>
    %cst_317 = arith.constant dense<0.000000e+00> : vector<8x256xf32>
    %499 = tpu.matmul %13, %498, %cst_317 {dimension_numbers = #tpu.dot_dimension_numbers<[1], [0], [0], [1], [0, 0, 1, 1], [], []>} : vector<8x128xf32>, vector<128x256xf32>, vector<8x256xf32> -> vector<8x256xf32>
    %c0_318 = arith.constant 0 : index
    %c0_319 = arith.constant 0 : index
    %500 = vector.load %arg38[%c0_318, %c0_319] : memref<1x256xf32, #tpu.memory_space<vmem>>, vector<1x256xf32>
    %501 = vector.broadcast %500 : vector<1x256xf32> to vector<8x256xf32>
    %502 = arith.addf %499, %501 : vector<8x256xf32>
    %503 = vector.extract_strided_slice %502 {offsets = [0, 0], sizes = [8, 128], strides = [1, 1]} : vector<8x256xf32> to vector<8x128xf32>
    %504 = vector.extract_strided_slice %502 {offsets = [0, 128], sizes = [8, 128], strides = [1, 1]} : vector<8x256xf32> to vector<8x128xf32>
    %505 = tpu.transpose %503, [1, 0] : vector<8x128xf32> -> vector<128x8xf32>
    %cst_320 = arith.constant dense<0.000000e+00> : vector<8x8xf32>
    %506 = tpu.matmul %497, %505, %cst_320 {dimension_numbers = #tpu.dot_dimension_numbers<[1], [0], [0], [1], [0, 0, 1, 1], [], []>} : vector<8x128xf32>, vector<128x8xf32>, vector<8x8xf32> -> vector<8x8xf32>
    %cst_321 = arith.constant dense<0xFF800000> : vector<8xf32>
    %507 = vector.multi_reduction <maximumf>, %506, %cst_321 [1] : vector<8x8xf32> to vector<8xf32>
    %508 = vector.shape_cast %507 : vector<8xf32> to vector<8x1xf32>
    %509 = vector.broadcast %508 : vector<8x1xf32> to vector<8x8xf32>
    %510 = arith.subf %506, %509 : vector<8x8xf32>
    %511 = math.exp %510 : vector<8x8xf32>
    %cst_322 = arith.constant dense<0.000000e+00> : vector<8xf32>
    %512 = vector.multi_reduction <add>, %511, %cst_322 [1] : vector<8x8xf32> to vector<8xf32>
    %513 = vector.shape_cast %512 : vector<8xf32> to vector<8x1xf32>
    %514 = tpu.reciprocal %513 : vector<8x1xf32> -> vector<8x1xf32>
    %515 = vector.broadcast %514 : vector<8x1xf32> to vector<8x8xf32>
    %516 = arith.mulf %511, %515 : vector<8x8xf32>
    %cst_323 = arith.constant dense<0.000000e+00> : vector<8x128xf32>
    %517 = tpu.matmul %516, %504, %cst_323 {dimension_numbers = #tpu.dot_dimension_numbers<[1], [0], [0], [1], [0, 0, 1, 1], [], []>} : vector<8x8xf32>, vector<8x128xf32>, vector<8x128xf32> -> vector<8x128xf32>
    %c0_324 = arith.constant 0 : index
    %c0_325 = arith.constant 0 : index
    %518 = vector.load %arg39[%c0_324, %c0_325] : memref<128x128xf32, #tpu.memory_space<vmem>>, vector<128x128xf32>
    %cst_326 = arith.constant dense<0.000000e+00> : vector<8x128xf32>
    %519 = tpu.matmul %517, %518, %cst_326 {dimension_numbers = #tpu.dot_dimension_numbers<[1], [0], [0], [1], [0, 0, 1, 1], [], []>} : vector<8x128xf32>, vector<128x128xf32>, vector<8x128xf32> -> vector<8x128xf32>
    %c0_327 = arith.constant 0 : index
    %c0_328 = arith.constant 0 : index
    %520 = vector.load %arg40[%c0_327, %c0_328] : memref<1x128xf32, #tpu.memory_space<vmem>>, vector<1x128xf32>
    %521 = vector.broadcast %520 : vector<1x128xf32> to vector<8x128xf32>
    %522 = arith.addf %519, %521 : vector<8x128xf32>
    %c0_329 = arith.constant 0 : index
    %c0_330 = arith.constant 0 : index
    %523 = vector.load %arg41[%c0_329, %c0_330] : memref<256x128xf32, #tpu.memory_space<vmem>>, vector<128x128xf32>
    %cst_331 = arith.constant dense<0.000000e+00> : vector<8x128xf32>
    %524 = tpu.matmul %492, %523, %cst_331 {dimension_numbers = #tpu.dot_dimension_numbers<[1], [0], [0], [1], [0, 0, 1, 1], [], []>} : vector<8x128xf32>, vector<128x128xf32>, vector<8x128xf32> -> vector<8x128xf32>
    %c128 = arith.constant 128 : index
    %c0_332 = arith.constant 0 : index
    %525 = vector.load %arg41[%c128, %c0_332] : memref<256x128xf32, #tpu.memory_space<vmem>>, vector<128x128xf32>
    %cst_333 = arith.constant dense<0.000000e+00> : vector<8x128xf32>
    %526 = tpu.matmul %522, %525, %cst_333 {dimension_numbers = #tpu.dot_dimension_numbers<[1], [0], [0], [1], [0, 0, 1, 1], [], []>} : vector<8x128xf32>, vector<128x128xf32>, vector<8x128xf32> -> vector<8x128xf32>
    %527 = arith.addf %524, %526 : vector<8x128xf32>
    %c0_334 = arith.constant 0 : index
    %c0_335 = arith.constant 0 : index
    %528 = vector.load %arg42[%c0_334, %c0_335] : memref<1x128xf32, #tpu.memory_space<vmem>>, vector<1x128xf32>
    %529 = vector.broadcast %528 : vector<1x128xf32> to vector<8x128xf32>
    %530 = arith.addf %527, %529 : vector<8x128xf32>
    %cst_336 = arith.constant 0.000000e+00 : f32
    %531 = vector.broadcast %cst_336 : f32 to vector<8x128xf32>
    %532 = arith.maximumf %530, %531 : vector<8x128xf32>
    %c0_337 = arith.constant 0 : index
    %c0_338 = arith.constant 0 : index
    %533 = vector.load %arg43[%c0_337, %c0_338] : memref<128x32xf32, #tpu.memory_space<vmem>>, vector<128x32xf32>
    %cst_339 = arith.constant dense<0.000000e+00> : vector<8x32xf32>
    %534 = tpu.matmul %532, %533, %cst_339 {dimension_numbers = #tpu.dot_dimension_numbers<[1], [0], [0], [1], [0, 0, 1, 1], [], []>} : vector<8x128xf32>, vector<128x32xf32>, vector<8x32xf32> -> vector<8x32xf32>
    %c0_340 = arith.constant 0 : index
    %c0_341 = arith.constant 0 : index
    %535 = vector.load %arg44[%c0_340, %c0_341] : memref<1x32xf32, #tpu.memory_space<vmem>>, vector<1x32xf32>
    %536 = vector.broadcast %535 : vector<1x32xf32> to vector<8x32xf32>
    %537 = arith.addf %534, %536 : vector<8x32xf32>
    %cst_342 = arith.constant 0.000000e+00 : f32
    %538 = vector.broadcast %cst_342 : f32 to vector<8x32xf32>
    %539 = arith.maximumf %537, %538 : vector<8x32xf32>
    %c0_343 = arith.constant 0 : index
    %c0_344 = arith.constant 0 : index
    %540 = vector.load %arg45[%c0_343, %c0_344] : memref<32x3xf32, #tpu.memory_space<vmem>>, vector<32x3xf32>
    %cst_345 = arith.constant dense<0.000000e+00> : vector<8x3xf32>
    %541 = tpu.matmul %539, %540, %cst_345 {dimension_numbers = #tpu.dot_dimension_numbers<[1], [0], [0], [1], [0, 0, 1, 1], [], []>} : vector<8x32xf32>, vector<32x3xf32>, vector<8x3xf32> -> vector<8x3xf32>
    %c0_346 = arith.constant 0 : index
    %c0_347 = arith.constant 0 : index
    %542 = vector.load %arg46[%c0_346, %c0_347] : memref<1x3xf32, #tpu.memory_space<vmem>>, vector<1x3xf32>
    %543 = vector.broadcast %542 : vector<1x3xf32> to vector<8x3xf32>
    %544 = arith.addf %541, %543 : vector<8x3xf32>
    %cst_348 = arith.constant dense<0.000000e+00> : vector<3xf32>
    %545 = vector.multi_reduction <add>, %544, %cst_348 [0] : vector<8x3xf32> to vector<3xf32>
    %546 = vector.shape_cast %545 : vector<3xf32> to vector<1x3xf32>
    %cst_349 = arith.constant 8.000000e+00 : f32
    %547 = vector.broadcast %cst_349 : f32 to vector<1x3xf32>
    %548 = arith.divf %546, %547 : vector<1x3xf32>
    %c0_350 = arith.constant 0 : index
    %c0_351 = arith.constant 0 : index
    %c0_352 = arith.constant 0 : index
    %549 = vector.load %arg47[%c0_350, %c0_351, %c0_352] : memref<1x1x3xf32, #tpu.memory_space<vmem>>, vector<1x1x3xf32>
    %550 = vector.shape_cast %549 : vector<1x1x3xf32> to vector<1x3xf32>
    %551 = vector.shape_cast %548 : vector<1x3xf32> to vector<1x1x3xf32>
    tpu.vector_store %arg47[%c0_350, %c0_351, %c0_352], %551 {strides = array<i32>} : memref<1x1x3xf32, #tpu.memory_space<vmem>>, vector<1x1x3xf32>,
    return
  }
  func.func @transform_0(%arg0: i32) -> (i32, i32, i32) {
    %c0_i32 = arith.constant 0 : i32
    %c0_i32_0 = arith.constant 0 : i32
    %c0_i32_1 = arith.constant 0 : i32
    return %arg0, %c0_i32, %c0_i32_0 : i32, i32, i32
  }
  func.func @transform_1(%arg0: i32) -> (i32, i32, i32) {
    %c0_i32 = arith.constant 0 : i32
    %c0_i32_0 = arith.constant 0 : i32
    %c0_i32_1 = arith.constant 0 : i32
    return %arg0, %c0_i32, %c0_i32_0 : i32, i32, i32
  }
  func.func @transform_2(%arg0: i32) -> (i32, i32) {
    %c0_i32 = arith.constant 0 : i32
    %c0_i32_0 = arith.constant 0 : i32
    %c0_i32_1 = arith.constant 0 : i32
    return %c0_i32, %c0_i32_0 : i32, i32
  }
  func.func @transform_3(%arg0: i32) -> (i32, i32) {
    %c0_i32 = arith.constant 0 : i32
    %c0_i32_0 = arith.constant 0 : i32
    %c0_i32_1 = arith.constant 0 : i32
    return %c0_i32, %c0_i32_0 : i32, i32
  }
  func.func @transform_4(%arg0: i32) -> (i32, i32) {
    %c0_i32 = arith.constant 0 : i32
    %c0_i32_0 = arith.constant 0 : i32
    %c0_i32_1 = arith.constant 0 : i32
    return %c0_i32, %c0_i32_0 : i32, i32
  }
  func.func @transform_5(%arg0: i32) -> (i32, i32) {
    %c0_i32 = arith.constant 0 : i32
    %c0_i32_0 = arith.constant 0 : i32
    %c0_i32_1 = arith.constant 0 : i32
    return %c0_i32, %c0_i32_0 : i32, i32
  }
  func.func @transform_6(%arg0: i32) -> (i32, i32, i32) {
    %c0_i32 = arith.constant 0 : i32
    %c0_i32_0 = arith.constant 0 : i32
    %c0_i32_1 = arith.constant 0 : i32
    %c0_i32_2 = arith.constant 0 : i32
    return %c0_i32, %c0_i32_0, %c0_i32_1 : i32, i32, i32
  }
  func.func @transform_7(%arg0: i32) -> (i32, i32) {
    %c0_i32 = arith.constant 0 : i32
    %c0_i32_0 = arith.constant 0 : i32
    %c0_i32_1 = arith.constant 0 : i32
    return %c0_i32, %c0_i32_0 : i32, i32
  }
  func.func @transform_8(%arg0: i32) -> (i32, i32, i32) {
    %c0_i32 = arith.constant 0 : i32
    %c0_i32_0 = arith.constant 0 : i32
    %c0_i32_1 = arith.constant 0 : i32
    %c0_i32_2 = arith.constant 0 : i32
    return %c0_i32, %c0_i32_0, %c0_i32_1 : i32, i32, i32
  }
  func.func @transform_9(%arg0: i32) -> (i32, i32, i32) {
    %c0_i32 = arith.constant 0 : i32
    %c0_i32_0 = arith.constant 0 : i32
    %c0_i32_1 = arith.constant 0 : i32
    %c0_i32_2 = arith.constant 0 : i32
    return %c0_i32, %c0_i32_0, %c0_i32_1 : i32, i32, i32
  }
  func.func @transform_10(%arg0: i32) -> (i32, i32, i32) {
    %c0_i32 = arith.constant 0 : i32
    %c0_i32_0 = arith.constant 0 : i32
    %c0_i32_1 = arith.constant 0 : i32
    %c0_i32_2 = arith.constant 0 : i32
    return %c0_i32, %c0_i32_0, %c0_i32_1 : i32, i32, i32
  }
  func.func @transform_11(%arg0: i32) -> (i32, i32, i32) {
    %c0_i32 = arith.constant 0 : i32
    %c0_i32_0 = arith.constant 0 : i32
    %c0_i32_1 = arith.constant 0 : i32
    %c0_i32_2 = arith.constant 0 : i32
    return %c0_i32, %c0_i32_0, %c0_i32_1 : i32, i32, i32
  }
  func.func @transform_12(%arg0: i32) -> (i32, i32, i32) {
    %c0_i32 = arith.constant 0 : i32
    %c0_i32_0 = arith.constant 0 : i32
    %c0_i32_1 = arith.constant 0 : i32
    %c0_i32_2 = arith.constant 0 : i32
    return %c0_i32, %c0_i32_0, %c0_i32_1 : i32, i32, i32
  }
  func.func @transform_13(%arg0: i32) -> (i32, i32) {
    %c0_i32 = arith.constant 0 : i32
    %c0_i32_0 = arith.constant 0 : i32
    %c0_i32_1 = arith.constant 0 : i32
    return %c0_i32, %c0_i32_0 : i32, i32
  }
  func.func @transform_14(%arg0: i32) -> (i32, i32) {
    %c0_i32 = arith.constant 0 : i32
    %c0_i32_0 = arith.constant 0 : i32
    %c0_i32_1 = arith.constant 0 : i32
    return %c0_i32, %c0_i32_0 : i32, i32
  }
  func.func @transform_15(%arg0: i32) -> (i32, i32) {
    %c0_i32 = arith.constant 0 : i32
    %c0_i32_0 = arith.constant 0 : i32
    %c0_i32_1 = arith.constant 0 : i32
    return %c0_i32, %c0_i32_0 : i32, i32
  }
  func.func @transform_16(%arg0: i32) -> (i32, i32, i32) {
    %c0_i32 = arith.constant 0 : i32
    %c0_i32_0 = arith.constant 0 : i32
    %c0_i32_1 = arith.constant 0 : i32
    %c0_i32_2 = arith.constant 0 : i32
    return %c0_i32, %c0_i32_0, %c0_i32_1 : i32, i32, i32
  }
  func.func @transform_17(%arg0: i32) -> (i32, i32, i32) {
    %c0_i32 = arith.constant 0 : i32
    %c0_i32_0 = arith.constant 0 : i32
    %c0_i32_1 = arith.constant 0 : i32
    %c0_i32_2 = arith.constant 0 : i32
    return %c0_i32, %c0_i32_0, %c0_i32_1 : i32, i32, i32
  }
  func.func @transform_18(%arg0: i32) -> (i32, i32, i32) {
    %c0_i32 = arith.constant 0 : i32
    %c0_i32_0 = arith.constant 0 : i32
    %c0_i32_1 = arith.constant 0 : i32
    %c0_i32_2 = arith.constant 0 : i32
    return %c0_i32, %c0_i32_0, %c0_i32_1 : i32, i32, i32
  }
  func.func @transform_19(%arg0: i32) -> (i32, i32, i32) {
    %c0_i32 = arith.constant 0 : i32
    %c0_i32_0 = arith.constant 0 : i32
    %c0_i32_1 = arith.constant 0 : i32
    %c0_i32_2 = arith.constant 0 : i32
    return %c0_i32, %c0_i32_0, %c0_i32_1 : i32, i32, i32
  }
  func.func @transform_20(%arg0: i32) -> (i32, i32, i32) {
    %c0_i32 = arith.constant 0 : i32
    %c0_i32_0 = arith.constant 0 : i32
    %c0_i32_1 = arith.constant 0 : i32
    %c0_i32_2 = arith.constant 0 : i32
    return %c0_i32, %c0_i32_0, %c0_i32_1 : i32, i32, i32
  }
  func.func @transform_21(%arg0: i32) -> (i32, i32, i32) {
    %c0_i32 = arith.constant 0 : i32
    %c0_i32_0 = arith.constant 0 : i32
    %c0_i32_1 = arith.constant 0 : i32
    %c0_i32_2 = arith.constant 0 : i32
    return %c0_i32, %c0_i32_0, %c0_i32_1 : i32, i32, i32
  }
  func.func @transform_22(%arg0: i32) -> (i32, i32, i32) {
    %c0_i32 = arith.constant 0 : i32
    %c0_i32_0 = arith.constant 0 : i32
    %c0_i32_1 = arith.constant 0 : i32
    %c0_i32_2 = arith.constant 0 : i32
    return %c0_i32, %c0_i32_0, %c0_i32_1 : i32, i32, i32
  }
  func.func @transform_23(%arg0: i32) -> (i32, i32, i32) {
    %c0_i32 = arith.constant 0 : i32
    %c0_i32_0 = arith.constant 0 : i32
    %c0_i32_1 = arith.constant 0 : i32
    %c0_i32_2 = arith.constant 0 : i32
    return %c0_i32, %c0_i32_0, %c0_i32_1 : i32, i32, i32
  }
  func.func @transform_24(%arg0: i32) -> (i32, i32, i32) {
    %c0_i32 = arith.constant 0 : i32
    %c0_i32_0 = arith.constant 0 : i32
    %c0_i32_1 = arith.constant 0 : i32
    %c0_i32_2 = arith.constant 0 : i32
    return %c0_i32, %c0_i32_0, %c0_i32_1 : i32, i32, i32
  }
  func.func @transform_25(%arg0: i32) -> (i32, i32, i32) {
    %c0_i32 = arith.constant 0 : i32
    %c0_i32_0 = arith.constant 0 : i32
    %c0_i32_1 = arith.constant 0 : i32
    %c0_i32_2 = arith.constant 0 : i32
    return %c0_i32, %c0_i32_0, %c0_i32_1 : i32, i32, i32
  }
  func.func @transform_26(%arg0: i32) -> (i32, i32, i32) {
    %c0_i32 = arith.constant 0 : i32
    %c0_i32_0 = arith.constant 0 : i32
    %c0_i32_1 = arith.constant 0 : i32
    %c0_i32_2 = arith.constant 0 : i32
    return %c0_i32, %c0_i32_0, %c0_i32_1 : i32, i32, i32
  }
  func.func @transform_27(%arg0: i32) -> (i32, i32, i32) {
    %c0_i32 = arith.constant 0 : i32
    %c0_i32_0 = arith.constant 0 : i32
    %c0_i32_1 = arith.constant 0 : i32
    %c0_i32_2 = arith.constant 0 : i32
    return %c0_i32, %c0_i32_0, %c0_i32_1 : i32, i32, i32
  }
  func.func @transform_28(%arg0: i32) -> (i32, i32) {
    %c0_i32 = arith.constant 0 : i32
    %c0_i32_0 = arith.constant 0 : i32
    %c0_i32_1 = arith.constant 0 : i32
    return %c0_i32, %c0_i32_0 : i32, i32
  }
  func.func @transform_29(%arg0: i32) -> (i32, i32) {
    %c0_i32 = arith.constant 0 : i32
    %c0_i32_0 = arith.constant 0 : i32
    %c0_i32_1 = arith.constant 0 : i32
    return %c0_i32, %c0_i32_0 : i32, i32
  }
  func.func @transform_30(%arg0: i32) -> (i32, i32) {
    %c0_i32 = arith.constant 0 : i32
    %c0_i32_0 = arith.constant 0 : i32
    %c0_i32_1 = arith.constant 0 : i32
    return %c0_i32, %c0_i32_0 : i32, i32
  }
  func.func @transform_31(%arg0: i32) -> (i32, i32) {
    %c0_i32 = arith.constant 0 : i32
    %c0_i32_0 = arith.constant 0 : i32
    %c0_i32_1 = arith.constant 0 : i32
    return %c0_i32, %c0_i32_0 : i32, i32
  }
  func.func @transform_32(%arg0: i32) -> (i32, i32) {
    %c0_i32 = arith.constant 0 : i32
    %c0_i32_0 = arith.constant 0 : i32
    %c0_i32_1 = arith.constant 0 : i32
    return %c0_i32, %c0_i32_0 : i32, i32
  }
  func.func @transform_33(%arg0: i32) -> (i32, i32) {
    %c0_i32 = arith.constant 0 : i32
    %c0_i32_0 = arith.constant 0 : i32
    %c0_i32_1 = arith.constant 0 : i32
    return %c0_i32, %c0_i32_0 : i32, i32
  }
  func.func @transform_34(%arg0: i32) -> (i32, i32) {
    %c0_i32 = arith.constant 0 : i32
    %c0_i32_0 = arith.constant 0 : i32
    %c0_i32_1 = arith.constant 0 : i32
    return %c0_i32, %c0_i32_0 : i32, i32
  }
  func.func @transform_35(%arg0: i32) -> (i32, i32) {
    %c0_i32 = arith.constant 0 : i32
    %c0_i32_0 = arith.constant 0 : i32
    %c0_i32_1 = arith.constant 0 : i32
    return %c0_i32, %c0_i32_0 : i32, i32
  }
  func.func @transform_36(%arg0: i32) -> (i32, i32) {
    %c0_i32 = arith.constant 0 : i32
    %c0_i32_0 = arith.constant 0 : i32
    %c0_i32_1 = arith.constant 0 : i32
    return %c0_i32, %c0_i32_0 : i32, i32
  }
  func.func @transform_37(%arg0: i32) -> (i32, i32) {
    %c0_i32 = arith.constant 0 : i32
    %c0_i32_0 = arith.constant 0 : i32
    %c0_i32_1 = arith.constant 0 : i32
    return %c0_i32, %c0_i32_0 : i32, i32
  }
  func.func @transform_38(%arg0: i32) -> (i32, i32) {
    %c0_i32 = arith.constant 0 : i32
    %c0_i32_0 = arith.constant 0 : i32
    %c0_i32_1 = arith.constant 0 : i32
    return %c0_i32, %c0_i32_0 : i32, i32
  }
  func.func @transform_39(%arg0: i32) -> (i32, i32) {
    %c0_i32 = arith.constant 0 : i32
    %c0_i32_0 = arith.constant 0 : i32
    %c0_i32_1 = arith.constant 0 : i32
    return %c0_i32, %c0_i32_0 : i32, i32
  }
  func.func @transform_40(%arg0: i32) -> (i32, i32) {
    %c0_i32 = arith.constant 0 : i32
    %c0_i32_0 = arith.constant 0 : i32
    %c0_i32_1 = arith.constant 0 : i32
    return %c0_i32, %c0_i32_0 : i32, i32
  }
  func.func @transform_41(%arg0: i32) -> (i32, i32) {
    %c0_i32 = arith.constant 0 : i32
    %c0_i32_0 = arith.constant 0 : i32
    %c0_i32_1 = arith.constant 0 : i32
    return %c0_i32, %c0_i32_0 : i32, i32
  }
  func.func @transform_42(%arg0: i32) -> (i32, i32) {
    %c0_i32 = arith.constant 0 : i32
    %c0_i32_0 = arith.constant 0 : i32
    %c0_i32_1 = arith.constant 0 : i32
    return %c0_i32, %c0_i32_0 : i32, i32
  }
  func.func @transform_43(%arg0: i32) -> (i32, i32) {
    %c0_i32 = arith.constant 0 : i32
    %c0_i32_0 = arith.constant 0 : i32
    %c0_i32_1 = arith.constant 0 : i32
    return %c0_i32, %c0_i32_0 : i32, i32
  }
  func.func @transform_44(%arg0: i32) -> (i32, i32) {
    %c0_i32 = arith.constant 0 : i32
    %c0_i32_0 = arith.constant 0 : i32
    %c0_i32_1 = arith.constant 0 : i32
    return %c0_i32, %c0_i32_0 : i32, i32
  }
  func.func @transform_45(%arg0: i32) -> (i32, i32) {
    %c0_i32 = arith.constant 0 : i32
    %c0_i32_0 = arith.constant 0 : i32
    %c0_i32_1 = arith.constant 0 : i32
    return %c0_i32, %c0_i32_0 : i32, i32
  }
  func.func @transform_46(%arg0: i32) -> (i32, i32, i32) {
    %c0_i32 = arith.constant 0 : i32
    %c0_i32_0 = arith.constant 0 : i32
    %c0_i32_1 = arith.constant 0 : i32
    return %arg0, %c0_i32, %c0_i32_0 : i32, i32, i32
  }
}

</mosaic_0001>

<bundles_post_ra>
// kernel: model_forward.1
= control target key start
LH: loop header
LB: loop body
LE: loop exit
PB: predicated region body
PF: predicated region fallthrough
CT: control target
= control target key end

     0   :  { %s14765_s6 = smov 1   ;;  %s14766_s10 = smov 2   ;;  %s16566_s0 = inlined_call_operand.smem [shape: u32[47], index: -1, kind: input, shape index: {}] }
   0x1   :  { %s14874_s5 = sld [smem:[%s16566_s0]]   ;;  %s14767_s14 = smov 3  }
   0x2   :  { %s14879_s9 = sld [smem:[%s16566_s0 + %s14765_s6]]   ;;  %s14768_s18 = smov 4  }
   0x3   :  { %s14884_s13 = sld [smem:[%s16566_s0 + %s14766_s10]]   ;;  %s14769_s22 = smov 5  }
   0x4   :  { %s14889_s17 = sld [smem:[%s16566_s0 + %s14767_s14]]   ;;  %s14770_s26 = smov 6  }
   0x5   :  { %s14894_s21 = sld [smem:[%s16566_s0 + %s14768_s18]]   ;;  %s14771_s30 = smov 7  }
   0x6   :  { %s14899_s25 = sld [smem:[%s16566_s0 + %s14769_s22]]   ;;  %s14772_s4 = smov 8  }
   0x7   :  { %16635 = sst [smem:[#allocation80_spill]] %s14874_s5  ;;  %s14773_s10 = smov 9  }
   0x8   :  { %16636 = sst [smem:[#allocation81_spill]] %s14879_s9  ;;  %s14774_s15 = smov 10  }
   0x9   :  { %16637 = sst [smem:[#allocation82_spill]] %s14884_s13  ;;  %s14775_s20 = smov 11  }
   0xa   :  { %16638 = sst [smem:[#allocation83_spill]] %s14889_s17  ;;  %s14777_s1 = smov 13  }
   0xb   :  { %16639 = sst [smem:[#allocation84_spill]] %s14894_s21  ;;  %s14778_s7 = smov 14  }
   0xc   :  { %s14904_s29 = sld [smem:[%s16566_s0 + %s14770_s26]]   ;;  %s14776_s26 = smov 12  }
   0xd   :  { %s14909_s3 = sld [smem:[%s16566_s0 + %s14771_s30]]   ;;  %s14780_s22 = smov 16  }
   0xe   :  { %s14914_s8 = sld [smem:[%s16566_s0 + %s14772_s4]]   ;;  %s14781_s28 = smov 17  }
   0xf   :  { %s14919_s14 = sld [smem:[%s16566_s0 + %s14773_s10]]  }
  0x10   :  { %s14924_s19 = sld [smem:[%s16566_s0 + %s14774_s15]]   ;;  %s14779_s15 = smov 15  }
  0x11   :  { %s14929_s24 = sld [smem:[%s16566_s0 + %s14775_s20]]  }
  0x12   :  { %16640 = sst [smem:[#allocation85_spill]] %s14904_s29 }
  0x13   :  { %16641 = sst [smem:[#allocation86_spill]] %s14909_s3 }
  0x14   :  { %16642 = sst [smem:[#allocation87_spill]] %s14914_s8 }
  0x15   :  { %16643 = sst [smem:[#allocation88_spill]] %s14919_s14 }
  0x16   :  { %16644 = sst [smem:[#allocation89_spill]] %s14924_s19 }
  0x17   :  { %16645 = sst [smem:[#allocation90_spill]] %s14929_s24 }
  0x18   :  { %s14934_s30 = sld [smem:[%s16566_s0 + %s14776_s26]]  }
  0x19   :  { %s14939_s6 = sld [smem:[%s16566_s0 + %s14777_s1]]  }
  0x1a   :  { %s14944_s12 = sld [smem:[%s16566_s0 + %s14778_s7]]   ;;  %s14782_s7 = smov 18  }
  0x1b   :  { %s14949_s20 = sld [smem:[%s16566_s0 + %s14779_s15]]   ;;  %s14783_s15 = smov 19  }
  0x1c   :  { %s14954_s27 = sld [smem:[%s16566_s0 + %s14780_s22]]   ;;  %s14784_s22 = smov 20  }
  0x1d   :  { %s14959_s4 = sld [smem:[%s16566_s0 + %s14781_s28]]   ;;  %s14785_s28 = smov 21  }
  0x1e   :  { %s14964_s24 = sld [smem:[%s16566_s0 + %s14782_s7]]   ;;  %s14786_s7 = smov 22  }
  0x1f   :  { %16646 = sst [smem:[#allocation91_spill]] %s14939_s6 }
  0x20   :  { %16647 = sst [smem:[#allocation92_spill]] %s14944_s12 }
  0x21   :  { %16648 = sst [smem:[#allocation93_spill]] %s14949_s20 }
  0x22   :  { %16649 = sst [smem:[#allocation94_spill]] %s14954_s27 }
  0x23   :  { %16650 = sst [smem:[#allocation95_spill]] %s14959_s4 }
  0x24   :  { %16651 = sst [smem:[#allocation96_spill]] %s14964_s24 }
  0x25   :  { %s14969_s9 = sld [smem:[%s16566_s0 + %s14783_s15]]   ;;  %s14787_s15 = smov 23  }
  0x26   :  { %s14974_s27 = sld [smem:[%s16566_s0 + %s14784_s22]]   ;;  %s14788_s22 = smov 24  }
  0x27   :  { %s14979_s5 = sld [smem:[%s16566_s0 + %s14785_s28]]   ;;  %s14789_s28 = smov 25  }
  0x28   :  { %s14984_s24 = sld [smem:[%s16566_s0 + %s14786_s7]]   ;;  %s14790_s7 = smov 26  }
  0x29   :  { %s14989_s20 = sld [smem:[%s16566_s0 + %s14787_s15]]   ;;  %s14791_s15 = smov 27  }
  0x2a   :  { %s14999_s6 = sld [smem:[%s16566_s0 + %s14789_s28]]   ;;  %s14793_s28 = smov 29  }
  0x2b   :  { %16652 = sst [smem:[#allocation97_spill]] %s14969_s9 }
  0x2c   :  { %16653 = sst [smem:[#allocation98_spill]] %s14974_s27 }
  0x2d   :  { %16654 = sst [smem:[#allocation99_spill]] %s14979_s5 }
  0x2e   :  { %16655 = sst [smem:[#allocation100_spill]] %s14984_s24 }
  0x2f   :  { %16656 = sst [smem:[#allocation101_spill]] %s14989_s20 }
  0x30   :  { %s14994_s27 = sld [smem:[%s16566_s0 + %s14788_s22]]   ;;  %s14792_s22 = smov 28  }
  0x31   :  { %16658 = sst [smem:[#allocation103_spill]] %s14999_s6 }
  0x32   :  { %s15004_s24 = sld [smem:[%s16566_s0 + %s14790_s7]]   ;;  %s14794_s7 = smov 30  }
  0x33   :  { %s15009_s20 = sld [smem:[%s16566_s0 + %s14791_s15]]   ;;  %s14795_s15 = smov 31  }
  0x34   :  { %s15019_s19 = sld [smem:[%s16566_s0 + %s14793_s28]]   ;;  %s14797_s28 = smov 33  }
  0x35   :  { %s15029_s8 = sld [smem:[%s16566_s0 + %s14795_s15]]   ;;  %s14799_s15 = smov 35  }
  0x36   :  { %16657 = sst [smem:[#allocation102_spill]] %s14994_s27 }
  0x37   :  { %s15014_s27 = sld [smem:[%s16566_s0 + %s14792_s22]]   ;;  %s14796_s22 = smov 32  }
  0x38   :  { %16659 = sst [smem:[#allocation104_spill]] %s15004_s24 }
  0x39   :  { %s15024_s24 = sld [smem:[%s16566_s0 + %s14794_s7]]   ;;  %s14798_s7 = smov 34  }
  0x3a   :  { %16661 = sst [smem:[#allocation106_spill]] %s15019_s19 }
  0x3b   :  { %16663 = sst [smem:[#allocation108_spill]] %s15029_s8 }
  0x3c   :  { %s15039_s29 = sld [smem:[%s16566_s0 + %s14797_s28]]   ;;  %s14801_s28 = smov 37  }
  0x3d   :  { %16660 = sst [smem:[#allocation105_spill]] %s15014_s27 }
  0x3e   :  { %s15034_s27 = sld [smem:[%s16566_s0 + %s14796_s22]]   ;;  %s14800_s22 = smov 36  }
  0x3f   :  { %16662 = sst [smem:[#allocation107_spill]] %s15024_s24 }
  0x40   :  { %s15044_s24 = sld [smem:[%s16566_s0 + %s14798_s7]]   ;;  %s14802_s7 = smov 38  }
  0x41   :  { %s15049_s8 = sld [smem:[%s16566_s0 + %s14799_s15]]   ;;  %s14803_s15 = smov 39  }
  0x42   :  { %16664 = sst [smem:[#allocation109_spill]] %s15039_s29 }
  0x43   :  { %s15054_s21 = sld [smem:[%s16566_s0 + %s14800_s22]]   ;;  %s14804_s22 = smov 40  }
  0x44   :  { %s15059_s29 = sld [smem:[%s16566_s0 + %s14801_s28]]   ;;  %s14805_s28 = smov 41  }
  0x45   :  { %s15064_s13 = sld [smem:[%s16566_s0 + %s14802_s7]]   ;;  %s14806_s7 = smov 42  }
  0x47   :  { %16665 = sst [smem:[#allocation110_spill]] %s15049_s8 }
  0x48   :  { %s15069_s8 = sld [smem:[%s16566_s0 + %s14803_s15]]   ;;  %s14807_s15 = smov 43  }
  0x49   :  { %16666 = sst [smem:[#allocation111_spill]] %s15054_s21 }
  0x4a   :  { %16667 = sst [smem:[#allocation112_spill]] %s15059_s29 }
  0x4b   :  { %16668 = sst [smem:[#allocation113_spill]] %s15064_s13 }
  0x4c   :  { %s15074_s21 = sld [smem:[%s16566_s0 + %s14804_s22]]   ;;  %s14808_s22 = smov 44  }
  0x4d   :  { %s15079_s29 = sld [smem:[%s16566_s0 + %s14805_s28]]   ;;  %s14809_s28 = smov 45  }
  0x4e   :  { %16669 = sst [smem:[#allocation114_spill]] %s15069_s8 }
  0x4f   :  { %s15084_s13 = sld [smem:[%s16566_s0 + %s14806_s7]]   ;;  %s14810_s7 = smov 46  }
  0x50   :  { %s15089_s8 = sld [smem:[%s16566_s0 + %s14807_s15]]  }
  0x52   :  { %16670 = sst [smem:[#allocation115_spill]] %s15074_s21 }
  0x53   :  { %16671 = sst [smem:[#allocation116_spill]] %s15079_s29 }
  0x54   :  { %s15094_s21 = sld [smem:[%s16566_s0 + %s14808_s22]]  }
  0x55   :  { %16672 = sst [smem:[#allocation117_spill]] %s15084_s13 }
  0x56   :  { %16673 = sst [smem:[#allocation118_spill]] %s15089_s8 }
  0x57   :  { %s15099_s29 = sld [smem:[%s16566_s0 + %s14809_s28]]  }
  0x58   :  { %s15104_s13 = sld [smem:[%s16566_s0 + %s14810_s7]]  }
  0x59   :  { %98 = vsyncpa [#allocation3], 0 }
  0x5a   :  { %99 = vsyncpa [#allocation6], 0 }
  0x5b   :  { %100 = vsyncpa [#allocation9], 0 }
  0x5c   :  { %101 = vsyncpa [#allocation12], 0 }
  0x5d   :  { %102 = vsyncpa [#allocation15], 0 }
  0x5e   :  { %103 = vsyncpa [#allocation18], 0 }
  0x5f   :  { %104 = vsyncpa [#allocation21], 0 }
  0x60   :  { %105 = vsyncpa [#allocation24], 0 }
  0x61   :  { %106 = vsyncpa [#allocation27], 0 }
  0x62   :  { %107 = vsyncpa [#allocation30], 0 }
  0x63   :  { %108 = vsyncpa [#allocation33], 0 }
  0x64   :  { %109 = vsyncpa [#allocation36], 0 }
  0x65   :  { %110 = vsyncpa [#allocation39], 0 }
  0x66   :  { %111 = vsyncpa [#allocation42], 0 }
  0x67   :  { %112 = vsyncpa [#allocation45], 0 }
  0x68   :  { %113 = vsyncpa [#allocation48], 0 }
  0x69   :  { %114 = vsyncpa [#allocation51], 0 }
  0x6a   :  { %115 = vsyncpa [#allocation54], 0 }
  0x6b   :  { %116 = vsyncpa [#allocation57], 0 }
  0x6c   :  { %117 = vsyncpa [#allocation4], 0 }
  0x6d   :  { %119 = vsyncpa [#allocation4 + $0x1], 0  ;;  %s15106_s0 = smov 0   ;;  %s15108_s15 = smov 0  }
  0x6e   :  { %s15110_s16 = smov 0   ;;  %s15112_s18 = smov 0  }
  0x6f LB: > { %s16674_s19 = sld [smem:[#allocation106_spill]]  ;;  %s16675_s17 = sld [smem:[#allocation83_spill]]  ;;  %s14755_s15 = sphi %s15108_s15, %s16732_s15   ;;  %s14751_s0 = sphi %s15106_s0, %s16731_s0   ;;  %s14763_s18 = sphi %s15112_s18, %s16728_s18   ;;  %s14759_s16 = sphi %s15110_s16, %s16733_s16  }
  0x70   : > { %s16676_s12 = sld [smem:[#allocation92_spill]]  ;;  %s16677_s8 = sld [smem:[#allocation118_spill]] }
  0x71   : > { %s16678_s9 = sld [smem:[#allocation97_spill]]  ;;  %s16679_s6 = sld [smem:[#allocation103_spill]] }
  0x72   : > { %s16680_s5 = sld [smem:[#allocation99_spill]]  ;;  %s16681_s4 = sld [smem:[#allocation95_spill]] }
  0x73   : > { %s16682_s14 = sld [smem:[#allocation88_spill]]  ;;  %s16683_s3 = sld [smem:[#allocation86_spill]] }
  0x74   : > { %16684 = sst [smem:[#allocation119_spill]] %s14759_s16  ;;  %s15127_s22 = sadd.s32 4294967295, %s14763_s18  }
  0x75   : > { %s9856_s23 = sadd.s32 4294967294, %s14763_s18   ;;  %s15131_s26 = sadd.s32 1, %s14763_s18  }
  0x76   : > { %16685 = sst [smem:[#allocation120_spill]] %s15131_s26  ;;  %s1108_s28 = sadd.s32 1, %s14759_s16 }
  0x77   : > { %s1105_s1 = ssub.s32 %s14763_s18, %s15131_s26  ;;  %p1118_p0 = scmp.ne.s32.totalorder %s14759_s16, %s14755_s15 }
  0x78   : > { %p1106_p1 = scmp.eq.s32.totalorder %s1105_s1, 0  ;;  %p1119_p2 = scmp.eq.s32.totalorder %s15127_s22, 1 }
  0x79   : > { %p1124_p3 = scmp.ne.s32.totalorder %s14755_s15, %s14751_s0  ;;  %p1125_p4 = scmp.eq.s32.totalorder %s9856_s23, 1 }
  0x7a   : > { %s15142_s2 = scalar_select %p1106_p1, %s14759_s16, %s1108_s28  }
  0x7b   : > { %p15144_p5 = por %p1119_p2, %p1118_p0  ;;  %p15148_p6 = por %p1125_p4, %p1124_p3 }
  0x7c   : > { %16686 = sst [smem:[#allocation121_spill]] %s15142_s2  ;;  %p9857_p7 = scmp.ge.s32.totalorder %s14763_s18, 1 }
  0x7d   : > { %s16687_s7 = scalar_select %p15144_p5, 1, 0 }
  0x7e   : > { %s16688_s10 = scalar_select %p15148_p6, 1, 0 }
  0x7f   : > { %p1132_p8 = scmp.lt.s32.totalorder %s14763_s18, 3 }
  0x80   : > { %16689 = sst [smem:[#allocation122_spill]] %s16688_s10 }
  0x81   : > { %p15154_p9 = pnand %p9857_p7, %p1132_p8 }
  0x82   : > { %p13406_p10 = scmp.eq.s32.totalorder (!%p15154_p9), %s15127_s22, 0  ;;  %s14811_s23 = smov (!%p15154_p9), [#allocation5]  }
  0x83   : > { %1136 = sbr.rel (%p15154_p9) target bundleno = 1029 (0x405), region = 12  ;;  %s1158_s28 = sshll.u32 (!%p15154_p9), %s14811_s23, 4  ;;  %s1159_s28 = int_to_ptr.vmem [resolvable:$true] %s1158_s28 }
  0x84   : > { %s14812_s1 = smov (!%p15154_p9), [#allocation8]   ;;  %s13663_s16 = scalar_lea.hbm (!%p15154_p9), %s16675_s17, 48 }
  0x85   : > { %s1182_s2 = sshll.u32 (!%p15154_p9), %s14812_s1, 4  ;;  %p13664_p11 = scmp.ne.s32.totalorder (!%p15154_p9), %s16675_s17, %s13663_s16  ;;  %s1183_s2 = int_to_ptr.vmem [resolvable:$true] %s1182_s2 }
  0x86   : > { %p13669_p0 = scmp.lt.u32.totalorder (!%p15154_p9), %s13663_s16, %s16675_s17 }
  0x87   : > { %p13665_p12 = pnand (!%p15154_p9), %p13664_p11, %p13406_p10 }
  0x89   : > { %p13666_p13 = pneg (!%p15154_p9), %p13665_p12 }
  0x8b   : > { %p13671_p1 = pnand %p13669_p0, %p13666_p13 }
  0x8d   : > { %13674 = shalt.err (!%p13671_p1)
}
  0x8e   : > { %s13675_s26 = scalar_lea.vmem %s1159_s28, 48  ;;  %s13681_s10 = scalar_lea.vmem %s1159_s28, 64 }
  0x8f   : > { %p13676_p2 = scmp.ne.s32.totalorder %s1159_s28, %s13675_s26  ;;  %p13682_p7 = scmp.lt.s32.totalorder %s1159_s28, %s1159_s28 }
  0x90   : > { %p13683_p8 = scmp.lt.s32.totalorder %s13681_s10, %s13675_s26 }
  0x91   : > { %p13677_p3 = pnand %p13676_p2, %p13406_p10 }
  0x92   : > { %p13684_p6 = por %p13683_p8, %p13682_p7 }
  0x93   : > { %p13678_p4 = pneg %p13677_p3 }
  0x95   : > { %p13685_p5 = pnand %p13684_p6, %p13678_p4 }
  0x97   : > { %13688 = shalt.err (!%p13685_p5)
}
  0x98   : > { %13255 = dma.hbm_to_vmem [thread:$0]  (%p13406_p10), %s16675_s17, 48, %s1159_s28, [#allocation6]  }
  0x99   : > { %s13689_s16 = scalar_lea.hbm %s14899_s25, 16 }
  0x9a   : > { %p13690_p11 = scmp.ne.s32.totalorder %s14899_s25, %s13689_s16  ;;  %p13695_p0 = scmp.lt.u32.totalorder %s13689_s16, %s14899_s25 }
  0x9c   : > { %p13691_p12 = pnand %p13690_p11, %p13406_p10 }
  0x9e   : > { %p13692_p13 = pneg %p13691_p12 }
  0xa0   : > { %p13697_p1 = pnand %p13695_p0, %p13692_p13 }
  0xa2   : > { %13700 = shalt.err (!%p13697_p1)
}
  0xa3   : > { %s13701_s26 = scalar_lea.vmem %s1183_s2, 16  ;;  %s13707_s10 = scalar_lea.vmem %s1183_s2, 32 }
  0xa4   : > { %p13702_p5 = scmp.ne.s32.totalorder %s1183_s2, %s13701_s26  ;;  %p13708_p3 = scmp.lt.s32.totalorder %s1183_s2, %s1183_s2 }
  0xa5   : > { %p13709_p4 = scmp.lt.s32.totalorder %s13707_s10, %s13701_s26 }
  0xa6   : > { %p13703_p6 = pnand %p13702_p5, %p13406_p10 }
  0xa7   : > { %p13710_p7 = por %p13709_p4, %p13708_p3 }
  0xa8   : > { %p13704_p2 = pneg %p13703_p6 }
  0xaa   : > { %p13711_p8 = pnand %p13710_p7, %p13704_p2 }
  0xac   : > { %13714 = shalt.err (!%p13711_p8)
}
  0xad   : > { %13259 = dma.hbm_to_vmem [thread:$0]  (%p13406_p10), %s14899_s25, 16, %s1183_s2, [#allocation9]  }
  0xae   : > { %s14813_s23 = smov [#allocation11]   ;;  %s13715_s1 = scalar_lea.hbm %s16683_s3, 128 }
  0xaf   : > { %s1206_s28 = sshll.u32 %s14813_s23, 4  ;;  %p13716_p11 = scmp.ne.s32.totalorder %s16683_s3, %s13715_s1  ;;  %s1207_s28 = int_to_ptr.vmem [resolvable:$true] %s1206_s28 }
  0xb0   : > { %p13721_p0 = scmp.lt.u32.totalorder %s13715_s1, %s16683_s3 }
  0xb1   : > { %p13717_p12 = pnand %p13716_p11, %p13406_p10 }
  0xb3   : > { %p13718_p13 = pneg %p13717_p12 }
  0xb5   : > { %p13723_p1 = pnand %p13721_p0, %p13718_p13 }
  0xb7   : > { %13726 = shalt.err (!%p13723_p1)
}
  0xb8   : > { %s13727_s16 = scalar_lea.vmem %s1207_s28, 128  ;;  %p13734_p3 = scmp.lt.s32.totalorder %s1207_s28, %s1207_s28 }
  0xb9   : > { %p13728_p5 = scmp.ne.s32.totalorder %s1207_s28, %s13727_s16  ;;  %p13735_p4 = scmp.lt.s32.totalorder %s13727_s16, %s13727_s16 }
  0xbb   : > { %p13729_p6 = pnand %p13728_p5, %p13406_p10  ;;  %p13736_p7 = por %p13735_p4, %p13734_p3 }
  0xbd   : > { %p13730_p2 = pneg %p13729_p6 }
  0xbf   : > { %p13737_p8 = pnand %p13736_p7, %p13730_p2 }
  0xc1   : > { %13740 = shalt.err (!%p13737_p8)
}
  0xc2   : > { %13263 = dma.hbm_to_vmem [thread:$0]  (%p13406_p10), %s16683_s3, 128, %s1207_s28, [#allocation12]  }
  0xc3   : > { %s14814_s2 = smov [#allocation14]   ;;  %s14815_s10 = smov [#allocation17]  }
  0xc4   : > { %s1229_s26 = sshll.u32 %s14814_s2, 4  ;;  %s1258_s23 = sshll.u32 %s14815_s10, 4  ;;  %s1230_s26 = int_to_ptr.vmem [resolvable:$true] %s1229_s26  ;;  %s15191_s23 = int_to_ptr.vmem [resolvable:$true] %s1258_s23 }
  0xc5   : > { %s13741_s1 = scalar_lea.hbm %s16682_s14, 6144 }
  0xc6   : > { %p13742_p11 = scmp.ne.s32.totalorder %s16682_s14, %s13741_s1  ;;  %p13747_p0 = scmp.lt.u32.totalorder %s13741_s1, %s16682_s14 }
  0xc8   : > { %p13743_p12 = pnand %p13742_p11, %p13406_p10 }
  0xca   : > { %p13744_p13 = pneg %p13743_p12 }
  0xcc   : > { %p13749_p1 = pnand %p13747_p0, %p13744_p13 }
  0xce   : > { %13752 = shalt.err (!%p13749_p1)
}
  0xcf   : > { %s13753_s16 = scalar_lea.vmem %s1230_s26, 6144  ;;  %p13760_p3 = scmp.lt.s32.totalorder %s1230_s26, %s1230_s26 }
  0xd0   : > { %p13754_p5 = scmp.ne.s32.totalorder %s1230_s26, %s13753_s16  ;;  %p13761_p4 = scmp.lt.s32.totalorder %s13753_s16, %s13753_s16 }
  0xd2   : > { %p13755_p6 = pnand %p13754_p5, %p13406_p10  ;;  %p13762_p7 = por %p13761_p4, %p13760_p3 }
  0xd4   : > { %p13756_p2 = pneg %p13755_p6 }
  0xd6   : > { %p13763_p8 = pnand %p13762_p7, %p13756_p2 }
  0xd8   : > { %13766 = shalt.err (!%p13763_p8)
}
  0xd9   : > { %s16601_s28 = smov 128   ;;  %s16603_s2 = smov 8  }
  0xda   : > { %13267 = dma.hbm_to_vmem [thread:$0]  (%p13406_p10), %s16682_s14, 6144, %s1230_s26, [#allocation15], %s16601_s28, %s16601_s28, %s16603_s2  }
  0xdb   : > { %s13767_s10 = scalar_lea.hbm %s14934_s30, 2048 }
  0xdc   : > { %p13768_p11 = scmp.ne.s32.totalorder %s14934_s30, %s13767_s10  ;;  %p13773_p0 = scmp.lt.u32.totalorder %s13767_s10, %s14934_s30 }
  0xde   : > { %p13769_p12 = pnand %p13768_p11, %p13406_p10 }
  0xe0   : > { %p13770_p13 = pneg %p13769_p12 }
  0xe2   : > { %p13775_p1 = pnand %p13773_p0, %p13770_p13 }
  0xe4   : > { %13778 = shalt.err (!%p13775_p1)
}
  0xe5   : > { %s13779_s1 = scalar_lea.vmem %s15191_s23, 2048  ;;  %p13786_p3 = scmp.lt.s32.totalorder %s15191_s23, %s15191_s23 }
  0xe6   : > { %p13780_p5 = scmp.ne.s32.totalorder %s15191_s23, %s13779_s1  ;;  %p13787_p4 = scmp.lt.s32.totalorder %s13779_s1, %s13779_s1 }
  0xe8   : > { %p13781_p6 = pnand %p13780_p5, %p13406_p10  ;;  %p13788_p7 = por %p13787_p4, %p13786_p3 }
  0xea   : > { %p13782_p2 = pneg %p13781_p6 }
  0xec   : > { %p13789_p8 = pnand %p13788_p7, %p13782_p2 }
  0xee   : > { %13792 = shalt.err (!%p13789_p8)
}
  0xef   : > { %13271 = dma.hbm_to_vmem [thread:$0]  (%p13406_p10), %s14934_s30, 2048, %s15191_s23, [#allocation18], %s16601_s28, %s16601_s28, %s16603_s2  }
  0xf0   : > { %s14818_s26 = smov [#allocation20]   ;;  %s14819_s10 = smov [#allocation23]  }
  0xf1   : > { %s1283_s16 = sshll.u32 %s14818_s26, 4  ;;  %s1307_s3 = sshll.u32 %s14819_s10, 4  ;;  %s1284_s16 = int_to_ptr.vmem [resolvable:$true] %s1283_s16  ;;  %s15224_s3 = int_to_ptr.vmem [resolvable:$true] %s1307_s3 }
  0xf2   : > { %s13793_s1 = scalar_lea.hbm %s16676_s12, 16 }
  0xf3   : > { %p13794_p11 = scmp.ne.s32.totalorder %s16676_s12, %s13793_s1  ;;  %p13799_p0 = scmp.lt.u32.totalorder %s13793_s1, %s16676_s12 }
  0xf5   : > { %p13795_p12 = pnand %p13794_p11, %p13406_p10 }
  0xf7   : > { %p13796_p13 = pneg %p13795_p12 }
  0xf9   : > { %p13801_p1 = pnand %p13799_p0, %p13796_p13 }
  0xfb   : > { %13804 = shalt.err (!%p13801_p1)
}
  0xfc   : > { %s13805_s14 = scalar_lea.vmem %s1284_s16, 16  ;;  %s13811_s23 = scalar_lea.vmem %s1284_s16, 32 }
  0xfd   : > { %p13806_p5 = scmp.ne.s32.totalorder %s1284_s16, %s13805_s14  ;;  %p13812_p3 = scmp.lt.s32.totalorder %s1284_s16, %s1284_s16 }
  0xfe   : > { %p13813_p4 = scmp.lt.s32.totalorder %s13811_s23, %s13805_s14 }
  0xff   : > { %p13807_p6 = pnand %p13806_p5, %p13406_p10 }
 0x100   : > { %p13814_p7 = por %p13813_p4, %p13812_p3 }
 0x101   : > { %p13808_p2 = pneg %p13807_p6 }
 0x103   : > { %p13815_p8 = pnand %p13814_p7, %p13808_p2 }
 0x105   : > { %13818 = shalt.err (!%p13815_p8)
}
 0x106   : > { %13275 = dma.hbm_to_vmem [thread:$0]  (%p13406_p10), %s16676_s12, 16, %s1284_s16, [#allocation21]  }
 0x107   : > { %s13819_s26 = scalar_lea.hbm %s16681_s4, 96 }
 0x108   : > { %p13820_p11 = scmp.ne.s32.totalorder %s16681_s4, %s13819_s26  ;;  %p13825_p0 = scmp.lt.u32.totalorder %s13819_s26, %s16681_s4 }
 0x10a   : > { %p13821_p12 = pnand %p13820_p11, %p13406_p10 }
 0x10c   : > { %p13822_p13 = pneg %p13821_p12 }
 0x10e   : > { %p13827_p1 = pnand %p13825_p0, %p13822_p13 }
 0x110   : > { %13830 = shalt.err (!%p13827_p1)
}
 0x111   : > { %s13831_s14 = scalar_lea.vmem %s15224_s3, 96  ;;  %p13838_p3 = scmp.lt.s32.totalorder %s15224_s3, %s15224_s3 }
 0x112   : > { %p13832_p5 = scmp.ne.s32.totalorder %s15224_s3, %s13831_s14  ;;  %p13839_p4 = scmp.lt.s32.totalorder %s13831_s14, %s13831_s14 }
 0x114   : > { %p13833_p6 = pnand %p13832_p5, %p13406_p10  ;;  %p13840_p7 = por %p13839_p4, %p13838_p3 }
 0x116   : > { %p13834_p2 = pneg %p13833_p6 }
 0x118   : > { %p13841_p8 = pnand %p13840_p7, %p13834_p2 }
 0x11a   : > { %13844 = shalt.err (!%p13841_p8)
}
 0x11b   : > { %s14820_s16 = smov 48   ;;  %s14821_s10 = smov 3  }
 0x11c   : > { %13279 = dma.hbm_to_vmem [thread:$0]  (%p13406_p10), %s16681_s4, 96, %s15224_s3, [#allocation24], %s14820_s16, %s14820_s16, %s14821_s10  }
 0x11d   : > { %s14822_s1 = smov [#allocation26]   ;;  %s13845_s26 = scalar_lea.hbm %s16678_s9, 32 }
 0x11e   : > { %s1333_s23 = sshll.u32 %s14822_s1, 4  ;;  %p13846_p11 = scmp.ne.s32.totalorder %s16678_s9, %s13845_s26  ;;  %s1334_s23 = int_to_ptr.vmem [resolvable:$true] %s1333_s23 }
 0x11f   : > { %p13851_p0 = scmp.lt.u32.totalorder %s13845_s26, %s16678_s9 }
 0x120   : > { %p13847_p12 = pnand %p13846_p11, %p13406_p10 }
 0x122   : > { %p13848_p13 = pneg %p13847_p12 }
 0x124   : > { %p13853_p1 = pnand %p13851_p0, %p13848_p13 }
 0x126   : > { %13856 = shalt.err (!%p13853_p1)
}
 0x127   : > { %s13857_s14 = scalar_lea.vmem %s1334_s23, 32  ;;  %p13864_p3 = scmp.lt.s32.totalorder %s1334_s23, %s1334_s23 }
 0x128   : > { %p13858_p5 = scmp.ne.s32.totalorder %s1334_s23, %s13857_s14  ;;  %p13865_p4 = scmp.lt.s32.totalorder %s13857_s14, %s13857_s14 }
 0x12a   : > { %p13859_p6 = pnand %p13858_p5, %p13406_p10  ;;  %p13866_p7 = por %p13865_p4, %p13864_p3 }
 0x12c   : > { %p13860_p2 = pneg %p13859_p6 }
 0x12e   : > { %p13867_p8 = pnand %p13866_p7, %p13860_p2 }
 0x130   : > { %13870 = shalt.err (!%p13867_p8)
}
 0x131   : > { %s16611_s3 = smov 16   ;;  %s16605_s16 = smov 1  }
 0x132   : > { %13283 = dma.hbm_to_vmem [thread:$0]  (%p13406_p10), %s16678_s9, 32, %s1334_s23, [#allocation27], %s16611_s3, %s16611_s3, %s16605_s16  }
 0x133   : > { %s14825_s10 = smov [#allocation29]   ;;  %s14826_s26 = smov [#allocation32]  }
 0x134   : > { %s1359_s1 = sshll.u32 %s14825_s10, 4  ;;  %s1391_s14 = sshll.u32 %s14826_s26, 4  ;;  %s1360_s1 = int_to_ptr.vmem [resolvable:$true] %s1359_s1  ;;  %s1392_s14 = int_to_ptr.vmem [resolvable:$true] %s1391_s14 }
 0x135   : > { %s13871_s28 = scalar_lea.hbm %s16680_s5, 32 }
 0x136   : > { %p13872_p11 = scmp.ne.s32.totalorder %s16680_s5, %s13871_s28  ;;  %p13877_p0 = scmp.lt.u32.totalorder %s13871_s28, %s16680_s5 }
 0x138   : > { %p13873_p12 = pnand %p13872_p11, %p13406_p10 }
 0x13a   : > { %p13874_p13 = pneg %p13873_p12 }
 0x13c   : > { %p13879_p1 = pnand %p13877_p0, %p13874_p13 }
 0x13e   : > { %13882 = shalt.err (!%p13879_p1)
}
 0x13f   : > { %s13883_s2 = scalar_lea.vmem %s1360_s1, 32  ;;  %p13890_p3 = scmp.lt.s32.totalorder %s1360_s1, %s1360_s1 }
 0x140   : > { %p13884_p5 = scmp.ne.s32.totalorder %s1360_s1, %s13883_s2  ;;  %p13891_p4 = scmp.lt.s32.totalorder %s13883_s2, %s13883_s2 }
 0x142   : > { %p13885_p6 = pnand %p13884_p5, %p13406_p10  ;;  %p13892_p7 = por %p13891_p4, %p13890_p3 }
 0x144   : > { %p13886_p2 = pneg %p13885_p6 }
 0x146   : > { %p13893_p8 = pnand %p13892_p7, %p13886_p2 }
 0x148   : > { %13896 = shalt.err (!%p13893_p8)
}
 0x149   : > { %13287 = dma.hbm_to_vmem [thread:$0]  (%p13406_p10), %s16680_s5, 32, %s1360_s1, [#allocation30], %s16611_s3, %s16611_s3, %s16605_s16  }
 0x14a   : > { %s13897_s28 = scalar_lea.hbm %s16679_s6, 32 }
 0x14b   : > { %p13898_p11 = scmp.ne.s32.totalorder %s16679_s6, %s13897_s28  ;;  %p13903_p0 = scmp.lt.u32.totalorder %s13897_s28, %s16679_s6 }
 0x14d   : > { %p13899_p12 = pnand %p13898_p11, %p13406_p10 }
 0x14f   : > { %p13900_p13 = pneg %p13899_p12 }
 0x151   : > { %p13905_p1 = pnand %p13903_p0, %p13900_p13 }
 0x153   : > { %13908 = shalt.err (!%p13905_p1)
}
 0x154   : > { %s13909_s2 = scalar_lea.vmem %s1392_s14, 32  ;;  %p13916_p3 = scmp.lt.s32.totalorder %s1392_s14, %s1392_s14 }
 0x155   : > { %p13910_p5 = scmp.ne.s32.totalorder %s1392_s14, %s13909_s2  ;;  %p13917_p4 = scmp.lt.s32.totalorder %s13909_s2, %s13909_s2 }
 0x157   : > { %p13911_p6 = pnand %p13910_p5, %p13406_p10  ;;  %p13918_p7 = por %p13917_p4, %p13916_p3 }
 0x159   : > { %p13912_p2 = pneg %p13911_p6 }
 0x15b   : > { %p13919_p8 = pnand %p13918_p7, %p13912_p2 }
 0x15d   : > { %13922 = shalt.err (!%p13919_p8)
}
 0x15e   : > { %13291 = dma.hbm_to_vmem [thread:$0]  (%p13406_p10), %s16679_s6, 32, %s1392_s14, [#allocation33], %s16611_s3, %s16611_s3, %s16605_s16  }
 0x15f   : > { %s14827_s23 = smov [#allocation35]   ;;  %s14828_s1 = smov [#allocation38]  }
 0x160   : > { %s1417_s10 = sshll.u32 %s14827_s23, 4  ;;  %s1444_s26 = sshll.u32 %s14828_s1, 4  ;;  %s1418_s10 = int_to_ptr.vmem [resolvable:$true] %s1417_s10  ;;  %s1445_s26 = int_to_ptr.vmem [resolvable:$true] %s1444_s26 }
 0x161   : > { %s13923_s28 = scalar_lea.hbm %s15009_s20, 32 }
 0x162   : > { %p13924_p11 = scmp.ne.s32.totalorder %s15009_s20, %s13923_s28  ;;  %p13929_p0 = scmp.lt.u32.totalorder %s13923_s28, %s15009_s20 }
 0x164   : > { %p13925_p12 = pnand %p13924_p11, %p13406_p10 }
 0x166   : > { %p13926_p13 = pneg %p13925_p12 }
 0x168   : > { %p13931_p1 = pnand %p13929_p0, %p13926_p13 }
 0x16a   : > { %13934 = shalt.err (!%p13931_p1)
}
 0x16b   : > { %s13935_s2 = scalar_lea.vmem %s1418_s10, 32  ;;  %p13942_p3 = scmp.lt.s32.totalorder %s1418_s10, %s1418_s10 }
 0x16c   : > { %p13936_p5 = scmp.ne.s32.totalorder %s1418_s10, %s13935_s2  ;;  %p13943_p4 = scmp.lt.s32.totalorder %s13935_s2, %s13935_s2 }
 0x16e   : > { %p13937_p6 = pnand %p13936_p5, %p13406_p10  ;;  %p13944_p7 = por %p13943_p4, %p13942_p3 }
 0x170   : > { %p13938_p2 = pneg %p13937_p6 }
 0x172   : > { %p13945_p8 = pnand %p13944_p7, %p13938_p2 }
 0x174   : > { %13948 = shalt.err (!%p13945_p8)
}
 0x175   : > { %13295 = dma.hbm_to_vmem [thread:$0]  (%p13406_p10), %s15009_s20, 32, %s1418_s10, [#allocation36], %s16611_s3, %s16611_s3, %s16605_s16  }
 0x176   : > { %s13949_s14 = scalar_lea.hbm %s16674_s19, 16 }
 0x177   : > { %p13950_p11 = scmp.ne.s32.totalorder %s16674_s19, %s13949_s14  ;;  %p13955_p0 = scmp.lt.u32.totalorder %s13949_s14, %s16674_s19 }
 0x179   : > { %p13951_p12 = pnand %p13950_p11, %p13406_p10 }
 0x17b   : > { %p13952_p13 = pneg %p13951_p12 }
 0x17d   : > { %p13957_p1 = pnand %p13955_p0, %p13952_p13 }
 0x17f   : > { %13960 = shalt.err (!%p13957_p1)
}
 0x180   : > { %s13961_s23 = scalar_lea.vmem %s1445_s26, 16  ;;  %s13967_s1 = scalar_lea.vmem %s1445_s26, 32 }
 0x181   : > { %p13962_p5 = scmp.ne.s32.totalorder %s1445_s26, %s13961_s23  ;;  %p13968_p3 = scmp.lt.s32.totalorder %s1445_s26, %s1445_s26 }
 0x182   : > { %p13969_p4 = scmp.lt.s32.totalorder %s13967_s1, %s13961_s23 }
 0x183   : > { %p13963_p6 = pnand %p13962_p5, %p13406_p10 }
 0x184   : > { %p13970_p7 = por %p13969_p4, %p13968_p3 }
 0x185   : > { %p13964_p2 = pneg %p13963_p6 }
 0x187   : > { %p13971_p8 = pnand %p13970_p7, %p13964_p2 }
 0x189   : > { %13974 = shalt.err (!%p13971_p8)
}
 0x18a   : > { %13299 = dma.hbm_to_vmem [thread:$0]  (%p13406_p10), %s16674_s19, 16, %s1445_s26, [#allocation39]  }
 0x18b   : > { %s14829_s10 = smov [#allocation41]   ;;  %s14830_s2 = smov [#allocation44]  }
 0x18c   : > { %s1468_s28 = sshll.u32 %s14829_s10, 4  ;;  %s1492_s14 = sshll.u32 %s14830_s2, 4  ;;  %s1469_s28 = int_to_ptr.vmem [resolvable:$true] %s1468_s28  ;;  %s1493_s14 = int_to_ptr.vmem [resolvable:$true] %s1492_s14 }
 0x18d   : > { %s13975_s16 = scalar_lea.hbm %s15034_s27, 2048 }
 0x18e   : > { %p13976_p11 = scmp.ne.s32.totalorder %s15034_s27, %s13975_s16  ;;  %p13981_p0 = scmp.lt.u32.totalorder %s13975_s16, %s15034_s27 }
 0x190   : > { %p13977_p12 = pnand %p13976_p11, %p13406_p10 }
 0x192   : > { %p13978_p13 = pneg %p13977_p12 }
 0x194   : > { %p13983_p1 = pnand %p13981_p0, %p13978_p13 }
 0x196   : > { %13986 = shalt.err (!%p13983_p1)
}
 0x197   : > { %s13987_s23 = scalar_lea.vmem %s1469_s28, 2048  ;;  %p13994_p3 = scmp.lt.s32.totalorder %s1469_s28, %s1469_s28 }
 0x198   : > { %p13988_p5 = scmp.ne.s32.totalorder %s1469_s28, %s13987_s23  ;;  %p13995_p4 = scmp.lt.s32.totalorder %s13987_s23, %s13987_s23 }
 0x19a   : > { %p13989_p6 = pnand %p13988_p5, %p13406_p10  ;;  %p13996_p7 = por %p13995_p4, %p13994_p3 }
 0x19c   : > { %p13990_p2 = pneg %p13989_p6 }
 0x19e   : > { %p13997_p8 = pnand %p13996_p7, %p13990_p2 }
 0x1a0   : > { %14000 = shalt.err (!%p13997_p8)
}
 0x1a1   : > { %s16691_s26 = smov 8   ;;  %s16692_s1 = smov 128  }
 0x1a2   : > { %13303 = dma.hbm_to_vmem [thread:$0]  (%p13406_p10), %s15034_s27, 2048, %s1469_s28, [#allocation42], %s16692_s1, %s16692_s1, %s16691_s26  }
 0x1a3   : > { %s14001_s16 = scalar_lea.hbm %s15044_s24, 2048 }
 0x1a4   : > { %p14002_p11 = scmp.ne.s32.totalorder %s15044_s24, %s14001_s16  ;;  %p14007_p0 = scmp.lt.u32.totalorder %s14001_s16, %s15044_s24 }
 0x1a6   : > { %p14003_p12 = pnand %p14002_p11, %p13406_p10 }
 0x1a8   : > { %p14004_p13 = pneg %p14003_p12 }
 0x1aa   : > { %p14009_p1 = pnand %p14007_p0, %p14004_p13 }
 0x1ac   : > { %14012 = shalt.err (!%p14009_p1)
}
 0x1ad   : > { %s14013_s10 = scalar_lea.vmem %s1493_s14, 2048  ;;  %p14020_p3 = scmp.lt.s32.totalorder %s1493_s14, %s1493_s14 }
 0x1ae   : > { %p14014_p5 = scmp.ne.s32.totalorder %s1493_s14, %s14013_s10  ;;  %p14021_p4 = scmp.lt.s32.totalorder %s14013_s10, %s14013_s10 }
 0x1b0   : > { %p14015_p6 = pnand %p14014_p5, %p13406_p10  ;;  %p14022_p7 = por %p14021_p4, %p14020_p3 }
 0x1b2   : > { %p14016_p2 = pneg %p14015_p6 }
 0x1b4   : > { %p14023_p8 = pnand %p14022_p7, %p14016_p2 }
 0x1b6   : > { %14026 = shalt.err (!%p14023_p8)
}
 0x1b7   : > { %s16693_s28 = sld [smem:[#allocation111_spill]]  ;;  %s14831_s2 = smov [#allocation47]  }
 0x1b8   : > { %13307 = dma.hbm_to_vmem [thread:$0]  (%p13406_p10), %s15044_s24, 2048, %s1493_s14, [#allocation45], %s16692_s1, %s16692_s1, %s16691_s26  }
 0x1b9   : > { %s1516_s23 = sshll.u32 %s14831_s2, 4  ;;  %s1517_s23 = int_to_ptr.vmem [resolvable:$true] %s1516_s23 }
 0x1bd   : > { %s14027_s16 = scalar_lea.hbm %s16693_s28, 4096 }
 0x1be   : > { %p14028_p11 = scmp.ne.s32.totalorder %s16693_s28, %s14027_s16  ;;  %p14033_p0 = scmp.lt.u32.totalorder %s14027_s16, %s16693_s28 }
 0x1c0   : > { %p14029_p12 = pnand %p14028_p11, %p13406_p10 }
 0x1c2   : > { %p14030_p13 = pneg %p14029_p12 }
 0x1c4   : > { %p14035_p1 = pnand %p14033_p0, %p14030_p13 }
 0x1c6   : > { %14038 = shalt.err (!%p14035_p1)
}
 0x1c7   : > { %s14039_s10 = scalar_lea.vmem %s1517_s23, 4096  ;;  %p14046_p3 = scmp.lt.s32.totalorder %s1517_s23, %s1517_s23 }
 0x1c8   : > { %p14040_p5 = scmp.ne.s32.totalorder %s1517_s23, %s14039_s10  ;;  %p14047_p4 = scmp.lt.s32.totalorder %s14039_s10, %s14039_s10 }
 0x1ca   : > { %p14041_p6 = pnand %p14040_p5, %p13406_p10  ;;  %p14048_p7 = por %p14047_p4, %p14046_p3 }
 0x1cc   : > { %p14042_p2 = pneg %p14041_p6 }
 0x1ce   : > { %p14049_p8 = pnand %p14048_p7, %p14042_p2 }
 0x1d0   : > { %14052 = shalt.err (!%p14049_p8)
}
 0x1d1   : > { %s14832_s14 = smov 256   ;;  %s16694_s2 = sld [smem:[#allocation113_spill]] }
 0x1d2   : > { %13311 = dma.hbm_to_vmem [thread:$0]  (%p13406_p10), %s16693_s28, 4096, %s1517_s23, [#allocation48], %s14832_s14, %s14832_s14, %s16611_s3  }
 0x1d3   : > { %s14833_s16 = smov [#allocation50]   ;;  %s14834_s5 = smov [#allocation53]  }
 0x1d4   : > { %s1540_s4 = sshll.u32 %s14833_s16, 4  ;;  %s1564_s6 = sshll.u32 %s14834_s5, 4  ;;  %s1541_s4 = int_to_ptr.vmem [resolvable:$true] %s1540_s4  ;;  %s1565_s6 = int_to_ptr.vmem [resolvable:$true] %s1564_s6 }
 0x1d7   : > { %s14053_s9 = scalar_lea.hbm %s16694_s2, 2048 }
 0x1d8   : > { %p14054_p11 = scmp.ne.s32.totalorder %s16694_s2, %s14053_s9  ;;  %p14059_p0 = scmp.lt.u32.totalorder %s14053_s9, %s16694_s2 }
 0x1da   : > { %p14055_p12 = pnand %p14054_p11, %p13406_p10 }
 0x1dc   : > { %p14056_p13 = pneg %p14055_p12 }
 0x1de   : > { %p14061_p1 = pnand %p14059_p0, %p14056_p13 }
 0x1e0   : > { %14064 = shalt.err (!%p14061_p1)
}
 0x1e1   : > { %s14065_s10 = scalar_lea.vmem %s1541_s4, 2048  ;;  %p14072_p3 = scmp.lt.s32.totalorder %s1541_s4, %s1541_s4 }
 0x1e2   : > { %p14066_p5 = scmp.ne.s32.totalorder %s1541_s4, %s14065_s10  ;;  %p14073_p4 = scmp.lt.s32.totalorder %s14065_s10, %s14065_s10 }
 0x1e4   : > { %p14067_p6 = pnand %p14066_p5, %p13406_p10  ;;  %p14074_p7 = por %p14073_p4, %p14072_p3 }
 0x1e6   : > { %p14068_p2 = pneg %p14067_p6 }
 0x1e8   : > { %p14075_p8 = pnand %p14074_p7, %p14068_p2 }
 0x1ea   : > { %14078 = shalt.err (!%p14075_p8)
}
 0x1eb   : > { %s16695_s5 = sld [smem:[#allocation115_spill]] }
 0x1ec   : > { %13315 = dma.hbm_to_vmem [thread:$0]  (%p13406_p10), %s16694_s2, 2048, %s1541_s4, [#allocation51], %s16692_s1, %s16692_s1, %s16691_s26  }
 0x1f1   : > { %s14079_s9 = scalar_lea.hbm %s16695_s5, 4096 }
 0x1f2   : > { %p14080_p11 = scmp.ne.s32.totalorder %s16695_s5, %s14079_s9  ;;  %p14085_p0 = scmp.lt.u32.totalorder %s14079_s9, %s16695_s5 }
 0x1f4   : > { %p14081_p12 = pnand %p14080_p11, %p13406_p10 }
 0x1f6   : > { %p14082_p13 = pneg %p14081_p12 }
 0x1f8   : > { %p14087_p1 = pnand %p14085_p0, %p14082_p13 }
 0x1fa   : > { %14090 = shalt.err (!%p14087_p1)
}
 0x1fb   : > { %s14091_s23 = scalar_lea.vmem %s1565_s6, 4096  ;;  %p14098_p3 = scmp.lt.s32.totalorder %s1565_s6, %s1565_s6 }
 0x1fc   : > { %p14092_p5 = scmp.ne.s32.totalorder %s1565_s6, %s14091_s23  ;;  %p14099_p4 = scmp.lt.s32.totalorder %s14091_s23, %s14091_s23 }
 0x1fe   : > { %p14093_p6 = pnand %p14092_p5, %p13406_p10  ;;  %p14100_p7 = por %p14099_p4, %p14098_p3 }
 0x200   : > { %p14094_p2 = pneg %p14093_p6 }
 0x202   : > { %p14101_p8 = pnand %p14100_p7, %p14094_p2 }
 0x204   : > { %14104 = shalt.err (!%p14101_p8)
}
 0x205   : > { %13319 = dma.hbm_to_vmem [thread:$0]  (%p13406_p10), %s16695_s5, 4096, %s1565_s6, [#allocation54], %s16692_s1, %s16692_s1, %s16691_s26  }
 0x206   : > { %s14835_s4 = smov [#allocation56]   ;;  %s14105_s16 = scalar_lea.hbm %s16677_s8, 16 }
 0x207   : > { %s1592_s14 = sshll.u32 %s14835_s4, 4  ;;  %p14106_p11 = scmp.ne.s32.totalorder %s16677_s8, %s14105_s16  ;;  %s1593_s14 = int_to_ptr.vmem [resolvable:$true] %s1592_s14 }
 0x208   : > { %p14111_p0 = scmp.lt.u32.totalorder %s14105_s16, %s16677_s8 }
 0x209   : > { %p14107_p12 = pnand %p14106_p11, %p13406_p10 }
 0x20b   : > { %p14108_p13 = pneg %p14107_p12 }
 0x20d   : > { %p14113_p1 = pnand %p14111_p0, %p14108_p13 }
 0x20f   : > { %14116 = shalt.err (!%p14113_p1)
}
 0x210   : > { %s14117_s10 = scalar_lea.vmem %s1593_s14, 16  ;;  %s14123_s9 = scalar_lea.vmem %s1593_s14, 32 }
 0x211   : > { %p14118_p5 = scmp.ne.s32.totalorder %s1593_s14, %s14117_s10  ;;  %p14124_p3 = scmp.lt.s32.totalorder %s1593_s14, %s1593_s14 }
 0x212   : > { %p14125_p4 = scmp.lt.s32.totalorder %s14123_s9, %s14117_s10 }
 0x213   : > { %p14119_p6 = pnand %p14118_p5, %p13406_p10 }
 0x214   : > { %p14126_p7 = por %p14125_p4, %p14124_p3 }
 0x215   : > { %p14120_p2 = pneg %p14119_p6 }
 0x217   : > { %p14127_p8 = pnand %p14126_p7, %p14120_p2 }
 0x219   : > { %14130 = shalt.err (!%p14127_p8)
}
 0x21a   : > { %s16696_s6 = sld [smem:[#allocation82_spill]]  ;;  %s14836_s23 = smov [#allocation2]  }
 0x21b   : > { %13323 = dma.hbm_to_vmem [thread:$0]  (%p13406_p10), %s16677_s8, 16, %s1593_s14, [#allocation57]  }
 0x21c   : > { %s1144_s4 = sshll.u32 %s14836_s23, 4  ;;  %s1145_s4 = int_to_ptr.vmem [resolvable:$true] %s1144_s4 }
 0x220   : > { %s14131_s16 = scalar_lea.hbm %s16696_s6, 36864 }
 0x221   : > { %p14132_p11 = scmp.ne.s32.totalorder %s16696_s6, %s14131_s16  ;;  %p14137_p0 = scmp.lt.u32.totalorder %s14131_s16, %s16696_s6 }
 0x223   : > { %p14133_p12 = pnand %p14132_p11, %p13406_p10 }
 0x225   : > { %p14134_p13 = pneg %p14133_p12 }
 0x227   : > { %p14139_p1 = pnand %p14137_p0, %p14134_p13 }
 0x229   : > { %14142 = shalt.err (!%p14139_p1)
}
 0x22a   : > { %s14143_s10 = scalar_lea.vmem %s1145_s4, 36864  ;;  %p14150_p3 = scmp.lt.s32.totalorder %s1145_s4, %s1145_s4 }
 0x22b   : > { %p14144_p5 = scmp.ne.s32.totalorder %s1145_s4, %s14143_s10  ;;  %p14151_p4 = scmp.lt.s32.totalorder %s14143_s10, %s14143_s10 }
 0x22d   : > { %p14145_p6 = pnand %p14144_p5, %p13406_p10  ;;  %p14152_p7 = por %p14151_p4, %p14150_p3 }
 0x22f   : > { %p14146_p2 = pneg %p14145_p6 }
 0x231   : > { %p14153_p8 = pnand %p14152_p7, %p14146_p2 }
 0x233   : > { %14156 = shalt.err (!%p14153_p8)
}
 0x234   : > { %s14837_s14 = smov 384   ;;  %s16697_s9 = sld [smem:[#allocation84_spill]] }
 0x235   : > { %s14838_s23 = smov 24   ;;  %s14839_s16 = smov [#allocation7]  }
 0x236   : > { %13253 = dma.hbm_to_vmem [thread:$0]  (%p13406_p10), %s16696_s6, 36864, %s1145_s4, [#allocation3], %s14837_s14, %s14837_s14, %s14838_s23  }
 0x237   : > { %s1168_s3 = sshll.u32 %s14839_s16, 4  ;;  %s14840_s2 = smov [#allocation10]   ;;  %s1169_s3 = int_to_ptr.vmem [resolvable:$true] %s1168_s3 }
 0x238   : > { %s1192_s5 = sshll.u32 %s14840_s2, 4  ;;  %s15396_s5 = int_to_ptr.vmem [resolvable:$true] %s1192_s5 }
 0x23a   : > { %s14157_s10 = scalar_lea.hbm %s16697_s9, 6144 }
 0x23b   : > { %p14158_p11 = scmp.ne.s32.totalorder %s16697_s9, %s14157_s10  ;;  %p14163_p0 = scmp.lt.u32.totalorder %s14157_s10, %s16697_s9 }
 0x23d   : > { %p14159_p12 = pnand %p14158_p11, %p13406_p10 }
 0x23f   : > { %p14160_p13 = pneg %p14159_p12 }
 0x241   : > { %p14165_p1 = pnand %p14163_p0, %p14160_p13 }
 0x243   : > { %14168 = shalt.err (!%p14165_p1)
}
 0x244   : > { %s14169_s8 = scalar_lea.vmem %s1169_s3, 6144  ;;  %p14176_p3 = scmp.lt.s32.totalorder %s1169_s3, %s1169_s3 }
 0x245   : > { %p14170_p5 = scmp.ne.s32.totalorder %s1169_s3, %s14169_s8  ;;  %p14177_p4 = scmp.lt.s32.totalorder %s14169_s8, %s14169_s8 }
 0x247   : > { %p14171_p6 = pnand %p14170_p5, %p13406_p10  ;;  %p14178_p7 = por %p14177_p4, %p14176_p3 }
 0x249   : > { %p14172_p2 = pneg %p14171_p6 }
 0x24b   : > { %p14179_p8 = pnand %p14178_p7, %p14172_p2 }
 0x24d   : > { %14182 = shalt.err (!%p14179_p8)
}
 0x24e   : > { %s16698_s2 = sld [smem:[#allocation85_spill]] }
 0x24f   : > { %13257 = dma.hbm_to_vmem [thread:$0]  (%p13406_p10), %s16697_s9, 6144, %s1169_s3, [#allocation6], %s16692_s1, %s16692_s1, %s16691_s26  }
 0x254   : > { %s14183_s4 = scalar_lea.hbm %s16698_s2, 768 }
 0x255   : > { %p14184_p11 = scmp.ne.s32.totalorder %s16698_s2, %s14183_s4  ;;  %p14189_p0 = scmp.lt.u32.totalorder %s14183_s4, %s16698_s2 }
 0x257   : > { %p14185_p12 = pnand %p14184_p11, %p13406_p10 }
 0x259   : > { %p14186_p13 = pneg %p14185_p12 }
 0x25b   : > { %p14191_p1 = pnand %p14189_p0, %p14186_p13 }
 0x25d   : > { %14194 = shalt.err (!%p14191_p1)
}
 0x25e   : > { %s14195_s8 = scalar_lea.vmem %s15396_s5, 768  ;;  %p14202_p3 = scmp.lt.s32.totalorder %s15396_s5, %s15396_s5 }
 0x25f   : > { %p14196_p5 = scmp.ne.s32.totalorder %s15396_s5, %s14195_s8  ;;  %p14203_p4 = scmp.lt.s32.totalorder %s14195_s8, %s14195_s8 }
 0x261   : > { %p14197_p6 = pnand %p14196_p5, %p13406_p10  ;;  %p14204_p7 = por %p14203_p4, %p14202_p3 }
 0x263   : > { %p14198_p2 = pneg %p14197_p6 }
 0x265   : > { %p14205_p8 = pnand %p14204_p7, %p14198_p2 }
 0x267   : > { %14208 = shalt.err (!%p14205_p8)
}
 0x268   : > { %s16699_s3 = sld [smem:[#allocation87_spill]]  ;;  %s14841_s14 = smov [#allocation13]  }
 0x269   : > { %13261 = dma.hbm_to_vmem [thread:$0]  (%p13406_p10), %s16698_s2, 768, %s15396_s5, [#allocation9], %s16692_s1, %s16692_s1, %s16691_s26  }
 0x26a   : > { %s1216_s23 = sshll.u32 %s14841_s14, 4  ;;  %s14842_s16 = smov [#allocation16]   ;;  %s1217_s23 = int_to_ptr.vmem [resolvable:$true] %s1216_s23 }
 0x26b   : > { %s1242_s10 = sshll.u32 %s14842_s16, 4  ;;  %s15429_s10 = int_to_ptr.vmem [resolvable:$true] %s1242_s10 }
 0x26e   : > { %s14209_s4 = scalar_lea.hbm %s16699_s3, 3072 }
 0x26f   : > { %p14210_p11 = scmp.ne.s32.totalorder %s16699_s3, %s14209_s4  ;;  %p14215_p0 = scmp.lt.u32.totalorder %s14209_s4, %s16699_s3 }
 0x271   : > { %p14211_p12 = pnand %p14210_p11, %p13406_p10 }
 0x273   : > { %p14212_p13 = pneg %p14211_p12 }
 0x275   : > { %p14217_p1 = pnand %p14215_p0, %p14212_p13 }
 0x277   : > { %14220 = shalt.err (!%p14217_p1)
}
 0x278   : > { %s14221_s8 = scalar_lea.vmem %s1217_s23, 3072  ;;  %p14228_p3 = scmp.lt.s32.totalorder %s1217_s23, %s1217_s23 }
 0x279   : > { %p14222_p5 = scmp.ne.s32.totalorder %s1217_s23, %s14221_s8  ;;  %p14229_p4 = scmp.lt.s32.totalorder %s14221_s8, %s14221_s8 }
 0x27b   : > { %p14223_p6 = pnand %p14222_p5, %p13406_p10  ;;  %p14230_p7 = por %p14229_p4, %p14228_p3 }
 0x27d   : > { %p14224_p2 = pneg %p14223_p6 }
 0x27f   : > { %p14231_p8 = pnand %p14230_p7, %p14224_p2 }
 0x281   : > { %14234 = shalt.err (!%p14231_p8)
}
 0x282   : > { %s16700_s5 = sld [smem:[#allocation89_spill]] }
 0x283   : > { %13265 = dma.hbm_to_vmem [thread:$0]  (%p13406_p10), %s16699_s3, 3072, %s1217_s23, [#allocation12], %s16692_s1, %s16692_s1, %s16691_s26  }
 0x288   : > { %s14235_s14 = scalar_lea.hbm %s16700_s5, 6144 }
 0x289   : > { %p14236_p11 = scmp.ne.s32.totalorder %s16700_s5, %s14235_s14  ;;  %p14241_p0 = scmp.lt.u32.totalorder %s14235_s14, %s16700_s5 }
 0x28b   : > { %p14237_p12 = pnand %p14236_p11, %p13406_p10 }
 0x28d   : > { %p14238_p13 = pneg %p14237_p12 }
 0x28f   : > { %p14243_p1 = pnand %p14241_p0, %p14238_p13 }
 0x291   : > { %14246 = shalt.err (!%p14243_p1)
}
 0x292   : > { %s14247_s16 = scalar_lea.vmem %s15429_s10, 6144  ;;  %p14254_p3 = scmp.lt.s32.totalorder %s15429_s10, %s15429_s10 }
 0x293   : > { %p14248_p5 = scmp.ne.s32.totalorder %s15429_s10, %s14247_s16  ;;  %p14255_p4 = scmp.lt.s32.totalorder %s14247_s16, %s14247_s16 }
 0x295   : > { %p14249_p6 = pnand %p14248_p5, %p13406_p10  ;;  %p14256_p7 = por %p14255_p4, %p14254_p3 }
 0x297   : > { %p14250_p2 = pneg %p14249_p6 }
 0x299   : > { %p14257_p8 = pnand %p14256_p7, %p14250_p2 }
 0x29b   : > { %14260 = shalt.err (!%p14257_p8)
}
 0x29c   : > { %s16701_s23 = sld [smem:[#allocation91_spill]]  ;;  %s14843_s4 = smov [#allocation19]  }
 0x29d   : > { %13269 = dma.hbm_to_vmem [thread:$0]  (%p13406_p10), %s16700_s5, 6144, %s15429_s10, [#allocation15], %s16692_s1, %s16692_s1, %s16691_s26  }
 0x29e   : > { %s1272_s8 = sshll.u32 %s14843_s4, 4  ;;  %s14844_s14 = smov [#allocation22]   ;;  %s1273_s8 = int_to_ptr.vmem [resolvable:$true] %s1272_s8 }
 0x29f   : > { %s1294_s2 = sshll.u32 %s14844_s14, 4  ;;  %s15462_s2 = int_to_ptr.vmem [resolvable:$true] %s1294_s2 }
 0x2a2   : > { %s14261_s16 = scalar_lea.hbm %s16701_s23, 128 }
 0x2a3   : > { %p14262_p11 = scmp.ne.s32.totalorder %s16701_s23, %s14261_s16  ;;  %p14267_p0 = scmp.lt.u32.totalorder %s14261_s16, %s16701_s23 }
 0x2a5   : > { %p14263_p12 = pnand %p14262_p11, %p13406_p10 }
 0x2a7   : > { %p14264_p13 = pneg %p14263_p12 }
 0x2a9   : > { %p14269_p1 = pnand %p14267_p0, %p14264_p13 }
 0x2ab   : > { %14272 = shalt.err (!%p14269_p1)
}
 0x2ac   : > { %s14273_s3 = scalar_lea.vmem %s1273_s8, 128  ;;  %p14280_p3 = scmp.lt.s32.totalorder %s1273_s8, %s1273_s8 }
 0x2ad   : > { %p14274_p5 = scmp.ne.s32.totalorder %s1273_s8, %s14273_s3  ;;  %p14281_p4 = scmp.lt.s32.totalorder %s14273_s3, %s14273_s3 }
 0x2af   : > { %p14275_p6 = pnand %p14274_p5, %p13406_p10  ;;  %p14282_p7 = por %p14281_p4, %p14280_p3 }
 0x2b1   : > { %p14276_p2 = pneg %p14275_p6 }
 0x2b3   : > { %p14283_p8 = pnand %p14282_p7, %p14276_p2 }
 0x2b5   : > { %14286 = shalt.err (!%p14283_p8)
}
 0x2b6   : > { %s16702_s10 = sld [smem:[#allocation93_spill]] }
 0x2b7   : > { %13273 = dma.hbm_to_vmem [thread:$0]  (%p13406_p10), %s16701_s23, 128, %s1273_s8, [#allocation18]  }
 0x2bc   : > { %s14287_s4 = scalar_lea.hbm %s16702_s10, 16 }
 0x2bd   : > { %p14288_p11 = scmp.ne.s32.totalorder %s16702_s10, %s14287_s4  ;;  %p14293_p0 = scmp.lt.u32.totalorder %s14287_s4, %s16702_s10 }
 0x2bf   : > { %p14289_p12 = pnand %p14288_p11, %p13406_p10 }
 0x2c1   : > { %p14290_p13 = pneg %p14289_p12 }
 0x2c3   : > { %p14295_p1 = pnand %p14293_p0, %p14290_p13 }
 0x2c5   : > { %14298 = shalt.err (!%p14295_p1)
}
 0x2c6   : > { %s14299_s3 = scalar_lea.vmem %s15462_s2, 16  ;;  %s14305_s14 = scalar_lea.vmem %s15462_s2, 32 }
 0x2c7   : > { %p14300_p5 = scmp.ne.s32.totalorder %s15462_s2, %s14299_s3  ;;  %p14306_p3 = scmp.lt.s32.totalorder %s15462_s2, %s15462_s2 }
 0x2c8   : > { %p14307_p4 = scmp.lt.s32.totalorder %s14305_s14, %s14299_s3 }
 0x2c9   : > { %p14301_p6 = pnand %p14300_p5, %p13406_p10 }
 0x2ca   : > { %p14308_p7 = por %p14307_p4, %p14306_p3 }
 0x2cb   : > { %p14302_p2 = pneg %p14301_p6 }
 0x2cd   : > { %p14309_p8 = pnand %p14308_p7, %p14302_p2 }
 0x2cf   : > { %14312 = shalt.err (!%p14309_p8)
}
 0x2d0   : > { %s16703_s8 = sld [smem:[#allocation96_spill]]  ;;  %s14845_s16 = smov [#allocation25]  }
 0x2d1   : > { %13277 = dma.hbm_to_vmem [thread:$0]  (%p13406_p10), %s16702_s10, 16, %s15462_s2, [#allocation21]  }
 0x2d2   : > { %s1320_s4 = sshll.u32 %s14845_s16, 4  ;;  %s14846_s5 = smov [#allocation28]   ;;  %s1321_s4 = int_to_ptr.vmem [resolvable:$true] %s1320_s4 }
 0x2d3   : > { %s1346_s6 = sshll.u32 %s14846_s5, 4  ;;  %s15490_s6 = int_to_ptr.vmem [resolvable:$true] %s1346_s6 }
 0x2d6   : > { %s14313_s3 = scalar_lea.hbm %s16703_s8, 4096 }
 0x2d7   : > { %p14314_p11 = scmp.ne.s32.totalorder %s16703_s8, %s14313_s3  ;;  %p14319_p0 = scmp.lt.u32.totalorder %s14313_s3, %s16703_s8 }
 0x2d9   : > { %p14315_p12 = pnand %p14314_p11, %p13406_p10 }
 0x2db   : > { %p14316_p13 = pneg %p14315_p12 }
 0x2dd   : > { %p14321_p1 = pnand %p14319_p0, %p14316_p13 }
 0x2df   : > { %14324 = shalt.err (!%p14321_p1)
}
 0x2e0   : > { %s14325_s14 = scalar_lea.vmem %s1321_s4, 4096  ;;  %p14332_p3 = scmp.lt.s32.totalorder %s1321_s4, %s1321_s4 }
 0x2e1   : > { %p14326_p5 = scmp.ne.s32.totalorder %s1321_s4, %s14325_s14  ;;  %p14333_p4 = scmp.lt.s32.totalorder %s14325_s14, %s14325_s14 }
 0x2e3   : > { %p14327_p6 = pnand %p14326_p5, %p13406_p10  ;;  %p14334_p7 = por %p14333_p4, %p14332_p3 }
 0x2e5   : > { %p14328_p2 = pneg %p14327_p6 }
 0x2e7   : > { %p14335_p8 = pnand %p14334_p7, %p14328_p2 }
 0x2e9   : > { %14338 = shalt.err (!%p14335_p8)
}
 0x2ea   : > { %s16704_s2 = sld [smem:[#allocation98_spill]] }
 0x2eb   : > { %13281 = dma.hbm_to_vmem [thread:$0]  (%p13406_p10), %s16703_s8, 4096, %s1321_s4, [#allocation24], %s16692_s1, %s16692_s1, %s16691_s26  }
 0x2f0   : > { %s14339_s5 = scalar_lea.hbm %s16704_s2, 32 }
 0x2f1   : > { %p14340_p11 = scmp.ne.s32.totalorder %s16704_s2, %s14339_s5  ;;  %p14345_p0 = scmp.lt.u32.totalorder %s14339_s5, %s16704_s2 }
 0x2f3   : > { %p14341_p12 = pnand %p14340_p11, %p13406_p10 }
 0x2f5   : > { %p14342_p13 = pneg %p14341_p12 }
 0x2f7   : > { %p14347_p1 = pnand %p14345_p0, %p14342_p13 }
 0x2f9   : > { %14350 = shalt.err (!%p14347_p1)
}
 0x2fa   : > { %s14351_s16 = scalar_lea.vmem %s15490_s6, 32  ;;  %p14358_p3 = scmp.lt.s32.totalorder %s15490_s6, %s15490_s6 }
 0x2fb   : > { %p14352_p5 = scmp.ne.s32.totalorder %s15490_s6, %s14351_s16  ;;  %p14359_p4 = scmp.lt.s32.totalorder %s14351_s16, %s14351_s16 }
 0x2fd   : > { %p14353_p6 = pnand %p14352_p5, %p13406_p10  ;;  %p14360_p7 = por %p14359_p4, %p14358_p3 }
 0x2ff   : > { %p14354_p2 = pneg %p14353_p6 }
 0x301   : > { %p14361_p8 = pnand %p14360_p7, %p14354_p2 }
 0x303   : > { %14364 = shalt.err (!%p14361_p8)
}
 0x304   : > { %s16705_s4 = smov 1   ;;  %s16706_s3 = smov 16  }
 0x305   : > { %s16707_s14 = sld [smem:[#allocation101_spill]]  ;;  %s14847_s5 = smov [#allocation31]  }
 0x306   : > { %13285 = dma.hbm_to_vmem [thread:$0]  (%p13406_p10), %s16704_s2, 32, %s15490_s6, [#allocation27], %s16706_s3, %s16706_s3, %s16705_s4  }
 0x307   : > { %s1375_s8 = sshll.u32 %s14847_s5, 4  ;;  %s1376_s8 = int_to_ptr.vmem [resolvable:$true] %s1375_s8 }
 0x30b   : > { %s14365_s9 = scalar_lea.hbm %s16707_s14, 64 }
 0x30c   : > { %p14366_p11 = scmp.ne.s32.totalorder %s16707_s14, %s14365_s9  ;;  %p14371_p0 = scmp.lt.u32.totalorder %s14365_s9, %s16707_s14 }
 0x30e   : > { %p14367_p12 = pnand %p14366_p11, %p13406_p10 }
 0x310   : > { %p14368_p13 = pneg %p14367_p12 }
 0x312   : > { %p14373_p1 = pnand %p14371_p0, %p14368_p13 }
 0x314   : > { %14376 = shalt.err (!%p14373_p1)
}
 0x315   : > { %s14377_s16 = scalar_lea.vmem %s1376_s8, 64  ;;  %p14384_p3 = scmp.lt.s32.totalorder %s1376_s8, %s1376_s8 }
 0x316   : > { %p14378_p5 = scmp.ne.s32.totalorder %s1376_s8, %s14377_s16  ;;  %p14385_p4 = scmp.lt.s32.totalorder %s14377_s16, %s14377_s16 }
 0x318   : > { %p14379_p6 = pnand %p14378_p5, %p13406_p10  ;;  %p14386_p7 = por %p14385_p4, %p14384_p3 }
 0x31a   : > { %p14380_p2 = pneg %p14379_p6 }
 0x31c   : > { %p14387_p8 = pnand %p14386_p7, %p14380_p2 }
 0x31e   : > { %14390 = shalt.err (!%p14387_p8)
}
 0x31f   : > { %s14848_s6 = smov 32   ;;  %s16708_s5 = sld [smem:[#allocation104_spill]] }
 0x320   : > { %s14849_s9 = smov 2   ;;  %s14850_s2 = smov [#allocation34]  }
 0x321   : > { %13289 = dma.hbm_to_vmem [thread:$0]  (%p13406_p10), %s16707_s14, 64, %s1376_s8, [#allocation30], %s14848_s6, %s14848_s6, %s14849_s9  }
 0x322   : > { %s1404_s10 = sshll.u32 %s14850_s2, 4  ;;  %s14851_s12 = smov [#allocation37]   ;;  %s1405_s10 = int_to_ptr.vmem [resolvable:$true] %s1404_s10 }
 0x323   : > { %s1430_s17 = sshll.u32 %s14851_s12, 4  ;;  %s1431_s17 = int_to_ptr.vmem [resolvable:$true] %s1430_s17 }
 0x325   : > { %s14391_s19 = scalar_lea.hbm %s16708_s5, 32 }
 0x326   : > { %p14392_p11 = scmp.ne.s32.totalorder %s16708_s5, %s14391_s19  ;;  %p14397_p0 = scmp.lt.u32.totalorder %s14391_s19, %s16708_s5 }
 0x328   : > { %p14393_p12 = pnand %p14392_p11, %p13406_p10 }
 0x32a   : > { %p14394_p13 = pneg %p14393_p12 }
 0x32c   : > { %p14399_p1 = pnand %p14397_p0, %p14394_p13 }
 0x32e   : > { %14402 = shalt.err (!%p14399_p1)
}
 0x32f   : > { %s14403_s16 = scalar_lea.vmem %s1405_s10, 32  ;;  %p14410_p3 = scmp.lt.s32.totalorder %s1405_s10, %s1405_s10 }
 0x330   : > { %p14404_p5 = scmp.ne.s32.totalorder %s1405_s10, %s14403_s16  ;;  %p14411_p4 = scmp.lt.s32.totalorder %s14403_s16, %s14403_s16 }
 0x332   : > { %p14405_p6 = pnand %p14404_p5, %p13406_p10  ;;  %p14412_p7 = por %p14411_p4, %p14410_p3 }
 0x334   : > { %p14406_p2 = pneg %p14405_p6 }
 0x336   : > { %p14413_p8 = pnand %p14412_p7, %p14406_p2 }
 0x338   : > { %14416 = shalt.err (!%p14413_p8)
}
 0x339   : > { %s16709_s19 = sld [smem:[#allocation105_spill]] }
 0x33a   : > { %13293 = dma.hbm_to_vmem [thread:$0]  (%p13406_p10), %s16708_s5, 32, %s1405_s10, [#allocation33], %s16706_s3, %s16706_s3, %s16705_s4  }
 0x33f   : > { %s14417_s12 = scalar_lea.hbm %s16709_s19, 2048 }
 0x340   : > { %p14418_p11 = scmp.ne.s32.totalorder %s16709_s19, %s14417_s12  ;;  %p14423_p0 = scmp.lt.u32.totalorder %s14417_s12, %s16709_s19 }
 0x342   : > { %p14419_p12 = pnand %p14418_p11, %p13406_p10 }
 0x344   : > { %p14420_p13 = pneg %p14419_p12 }
 0x346   : > { %p14425_p1 = pnand %p14423_p0, %p14420_p13 }
 0x348   : > { %14428 = shalt.err (!%p14425_p1)
}
 0x349   : > { %s14429_s8 = scalar_lea.vmem %s1431_s17, 2048  ;;  %p14436_p3 = scmp.lt.s32.totalorder %s1431_s17, %s1431_s17 }
 0x34a   : > { %p14430_p5 = scmp.ne.s32.totalorder %s1431_s17, %s14429_s8  ;;  %p14437_p4 = scmp.lt.s32.totalorder %s14429_s8, %s14429_s8 }
 0x34c   : > { %p14431_p6 = pnand %p14430_p5, %p13406_p10  ;;  %p14438_p7 = por %p14437_p4, %p14436_p3 }
 0x34e   : > { %p14432_p2 = pneg %p14431_p6 }
 0x350   : > { %p14439_p8 = pnand %p14438_p7, %p14432_p2 }
 0x352   : > { %14442 = shalt.err (!%p14439_p8)
}
 0x353   : > { %s16710_s10 = sld [smem:[#allocation108_spill]]  ;;  %s14852_s2 = smov [#allocation40]  }
 0x354   : > { %13297 = dma.hbm_to_vmem [thread:$0]  (%p13406_p10), %s16709_s19, 2048, %s1431_s17, [#allocation36], %s16692_s1, %s16692_s1, %s16691_s26  }
 0x355   : > { %s1458_s4 = sshll.u32 %s14852_s2, 4  ;;  %s14853_s3 = smov [#allocation43]   ;;  %s1459_s4 = int_to_ptr.vmem [resolvable:$true] %s1458_s4 }
 0x356   : > { %s1482_s6 = sshll.u32 %s14853_s3, 4  ;;  %s1483_s6 = int_to_ptr.vmem [resolvable:$true] %s1482_s6 }
 0x359   : > { %s14443_s9 = scalar_lea.hbm %s16710_s10, 32 }
 0x35a   : > { %p14444_p11 = scmp.ne.s32.totalorder %s16710_s10, %s14443_s9  ;;  %p14449_p0 = scmp.lt.u32.totalorder %s14443_s9, %s16710_s10 }
 0x35c   : > { %p14445_p12 = pnand %p14444_p11, %p13406_p10 }
 0x35e   : > { %p14446_p13 = pneg %p14445_p12 }
 0x360   : > { %p14451_p1 = pnand %p14449_p0, %p14446_p13 }
 0x362   : > { %14454 = shalt.err (!%p14451_p1)
}
 0x363   : > { %s14455_s16 = scalar_lea.vmem %s1459_s4, 32  ;;  %p14462_p3 = scmp.lt.s32.totalorder %s1459_s4, %s1459_s4 }
 0x364   : > { %p14456_p5 = scmp.ne.s32.totalorder %s1459_s4, %s14455_s16  ;;  %p14463_p4 = scmp.lt.s32.totalorder %s14455_s16, %s14455_s16 }
 0x366   : > { %p14457_p6 = pnand %p14456_p5, %p13406_p10  ;;  %p14464_p7 = por %p14463_p4, %p14462_p3 }
 0x368   : > { %p14458_p2 = pneg %p14457_p6 }
 0x36a   : > { %p14465_p8 = pnand %p14464_p7, %p14458_p2 }
 0x36c   : > { %14468 = shalt.err (!%p14465_p8)
}
 0x36d   : > { %s16711_s17 = sld [smem:[#allocation109_spill]] }
 0x36e   : > { %13301 = dma.hbm_to_vmem [thread:$0]  (%p13406_p10), %s16710_s10, 32, %s1459_s4, [#allocation39]  }
 0x373   : > { %s14469_s26 = scalar_lea.hbm %s16711_s17, 16 }
 0x374   : > { %p14470_p11 = scmp.ne.s32.totalorder %s16711_s17, %s14469_s26  ;;  %p14475_p0 = scmp.lt.u32.totalorder %s14469_s26, %s16711_s17 }
 0x376   : > { %p14471_p12 = pnand %p14470_p11, %p13406_p10 }
 0x378   : > { %p14472_p13 = pneg %p14471_p12 }
 0x37a   : > { %p14477_p1 = pnand %p14475_p0, %p14472_p13 }
 0x37c   : > { %14480 = shalt.err (!%p14477_p1)
}
 0x37d   : > { %s14481_s1 = scalar_lea.vmem %s1483_s6, 16  ;;  %s14487_s12 = scalar_lea.vmem %s1483_s6, 32 }
 0x37e   : > { %p14482_p5 = scmp.ne.s32.totalorder %s1483_s6, %s14481_s1  ;;  %p14488_p3 = scmp.lt.s32.totalorder %s1483_s6, %s1483_s6 }
 0x37f   : > { %p14489_p4 = scmp.lt.s32.totalorder %s14487_s12, %s14481_s1 }
 0x380   : > { %p14483_p6 = pnand %p14482_p5, %p13406_p10 }
 0x381   : > { %p14490_p7 = por %p14489_p4, %p14488_p3 }
 0x382   : > { %p14484_p2 = pneg %p14483_p6 }
 0x384   : > { %p14491_p8 = pnand %p14490_p7, %p14484_p2 }
 0x386   : > { %14494 = shalt.err (!%p14491_p8)
}
 0x387   : > { %s16712_s8 = sld [smem:[#allocation110_spill]]  ;;  %s14854_s2 = smov [#allocation46]  }
 0x388   : > { %13305 = dma.hbm_to_vmem [thread:$0]  (%p13406_p10), %s16711_s17, 16, %s1483_s6, [#allocation42]  }
 0x389   : > { %s1506_s4 = sshll.u32 %s14854_s2, 4  ;;  %s14855_s3 = smov [#allocation49]   ;;  %s1507_s4 = int_to_ptr.vmem [resolvable:$true] %s1506_s4 }
 0x38a   : > { %s1530_s9 = sshll.u32 %s14855_s3, 4  ;;  %s1531_s9 = int_to_ptr.vmem [resolvable:$true] %s1530_s9 }
 0x38d   : > { %s14495_s16 = scalar_lea.hbm %s16712_s8, 16 }
 0x38e   : > { %p14496_p11 = scmp.ne.s32.totalorder %s16712_s8, %s14495_s16  ;;  %p14501_p0 = scmp.lt.u32.totalorder %s14495_s16, %s16712_s8 }
 0x390   : > { %p14497_p12 = pnand %p14496_p11, %p13406_p10 }
 0x392   : > { %p14498_p13 = pneg %p14497_p12 }
 0x394   : > { %p14503_p1 = pnand %p14501_p0, %p14498_p13 }
 0x396   : > { %14506 = shalt.err (!%p14503_p1)
}
 0x397   : > { %s14507_s26 = scalar_lea.vmem %s1507_s4, 16  ;;  %s14513_s6 = scalar_lea.vmem %s1507_s4, 32 }
 0x398   : > { %p14508_p5 = scmp.ne.s32.totalorder %s1507_s4, %s14507_s26  ;;  %p14514_p3 = scmp.lt.s32.totalorder %s1507_s4, %s1507_s4 }
 0x399   : > { %p14515_p4 = scmp.lt.s32.totalorder %s14513_s6, %s14507_s26 }
 0x39a   : > { %p14509_p6 = pnand %p14508_p5, %p13406_p10 }
 0x39b   : > { %p14516_p7 = por %p14515_p4, %p14514_p3 }
 0x39c   : > { %p14510_p2 = pneg %p14509_p6 }
 0x39e   : > { %p14517_p8 = pnand %p14516_p7, %p14510_p2 }
 0x3a0   : > { %14520 = shalt.err (!%p14517_p8)
}
 0x3a1   : > { %s16713_s1 = sld [smem:[#allocation112_spill]] }
 0x3a2   : > { %13309 = dma.hbm_to_vmem [thread:$0]  (%p13406_p10), %s16712_s8, 16, %s1507_s4, [#allocation45]  }
 0x3a7   : > { %s14521_s12 = scalar_lea.hbm %s16713_s1, 32 }
 0x3a8   : > { %p14522_p11 = scmp.ne.s32.totalorder %s16713_s1, %s14521_s12  ;;  %p14527_p0 = scmp.lt.u32.totalorder %s14521_s12, %s16713_s1 }
 0x3aa   : > { %p14523_p12 = pnand %p14522_p11, %p13406_p10 }
 0x3ac   : > { %p14524_p13 = pneg %p14523_p12 }
 0x3ae   : > { %p14529_p1 = pnand %p14527_p0, %p14524_p13 }
 0x3b0   : > { %14532 = shalt.err (!%p14529_p1)
}
 0x3b1   : > { %s14533_s2 = scalar_lea.vmem %s1531_s9, 32  ;;  %p14540_p3 = scmp.lt.s32.totalorder %s1531_s9, %s1531_s9 }
 0x3b2   : > { %p14534_p5 = scmp.ne.s32.totalorder %s1531_s9, %s14533_s2  ;;  %p14541_p4 = scmp.lt.s32.totalorder %s14533_s2, %s14533_s2 }
 0x3b4   : > { %p14535_p6 = pnand %p14534_p5, %p13406_p10  ;;  %p14542_p7 = por %p14541_p4, %p14540_p3 }
 0x3b6   : > { %p14536_p2 = pneg %p14535_p6 }
 0x3b8   : > { %p14543_p8 = pnand %p14542_p7, %p14536_p2 }
 0x3ba   : > { %14546 = shalt.err (!%p14543_p8)
}
 0x3bb   : > { %s16714_s4 = sld [smem:[#allocation114_spill]]  ;;  %s14856_s3 = smov [#allocation52]  }
 0x3bc   : > { %13313 = dma.hbm_to_vmem [thread:$0]  (%p13406_p10), %s16713_s1, 32, %s1531_s9, [#allocation48]  }
 0x3bd   : > { %s1554_s16 = sshll.u32 %s14856_s3, 4  ;;  %s14857_s26 = smov [#allocation55]   ;;  %s1555_s16 = int_to_ptr.vmem [resolvable:$true] %s1554_s16 }
 0x3be   : > { %s1578_s6 = sshll.u32 %s14857_s26, 4  ;;  %s1579_s6 = int_to_ptr.vmem [resolvable:$true] %s1578_s6 }
 0x3c1   : > { %s14547_s12 = scalar_lea.hbm %s16714_s4, 16 }
 0x3c2   : > { %p14548_p11 = scmp.ne.s32.totalorder %s16714_s4, %s14547_s12  ;;  %p14553_p0 = scmp.lt.u32.totalorder %s14547_s12, %s16714_s4 }
 0x3c4   : > { %p14549_p12 = pnand %p14548_p11, %p13406_p10 }
 0x3c6   : > { %p14550_p13 = pneg %p14549_p12 }
 0x3c8   : > { %p14555_p1 = pnand %p14553_p0, %p14550_p13 }
 0x3ca   : > { %14558 = shalt.err (!%p14555_p1)
}
 0x3cb   : > { %s14559_s2 = scalar_lea.vmem %s1555_s16, 16  ;;  %s14565_s9 = scalar_lea.vmem %s1555_s16, 32 }
 0x3cc   : > { %p14560_p5 = scmp.ne.s32.totalorder %s1555_s16, %s14559_s2  ;;  %p14566_p3 = scmp.lt.s32.totalorder %s1555_s16, %s1555_s16 }
 0x3cd   : > { %p14567_p4 = scmp.lt.s32.totalorder %s14565_s9, %s14559_s2 }
 0x3ce   : > { %p14561_p6 = pnand %p14560_p5, %p13406_p10 }
 0x3cf   : > { %p14568_p7 = por %p14567_p4, %p14566_p3 }
 0x3d0   : > { %p14562_p2 = pneg %p14561_p6 }
 0x3d2   : > { %p14569_p8 = pnand %p14568_p7, %p14562_p2 }
 0x3d4   : > { %14572 = shalt.err (!%p14569_p8)
}
 0x3d5   : > { %s16715_s3 = sld [smem:[#allocation116_spill]] }
 0x3d6   : > { %13317 = dma.hbm_to_vmem [thread:$0]  (%p13406_p10), %s16714_s4, 16, %s1555_s16, [#allocation51]  }
 0x3db   : > { %s14573_s26 = scalar_lea.hbm %s16715_s3, 16 }
 0x3dc   : > { %p14574_p11 = scmp.ne.s32.totalorder %s16715_s3, %s14573_s26  ;;  %p14579_p0 = scmp.lt.u32.totalorder %s14573_s26, %s16715_s3 }
 0x3de   : > { %p14575_p12 = pnand %p14574_p11, %p13406_p10 }
 0x3e0   : > { %p14576_p13 = pneg %p14575_p12 }
 0x3e2   : > { %p14581_p1 = pnand %p14579_p0, %p14576_p13 }
 0x3e4   : > { %14584 = shalt.err (!%p14581_p1)
}
 0x3e5   : > { %s14585_s12 = scalar_lea.vmem %s1579_s6, 16  ;;  %s14591_s2 = scalar_lea.vmem %s1579_s6, 32 }
 0x3e6   : > { %p14586_p5 = scmp.ne.s32.totalorder %s1579_s6, %s14585_s12  ;;  %p14592_p3 = scmp.lt.s32.totalorder %s1579_s6, %s1579_s6 }
 0x3e7   : > { %p14593_p4 = scmp.lt.s32.totalorder %s14591_s2, %s14585_s12 }
 0x3e8   : > { %p14587_p6 = pnand %p14586_p5, %p13406_p10 }
 0x3e9   : > { %p14594_p7 = por %p14593_p4, %p14592_p3 }
 0x3ea   : > { %p14588_p2 = pneg %p14587_p6 }
 0x3ec   : > { %p14595_p8 = pnand %p14594_p7, %p14588_p2 }
 0x3ee   : > { %14598 = shalt.err (!%p14595_p8)
}
 0x3ef   : > { %13321 = dma.hbm_to_vmem [thread:$0]  (%p13406_p10), %s16715_s3, 16, %s1579_s6, [#allocation54]  }
 0x3f0   : > { %s14858_s16 = smov [#allocation58]   ;;  %s14599_s26 = scalar_lea.hbm %s15099_s29, 16 }
 0x3f1   : > { %s1606_s9 = sshll.u32 %s14858_s16, 4  ;;  %p14600_p11 = scmp.ne.s32.totalorder %s15099_s29, %s14599_s26  ;;  %s1607_s9 = int_to_ptr.vmem [resolvable:$true] %s1606_s9 }
 0x3f2   : > { %p14605_p0 = scmp.lt.u32.totalorder %s14599_s26, %s15099_s29 }
 0x3f3   : > { %p14601_p12 = pnand %p14600_p11, %p13406_p10 }
 0x3f5   : > { %p14602_p13 = pneg %p14601_p12 }
 0x3f7   : > { %p14607_p1 = pnand %p14605_p0, %p14602_p13 }
 0x3f9   : > { %14610 = shalt.err (!%p14607_p1)
}
 0x3fa   : > { %s14611_s12 = scalar_lea.vmem %s1607_s9, 16  ;;  %s14617_s2 = scalar_lea.vmem %s1607_s9, 32 }
 0x3fb   : > { %p14612_p5 = scmp.ne.s32.totalorder %s1607_s9, %s14611_s12  ;;  %p14618_p3 = scmp.lt.s32.totalorder %s1607_s9, %s1607_s9 }
 0x3fc   : > { %p14619_p4 = scmp.lt.s32.totalorder %s14617_s2, %s14611_s12 }
 0x3fd   : > { %p14613_p6 = pnand %p14612_p5, %p13406_p10 }
 0x3fe   : > { %p14620_p7 = por %p14619_p4, %p14618_p3 }
 0x3ff   : > { %p14614_p2 = pneg %p14613_p6 }
 0x401   : > { %p14621_p8 = pnand %p14620_p7, %p14614_p2 }
 0x403   : > { %14624 = shalt.err (!%p14621_p8)
}
 0x404   : > { %13325 = dma.hbm_to_vmem [thread:$0]  (%p13406_p10), %s15099_s29, 16, %s1607_s9, [#allocation57]  }
 0x405 PF: > { %1635 = sbr.rel (%p15154_p9) target bundleno = 14376 (0x3828), region = 204  ;;  %p13443_p11 = scmp.eq.s32.totalorder (!%p15154_p9), %s15127_s22, 0 }
 0x40c   : > { %14670 = dma.done.wait (%p13443_p11), [#allocation3], 36864  }
 0x40d   : > { %14672 = vsyncadd (%p13443_p11), [#allocation3], 4294930432 }
 0x40e   : > { %14674 = dma.done.wait (%p13443_p11), [#allocation6], 6192  }
 0x40f   : > { %14676 = vsyncadd (%p13443_p11), [#allocation6], 4294961104 }
 0x410   : > { %14678 = dma.done.wait (%p13443_p11), [#allocation9], 784  }
 0x411   : > { %14680 = vsyncadd (%p13443_p11), [#allocation9], 4294966512 }
 0x412   : > { %14682 = dma.done.wait (%p13443_p11), [#allocation12], 3200  }
 0x413   : > { %14684 = vsyncadd (%p13443_p11), [#allocation12], 4294964096 }
 0x414   : > { %14686 = dma.done.wait (%p13443_p11), [#allocation15], 12288  }
 0x415   : > { %14688 = vsyncadd (%p13443_p11), [#allocation15], 4294955008 }
 0x416   : > { %14690 = dma.done.wait (%p13443_p11), [#allocation18], 2176  }
 0x417   : > { %14692 = vsyncadd (%p13443_p11), [#allocation18], 4294965120 }
 0x418   : > { %14694 = dma.done.wait (%p13443_p11), [#allocation21], 32  }
 0x419   : > { %14696 = vsyncadd (%p13443_p11), [#allocation21], 4294967264 }
 0x41a   : > { %14698 = dma.done.wait (%p13443_p11), [#allocation24], 4192  }
 0x41b   : > { %14700 = vsyncadd (%p13443_p11), [#allocation24], 4294963104 }
 0x41c   : > { %14702 = dma.done.wait (%p13443_p11), [#allocation27], 64  }
 0x41d   : > { %14704 = vsyncadd (%p13443_p11), [#allocation27], 4294967232 }
 0x41e   : > { %14706 = dma.done.wait (%p13443_p11), [#allocation30], 96  }
 0x41f   : > { %14708 = vsyncadd (%p13443_p11), [#allocation30], 4294967200 }
 0x420   : > { %14710 = dma.done.wait (%p13443_p11), [#allocation33], 64  }
 0x421   : > { %14712 = vsyncadd (%p13443_p11), [#allocation33], 4294967232 }
 0x422   : > { %14714 = dma.done.wait (%p13443_p11), [#allocation36], 2080  }
 0x423   : > { %14716 = vsyncadd (%p13443_p11), [#allocation36], 4294965216 }
 0x424   : > { %14718 = dma.done.wait (%p13443_p11), [#allocation39], 48  }
 0x425   : > { %14720 = vsyncadd (%p13443_p11), [#allocation39], 4294967248 }
 0x426   : > { %14722 = dma.done.wait (%p13443_p11), [#allocation42], 2064  }
 0x427   : > { %14724 = vsyncadd (%p13443_p11), [#allocation42], 4294965232 }
 0x428   : > { %14726 = dma.done.wait (%p13443_p11), [#allocation45], 2064  }
 0x429   : > { %14728 = vsyncadd (%p13443_p11), [#allocation45], 4294965232 }
 0x42a   : > { %14730 = dma.done.wait (%p13443_p11), [#allocation48], 4128  }
 0x42b   : > { %14732 = vsyncadd (%p13443_p11), [#allocation48], 4294963168 }
 0x42c   : > { %14734 = dma.done.wait (%p13443_p11), [#allocation51], 2064  }
 0x42d   : > { %14736 = vsyncadd (%p13443_p11), [#allocation51], 4294965232 }
 0x42e   : > { %14738 = dma.done.wait (%p13443_p11), [#allocation54], 4112  }
 0x42f   : > { %14740 = vsyncadd (%p13443_p11), [#allocation54], 4294963184 }
 0x430   : > { %14742 = dma.done.wait (%p13443_p11), [#allocation57], 32  }
 0x431   : > { %14744 = vsyncadd (%p13443_p11), [#allocation57], 4294967264  ;;  %v1910_v0 = vld [vmem:[#allocation2 + $0x8] sm:$0xff]  ;;  %v1913_v1 = vld [vmem:[#allocation2 + $0x20] sm:$0xff]  ;;  %p1893_p9 = scmp.lt.s32.totalorder %s15127_s22, 1  ;;  %s16716_s6 = sld [smem:[#allocation80_spill]] }
 0x432   : > { %v1909_v2 = vld [vmem:[#allocation2] sm:$0xff]  ;;  %v11951_v3 = vpack.c.bf16 %v1913_v1, %v1910_v0  ;;  %v1912_v4 = vld [vmem:[#allocation2 + $0x18] sm:$0xff]  ;;  %v1919_v6 = vld [vmem:[#allocation2 + $0x50] sm:$0xff]  ;;  %s16717_s26 = sld [smem:[#allocation81_spill]]  ;;  %vm2845_vm0 = vcmask 1044480   ;;  %vm2838_vm1 = vcmask 39936  }
 0x433   : > { %v1916_v5 = vld [vmem:[#allocation2 + $0x38] sm:$0xff]  ;;  %v11953_v7 = vpack.c.bf16 %v1912_v4, %v1909_v2  ;;  %v1915_v9 = vld [vmem:[#allocation2 + $0x30] sm:$0xff]  ;;  %v1918_v10 = vld [vmem:[#allocation2 + $0x48] sm:$0xff]  ;;  %s15710_s11 = scalar_select %p1893_p9, %s15127_s22, 1  ;;  %vm2928_vm2 = vcmask 130048   ;;  %vm14860_vm3 = vmmov 0  }
 0x434   : > { %v11955_v8 = vpack.c.bf16 %v1919_v6, %v1916_v5  ;;  %v1922_v11 = vld [vmem:[#allocation2 + $0x68] sm:$0xff]  ;;  %11952 = vmatprep.subr.bf16.mxu0 %v11951_v3  ;;  %v1925_v12 = vld [vmem:[#allocation2 + $0x80] sm:$0xff]  ;;  %v11957_v13 = vpack.c.bf16 %v1918_v10, %v1915_v9  ;;  %v1924_v16 = vld [vmem:[#allocation2 + $0x78] sm:$0xff]  ;;  %vm3111_vm4 = vcmask 523264   ;;  %vm5363_vm5 = vcmask 261120   ;;  %s10173_s1 = sshll.u32 %s15127_s22, 4 }
 0x435   : > { %11954 = vmatpush1.bf16.msra.mxu0 %v11953_v7  ;;  %v11959_v14 = vpack.c.bf16 %v1925_v12, %v1922_v11  ;;  %v1921_v15 = vld [vmem:[#allocation2 + $0x60] sm:$0xff]  ;;  %v1928_v17 = vld [vmem:[#allocation2 + $0x98] sm:$0xff]  ;;  %v1931_v18 = vld [vmem:[#allocation2 + $0xb0] sm:$0xff]  ;;  %s13251_s16 = smul.u32 48, %s15710_s11  ;;  %s10176_s12 = sshll.u32 %s15710_s11, 4  ;;  %vm5440_vm6 = vcmask 64512  }
 0x436   : > { %11956 = vmatprep.subr.bf16.mxu0 %v11955_v8  ;;  %v11961_v19 = vpack.c.bf16 %v1924_v16, %v1921_v15  ;;  %v11963_v20 = vpack.c.bf16 %v1931_v18, %v1928_v17  ;;  %v1927_v21 = vld [vmem:[#allocation2 + $0x90] sm:$0xff]  ;;  %v1930_v22 = vld [vmem:[#allocation2 + $0xa8] sm:$0xff]  ;;  %v1937_v24 = vld [vmem:[#allocation2 + $0xe0] sm:$0xff]  ;;  %s16718_s11 = sld [smem:[#allocation90_spill]]  ;;  %vm9364_vm7 = vcmask 23552   ;;  %vm9374_vm8 = vcmask 16384   ;;  %s16528_s4 = scalar_lea.hbm %s15104_s13, %s10173_s1 }
 0x437   : > { %v1934_v23 = vld [vmem:[#allocation2 + $0xc8] sm:$0xff]  ;;  %v11965_v25 = vpack.c.bf16 %v1930_v22, %v1927_v21  ;;  %v1933_v27 = vld [vmem:[#allocation2 + $0xc0] sm:$0xff]  ;;  %v1936_v28 = vld [vmem:[#allocation2 + $0xd8] sm:$0xff]  ;;  %s15714_s9 = scalar_lea.vmem %s16716_s6, %s13251_s16  ;;  %s16719_s6 = sld [smem:[#allocation94_spill]] }
 0x438   : > { %v11967_v26 = vpack.c.bf16 %v1937_v24, %v1934_v23  ;;  %v1940_v29 = vld [vmem:[#allocation2 + $0xf8] sm:$0xff]  ;;  %v1943_v30 = vld [vmem:[#allocation2 + $0x110] sm:$0xff]  ;;  %v11969_v31 = vpack.c.bf16 %v1936_v28, %v1933_v27  ;;  %v1942_v34 = vld [vmem:[#allocation2 + $0x108] sm:$0xff]  ;;  %s1902_s2 = scalar_lea.vmem %s16717_s26, %s10176_s12  ;;  %s14862_s16 = smov 96  }
 0x439   : > { %11958 = vmatpush1.bf16.msra.mxu0 %v11957_v13  ;;  %v11971_v32 = vpack.c.bf16 %v1943_v30, %v1940_v29  ;;  %v1939_v33 = vld [vmem:[#allocation2 + $0xf0] sm:$0xff]  ;;  %v1946_v35 = vld [vmem:[#allocation2 + $0x128] sm:$0xff]  ;;  %v1949_v36 = vld [vmem:[#allocation2 + $0x140] sm:$0xff]  ;;  %s14864_s26 = smov 32   ;;  %s16720_s12 = sld [smem:[#allocation100_spill]] }
 0x43a   : > { %11960 = vmatprep.subr.bf16.mxu0 %v11959_v14  ;;  %v11973_v37 = vpack.c.bf16 %v1942_v34, %v1939_v33  ;;  %v11975_v38 = vpack.c.bf16 %v1949_v36, %v1946_v35  ;;  %v1945_v39 = vld [vmem:[#allocation2 + $0x120] sm:$0xff]  ;;  %v1948_v40 = vld [vmem:[#allocation2 + $0x138] sm:$0xff]  ;;  %v1904_v41 = vld [vmem:[%s15714_s9 + $0x8] sm:$0xff]  ;;  %p16725_p12 = scmp.ne.s32.totalorder %s16687_s7, 0  ;;  %s14865_s22 = smov [#allocation59]  }
 0x43b   : > { %v1952_v42 = vld [vmem:[#allocation2 + $0x158] sm:$0xff]  ;;  %v1955_v43 = vld [vmem:[#allocation2 + $0x170] sm:$0xff]  ;;  %2278 = vmatprep.mubr.f32.mxu0 %v1904_v41  ;;  %2491 = vmatprep.mubr.f32.mxu1 %v1904_v41  ;;  %v1962_v45 = vld [vmem:[#allocation2 + $0x1a8] sm:$0xff]  ;;  %v11977_v46 = vpack.c.bf16 %v1948_v40, %v1945_v39  ;;  %s14629_s8 = sshll.u32 %s14865_s22, 4  ;;  %s14630_s8 = int_to_ptr.vmem [resolvable:$false] %s14629_s8 }
 0x43c   : > { %v1959_v44 = vld [vmem:[#allocation2 + $0x190] sm:$0xff]  ;;  %v1914_v50 = vld [vmem:[#allocation2 + $0x28] sm:$0xff]  ;;  %v11979_v51 = vpack.c.bf16 %v1955_v43, %v1952_v42  ;;  %v1961_v54 = vld [vmem:[#allocation2 + $0x1a0] sm:$0xff] }
 0x43d   : > { %11962 = vmatpush1.bf16.msra.mxu0 %v11961_v19  ;;  %v1951_v47 = vld [vmem:[#allocation2 + $0x150] sm:$0xff]  ;;  %v12143_v48 = vpack.c.bf16 %v1962_v45, %v1959_v44  ;;  %v1954_v52 = vld [vmem:[#allocation2 + $0x168] sm:$0xff]  ;;  %v1965_v56 = vld [vmem:[#allocation2 + $0x1c0] sm:$0xff] }
 0x43e   : > { %11964 = vmatprep.subr.bf16.mxu0 %v11963_v20  ;;  %v1911_v49 = vld [vmem:[#allocation2 + $0x10] sm:$0xff]  ;;  %v1958_v53 = vld [vmem:[#allocation2 + $0x188] sm:$0xff]  ;;  %v1968_v57 = vld [vmem:[#allocation2 + $0x1d8] sm:$0xff]  ;;  %v11981_v61 = vpack.c.bf16 %v1954_v52, %v1951_v47 }
 0x43f   : > { %v12145_v55 = vpack.c.bf16 %v1914_v50, %v1911_v49  ;;  %12144 = vmatprep.subr.bf16.mxu1 %v12143_v48  ;;  %v1917_v58 = vld [vmem:[#allocation2 + $0x40] sm:$0xff]  ;;  %v12147_v59 = vpack.c.bf16 %v1968_v57, %v1965_v56  ;;  %v1920_v60 = vld [vmem:[#allocation2 + $0x58] sm:$0xff]  ;;  %v1971_v1 = vld [vmem:[#allocation2 + $0x1f0] sm:$0xff]  ;;  %v11983_v2 = vpack.c.bf16 %v1961_v54, %v1958_v53 }
 0x440   : > { %v1957_v62 = vld [vmem:[#allocation2 + $0x180] sm:$0xff]  ;;  %v1960_v63 = vld [vmem:[#allocation2 + $0x198] sm:$0xff]  ;;  %v12149_v0 = vpack.c.bf16 %v1920_v60, %v1917_v58  ;;  %v1974_v3 = vld [vmem:[#allocation2 + $0x208] sm:$0xff] }
 0x441   : > { %11966 = vmatpush1.bf16.msra.mxu0 %v11965_v25  ;;  %12146 = vmatpush3.bf16.msra.mxu1 %v12145_v55  ;;  %v1923_v4 = vld [vmem:[#allocation2 + $0x70] sm:$0xff]  ;;  %v1926_v5 = vld [vmem:[#allocation2 + $0x88] sm:$0xff]  ;;  %v1964_v6 = vld [vmem:[#allocation2 + $0x1b8] sm:$0xff]  ;;  %v12151_v8 = vpack.c.bf16 %v1974_v3, %v1971_v1  ;;  %v11985_v12 = vpack.c.bf16 %v1960_v63, %v1957_v62 }
 0x442   : > { %11968 = vmatprep.subr.bf16.mxu0 %v11967_v26  ;;  %12148 = vmatprep.subr.bf16.mxu1 %v12147_v59  ;;  %v1967_v7 = vld [vmem:[#allocation2 + $0x1d0] sm:$0xff]  ;;  %v12153_v9 = vpack.c.bf16 %v1926_v5, %v1923_v4  ;;  %v1977_v10 = vld [vmem:[#allocation2 + $0x220] sm:$0xff]  ;;  %v1980_v11 = vld [vmem:[#allocation2 + $0x238] sm:$0xff] }
 0x443   : > { %v12155_v13 = vpack.c.bf16 %v1980_v11, %v1977_v10  ;;  %v1929_v14 = vld [vmem:[#allocation2 + $0xa0] sm:$0xff]  ;;  %v1932_v15 = vld [vmem:[#allocation2 + $0xb8] sm:$0xff]  ;;  %v11987_v16 = vpack.c.bf16 %v1967_v7, %v1964_v6  ;;  %v1963_v17 = vld [vmem:[#allocation2 + $0x1b0] sm:$0xff] }
 0x444   : > { %v1966_v18 = vld [vmem:[#allocation2 + $0x1c8] sm:$0xff]  ;;  %v1973_v20 = vld [vmem:[#allocation2 + $0x200] sm:$0xff]  ;;  %v1983_v21 = vld [vmem:[#allocation2 + $0x250] sm:$0xff]  ;;  %v12157_v23 = vpack.c.bf16 %v1932_v15, %v1929_v14 }
 0x445   : > { %11970 = vmatpush1.bf16.msra.mxu0 %v11969_v31  ;;  %12150 = vmatpush3.bf16.msra.mxu1 %v12149_v0  ;;  %v1970_v19 = vld [vmem:[#allocation2 + $0x1e8] sm:$0xff]  ;;  %v11989_v24 = vpack.c.bf16 %v1966_v18, %v1963_v17  ;;  %v1969_v25 = vld [vmem:[#allocation2 + $0x1e0] sm:$0xff]  ;;  %v1935_v27 = vld [vmem:[#allocation2 + $0xd0] sm:$0xff] }
 0x446   : > { %11972 = vmatprep.subr.bf16.mxu0 %v11971_v32  ;;  %12152 = vmatprep.subr.bf16.mxu1 %v12151_v8  ;;  %v1986_v22 = vld [vmem:[#allocation2 + $0x268] sm:$0xff]  ;;  %v11991_v29 = vpack.c.bf16 %v1973_v20, %v1970_v19  ;;  %v1972_v30 = vld [vmem:[#allocation2 + $0x1f8] sm:$0xff]  ;;  %v1989_v31 = vld [vmem:[#allocation2 + $0x280] sm:$0xff] }
 0x447   : > { %v12159_v26 = vpack.c.bf16 %v1986_v22, %v1983_v21  ;;  %v1938_v28 = vld [vmem:[#allocation2 + $0xe8] sm:$0xff]  ;;  %v1992_v32 = vld [vmem:[#allocation2 + $0x298] sm:$0xff]  ;;  %v1979_v34 = vld [vmem:[#allocation2 + $0x230] sm:$0xff]  ;;  %v11993_v36 = vpack.c.bf16 %v1972_v30, %v1969_v25 }
 0x448   : > { %v1976_v33 = vld [vmem:[#allocation2 + $0x218] sm:$0xff]  ;;  %v12161_v35 = vpack.c.bf16 %v1938_v28, %v1935_v27  ;;  %v1941_v39 = vld [vmem:[#allocation2 + $0x100] sm:$0xff]  ;;  %v1978_v42 = vld [vmem:[#allocation2 + $0x228] sm:$0xff] }
 0x449   : > { %11974 = vmatpush1.bf16.msra.mxu0 %v11973_v37  ;;  %12154 = vmatpush3.bf16.msra.mxu1 %v12153_v9  ;;  %v1975_v37 = vld [vmem:[#allocation2 + $0x210] sm:$0xff]  ;;  %v1944_v40 = vld [vmem:[#allocation2 + $0x118] sm:$0xff]  ;;  %v11995_v41 = vpack.c.bf16 %v1979_v34, %v1976_v33  ;;  %v1998_v44 = vld [vmem:[#allocation2 + $0x2c8] sm:$0xff] }
 0x44a   : > { %11976 = vmatprep.subr.bf16.mxu0 %v11975_v38  ;;  %12156 = vmatprep.subr.bf16.mxu1 %v12155_v13  ;;  %v12163_v38 = vpack.c.bf16 %v1992_v32, %v1989_v31  ;;  %v1995_v43 = vld [vmem:[#allocation2 + $0x2b0] sm:$0xff]  ;;  %v1982_v45 = vld [vmem:[#allocation2 + $0x248] sm:$0xff]  ;;  %v12165_v47 = vpack.c.bf16 %v1944_v40, %v1941_v39  ;;  %v11997_v48 = vpack.c.bf16 %v1978_v42, %v1975_v37  ;;  %v1981_v49 = vld [vmem:[#allocation2 + $0x240] sm:$0xff] }
 0x44b   : > { %v12167_v50 = vpack.c.bf16 %v1998_v44, %v1995_v43  ;;  %v1950_v52 = vld [vmem:[#allocation2 + $0x148] sm:$0xff]  ;;  %v1984_v54 = vld [vmem:[#allocation2 + $0x258] sm:$0xff]  ;;  %v2001_v55 = vld [vmem:[#allocation2 + $0x2e0] sm:$0xff] }
 0x44c   : > { %v2004_v56 = vld [vmem:[#allocation2 + $0x2f8] sm:$0xff]  ;;  %v1991_v58 = vld [vmem:[#allocation2 + $0x290] sm:$0xff]  ;;  %v12001_v60 = vpack.c.bf16 %v1984_v54, %v1981_v49  ;;  %v1953_v63 = vld [vmem:[#allocation2 + $0x160] sm:$0xff] }
 0x44d   : > { %11978 = vmatpush1.bf16.msra.mxu0 %v11977_v46  ;;  %12158 = vmatpush3.bf16.msra.mxu1 %v12157_v23  ;;  %v1985_v46 = vld [vmem:[#allocation2 + $0x260] sm:$0xff]  ;;  %v1988_v57 = vld [vmem:[#allocation2 + $0x278] sm:$0xff]  ;;  %v12171_v62 = vpack.c.bf16 %v2004_v56, %v2001_v55  ;;  %v2055_v3 = vld [vmem:[#allocation2 + $0x490] sm:$0xff] }
 0x44e   : > { %11980 = vmatprep.subr.bf16.mxu0 %v11979_v51  ;;  %12160 = vmatprep.subr.bf16.mxu1 %v12159_v26  ;;  %v1947_v51 = vld [vmem:[#allocation2 + $0x130] sm:$0xff]  ;;  %v11999_v53 = vpack.c.bf16 %v1985_v46, %v1982_v45  ;;  %v1956_v0 = vld [vmem:[#allocation2 + $0x178] sm:$0xff]  ;;  %v12003_v1 = vpack.c.bf16 %v1991_v58, %v1988_v57  ;;  %v2058_v4 = vld [vmem:[#allocation2 + $0x4a8] sm:$0xff] }
 0x44f   : > { %v12169_v59 = vpack.c.bf16 %v1950_v52, %v1947_v51  ;;  %v1994_v5 = vld [vmem:[#allocation2 + $0x2a8] sm:$0xff]  ;;  %v1997_v6 = vld [vmem:[#allocation2 + $0x2c0] sm:$0xff]  ;;  %v12173_v7 = vpack.c.bf16 %v1956_v0, %v1953_v63  ;;  %v12175_v10 = vpack.c.bf16 %v2058_v4, %v2055_v3  ;;  %v2007_v11 = vld [vmem:[#allocation2 + $0x310] sm:$0xff] }
 0x450   : > { %v1993_v9 = vld [vmem:[#allocation2 + $0x2a0] sm:$0xff]  ;;  %v12007_v13 = vpack.c.bf16 %v1997_v6, %v1994_v5  ;;  %v1996_v14 = vld [vmem:[#allocation2 + $0x2b8] sm:$0xff]  ;;  %v2003_v18 = vld [vmem:[#allocation2 + $0x2f0] sm:$0xff] }
 0x451   : > { %11982 = vmatpush1.bf16.msra.mxu0 %v11981_v61  ;;  %12162 = vmatpush3.bf16.msra.mxu1 %v12161_v35  ;;  %v1987_v61 = vld [vmem:[#allocation2 + $0x270] sm:$0xff]  ;;  %v2061_v15 = vld [vmem:[#allocation2 + $0x4c0] sm:$0xff]  ;;  %v2000_v17 = vld [vmem:[#allocation2 + $0x2d8] sm:$0xff]  ;;  %v12009_v21 = vpack.c.bf16 %v1996_v14, %v1993_v9 }
 0x452   : > { %11984 = vmatprep.subr.bf16.mxu0 %v11983_v2  ;;  %12164 = vmatprep.subr.bf16.mxu1 %v12163_v38  ;;  %v1990_v2 = vld [vmem:[#allocation2 + $0x288] sm:$0xff]  ;;  %v1999_v19 = vld [vmem:[#allocation2 + $0x2d0] sm:$0xff]  ;;  %v2016_v25 = vld [vmem:[#allocation2 + $0x358] sm:$0xff]  ;;  %v12011_v26 = vpack.c.bf16 %v2003_v18, %v2000_v17 }
 0x453   : > { %v12005_v8 = vpack.c.bf16 %v1990_v2, %v1987_v61  ;;  %v2002_v22 = vld [vmem:[#allocation2 + $0x2e8] sm:$0xff]  ;;  %v1903_v27 = vld [vmem:[%s15714_s9] sm:$0xff]  ;;  %v2067_v28 = vld [vmem:[#allocation2 + $0x4f0] sm:$0xff] }
 0x454   : > { %v2006_v30 = vld [vmem:[#allocation2 + $0x308] sm:$0xff]  ;;  %v2009_v31 = vld [vmem:[#allocation2 + $0x320] sm:$0xff]  ;;  %v12013_v33 = vpack.c.bf16 %v2002_v22, %v1999_v19  ;;  %v2008_v39 = vld [vmem:[#allocation2 + $0x318] sm:$0xff] }
 0x455   : > { %11986 = vmatpush1.bf16.msra.mxu0 %v11985_v12  ;;  %12166 = vmatpush3.bf16.msra.mxu1 %v12165_v47  ;;  %v2010_v12 = vld [vmem:[#allocation2 + $0x328] sm:$0xff]  ;;  %v2005_v34 = vld [vmem:[#allocation2 + $0x300] sm:$0xff]  ;;  %v12015_v38 = vpack.c.bf16 %v2009_v31, %v2006_v30  ;;  %v2012_v42 = vld [vmem:[#allocation2 + $0x338] sm:$0xff] }
 0x456   : > { %11988 = vmatprep.subr.bf16.mxu0 %v11987_v16  ;;  %12168 = vmatprep.subr.bf16.mxu1 %v12167_v50  ;;  %v2064_v16 = vld [vmem:[#allocation2 + $0x4d8] sm:$0xff]  ;;  %v12177_v20 = vpack.c.bf16 %v2010_v12, %v2007_v11  ;;  %v2022_v37 = vld [vmem:[#allocation2 + $0x388] sm:$0xff]  ;;  %v2073_v40 = vld [vmem:[#allocation2 + $0x520] sm:$0xff]  ;;  %v12017_v46 = vpack.c.bf16 %v2008_v39, %v2005_v34 }
 0x457   : > { %v12179_v23 = vpack.c.bf16 %v2064_v16, %v2061_v15  ;;  %v2015_v43 = vld [vmem:[#allocation2 + $0x350] sm:$0xff]  ;;  %v2028_v49 = vld [vmem:[#allocation2 + $0x3b8] sm:$0xff]  ;;  %v2014_v52 = vld [vmem:[#allocation2 + $0x348] sm:$0xff] }
 0x458   : > { %v2011_v44 = vld [vmem:[#allocation2 + $0x330] sm:$0xff]  ;;  %v1906_v50 = vld [vmem:[%s15714_s9 + $0x18] sm:$0xff]  ;;  %v12019_v51 = vpack.c.bf16 %v2015_v43, %v2012_v42  ;;  %v2082_v54 = vld [vmem:[#allocation2 + $0x568] sm:$0xff] }
 0x459   : > { %11990 = vmatpush1.bf16.msra.mxu0 %v11989_v24  ;;  %12170 = vmatpush3.bf16.msra.mxu1 %v12169_v59  ;;  %v2013_v24 = vld [vmem:[#allocation2 + $0x340] sm:$0xff]  ;;  %v2018_v55 = vld [vmem:[#allocation2 + $0x368] sm:$0xff]  ;;  %v12021_v58 = vpack.c.bf16 %v2014_v52, %v2011_v44  ;;  %v2031_v61 = vld [vmem:[#allocation2 + $0x3d0] sm:$0xff] }
 0x45a   : > { %11992 = vmatprep.subr.bf16.mxu0 %v11991_v29  ;;  %12172 = vmatprep.subr.bf16.mxu1 %v12171_v62  ;;  %v2070_v29 = vld [vmem:[#allocation2 + $0x508] sm:$0xff]  ;;  %v12181_v32 = vpack.c.bf16 %v2016_v25, %v2013_v24  ;;  %v2021_v56 = vld [vmem:[#allocation2 + $0x380] sm:$0xff]  ;;  %v2020_v0 = vld [vmem:[#allocation2 + $0x378] sm:$0xff] }
 0x45b   : > { %v12183_v35 = vpack.c.bf16 %v2070_v29, %v2067_v28  ;;  %v2017_v59 = vld [vmem:[#allocation2 + $0x360] sm:$0xff]  ;;  %v2034_v62 = vld [vmem:[#allocation2 + $0x3e8] sm:$0xff]  ;;  %v12023_v63 = vpack.c.bf16 %v2021_v56, %v2018_v55  ;;  %v2088_v2 = vld [vmem:[#allocation2 + $0x598] sm:$0xff] }
 0x45c   : > { %v2024_v3 = vld [vmem:[#allocation2 + $0x398] sm:$0xff]  ;;  %v2027_v4 = vld [vmem:[#allocation2 + $0x3b0] sm:$0xff]  ;;  %v12193_v5 = vpack.c.bf16 %v2034_v62, %v2031_v61  ;;  %v12025_v6 = vpack.c.bf16 %v2020_v0, %v2017_v59  ;;  %v2037_v9 = vld [vmem:[#allocation2 + $0x400] sm:$0xff] }
 0x45d   : > { %11994 = vmatpush1.bf16.msra.mxu0 %v11993_v36  ;;  %12174 = vmatpush3.bf16.msra.mxu1 %v12173_v7  ;;  %v2019_v36 = vld [vmem:[#allocation2 + $0x370] sm:$0xff]  ;;  %v12027_v11 = vpack.c.bf16 %v2027_v4, %v2024_v3  ;;  %v2026_v12 = vld [vmem:[#allocation2 + $0x3a8] sm:$0xff]  ;;  %v2033_v16 = vld [vmem:[#allocation2 + $0x3e0] sm:$0xff] }
 0x45e   : > { %11996 = vmatprep.subr.bf16.mxu0 %v11995_v41  ;;  %12176 = vmatprep.subr.bf16.mxu1 %v12175_v10  ;;  %v2076_v41 = vld [vmem:[#allocation2 + $0x538] sm:$0xff]  ;;  %v12185_v45 = vpack.c.bf16 %v2022_v37, %v2019_v36  ;;  %v2023_v7 = vld [vmem:[#allocation2 + $0x390] sm:$0xff]  ;;  %v2094_v14 = vld [vmem:[#allocation2 + $0x5c8] sm:$0xff] }
 0x45f   : > { %v12187_v47 = vpack.c.bf16 %v2076_v41, %v2073_v40  ;;  %v2040_v10 = vld [vmem:[#allocation2 + $0x418] sm:$0xff]  ;;  %v2030_v15 = vld [vmem:[#allocation2 + $0x3c8] sm:$0xff]  ;;  %v12029_v18 = vpack.c.bf16 %v2026_v12, %v2023_v7  ;;  %v2029_v19 = vld [vmem:[#allocation2 + $0x3c0] sm:$0xff] }
 0x460   : > { %2492 = vmatmul.mubr.f32.vlgmr.msra.gmra.mrb[0].mxu1 %v1903_v27  ;;  %v12197_v17 = vpack.c.bf16 %v2040_v10, %v2037_v9  ;;  %v2046_v22 = vld [vmem:[#allocation2 + $0x448] sm:$0xff]  ;;  %v2032_v24 = vld [vmem:[#allocation2 + $0x3d8] sm:$0xff]  ;;  %v2097_v25 = vld [vmem:[#allocation2 + $0x5e0] sm:$0xff] }
 0x461   : > { %11998 = vmatpush1.bf16.msra.mxu0 %v11997_v48  ;;  %12178 = vmatpush3.bf16.msra.mxu1 %v12177_v20  ;;  %v2025_v48 = vld [vmem:[#allocation2 + $0x3a0] sm:$0xff]  ;;  %v2039_v28 = vld [vmem:[#allocation2 + $0x410] sm:$0xff]  ;;  %v12033_v30 = vpack.c.bf16 %v2032_v24, %v2029_v19  ;;  %v2052_v34 = vld [vmem:[#allocation2 + $0x478] sm:$0xff] }
 0x462   : > { %12000 = vmatprep.subr.bf16.mxu0 %v11999_v53  ;;  %12180 = vmatprep.subr.bf16.mxu1 %v12179_v23  ;;  %v2079_v53 = vld [vmem:[#allocation2 + $0x550] sm:$0xff]  ;;  %v12189_v57 = vpack.c.bf16 %v2028_v49, %v2025_v48  ;;  %v12031_v23 = vpack.c.bf16 %v2033_v16, %v2030_v15  ;;  %v2038_v36 = vld [vmem:[#allocation2 + $0x408] sm:$0xff]  ;;  %v2045_v40 = vld [vmem:[#allocation2 + $0x440] sm:$0xff] }
 0x463   : > { %2561 = vmatprep.mubr.f32.mxu1 %v1906_v50  ;;  %v2035_v31 = vld [vmem:[#allocation2 + $0x3f0] sm:$0xff]  ;;  %v2042_v39 = vld [vmem:[#allocation2 + $0x428] sm:$0xff]  ;;  %v2041_v43 = vld [vmem:[#allocation2 + $0x420] sm:$0xff] }
 0x464   : > { %v2151_v37 = vld [vmem:[#allocation2 + $0x790] sm:$0xff]  ;;  %v12037_v42 = vpack.c.bf16 %v2038_v36, %v2035_v31  ;;  %v2044_v48 = vld [vmem:[#allocation2 + $0x438] sm:$0xff]  ;;  %v2157_v49 = vld [vmem:[#allocation2 + $0x7c0] sm:$0xff] }
 0x465   : > { %12002 = vmatpush1.bf16.msra.mxu0 %v12001_v60  ;;  %12182 = vmatpush3.bf16.msra.mxu1 %v12181_v32  ;;  %v12191_v60 = vpack.c.bf16 %v2082_v54, %v2079_v53  ;;  %v2051_v52 = vld [vmem:[#allocation2 + $0x470] sm:$0xff]  ;;  %v2050_v54 = vld [vmem:[#allocation2 + $0x468] sm:$0xff]  ;;  %v12041_v56 = vpack.c.bf16 %v2044_v48, %v2041_v43  ;;  %v2112_v59 = vld [vmem:[#allocation2 + $0x658] sm:$0xff] }
 0x466   : > { %12004 = vmatprep.subr.bf16.mxu0 %v12003_v1  ;;  %12184 = vmatprep.subr.bf16.mxu1 %v12183_v35  ;;  %v2085_v1 = vld [vmem:[#allocation2 + $0x580] sm:$0xff]  ;;  %v2047_v53 = vld [vmem:[#allocation2 + $0x450] sm:$0xff]  ;;  %v2166_v0 = vld [vmem:[#allocation2 + $0x808] sm:$0xff] }
 0x467   : > { %v15723_v62 = vld [vmem:[%s15714_s9 + $0x10] sm:$0xff]  ;;  %v12045_v4 = vpack.c.bf16 %v2050_v54, %v2047_v53  ;;  %v2056_v10 = vld [vmem:[#allocation2 + $0x498] sm:$0xff]  ;;  %v2121_v19 = vld [vmem:[#allocation2 + $0x6a0] sm:$0xff] }
 0x468   : > { %v2115_v7 = vld [vmem:[#allocation2 + $0x670] sm:$0xff]  ;;  %v2172_v12 = vld [vmem:[#allocation2 + $0x838] sm:$0xff]  ;;  %v2178_v24 = vld [vmem:[#allocation2 + $0x868] sm:$0xff] }
 0x469   : > { %12006 = vmatpush1.bf16.msra.mxu0 %v12005_v8  ;;  %12186 = vmatpush3.bf16.msra.mxu1 %v12185_v45  ;;  %v12195_v8 = vpack.c.bf16 %v2088_v2, %v2085_v1  ;;  %v2103_v45 = vld [vmem:[#allocation2 + $0x610] sm:$0xff]  ;;  %v2054_v1 = vld [vmem:[#allocation2 + $0x488] sm:$0xff]  ;;  %v2057_v2 = vld [vmem:[#allocation2 + $0x4a0] sm:$0xff] }
 0x46a   : > { %12008 = vmatprep.subr.bf16.mxu0 %v12007_v13  ;;  %12188 = vmatprep.subr.bf16.mxu1 %v12187_v47  ;;  %v2091_v13 = vld [vmem:[#allocation2 + $0x5b0] sm:$0xff]  ;;  %v12039_v47 = vpack.c.bf16 %v2045_v40, %v2042_v39  ;;  %v12047_v9 = vpack.c.bf16 %v2057_v2, %v2054_v1  ;;  %v2184_v36 = vld [vmem:[#allocation2 + $0x898] sm:$0xff]  ;;  %v2133_v43 = vld [vmem:[#allocation2 + $0x700] sm:$0xff] }
 0x46b   : > { %v12199_v20 = vpack.c.bf16 %v2094_v14, %v2091_v13  ;;  %v2060_v13 = vld [vmem:[#allocation2 + $0x4b8] sm:$0xff]  ;;  %v2063_v14 = vld [vmem:[#allocation2 + $0x4d0] sm:$0xff]  ;;  %v2190_v48 = vld [vmem:[#allocation2 + $0x8c8] sm:$0xff] }
 0x46c   : > { %v2127_v31 = vld [vmem:[#allocation2 + $0x6d0] sm:$0xff]  ;;  %v2077_v53 = vld [vmem:[#allocation2 + $0x540] sm:$0xff] }
 0x46d   : > { %12010 = vmatpush1.bf16.msra.mxu0 %v12009_v21  ;;  %12190 = vmatpush3.bf16.msra.mxu1 %v12189_v57  ;;  %v2043_v21 = vld [vmem:[#allocation2 + $0x430] sm:$0xff] }
 0x46e   : > { %12012 = vmatprep.subr.bf16.mxu0 %v12011_v26  ;;  %12192 = vmatprep.subr.bf16.mxu1 %v12191_v60  ;;  %v2100_v26 = vld [vmem:[#allocation2 + $0x5f8] sm:$0xff]  ;;  %v12201_v29 = vpack.c.bf16 %v2046_v22, %v2043_v21  ;;  %v15720_v60 = vld [vmem:[%s15714_s9 + $0x28] sm:$0xff]  ;;  %v12051_v21 = vpack.c.bf16 %v2063_v14, %v2060_v13  ;;  %v2089_v14 = vld [vmem:[#allocation2 + $0x5a0] sm:$0xff] }
 0x46f   : > { %v12203_v32 = vpack.c.bf16 %v2100_v26, %v2097_v25  ;;  %v2062_v22 = vld [vmem:[#allocation2 + $0x4c8] sm:$0xff]  ;;  %v2069_v26 = vld [vmem:[#allocation2 + $0x500] sm:$0xff] }
 0x470   : > { %v2066_v25 = vld [vmem:[#allocation2 + $0x4e8] sm:$0xff] }
 0x471   : > { %12014 = vmatpush1.bf16.msra.mxu0 %v12013_v33  ;;  %12194 = vmatpush3.bf16.msra.mxu1 %v12193_v5  ;;  %v2049_v33 = vld [vmem:[#allocation2 + $0x460] sm:$0xff] }
 0x472   : > { %12016 = vmatprep.subr.bf16.mxu0 %v12015_v38  ;;  %12196 = vmatprep.subr.bf16.mxu1 %v12195_v8  ;;  %v2154_v38 = vld [vmem:[#allocation2 + $0x7a8] sm:$0xff]  ;;  %v12205_v41 = vpack.c.bf16 %v2052_v34, %v2049_v33  ;;  %v2053_v5 = vld [vmem:[#allocation2 + $0x480] sm:$0xff]  ;;  %v12055_v33 = vpack.c.bf16 %v2069_v26, %v2066_v25  ;;  %v2068_v34 = vld [vmem:[#allocation2 + $0x4f8] sm:$0xff] }
 0x473   : > { %v12207_v44 = vpack.c.bf16 %v2154_v38, %v2151_v37  ;;  %v2118_v8 = vld [vmem:[#allocation2 + $0x688] sm:$0xff]  ;;  %v12049_v16 = vpack.c.bf16 %v2056_v10, %v2053_v5  ;;  %v2072_v37 = vld [vmem:[#allocation2 + $0x518] sm:$0xff]  ;;  %v2075_v38 = vld [vmem:[#allocation2 + $0x530] sm:$0xff] }
 0x474   : > { %2279 = vmatmul.mubr.f32.vlgmr.msra.gmra.mrb[0].mxu0 %v1903_v27  ;;  %v2036_v27 = vld [vmem:[#allocation2 + $0x3f8] sm:$0xff]  ;;  %v12217_v15 = vpack.c.bf16 %v2118_v8, %v2115_v7  ;;  %v2083_v7 = vld [vmem:[#allocation2 + $0x570] sm:$0xff]  ;;  %v2086_v8 = vld [vmem:[#allocation2 + $0x588] sm:$0xff] }
 0x475   : > { %12018 = vmatpush1.bf16.msra.mxu0 %v12017_v46  ;;  %2349 = vmatprep.mubr.f32.mxu0 %v1906_v50  ;;  %v12035_v35 = vpack.c.bf16 %v2039_v28, %v2036_v27  ;;  %v2106_v46 = vld [vmem:[#allocation2 + $0x628] sm:$0xff]  ;;  %v2160_v50 = vld [vmem:[#allocation2 + $0x7d8] sm:$0xff]  ;;  %v2093_v10 = vld [vmem:[#allocation2 + $0x5c0] sm:$0xff] }
 0x476   : > { %12020 = vmatprep.subr.bf16.mxu0 %v12019_v51  ;;  %12198 = vmatpush3.bf16.msra.mxu1 %v12197_v17  ;;  %v2048_v51 = vld [vmem:[#allocation2 + $0x458] sm:$0xff]  ;;  %v12209_v55 = vpack.c.bf16 %v2106_v46, %v2103_v45  ;;  %v12211_v57 = vpack.c.bf16 %v2160_v50, %v2157_v49  ;;  %v2059_v17 = vld [vmem:[#allocation2 + $0x4b0] sm:$0xff]  ;;  %v12059_v45 = vpack.c.bf16 %v2075_v38, %v2072_v37  ;;  %v2074_v46 = vld [vmem:[#allocation2 + $0x528] sm:$0xff] }
 0x477   : > { %12200 = vmatprep.subr.bf16.mxu1 %v12199_v20  ;;  %v12043_v61 = vpack.c.bf16 %v2051_v52, %v2048_v51  ;;  %v2124_v20 = vld [vmem:[#allocation2 + $0x6b8] sm:$0xff]  ;;  %v12053_v28 = vpack.c.bf16 %v2062_v22, %v2059_v17  ;;  %v2078_v49 = vld [vmem:[#allocation2 + $0x548] sm:$0xff]  ;;  %v2081_v50 = vld [vmem:[#allocation2 + $0x560] sm:$0xff] }
 0x478   : > { %v12221_v27 = vpack.c.bf16 %v2124_v20, %v2121_v19  ;;  %v2148_v5 = vld [vmem:[#allocation2 + $0x778] sm:$0xff]  ;;  %v2099_v17 = vld [vmem:[#allocation2 + $0x5f0] sm:$0xff]  ;;  %v2098_v22 = vld [vmem:[#allocation2 + $0x5e8] sm:$0xff] }
 0x479   : > { %12022 = vmatpush1.bf16.msra.mxu0 %v12021_v58  ;;  %v2109_v58 = vld [vmem:[#allocation2 + $0x640] sm:$0xff] }
 0x47a   : > { %12024 = vmatprep.subr.bf16.mxu0 %v12023_v63  ;;  %12202 = vmatpush3.bf16.msra.mxu1 %v12201_v29  ;;  %v2163_v63 = vld [vmem:[#allocation2 + $0x7f0] sm:$0xff]  ;;  %v12213_v3 = vpack.c.bf16 %v2112_v59, %v2109_v58  ;;  %v2065_v29 = vld [vmem:[#allocation2 + $0x4e0] sm:$0xff]  ;;  %v2080_v58 = vld [vmem:[#allocation2 + $0x558] sm:$0xff] }
 0x47b   : > { %12204 = vmatprep.subr.bf16.mxu1 %v12203_v32  ;;  %v2130_v32 = vld [vmem:[#allocation2 + $0x6e8] sm:$0xff]  ;;  %v12057_v40 = vpack.c.bf16 %v2068_v34, %v2065_v29  ;;  %v2193_v59 = vld [vmem:[#allocation2 + $0x8e0] sm:$0xff]  ;;  %v12065_v2 = vpack.c.bf16 %v2080_v58, %v2077_v53  ;;  %v2108_v29 = vld [vmem:[#allocation2 + $0x638] sm:$0xff] }
 0x47c   : > { %v12225_v39 = vpack.c.bf16 %v2130_v32, %v2127_v31  ;;  %v2110_v34 = vld [vmem:[#allocation2 + $0x648] sm:$0xff]  ;;  %v2141_v58 = vld [vmem:[#allocation2 + $0x740] sm:$0xff] }
 0x47d   : > { %12026 = vmatpush1.bf16.msra.mxu0 %v12025_v6  ;;  %v12215_v6 = vpack.c.bf16 %v2166_v0, %v2163_v63  ;;  %v2084_v63 = vld [vmem:[#allocation2 + $0x578] sm:$0xff]  ;;  %v2087_v0 = vld [vmem:[#allocation2 + $0x590] sm:$0xff] }
 0x47e   : > { %12028 = vmatprep.subr.bf16.mxu0 %v12027_v11  ;;  %12206 = vmatpush3.bf16.msra.mxu1 %v12205_v41  ;;  %v2169_v11 = vld [vmem:[#allocation2 + $0x820] sm:$0xff]  ;;  %v2071_v41 = vld [vmem:[#allocation2 + $0x510] sm:$0xff] }
 0x47f   : > { %12208 = vmatprep.subr.bf16.mxu1 %v12207_v44  ;;  %v2136_v44 = vld [vmem:[#allocation2 + $0x718] sm:$0xff]  ;;  %v12061_v52 = vpack.c.bf16 %v2074_v46, %v2071_v41  ;;  %v2122_v46 = vld [vmem:[#allocation2 + $0x6a8] sm:$0xff] }
 0x480   : > { %v12229_v51 = vpack.c.bf16 %v2136_v44, %v2133_v43  ;;  %v2120_v41 = vld [vmem:[#allocation2 + $0x698] sm:$0xff] }
 0x481   : > { %12030 = vmatpush1.bf16.msra.mxu0 %v12029_v18  ;;  %2562 = vmatmul.mubr.f32.vlgmr.msra.gmra.mrb[2].mxu1 %v15723_v62  ;;  %v12219_v18 = vpack.c.bf16 %v2172_v12, %v2169_v11  ;;  %v12069_v12 = vpack.c.bf16 %v2086_v8, %v2083_v7  ;;  %v2150_v7 = vld [vmem:[#allocation2 + $0x788] sm:$0xff]  ;;  %v2153_v8 = vld [vmem:[#allocation2 + $0x7a0] sm:$0xff] }
 0x482   : > { %12032 = vmatprep.subr.bf16.mxu0 %v12031_v23  ;;  %12210 = vmatpush3.bf16.msra.mxu1 %v12209_v55  ;;  %v2175_v23 = vld [vmem:[#allocation2 + $0x850] sm:$0xff] }
 0x483   : > { %2631 = vmatprep.mubr.f32.mxu1 %v15720_v60  ;;  %12212 = vmatprep.subr.bf16.mxu1 %v12211_v57  ;;  %v2139_v55 = vld [vmem:[#allocation2 + $0x730] sm:$0xff]  ;;  %v12063_v57 = vpack.c.bf16 %v2081_v50, %v2078_v49  ;;  %v2125_v50 = vld [vmem:[#allocation2 + $0x6c0] sm:$0xff] }
 0x485   : > { %12034 = vmatpush1.bf16.msra.mxu0 %v12033_v30  ;;  %v12223_v30 = vpack.c.bf16 %v2178_v24, %v2175_v23  ;;  %v2102_v23 = vld [vmem:[#allocation2 + $0x608] sm:$0xff]  ;;  %v2105_v24 = vld [vmem:[#allocation2 + $0x620] sm:$0xff] }
 0x486   : > { %12036 = vmatprep.subr.bf16.mxu0 %v12035_v35  ;;  %12214 = vmatpush3.bf16.msra.mxu1 %v12213_v3  ;;  %v2181_v35 = vld [vmem:[#allocation2 + $0x880] sm:$0xff]  ;;  %v12079_v26 = vpack.c.bf16 %v2105_v24, %v2102_v23 }
 0x487   : > { %12216 = vmatprep.subr.bf16.mxu1 %v12215_v6  ;;  %v12067_v6 = vpack.c.bf16 %v2087_v0, %v2084_v63  ;;  %v2137_v63 = vld [vmem:[#allocation2 + $0x720] sm:$0xff]  ;;  %v2140_v0 = vld [vmem:[#allocation2 + $0x738] sm:$0xff] }
 0x488   : > { %v2161_v24 = vld [vmem:[#allocation2 + $0x7e0] sm:$0xff] }
 0x489   : > { %12038 = vmatpush1.bf16.msra.mxu0 %v12037_v42  ;;  %v12227_v42 = vpack.c.bf16 %v2184_v36, %v2181_v35  ;;  %v2114_v35 = vld [vmem:[#allocation2 + $0x668] sm:$0xff]  ;;  %v2117_v36 = vld [vmem:[#allocation2 + $0x680] sm:$0xff] }
 0x48a   : > { %12040 = vmatprep.subr.bf16.mxu0 %v12039_v47  ;;  %12218 = vmatpush3.bf16.msra.mxu1 %v12217_v15  ;;  %v2187_v47 = vld [vmem:[#allocation2 + $0x8b0] sm:$0xff]  ;;  %v2092_v15 = vld [vmem:[#allocation2 + $0x5b8] sm:$0xff]  ;;  %v12087_v38 = vpack.c.bf16 %v2117_v36, %v2114_v35  ;;  %v2173_v36 = vld [vmem:[#allocation2 + $0x840] sm:$0xff] }
 0x48b   : > { %12220 = vmatprep.subr.bf16.mxu1 %v12219_v18  ;;  %v12231_v54 = vpack.c.bf16 %v2190_v48, %v2187_v47  ;;  %v15728_v18 = vld [vmem:[%s15714_s9 + $0x20] sm:$0xff]  ;;  %v12073_v19 = vpack.c.bf16 %v2092_v15, %v2089_v14  ;;  %v2126_v47 = vld [vmem:[#allocation2 + $0x6c8] sm:$0xff]  ;;  %v2159_v14 = vld [vmem:[#allocation2 + $0x7d0] sm:$0xff]  ;;  %s14863_s9 = smov 64  }
 0x48c   : > { %v2129_v48 = vld [vmem:[#allocation2 + $0x6e0] sm:$0xff] }
 0x48d   : > { %12042 = vmatpush1.bf16.msra.mxu0 %v12041_v56  ;;  %v2142_v56 = vld [vmem:[#allocation2 + $0x748] sm:$0xff]  ;;  %v12095_v49 = vpack.c.bf16 %v2129_v48, %v2126_v47  ;;  %v2185_v48 = vld [vmem:[#allocation2 + $0x8a0] sm:$0xff] }
 0x48e   : > { %12044 = vmatprep.subr.bf16.mxu0 %v12043_v61  ;;  %12222 = vmatpush3.bf16.msra.mxu1 %v12221_v27  ;;  %v2196_v61 = vld [vmem:[#allocation2 + $0x8f8] sm:$0xff]  ;;  %v12233_v1 = vpack.c.bf16 %v2142_v56, %v2139_v55  ;;  %v2101_v27 = vld [vmem:[#allocation2 + $0x600] sm:$0xff]  ;;  %v2131_v55 = vld [vmem:[#allocation2 + $0x6f0] sm:$0xff] }
 0x48f   : > { %12224 = vmatprep.subr.bf16.mxu1 %v12223_v30  ;;  %v12235_v3 = vpack.c.bf16 %v2196_v61, %v2193_v59  ;;  %v2111_v30 = vld [vmem:[#allocation2 + $0x650] sm:$0xff]  ;;  %v2134_v56 = vld [vmem:[#allocation2 + $0x708] sm:$0xff] }
 0x490   : > { %v12083_v32 = vpack.c.bf16 %v2111_v30, %v2108_v29  ;;  %v12101_v59 = vpack.c.bf16 %v2134_v56, %v2131_v55  ;;  %v2167_v30 = vld [vmem:[#allocation2 + $0x810] sm:$0xff]  ;;  %v2835_v56 = vld [vmem:[%s1902_s2] sm:$0xff] }
 0x491   : > { %12046 = vmatpush1.bf16.msra.mxu0 %v12045_v4  ;;  %v2145_v4 = vld [vmem:[#allocation2 + $0x760] sm:$0xff]  ;;  %v2837_v55 = vld [vmem:[#allocation11] sm:$0x1f] }
 0x492   : > { %12048 = vmatprep.subr.bf16.mxu0 %v12047_v9  ;;  %12226 = vmatpush3.bf16.msra.mxu1 %v12225_v39  ;;  %v2090_v9 = vld [vmem:[#allocation2 + $0x5a8] sm:$0xff]  ;;  %v12237_v11 = vpack.c.bf16 %v2148_v5, %v2145_v4  ;;  %v2113_v39 = vld [vmem:[#allocation2 + $0x660] sm:$0xff]  ;;  %v2143_v5 = vld [vmem:[#allocation2 + $0x750] sm:$0xff] }
 0x493   : > { %12228 = vmatprep.subr.bf16.mxu1 %v12227_v42  ;;  %v12071_v13 = vpack.c.bf16 %v2093_v10, %v2090_v9  ;;  %v2123_v42 = vld [vmem:[#allocation2 + $0x6b0] sm:$0xff]  ;;  %v12111_v10 = vpack.c.bf16 %v2153_v8, %v2150_v7  ;;  %v2660_v7 = vld [vmem:[#allocation7 + $0xa0] sm:$0xff] }
 0x494   : > { %v12091_v44 = vpack.c.bf16 %v2123_v42, %v2120_v41  ;;  %v2179_v42 = vld [vmem:[#allocation2 + $0x870] sm:$0xff] }
 0x495   : > { %12050 = vmatpush1.bf16.msra.mxu0 %v12049_v16  ;;  %v2096_v16 = vld [vmem:[#allocation2 + $0x5d8] sm:$0xff]  ;;  %v2661_v8 = vld [vmem:[#allocation7 + $0xa8] sm:$0xff] }
 0x496   : > { %12052 = vmatprep.subr.bf16.mxu0 %v12051_v21  ;;  %12230 = vmatpush3.bf16.msra.mxu1 %v12229_v51  ;;  %v12075_v20 = vpack.c.bf16 %v2099_v17, %v2096_v16  ;;  %v2095_v21 = vld [vmem:[#allocation2 + $0x5d0] sm:$0xff]  ;;  %v2132_v51 = vld [vmem:[#allocation2 + $0x6f8] sm:$0xff] }
 0x497   : > { %12232 = vmatprep.subr.bf16.mxu1 %v12231_v54  ;;  %v12077_v25 = vpack.c.bf16 %v2098_v22, %v2095_v21  ;;  %v2155_v17 = vld [vmem:[#allocation2 + $0x7b0] sm:$0xff]  ;;  %v2165_v21 = vld [vmem:[#allocation2 + $0x800] sm:$0xff] }
 0x499   : > { %12054 = vmatpush1.bf16.msra.mxu0 %v12053_v28  ;;  %v2104_v28 = vld [vmem:[#allocation2 + $0x618] sm:$0xff] }
 0x49a   : > { %12056 = vmatprep.subr.bf16.mxu0 %v12055_v33  ;;  %12234 = vmatpush3.bf16.msra.mxu1 %v12233_v1  ;;  %v12081_v31 = vpack.c.bf16 %v2104_v28, %v2101_v27  ;;  %v2107_v33 = vld [vmem:[#allocation2 + $0x630] sm:$0xff]  ;;  %v2144_v1 = vld [vmem:[#allocation2 + $0x758] sm:$0xff] }
 0x49b   : > { %12236 = vmatprep.subr.bf16.mxu1 %v12235_v3  ;;  %v12085_v37 = vpack.c.bf16 %v2110_v34, %v2107_v33  ;;  %v12105_v3 = vpack.c.bf16 %v2140_v0, %v2137_v63  ;;  %v2171_v27 = vld [vmem:[#allocation2 + $0x830] sm:$0xff]  ;;  %v2177_v33 = vld [vmem:[#allocation2 + $0x860] sm:$0xff] }
 0x49c   : > { %v2641_v0 = vld [vmem:[#allocation7 + $0x8] sm:$0xff] }
 0x49d   : > { %12058 = vmatpush1.bf16.msra.mxu0 %v12057_v40  ;;  %v2116_v40 = vld [vmem:[#allocation2 + $0x678] sm:$0xff] }
 0x49e   : > { %12060 = vmatprep.subr.bf16.mxu0 %v12059_v45  ;;  %12238 = vmatpush3.bf16.msra.mxu1 %v12237_v11  ;;  %v12089_v43 = vpack.c.bf16 %v2116_v40, %v2113_v39  ;;  %v2119_v45 = vld [vmem:[#allocation2 + $0x690] sm:$0xff]  ;;  %v2149_v11 = vld [vmem:[#allocation2 + $0x780] sm:$0xff] }
 0x49f   : > { %v2183_v39 = vld [vmem:[#allocation2 + $0x890] sm:$0xff] }
 0x4a1   : > { %12062 = vmatpush1.bf16.msra.mxu0 %v12061_v52  ;;  %2632 = vmatmul.mubr.f32.vlgmr.msra.gmra.mrb[4].mxu1 %v15728_v18  ;;  %v2135_v52 = vld [vmem:[#allocation2 + $0x710] sm:$0xff] }
 0x4a2   : > { %12064 = vmatprep.subr.bf16.mxu0 %v12063_v57  ;;  %v12099_v54 = vpack.c.bf16 %v2135_v52, %v2132_v51  ;;  %v2138_v57 = vld [vmem:[#allocation2 + $0x728] sm:$0xff]  ;;  %v2191_v52 = vld [vmem:[#allocation2 + $0x8d0] sm:$0xff] }
 0x4a3   : > { %v12103_v61 = vpack.c.bf16 %v2141_v58, %v2138_v57  ;;  %v2836_v57 = vld [vmem:[%s1902_s2 + $0x8] sm:$0xff]  ;;  %s16721_s2 = sld [smem:[#allocation102_spill]] }
 0x4a4   : > { %v2656_v58 = vld [vmem:[#allocation7 + $0x80] sm:$0xff] }
 0x4a5   : > { %12066 = vmatpush1.bf16.msra.mxu0 %v12065_v2  ;;  %v2147_v2 = vld [vmem:[#allocation2 + $0x770] sm:$0xff] }
 0x4a6   : > { %12068 = vmatprep.subr.bf16.mxu0 %v12067_v6  ;;  %v12107_v4 = vpack.c.bf16 %v2147_v2, %v2144_v1  ;;  %v2146_v6 = vld [vmem:[#allocation2 + $0x768] sm:$0xff]  ;;  %v2658_v1 = vld [vmem:[#allocation7 + $0x90] sm:$0xff]  ;;  %v2659_v2 = vld [vmem:[#allocation7 + $0x98] sm:$0xff] }
 0x4a7   : > { %v12109_v9 = vpack.c.bf16 %v2146_v6, %v2143_v5  ;;  %v2642_v5 = vld [vmem:[#allocation7 + $0x10] sm:$0xff]  ;;  %v2643_v6 = vld [vmem:[#allocation7 + $0x18] sm:$0xff] }
 0x4a9   : > { %12070 = vmatpush1.bf16.msra.mxu0 %v12069_v12  ;;  %v2152_v12 = vld [vmem:[#allocation2 + $0x798] sm:$0xff] }
 0x4aa   : > { %12072 = vmatprep.subr.bf16.mxu0 %v12071_v13  ;;  %v2156_v13 = vld [vmem:[#allocation2 + $0x7b8] sm:$0xff]  ;;  %v12113_v15 = vpack.c.bf16 %v2152_v12, %v2149_v11  ;;  %v2645_v11 = vld [vmem:[#allocation7 + $0x28] sm:$0xff] }
 0x4ab   : > { %v12115_v16 = vpack.c.bf16 %v2159_v14, %v2156_v13  ;;  %v2662_v12 = vld [vmem:[#allocation7 + $0xb0] sm:$0xff]  ;;  %v2663_v13 = vld [vmem:[#allocation7 + $0xb8] sm:$0xff] }
 0x4ad   : > { %12074 = vmatpush1.bf16.msra.mxu0 %v12073_v19  ;;  %v2158_v19 = vld [vmem:[#allocation2 + $0x7c8] sm:$0xff] }
 0x4ae   : > { %12076 = vmatprep.subr.bf16.mxu0 %v12075_v20  ;;  %v2162_v20 = vld [vmem:[#allocation2 + $0x7e8] sm:$0xff]  ;;  %v12117_v22 = vpack.c.bf16 %v2158_v19, %v2155_v17  ;;  %v2647_v17 = vld [vmem:[#allocation7 + $0x38] sm:$0xff] }
 0x4af   : > { %v12119_v23 = vpack.c.bf16 %v2165_v21, %v2162_v20  ;;  %v2664_v19 = vld [vmem:[#allocation7 + $0xc0] sm:$0xff]  ;;  %v2665_v20 = vld [vmem:[#allocation7 + $0xc8] sm:$0xff] }
 0x4b1   : > { %12078 = vmatpush1.bf16.msra.mxu0 %v12077_v25  ;;  %v2164_v25 = vld [vmem:[#allocation2 + $0x7f8] sm:$0xff] }
 0x4b2   : > { %12080 = vmatprep.subr.bf16.mxu0 %v12079_v26  ;;  %v2168_v26 = vld [vmem:[#allocation2 + $0x818] sm:$0xff]  ;;  %v12121_v28 = vpack.c.bf16 %v2164_v25, %v2161_v24  ;;  %v2649_v24 = vld [vmem:[#allocation7 + $0x48] sm:$0xff] }
 0x4b3   : > { %v12123_v29 = vpack.c.bf16 %v2171_v27, %v2168_v26  ;;  %v2666_v25 = vld [vmem:[#allocation7 + $0xd0] sm:$0xff]  ;;  %v2667_v26 = vld [vmem:[#allocation7 + $0xd8] sm:$0xff] }
 0x4b4   : > { %2350 = vmatmul.mubr.f32.vlgmr.msra.gmra.mrb[0].mxu0 %v15723_v62  ;;  %v12093_v62 = vpack.c.bf16 %v2122_v46, %v2119_v45  ;;  %v2189_v45 = vld [vmem:[#allocation2 + $0x8c0] sm:$0xff] }
 0x4b5   : > { %12082 = vmatpush1.bf16.msra.mxu0 %v12081_v31  ;;  %2420 = vmatprep.mubr.f32.mxu0 %v15720_v60  ;;  %v2128_v60 = vld [vmem:[#allocation2 + $0x6d8] sm:$0xff]  ;;  %v2170_v31 = vld [vmem:[#allocation2 + $0x828] sm:$0xff] }
 0x4b6   : > { %12084 = vmatprep.subr.bf16.mxu0 %v12083_v32  ;;  %v12097_v53 = vpack.c.bf16 %v2128_v60, %v2125_v50  ;;  %v2174_v32 = vld [vmem:[#allocation2 + $0x848] sm:$0xff]  ;;  %v12125_v34 = vpack.c.bf16 %v2170_v31, %v2167_v30  ;;  %v2195_v50 = vld [vmem:[#allocation2 + $0x8f0] sm:$0xff]  ;;  %v2651_v30 = vld [vmem:[#allocation7 + $0x58] sm:$0xff] }
 0x4b7   : > { %v12127_v35 = vpack.c.bf16 %v2177_v33, %v2174_v32  ;;  %v2668_v31 = vld [vmem:[#allocation7 + $0xe0] sm:$0xff]  ;;  %v2669_v32 = vld [vmem:[#allocation7 + $0xe8] sm:$0xff] }
 0x4b9   : > { %12086 = vmatpush1.bf16.msra.mxu0 %v12085_v37  ;;  %v2176_v37 = vld [vmem:[#allocation2 + $0x858] sm:$0xff] }
 0x4ba   : > { %12088 = vmatprep.subr.bf16.mxu0 %v12087_v38  ;;  %v2180_v38 = vld [vmem:[#allocation2 + $0x878] sm:$0xff]  ;;  %v12129_v40 = vpack.c.bf16 %v2176_v37, %v2173_v36  ;;  %v2653_v36 = vld [vmem:[#allocation7 + $0x68] sm:$0xff] }
 0x4bb   : > { %v12131_v41 = vpack.c.bf16 %v2183_v39, %v2180_v38 }
 0x4bd   : > { %12090 = vmatpush1.bf16.msra.mxu0 %v12089_v43  ;;  %v2182_v43 = vld [vmem:[#allocation2 + $0x888] sm:$0xff] }
 0x4be   : > { %12092 = vmatprep.subr.bf16.mxu0 %v12091_v44  ;;  %v2186_v44 = vld [vmem:[#allocation2 + $0x8a8] sm:$0xff]  ;;  %v12133_v46 = vpack.c.bf16 %v2182_v43, %v2179_v42  ;;  %v2671_v42 = vld [vmem:[#allocation7 + $0xf8] sm:$0xff] }
 0x4bf   : > { %v12135_v47 = vpack.c.bf16 %v2189_v45, %v2186_v44  ;;  %v2654_v44 = vld [vmem:[#allocation7 + $0x70] sm:$0xff]  ;;  %v2655_v45 = vld [vmem:[#allocation7 + $0x78] sm:$0xff] }
 0x4c1   : > { %12094 = vmatpush1.bf16.msra.mxu0 %v12093_v62  ;;  %v2188_v62 = vld [vmem:[#allocation2 + $0x8b8] sm:$0xff] }
 0x4c2   : > { %12096 = vmatprep.subr.bf16.mxu0 %v12095_v49  ;;  %v2192_v49 = vld [vmem:[#allocation2 + $0x8d8] sm:$0xff]  ;;  %v12137_v60 = vpack.c.bf16 %v2188_v62, %v2185_v48  ;;  %v2199_v48 = vlaneseq }
 0x4c3   : > { %v12139_v51 = vpack.c.bf16 %v2195_v50, %v2192_v49  ;;  %v2197_v50 = vld [vmem:[#allocation5] sm:$0x7] }
 0x4c4   : > { %v2200_v62 = vshrl.u32 %v2199_v48, 7  ;;  %v3105_v48 = vld [vmem:[#allocation13 + $0x50] sm:$0xff] }
 0x4c5   : > { %12098 = vmatpush1.bf16.msra.mxu0 %v12097_v53  ;;  %v2194_v53 = vld [vmem:[#allocation2 + $0x8e8] sm:$0xff] }
 0x4c6   : > { %12100 = vmatprep.subr.bf16.mxu0 %v12099_v54  ;;  %v12141_v54 = vpack.c.bf16 %v2194_v53, %v2191_v52  ;;  %v15737_v49 = vsub.s32 2, %v2200_v62 }
 0x4c9   : > { %12102 = vmatpush1.bf16.msra.mxu0 %v12101_v59  ;;  %v2657_v59 = vld [vmem:[#allocation7 + $0x88] sm:$0xff] }
 0x4ca   : > { %12104 = vmatprep.subr.bf16.mxu0 %v12103_v61  ;;  %v2640_v61 = vld [vmem:[#allocation7] sm:$0xff]  ;;  %v12239_v63 = vpack.c.bf16 %v2657_v59, %v2656_v58 }
 0x4cc   : > { %12240 = vmatprep.subr.bf16.mxu1 %v12239_v63  ;;  %v15746_v63 = vsub.s32 0, %v2200_v62 }
 0x4cd   : > { %12106 = vmatpush1.bf16.msra.mxu0 %v12105_v3  ;;  %v12241_v3 = vpack.c.bf16 %v2641_v0, %v2640_v61  ;;  %v15748_v0 = vsub.s32 1, %v2200_v62 }
 0x4ce   : > { %12108 = vmatprep.subr.bf16.mxu0 %v12107_v4  ;;  %v12243_v4 = vpack.c.bf16 %v2659_v2, %v2658_v1  ;;  %v2202_v1 = vrot.slane %v2197_v50, %v15746_v63 }
 0x4cf   : > { %12242 = vmatpush3.bf16.msra.mxu1 %v12241_v3  ;;  %v2206_v2 = vrot.slane %v2197_v50, %v15748_v0 }
 0x4d0   : > { %12244 = vmatprep.subr.bf16.mxu1 %v12243_v4 }
 0x4d1   : > { %12110 = vmatpush1.bf16.msra.mxu0 %v12109_v9  ;;  %v12247_v9 = vpack.c.bf16 %v2661_v8, %v2660_v7  ;;  %v2673_v7 = vld [vmem:[#allocation7 + $0x108] sm:$0xff] }
 0x4d2   : > { %12112 = vmatprep.subr.bf16.mxu0 %v12111_v10  ;;  %v2644_v10 = vld [vmem:[#allocation7 + $0x20] sm:$0xff] }
 0x4d3   : > { %v12249_v14 = vpack.c.bf16 %v2645_v11, %v2644_v10  ;;  %v2674_v10 = vld [vmem:[#allocation7 + $0x110] sm:$0xff] }
 0x4d5   : > { %12114 = vmatpush1.bf16.msra.mxu0 %v12113_v15  ;;  %v12251_v15 = vpack.c.bf16 %v2663_v13, %v2662_v12  ;;  %v2675_v13 = vld [vmem:[#allocation7 + $0x118] sm:$0xff] }
 0x4d6   : > { %12116 = vmatprep.subr.bf16.mxu0 %v12115_v16  ;;  %v2646_v16 = vld [vmem:[#allocation7 + $0x30] sm:$0xff] }
 0x4d7   : > { %v12253_v21 = vpack.c.bf16 %v2647_v17, %v2646_v16  ;;  %v12275_v17 = vpack.c.bf16 %v2675_v13, %v2674_v10  ;;  %v3013_v13 = vld [vmem:[#allocation13 + $0x18] sm:$0xff] }
 0x4d9   : > { %12118 = vmatpush1.bf16.msra.mxu0 %v12117_v22  ;;  %v12255_v22 = vpack.c.bf16 %v2665_v20, %v2664_v19  ;;  %v14861_v20 = vmov 0.0  }
 0x4da   : > { %12120 = vmatprep.subr.bf16.mxu0 %v12119_v23  ;;  %v2648_v23 = vld [vmem:[#allocation7 + $0x40] sm:$0xff] }
 0x4db   : > { %v12257_v27 = vpack.c.bf16 %v2649_v24, %v2648_v23  ;;  %v15755_v23 = vld [vmem:[#allocation10 + $0x28] sm:$0xff] }
 0x4dd   : > { %12122 = vmatpush1.bf16.msra.mxu0 %v12121_v28  ;;  %v12259_v28 = vpack.c.bf16 %v2667_v26, %v2666_v25  ;;  %v2678_v25 = vld [vmem:[#allocation7 + $0x130] sm:$0xff]  ;;  %v2679_v26 = vld [vmem:[#allocation7 + $0x138] sm:$0xff] }
 0x4de   : > { %12124 = vmatprep.subr.bf16.mxu0 %v12123_v29  ;;  %v2650_v29 = vld [vmem:[#allocation7 + $0x50] sm:$0xff] }
 0x4df   : > { %v12261_v33 = vpack.c.bf16 %v2651_v30, %v2650_v29  ;;  %v2680_v29 = vld [vmem:[#allocation7 + $0x140] sm:$0xff]  ;;  %v2681_v30 = vld [vmem:[#allocation7 + $0x148] sm:$0xff] }
 0x4e1   : > { %12126 = vmatpush1.bf16.msra.mxu0 %v12125_v34  ;;  %v12263_v34 = vpack.c.bf16 %v2669_v32, %v2668_v31  ;;  %v12284_v31 = vpack.c.bf16 %v2681_v30, %v2680_v29  ;;  %v2682_v32 = vld [vmem:[#allocation7 + $0x150] sm:$0xff] }
 0x4e2   : > { %12128 = vmatprep.subr.bf16.mxu0 %v12127_v35  ;;  %v2652_v35 = vld [vmem:[#allocation7 + $0x60] sm:$0xff]  ;;  %v3361_v30 = vld [vmem:[#allocation13 + $0x90] sm:$0xff] }
 0x4e3   : > { %v12265_v37 = vpack.c.bf16 %v2653_v36, %v2652_v35  ;;  %v2684_v35 = vld [vmem:[#allocation7 + $0x160] sm:$0xff]  ;;  %v2685_v36 = vld [vmem:[#allocation7 + $0x168] sm:$0xff] }
 0x4e5   : > { %12130 = vmatpush1.bf16.msra.mxu0 %v12129_v40 }
 0x4e6   : > { %12132 = vmatprep.subr.bf16.mxu0 %v12131_v41  ;;  %v2670_v41 = vld [vmem:[#allocation7 + $0xf0] sm:$0xff] }
 0x4e7   : > { %v12267_v43 = vpack.c.bf16 %v2671_v42, %v2670_v41  ;;  %v15772_v42 = vld [vmem:[#allocation10 + $0x8] sm:$0xff] }
 0x4e9   : > { %12134 = vmatpush1.bf16.msra.mxu0 %v12133_v46  ;;  %v12269_v46 = vpack.c.bf16 %v2655_v45, %v2654_v44  ;;  %v15780_v44 = vld [vmem:[#allocation10 + $0x18] sm:$0xff] }
 0x4ea   : > { %12136 = vmatprep.subr.bf16.mxu0 %v12135_v47  ;;  %v14859_v47 = vmov 0.0|0.0   ;;  %v3103_v45 = vld [vmem:[#allocation13 + $0x40] sm:$0xff] }
 0x4ed   : > { %12138 = vmatpush1.bf16.msra.mxu0 %v12137_v60  ;;  %v2210_v60 = vrot.slane %v2197_v50, %v15737_v49  ;;  %v3106_v50 = vld [vmem:[#allocation13 + $0x58] sm:$0xff] }
 0x4ee   : > { %12140 = vmatprep.subr.bf16.mxu0 %v12139_v51 }
 0x4f1   : > { %12142 = vmatpush1.bf16.msra.mxu0 %v12141_v54 }
 0x4f2   : > { %10938 = vmatprep.subr.msk.mxu0 %vm2845_vm0, %v2837_v55 }
 0x4f4   : > { %2421 = vmatmul.mubr.f32.vlgmr.msra.gmra.mrb[0].mxu0 %v15728_v18  ;;  %v12245_v18 = vpack.c.bf16 %v2643_v6, %v2642_v5  ;;  %v2672_v6 = vld [vmem:[#allocation7 + $0x100] sm:$0xff] }
 0x4f5   : > { %10939 = vmatpush3.msk.msra.mxu0 %vm2845_vm0, %v2837_v55  ;;  %10940 = vmatprep.mubr.msk.f32.mxu0 %vm2838_vm1, %v2835_v56  ;;  %v15740_v56 = vld [vmem:[#allocation10 + $0x20] sm:$0xff] }
 0x4f6   : > { %12246 = vmatpush3.bf16.msra.mxu1 %v12245_v18 }
 0x4f7   : > { %12248 = vmatprep.subr.bf16.mxu1 %v12247_v9  ;;  %v12272_v9 = vpack.c.bf16 %v2673_v7, %v2672_v6  ;;  %v9937_v6 = vld [vmem:[#allocation8] ss:$0 sm:$0xff] }
 0x4f8   : > { %10941 = vmatmul.mubr.msk.f32.vlgmr.msra.gmra.mrb[2].mxu0 %vm2838_vm1, %v2836_v57 }
 0x4f9   : > { %10999 = vmatprep.mubr.msk.f32.mxu0 %vm2928_vm2, %v15740_v56 }
 0x4fa   : > { %12250 = vmatpush3.bf16.msra.mxu1 %v12249_v14 }
 0x4fb   : > { %12252 = vmatprep.subr.bf16.mxu1 %v12251_v15 }
 0x4fe   : > { %12254 = vmatpush3.bf16.msra.mxu1 %v12253_v21  ;;  %v2676_v21 = vld [vmem:[#allocation7 + $0x120] sm:$0xff] }
 0x4ff   : > { %12256 = vmatprep.subr.bf16.mxu1 %v12255_v22  ;;  %v2677_v22 = vld [vmem:[#allocation7 + $0x128] sm:$0xff] }
 0x500   : > { %v12278_v24 = vpack.c.bf16 %v2677_v22, %v2676_v21  ;;  %v3016_v22 = vld [vmem:[#allocation13 + $0x30] sm:$0xff] }
 0x502   : > { %12258 = vmatpush3.bf16.msra.mxu1 %v12257_v27  ;;  %v15758_v27 = vld [vmem:[#allocation10] sm:$0xff] }
 0x503   : > { %12260 = vmatprep.subr.bf16.mxu1 %v12259_v28  ;;  %v12281_v28 = vpack.c.bf16 %v2679_v26, %v2678_v25  ;;  %v3359_v26 = vld [vmem:[#allocation13 + $0x80] sm:$0xff] }
 0x506   : > { %12262 = vmatpush3.bf16.msra.mxu1 %v12261_v33  ;;  %v2683_v33 = vld [vmem:[#allocation7 + $0x158] sm:$0xff] }
 0x507   : > { %12264 = vmatprep.subr.bf16.mxu1 %v12263_v34  ;;  %v12287_v34 = vpack.c.bf16 %v2683_v33, %v2682_v32  ;;  %v3363_v33 = vld [vmem:[#allocation13 + $0xa0] sm:$0xff] }
 0x50a   : > { %12266 = vmatpush3.bf16.msra.mxu1 %v12265_v37  ;;  %v12290_v37 = vpack.c.bf16 %v2685_v36, %v2684_v35  ;;  %v3365_v36 = vld [vmem:[#allocation13 + $0xb0] sm:$0xff] }
 0x50b   : > { %12268 = vmatprep.subr.bf16.mxu1 %v12267_v43  ;;  %v15774_v43 = vld [vmem:[#allocation10 + $0x10] sm:$0xff] }
 0x50e   : > { %12270 = vmatpush3.bf16.msra.mxu1 %v12269_v46  ;;  %v3104_v46 = vld [vmem:[#allocation13 + $0x48] sm:$0xff] }
 0x50f   : > { %12271 = vmatprep.subr.bf16.mxu1 %v14859_v47  ;;  %v12303_v62 = vpack.c.bf16 %v3104_v46, %v3103_v45 }
 0x533   : > { %v10209_v38 = vpop.f32.mrb[0].mxu1 }
 0x534   : > { %v10210_v39 = vpop.f32.mrb[1].mxu1 }
 0x535   : > { %v10211_v40 = vadd.f32 %v10210_v39, %v10209_v38  ;;  %v2686_v38 = vld [vmem:[#allocation7 + $0x170] sm:$0xff]  ;;  %v2687_v39 = vld [vmem:[#allocation7 + $0x178] sm:$0xff] }
 0x537   : > { %v2494_v51 = vadd.f32 %v10211_v40, %v2210_v60  ;;  %v12293_v40 = vpack.c.bf16 %v2687_v39, %v2686_v38  ;;  %v12307_v60 = vpack.c.bf16 %v3106_v50, %v3105_v48  ;;  %v3619_v48 = vld [vmem:[#allocation14 + $0x80] sm:$0xff] }
 0x554   : > { %v10244_v52 = vpop.f32.mrb[2].mxu1 }
 0x555   : > { %v10245_v53 = vpop.f32.mrb[3].mxu1 }
 0x556   : > { %v10246_v54 = vadd.f32 %v10245_v53, %v10244_v52  ;;  %v3108_v52 = vld [vmem:[#allocation13 + $0x68] sm:$0xff] }
 0x558   : > { %v2564_v55 = vadd.f32 %v10246_v54, %v2494_v51  ;;  %v3107_v51 = vld [vmem:[#allocation13 + $0x60] sm:$0xff]  ;;  %v3109_v54 = vld [vmem:[#allocation13 + $0x70] sm:$0xff] }
 0x559   : > { %v12311_v53 = vpack.c.bf16 %v3108_v52, %v3107_v51  ;;  %v3622_v51 = vld [vmem:[#allocation14 + $0x98] sm:$0xff] }
 0x574   : > { %v10279_v57 = vpop.f32.mrb[4].mxu1 }
 0x575   : > { %v10280_v58 = vpop.f32.mrb[5].mxu1 }
 0x576   : > { %v10281_v59 = vadd.f32 %v10280_v58, %v10279_v57  ;;  %v3010_v58 = vld [vmem:[#allocation13] sm:$0xff] }
 0x578   : > { %v15744_v61 = vadd.f32 %v10281_v59, %v2564_v55  ;;  %v3110_v55 = vld [vmem:[#allocation13 + $0x78] sm:$0xff]  ;;  %v3011_v59 = vld [vmem:[#allocation13 + $0x8] sm:$0xff] }
 0x579   : > { %v12315_v57 = vpack.c.bf16 %v3110_v55, %v3109_v54  ;;  %v3624_v54 = vld [vmem:[#allocation14 + $0xa8] sm:$0xff] }
 0x57a   : > { %v2639_v41 = vmax.f32 %v15744_v61, 0.0  ;;  %v12319_v61 = vpack.c.bf16 %v3011_v59, %v3010_v58  ;;  %v3626_v58 = vld [vmem:[#allocation14 + $0xb8] sm:$0xff] }
 0x5c7   : > { %v2422_v3 = vpop.f32.mrb[0].mxu0 }
 0x5c8   : > { %v13229_v4 = vadd.f32 %v2422_v3, %v2202_v1  ;;  %v2424_v5 = vpop.f32.mrb[1].mxu0 }
 0x5c9   : > { %v13230_v8 = vadd.f32 %v2424_v5, %v2206_v2 }
 0x5ca   : > { %v2637_v12 = vmax.f32 %v13229_v4, 0.0 }
 0x5cb   : > { %v2638_v18 = vmax.f32 %v13230_v8, 0.0  ;;  %v10942_v11 = vpop.f32.mrb[2].mxu0 }
 0x5cc   : > { %v2925_v14 = vmax.f32 %v10942_v11, 0.0  ;;  %v2915_v15 = vpop.f32.mrb[3].mxu0 }
 0x5cd   : > { %2759 = vmatprep.mubr.f32.mxu1 %v2638_v18  ;;  %v2924_v16 = vmax.f32 %v2915_v15, 0.0 }
 0x5ce   : > { %2760 = vmatmul.mubr.f32.vlgmr.msra.gmra.mrb[6].mxu1 %v2637_v12  ;;  %v3012_v12 = vld [vmem:[#allocation13 + $0x10] sm:$0xff] }
 0x5cf   : > { %12273 = vmatpush3.bf16.msra.mxu1 %v12272_v9  ;;  %v12295_v19 = vpack.c.bf16 %v2925_v14, %v2924_v16  ;;  %10935 = vmatprep.mubr.msk.f32.mxu1 %vm14860_vm3, %v14861_v20  ;;  %v12323_v16 = vpack.c.bf16 %v3013_v13, %v3012_v12  ;;  %v3527_v12 = vld [vmem:[#allocation14] sm:$0xff]  ;;  %v3528_v13 = vld [vmem:[#allocation14 + $0x8] sm:$0xff] }
 0x5d0   : > { %12274 = vmatprep.subr.bf16.mxu1 %v14859_v47 }
 0x5d1   : > { %12336 = vmatprep.subr.bf16.mxu0 %v12295_v19 }
 0x5d2   : > { %12338 = vmatpush3.bf16.msra.mxu0 %v12295_v19 }
 0x5d3   : > { %12276 = vmatpush3.bf16.msra.mxu1 %v12275_v17  ;;  %v3014_v17 = vld [vmem:[#allocation13 + $0x20] sm:$0xff] }
 0x5d4   : > { %12277 = vmatprep.subr.bf16.mxu1 %v14859_v47 }
 0x5d5   : > { %11000 = vmatmul.mubr.msk.f32.vlgmr.msra.gmra.mrb[4].mxu0 %vm2928_vm2, %v15755_v23 }
 0x5d6   : > { %11025 = vmatprep.mubr.msk.f32.mxu0 %vm2928_vm2, %v15758_v27 }
 0x5d7   : > { %12279 = vmatpush3.bf16.msra.mxu1 %v12278_v24  ;;  %v3017_v24 = vld [vmem:[#allocation13 + $0x38] sm:$0xff] }
 0x5d8   : > { %12280 = vmatprep.subr.bf16.mxu1 %v14859_v47  ;;  %v12331_v25 = vpack.c.bf16 %v3017_v24, %v3016_v22  ;;  %v3530_v22 = vld [vmem:[#allocation14 + $0x18] sm:$0xff] }
 0x5db   : > { %12282 = vmatpush3.bf16.msra.mxu1 %v12281_v28  ;;  %v3360_v28 = vld [vmem:[#allocation13 + $0x88] sm:$0xff] }
 0x5dc   : > { %12283 = vmatprep.subr.bf16.mxu1 %v14859_v47  ;;  %v12339_v29 = vpack.c.bf16 %v3360_v28, %v3359_v26  ;;  %v3531_v28 = vld [vmem:[#allocation14 + $0x20] sm:$0xff] }
 0x5df   : > { %12285 = vmatpush3.bf16.msra.mxu1 %v12284_v31  ;;  %v3362_v31 = vld [vmem:[#allocation13 + $0x98] sm:$0xff] }
 0x5e0   : > { %12286 = vmatprep.subr.bf16.mxu1 %v14859_v47  ;;  %v12343_v32 = vpack.c.bf16 %v3362_v31, %v3361_v30  ;;  %v3533_v31 = vld [vmem:[#allocation14 + $0x30] sm:$0xff] }
 0x5e3   : > { %12288 = vmatpush3.bf16.msra.mxu1 %v12287_v34  ;;  %v3364_v34 = vld [vmem:[#allocation13 + $0xa8] sm:$0xff] }
 0x5e4   : > { %12289 = vmatprep.subr.bf16.mxu1 %v14859_v47  ;;  %v12347_v35 = vpack.c.bf16 %v3364_v34, %v3363_v33  ;;  %v3535_v34 = vld [vmem:[#allocation14 + $0x40] sm:$0xff] }
 0x5e7   : > { %12291 = vmatpush3.bf16.msra.mxu1 %v12290_v37  ;;  %v3366_v37 = vld [vmem:[#allocation13 + $0xb8] sm:$0xff] }
 0x5e8   : > { %12292 = vmatprep.subr.bf16.mxu1 %v14859_v47  ;;  %v12351_v38 = vpack.c.bf16 %v3366_v37, %v3365_v36  ;;  %v3537_v37 = vld [vmem:[#allocation14 + $0x50] sm:$0xff] }
 0x5eb   : > { %12294 = vmatpush3.bf16.msra.mxu1 %v12293_v40 }
 0x5ec   : > { %12296 = vmatprep.subr.bf16.mxu1 %v12295_v19 }
 0x5ee   : > { %10936 = vmatmul.mubr.f32.vlgmr.msra.gmra.mrb[8].mxu1 %v2639_v41 }
 0x5ef   : > { %12298 = vmatpush3.bf16.msra.mxu1 %v12295_v19  ;;  %10947 = vmatprep.mubr.msk.f32.mxu1 %vm2928_vm2, %v15758_v27 }
 0x5f0   : > { %12300 = vmatprep.subr.bf16.mxu1 %v12295_v19 }
 0x5f2   : > { %10948 = vmatmul.mubr.msk.f32.vlgmr.msra.gmra.mrb[10].mxu1 %vm2928_vm2, %v15772_v42 }
 0x5f3   : > { %12302 = vmatpush3.bf16.msra.mxu1 %v12295_v19  ;;  %10954 = vmatprep.mubr.msk.f32.mxu1 %vm2928_vm2, %v15774_v43  ;;  %v3015_v19 = vld [vmem:[#allocation13 + $0x28] sm:$0xff] }
 0x5f4   : > { %12304 = vmatprep.subr.bf16.mxu1 %v12303_v62  ;;  %v12327_v21 = vpack.c.bf16 %v3015_v19, %v3014_v17 }
 0x5f6   : > { %10955 = vmatmul.mubr.msk.f32.vlgmr.msra.gmra.mrb[12].mxu1 %vm2928_vm2, %v15780_v44 }
 0x5f7   : > { %12306 = vmatpush3.bf16.msra.mxu1 %v12303_v62  ;;  %v3620_v62 = vld [vmem:[#allocation14 + $0x88] sm:$0xff] }
 0x5f8   : > { %12308 = vmatprep.subr.bf16.mxu1 %v12307_v60  ;;  %v12363_v50 = vpack.c.bf16 %v3620_v62, %v3619_v48  ;;  %v3542_v48 = vld [vmem:[#allocation14 + $0x78] sm:$0xff] }
 0x5fb   : > { %12310 = vmatpush3.bf16.msra.mxu1 %v12307_v60  ;;  %v3621_v60 = vld [vmem:[#allocation14 + $0x90] sm:$0xff] }
 0x5fc   : > { %12312 = vmatprep.subr.bf16.mxu1 %v12311_v53  ;;  %v12367_v52 = vpack.c.bf16 %v3622_v51, %v3621_v60  ;;  %v3862_v60 = vld [vmem:[#allocation14 + $0x108] sm:$0xff] }
 0x5ff   : > { %12314 = vmatpush3.bf16.msra.mxu1 %v12311_v53  ;;  %v3623_v53 = vld [vmem:[#allocation14 + $0xa0] sm:$0xff] }
 0x600   : > { %12316 = vmatprep.subr.bf16.mxu1 %v12315_v57  ;;  %v12371_v55 = vpack.c.bf16 %v3624_v54, %v3623_v53  ;;  %v3864_v53 = vld [vmem:[#allocation14 + $0x118] sm:$0xff] }
 0x603   : > { %12318 = vmatpush3.bf16.msra.mxu1 %v12315_v57  ;;  %v3625_v57 = vld [vmem:[#allocation14 + $0xb0] sm:$0xff] }
 0x604   : > { %12320 = vmatprep.subr.bf16.mxu1 %v12319_v61  ;;  %v12375_v59 = vpack.c.bf16 %v3626_v58, %v3625_v57  ;;  %v3866_v57 = vld [vmem:[#allocation14 + $0x128] sm:$0xff] }
 0x6a1   : > { %v10314_v1 = vpop.f32.mrb[6].mxu1 }
 0x6a2   : > { %v10315_v2 = vpop.f32.mrb[7].mxu1 }
 0x6a3   : > { %v10316_v3 = vadd.f32 %v10315_v2, %v10314_v1  ;;  %v3628_v1 = vld [vmem:[#allocation14 + $0xc8] sm:$0xff] }
 0x6a5   : > { %v2762_v7 = vadd.f32 %v10316_v3, %v9937_v6  ;;  %v3629_v3 = vld [vmem:[#allocation14 + $0xd0] sm:$0xff]  ;;  %v3631_v6 = vld [vmem:[#allocation14 + $0xe0] sm:$0xff] }
 0x6a8   : > { %v11001_v4 = vpop.f32.mrb[4].mxu0 }
 0x6a9   : > { %v3349_v5 = vpop.f32.mrb[5].mxu0 }
 0x6c1   : > { %v2831_v8 = vpop.f32.mrb[8].mxu1 }
 0x6c2   : > { %v15784_v18 = vadd.f32 %v2831_v8, %v2762_v7  ;;  %v10937_v9 = vpop.f32.mrb[9].mxu1  ;;  %v3632_v7 = vld [vmem:[#allocation14 + $0xe8] sm:$0xff] }
 0x6c3   : > { %v12387_v8 = vpack.c.bf16 %v3632_v7, %v3631_v6  ;;  %v3633_v9 = vld [vmem:[#allocation14 + $0xf0] sm:$0xff]  ;;  %v3872_v6 = vld [vmem:[#allocation14 + $0x158] sm:$0xff] }
 0x6c5   : > { %v10949_v10 = vpop.f32.mrb[10].mxu1 }
 0x6c6   : > { %v3001_v11 = vpop.f32.mrb[11].mxu1 }
 0x6c9   : > { %v10956_v14 = vpop.f32.mrb[12].mxu1 }
 0x6ca   : > { %v3093_v15 = vpop.f32.mrb[13].mxu1 }
 0x6cb   : > { %10973 = vmatprep.mubr.msk.f32.mxu1 %vm3111_vm4, %v3093_v15 }
 0x6cc   : > { %10974 = vmatmul.mubr.msk.f32.vlgmr.msra.gmra.mrb[14].mxu1 %vm3111_vm4, %v10956_v14  ;;  %v12395_v14 = vpack.c.bf16 %v3528_v13, %v3527_v12  ;;  %v3876_v12 = vld [vmem:[#allocation14 + $0x178] sm:$0xff] }
 0x6cd   : > { %12322 = vmatpush3.bf16.msra.mxu1 %v12319_v61  ;;  %10992 = vmatprep.mubr.msk.f32.mxu1 %vm3111_vm4, %v3001_v11  ;;  %v3627_v61 = vld [vmem:[#allocation14 + $0xc0] sm:$0xff] }
 0x6ce   : > { %12324 = vmatprep.subr.bf16.mxu1 %v12323_v16  ;;  %v12379_v2 = vpack.c.bf16 %v3628_v1, %v3627_v61  ;;  %v3868_v61 = vld [vmem:[#allocation14 + $0x138] sm:$0xff] }
 0x6d1   : > { %12326 = vmatpush3.bf16.msra.mxu1 %v12323_v16 }
 0x6d2   : > { %12328 = vmatprep.subr.bf16.mxu1 %v12327_v21 }
 0x6d5   : > { %12330 = vmatpush3.bf16.msra.mxu1 %v12327_v21  ;;  %v3529_v21 = vld [vmem:[#allocation14 + $0x10] sm:$0xff] }
 0x6d6   : > { %12332 = vmatprep.subr.bf16.mxu1 %v12331_v25  ;;  %v12399_v26 = vpack.c.bf16 %v3530_v22, %v3529_v21  ;;  %v4123_v22 = vld [vmem:[#allocation16 + $0x80] sm:$0xff] }
 0x6d9   : > { %12334 = vmatpush3.bf16.msra.mxu1 %v12331_v25 }
 0x6da   : > { %12340 = vmatprep.subr.bf16.mxu1 %v12339_v29 }
 0x6dc   : > { %10993 = vmatmul.mubr.msk.f32.vlgmr.msra.gmra.mrb[14].mxu1 %vm3111_vm4, %v10949_v10  ;;  %v3634_v10 = vld [vmem:[#allocation14 + $0xf8] sm:$0xff] }
 0x6dd   : > { %12342 = vmatpush3.bf16.msra.mxu1 %v12339_v29  ;;  %11018 = vmatprep.mubr.msk.f32.mxu1 %vm3111_vm4, %v3349_v5  ;;  %v12391_v11 = vpack.c.bf16 %v3634_v10, %v3633_v9  ;;  %v3532_v29 = vld [vmem:[#allocation14 + $0x28] sm:$0xff] }
 0x6de   : > { %12344 = vmatprep.subr.bf16.mxu1 %v12343_v32  ;;  %v12403_v30 = vpack.c.bf16 %v3532_v29, %v3531_v28  ;;  %v3874_v9 = vld [vmem:[#allocation14 + $0x168] sm:$0xff]  ;;  %v4127_v28 = vld [vmem:[#allocation16 + $0xa0] sm:$0xff] }
 0x6df   : > { %v4128_v29 = vld [vmem:[#allocation16 + $0xa8] sm:$0xff] }
 0x6e1   : > { %12346 = vmatpush3.bf16.msra.mxu1 %v12343_v32  ;;  %v3534_v32 = vld [vmem:[#allocation14 + $0x38] sm:$0xff] }
 0x6e2   : > { %12348 = vmatprep.subr.bf16.mxu1 %v12347_v35  ;;  %v12407_v33 = vpack.c.bf16 %v3534_v32, %v3533_v31  ;;  %v4129_v31 = vld [vmem:[#allocation16 + $0xb0] sm:$0xff]  ;;  %v4130_v32 = vld [vmem:[#allocation16 + $0xb8] sm:$0xff] }
 0x6e5   : > { %12350 = vmatpush3.bf16.msra.mxu1 %v12347_v35  ;;  %v3536_v35 = vld [vmem:[#allocation14 + $0x48] sm:$0xff] }
 0x6e6   : > { %12352 = vmatprep.subr.bf16.mxu1 %v12351_v38  ;;  %v12411_v36 = vpack.c.bf16 %v3536_v35, %v3535_v34  ;;  %v4131_v34 = vld [vmem:[#allocation16 + $0xc0] sm:$0xff]  ;;  %v4132_v35 = vld [vmem:[#allocation16 + $0xc8] sm:$0xff] }
 0x6e9   : > { %12354 = vmatpush3.bf16.msra.mxu1 %v12351_v38  ;;  %v3538_v38 = vld [vmem:[#allocation14 + $0x58] sm:$0xff] }
 0x6ec   : > { %11019 = vmatmul.mubr.msk.f32.vlgmr.msra.gmra.mrb[14].mxu1 %vm3111_vm4, %v11001_v4  ;;  %v3630_v4 = vld [vmem:[#allocation14 + $0xd8] sm:$0xff] }
 0x6ed   : > { %11109 = vmatprep.mubr.msk.f32.mxu1 %vm2928_vm2, %v15740_v56  ;;  %v12383_v5 = vpack.c.bf16 %v3630_v4, %v3629_v3  ;;  %v3870_v3 = vld [vmem:[#allocation14 + $0x148] sm:$0xff] }
 0x7bf   : > { %v11020_v39 = vpop.f32.mrb[14].mxu1 }
 0x7c0   : > { %v3451_v40 = vmax.f32 %v11020_v39, 0.0  ;;  %v3439_v41 = vpop.f32.mrb[15].mxu1  ;;  %v12415_v39 = vpack.c.bf16 %v3538_v38, %v3537_v37  ;;  %v4133_v37 = vld [vmem:[#allocation16 + $0xd0] sm:$0xff]  ;;  %v4134_v38 = vld [vmem:[#allocation16 + $0xd8] sm:$0xff] }
 0x7c1   : > { %v3450_v45 = vmax.f32 %v3439_v41, 0.0  ;;  %v3540_v41 = vld [vmem:[#allocation14 + $0x68] sm:$0xff] }
 0x7c3   : > { %v12355_v46 = vpack.c.bf16 %v3451_v40, %v3450_v45  ;;  %v3539_v40 = vld [vmem:[#allocation14 + $0x60] sm:$0xff] }
 0x7c4   : > { %v12419_v45 = vpack.c.bf16 %v3540_v41, %v3539_v40  ;;  %v4135_v40 = vld [vmem:[#allocation16 + $0xe0] sm:$0xff]  ;;  %v4136_v41 = vld [vmem:[#allocation16 + $0xe8] sm:$0xff] }
 0x7c5   : > { %12356 = vmatprep.subr.bf16.mxu0 %v12355_v46  ;;  %12428 = vmatprep.subr.bf16.mxu1 %v12355_v46 }
 0x7c6   : > { %12358 = vmatpush3.bf16.msra.mxu0 %v12355_v46  ;;  %12430 = vmatpush3.bf16.msra.mxu1 %v12355_v46 }
 0x7c7   : > { %12360 = vmatprep.subr.bf16.mxu0 %v12355_v46 }
 0x7c9   : > { %11026 = vmatmul.mubr.msk.f32.vlgmr.msra.gmra.mrb[6].mxu0 %vm2928_vm2, %v15772_v42  ;;  %11110 = vmatmul.mubr.msk.f32.vlgmr.msra.gmra.mrb[16].mxu1 %vm2928_vm2, %v15755_v23 }
 0x7ca   : > { %12362 = vmatpush3.bf16.msra.mxu0 %v12355_v46  ;;  %11032 = vmatprep.mubr.msk.f32.mxu0 %vm2928_vm2, %v15774_v43  ;;  %v3541_v46 = vld [vmem:[#allocation14 + $0x70] sm:$0xff] }
 0x7cb   : > { %12364 = vmatprep.subr.bf16.mxu0 %v12363_v50  ;;  %11151 = vmatprep.mubr.msk.f32.mxu1 %vm2928_vm2, %v15758_v27  ;;  %v12423_v62 = vpack.c.bf16 %v3542_v48, %v3541_v46  ;;  %v4137_v46 = vld [vmem:[#allocation16 + $0xf0] sm:$0xff]  ;;  %v4138_v48 = vld [vmem:[#allocation16 + $0xf8] sm:$0xff] }
 0x7cd   : > { %11033 = vmatmul.mubr.msk.f32.vlgmr.msra.gmra.mrb[8].mxu0 %vm2928_vm2, %v15780_v44 }
 0x7ce   : > { %12366 = vmatpush3.bf16.msra.mxu0 %v12363_v50  ;;  %v3861_v50 = vld [vmem:[#allocation14 + $0x100] sm:$0xff] }
 0x7cf   : > { %12368 = vmatprep.subr.bf16.mxu0 %v12367_v52  ;;  %v12431_v51 = vpack.c.bf16 %v3862_v60, %v3861_v50  ;;  %v4031_v50 = vld [vmem:[#allocation16] sm:$0xff]  ;;  %v4032_v60 = vld [vmem:[#allocation16 + $0x8] sm:$0xff] }
 0x7d2   : > { %12370 = vmatpush3.bf16.msra.mxu0 %v12367_v52  ;;  %v3863_v52 = vld [vmem:[#allocation14 + $0x110] sm:$0xff] }
 0x7d3   : > { %12372 = vmatprep.subr.bf16.mxu0 %v12371_v55  ;;  %v12435_v54 = vpack.c.bf16 %v3864_v53, %v3863_v52 }
 0x7d6   : > { %12374 = vmatpush3.bf16.msra.mxu0 %v12371_v55  ;;  %v3865_v55 = vld [vmem:[#allocation14 + $0x120] sm:$0xff] }
 0x7d7   : > { %12376 = vmatprep.subr.bf16.mxu0 %v12375_v59  ;;  %v12439_v58 = vpack.c.bf16 %v3866_v57, %v3865_v55  ;;  %v4034_v55 = vld [vmem:[#allocation16 + $0x18] sm:$0xff] }
 0x7da   : > { %12378 = vmatpush3.bf16.msra.mxu0 %v12375_v59  ;;  %v3867_v59 = vld [vmem:[#allocation14 + $0x130] sm:$0xff] }
 0x7db   : > { %12380 = vmatprep.subr.bf16.mxu0 %v12379_v2  ;;  %v12443_v1 = vpack.c.bf16 %v3868_v61, %v3867_v59  ;;  %v4035_v61 = vld [vmem:[#allocation16 + $0x20] sm:$0xff] }
 0x7de   : > { %12382 = vmatpush3.bf16.msra.mxu0 %v12379_v2  ;;  %v3869_v2 = vld [vmem:[#allocation14 + $0x140] sm:$0xff] }
 0x7df   : > { %12384 = vmatprep.subr.bf16.mxu0 %v12383_v5  ;;  %v12447_v4 = vpack.c.bf16 %v3870_v3, %v3869_v2  ;;  %v4037_v3 = vld [vmem:[#allocation16 + $0x30] sm:$0xff] }
 0x7e2   : > { %12386 = vmatpush3.bf16.msra.mxu0 %v12383_v5  ;;  %v3871_v5 = vld [vmem:[#allocation14 + $0x150] sm:$0xff] }
 0x7e3   : > { %12388 = vmatprep.subr.bf16.mxu0 %v12387_v8  ;;  %v12451_v7 = vpack.c.bf16 %v3872_v6, %v3871_v5  ;;  %v4039_v6 = vld [vmem:[#allocation16 + $0x40] sm:$0xff] }
 0x7e6   : > { %12390 = vmatpush3.bf16.msra.mxu0 %v12387_v8  ;;  %v3873_v8 = vld [vmem:[#allocation14 + $0x160] sm:$0xff] }
 0x7e7   : > { %12392 = vmatprep.subr.bf16.mxu0 %v12391_v11  ;;  %v12455_v10 = vpack.c.bf16 %v3874_v9, %v3873_v8  ;;  %v4041_v9 = vld [vmem:[#allocation16 + $0x50] sm:$0xff] }
 0x7ea   : > { %12394 = vmatpush3.bf16.msra.mxu0 %v12391_v11  ;;  %v3875_v11 = vld [vmem:[#allocation14 + $0x170] sm:$0xff] }
 0x7eb   : > { %12396 = vmatprep.subr.bf16.mxu0 %v12395_v14  ;;  %v12459_v13 = vpack.c.bf16 %v3876_v12, %v3875_v11  ;;  %v4043_v12 = vld [vmem:[#allocation16 + $0x60] sm:$0xff] }
 0x89c   : > { %v11027_v15 = vpop.f32.mrb[6].mxu0  ;;  %v15804_v16 = vpop.f32.mrb[16].mxu1 }
 0x89d   : > { %v3518_v17 = vpop.f32.mrb[7].mxu0  ;;  %v3851_v19 = vpop.f32.mrb[17].mxu1 }
 0x8a0   : > { %v11034_v24 = vpop.f32.mrb[8].mxu0 }
 0x8a1   : > { %v3609_v25 = vpop.f32.mrb[9].mxu0 }
 0x8a2   : > { %11067 = vmatprep.mubr.f32.mxu0 %v3609_v25 }
 0x8a3   : > { %11068 = vmatmul.mubr.f32.vlgmr.msra.gmra.mrb[10].mxu0 %v11034_v24  ;;  %v4124_v24 = vld [vmem:[#allocation16 + $0x88] sm:$0xff] }
 0x8a4   : > { %12398 = vmatpush3.bf16.msra.mxu0 %v12395_v14  ;;  %11102 = vmatprep.mubr.f32.mxu0 %v3518_v17  ;;  %v12471_v25 = vpack.c.bf16 %v4124_v24, %v4123_v22  ;;  %v4365_v22 = vld [vmem:[#allocation16 + $0x100] sm:$0xff]  ;;  %v4366_v24 = vld [vmem:[#allocation16 + $0x108] sm:$0xff] }
 0x8a5   : > { %12400 = vmatprep.subr.bf16.mxu0 %v12399_v26 }
 0x8a8   : > { %12402 = vmatpush3.bf16.msra.mxu0 %v12399_v26  ;;  %v4125_v26 = vld [vmem:[#allocation16 + $0x90] sm:$0xff] }
 0x8a9   : > { %12404 = vmatprep.subr.bf16.mxu0 %v12403_v30 }
 0x8ac   : > { %12406 = vmatpush3.bf16.msra.mxu0 %v12403_v30  ;;  %v12479_v30 = vpack.c.bf16 %v4128_v29, %v4127_v28  ;;  %v4369_v28 = vld [vmem:[#allocation16 + $0x120] sm:$0xff]  ;;  %v4370_v29 = vld [vmem:[#allocation16 + $0x128] sm:$0xff] }
 0x8ad   : > { %12408 = vmatprep.subr.bf16.mxu0 %v12407_v33 }
 0x8b0   : > { %12410 = vmatpush3.bf16.msra.mxu0 %v12407_v33  ;;  %v12483_v33 = vpack.c.bf16 %v4130_v32, %v4129_v31  ;;  %v4371_v31 = vld [vmem:[#allocation16 + $0x130] sm:$0xff]  ;;  %v4372_v32 = vld [vmem:[#allocation16 + $0x138] sm:$0xff] }
 0x8b1   : > { %12412 = vmatprep.subr.bf16.mxu0 %v12411_v36 }
 0x8b4   : > { %12414 = vmatpush3.bf16.msra.mxu0 %v12411_v36  ;;  %v12487_v36 = vpack.c.bf16 %v4132_v35, %v4131_v34  ;;  %v4373_v34 = vld [vmem:[#allocation16 + $0x140] sm:$0xff] }
 0x8b5   : > { %12416 = vmatprep.subr.bf16.mxu0 %v12415_v39 }
 0x8b8   : > { %12418 = vmatpush3.bf16.msra.mxu0 %v12415_v39  ;;  %v12491_v39 = vpack.c.bf16 %v4134_v38, %v4133_v37  ;;  %v4376_v37 = vld [vmem:[#allocation16 + $0x158] sm:$0xff] }
 0x8b9   : > { %12420 = vmatprep.subr.bf16.mxu0 %v12419_v45 }
 0x8bc   : > { %12422 = vmatpush3.bf16.msra.mxu0 %v12419_v45  ;;  %v12495_v45 = vpack.c.bf16 %v4136_v41, %v4135_v40  ;;  %v4378_v40 = vld [vmem:[#allocation16 + $0x168] sm:$0xff] }
 0x8bd   : > { %12424 = vmatprep.subr.bf16.mxu0 %v12423_v62 }
 0x8c0   : > { %12426 = vmatpush3.bf16.msra.mxu0 %v12423_v62  ;;  %v12499_v62 = vpack.c.bf16 %v4138_v48, %v4137_v46  ;;  %v4380_v46 = vld [vmem:[#allocation16 + $0x178] sm:$0xff] }
 0x8c1   : > { %12432 = vmatprep.subr.bf16.mxu0 %v12431_v51 }
 0x8c3   : > { %11103 = vmatmul.mubr.f32.vlgmr.msra.gmra.mrb[10].mxu0 %v11027_v15 }
 0x8c4   : > { %12434 = vmatpush3.bf16.msra.mxu0 %v12431_v51  ;;  %11144 = vmatprep.mubr.f32.mxu0 %v3851_v19  ;;  %v12503_v51 = vpack.c.bf16 %v4032_v60, %v4031_v50 }
 0x8c5   : > { %12436 = vmatprep.subr.bf16.mxu0 %v12435_v54 }
 0x8c8   : > { %12438 = vmatpush3.bf16.msra.mxu0 %v12435_v54  ;;  %v4033_v54 = vld [vmem:[#allocation16 + $0x10] sm:$0xff] }
 0x8c9   : > { %12440 = vmatprep.subr.bf16.mxu0 %v12439_v58  ;;  %v12507_v59 = vpack.c.bf16 %v4034_v55, %v4033_v54  ;;  %v9969_v55 = vld [vmem:[%s16718_s11 + $0x80] sm:$0xff] }
 0x8cc   : > { %12442 = vmatpush3.bf16.msra.mxu0 %v12439_v58 }
 0x8cd   : > { %12444 = vmatprep.subr.bf16.mxu0 %v12443_v1 }
 0x8d0   : > { %12446 = vmatpush3.bf16.msra.mxu0 %v12443_v1  ;;  %v4036_v1 = vld [vmem:[#allocation16 + $0x28] sm:$0xff] }
 0x8d1   : > { %12448 = vmatprep.subr.bf16.mxu0 %v12447_v4  ;;  %v12511_v2 = vpack.c.bf16 %v4036_v1, %v4035_v61  ;;  %v9973_v1 = vld [vmem:[%s16718_s11 + $0xa0] sm:$0xff] }
 0x8d4   : > { %12450 = vmatpush3.bf16.msra.mxu0 %v12447_v4  ;;  %v4038_v4 = vld [vmem:[#allocation16 + $0x38] sm:$0xff] }
 0x8d5   : > { %12452 = vmatprep.subr.bf16.mxu0 %v12451_v7  ;;  %v12515_v5 = vpack.c.bf16 %v4038_v4, %v4037_v3  ;;  %v9977_v4 = vld [vmem:[%s16718_s11 + $0xc0] sm:$0xff] }
 0x8d8   : > { %12454 = vmatpush3.bf16.msra.mxu0 %v12451_v7  ;;  %v4040_v7 = vld [vmem:[#allocation16 + $0x48] sm:$0xff] }
 0x8d9   : > { %12456 = vmatprep.subr.bf16.mxu0 %v12455_v10  ;;  %v12519_v8 = vpack.c.bf16 %v4040_v7, %v4039_v6  ;;  %v9979_v7 = vld [vmem:[%s16718_s11 + $0xd0] sm:$0xff] }
 0x8dc   : > { %12458 = vmatpush3.bf16.msra.mxu0 %v12455_v10  ;;  %v4042_v10 = vld [vmem:[#allocation16 + $0x58] sm:$0xff] }
 0x8dd   : > { %12460 = vmatprep.subr.bf16.mxu0 %v12459_v13  ;;  %v12523_v11 = vpack.c.bf16 %v4042_v10, %v4041_v9  ;;  %v9981_v9 = vld [vmem:[%s16718_s11 + $0xe0] sm:$0xff]  ;;  %v9982_v10 = vld [vmem:[%s16718_s11 + $0xe8] sm:$0xff] }
 0x8e0   : > { %12462 = vmatpush3.bf16.msra.mxu0 %v12459_v13  ;;  %v4044_v13 = vld [vmem:[#allocation16 + $0x68] sm:$0xff] }
 0x8e3   : > { %11145 = vmatmul.mubr.f32.vlgmr.msra.gmra.mrb[10].mxu0 %v15804_v16  ;;  %v4126_v16 = vld [vmem:[#allocation16 + $0x98] sm:$0xff] }
 0x8e4   : > { %11277 = vmatprep.mubr.msk.f32.mxu0 %vm2928_vm2, %v15758_v27  ;;  %v12475_v27 = vpack.c.bf16 %v4126_v16, %v4125_v26  ;;  %v4367_v26 = vld [vmem:[#allocation16 + $0x110] sm:$0xff]  ;;  %v4368_v16 = vld [vmem:[#allocation16 + $0x118] sm:$0xff] }
 0x9b6   : > { %v11146_v14 = vpop.f32.mrb[10].mxu0 }
 0x9b7   : > { %v3955_v15 = vmax.f32 %v11146_v14, 0.0  ;;  %v3943_v17 = vpop.f32.mrb[11].mxu0  ;;  %v12527_v14 = vpack.c.bf16 %v4044_v13, %v4043_v12  ;;  %v9983_v12 = vld [vmem:[%s16718_s11 + $0xf0] sm:$0xff]  ;;  %v9984_v13 = vld [vmem:[%s16718_s11 + $0xf8] sm:$0xff] }
 0x9b8   : > { %v3954_v19 = vmax.f32 %v3943_v17, 0.0  ;;  %v4046_v17 = vld [vmem:[#allocation16 + $0x78] sm:$0xff] }
 0x9ba   : > { %v15809_v21 = vpack.c.bf16 %v3955_v15, %v3954_v19  ;;  %v4045_v15 = vld [vmem:[#allocation16 + $0x70] sm:$0xff] }
 0x9bb   : > { %v12531_v19 = vpack.c.bf16 %v4046_v17, %v4045_v15  ;;  %v4535_v15 = vld [vmem:[%s16718_s11] sm:$0xff]  ;;  %v4536_v17 = vld [vmem:[%s16718_s11 + $0x8] sm:$0xff] }
 0x9bc   : > { %12464 = vmatprep.subr.bf16.mxu1 %v15809_v21 }
 0x9bd   : > { %12466 = vmatpush3.bf16.msra.mxu1 %v15809_v21 }
 0x9be   : > { %12468 = vmatprep.subr.bf16.mxu1 %v15809_v21 }
 0x9c0   : > { %11152 = vmatmul.mubr.msk.f32.vlgmr.msra.gmra.mrb[18].mxu1 %vm2928_vm2, %v15772_v42 }
 0x9c1   : > { %12470 = vmatpush3.bf16.msra.mxu1 %v15809_v21  ;;  %11158 = vmatprep.mubr.msk.f32.mxu1 %vm2928_vm2, %v15774_v43 }
 0x9c2   : > { %12472 = vmatprep.subr.bf16.mxu1 %v12471_v25 }
 0x9c4   : > { %11159 = vmatmul.mubr.msk.f32.vlgmr.msra.gmra.mrb[20].mxu1 %vm2928_vm2, %v15780_v44 }
 0x9c5   : > { %12474 = vmatpush3.bf16.msra.mxu1 %v12471_v25  ;;  %v12539_v25 = vpack.c.bf16 %v4366_v24, %v4365_v22  ;;  %v4973_v22 = vld [vmem:[#allocation17 + $0x40] sm:$0xff]  ;;  %v4974_v24 = vld [vmem:[#allocation17 + $0x48] sm:$0xff] }
 0x9c6   : > { %12476 = vmatprep.subr.bf16.mxu1 %v12475_v27 }
 0x9c9   : > { %12478 = vmatpush3.bf16.msra.mxu1 %v12475_v27  ;;  %v12543_v27 = vpack.c.bf16 %v4368_v16, %v4367_v26  ;;  %v12680_v26 = vpack.c.bf16 %v4974_v24, %v4973_v22  ;;  %v4976_v16 = vld [vmem:[#allocation17 + $0x58] sm:$0xff]  ;;  %v10000_v22 = vld [vmem:[%s16718_s11 + $0x168] sm:$0xff] }
 0x9ca   : > { %12480 = vmatprep.subr.bf16.mxu1 %v12479_v30 }
 0x9cd   : > { %12482 = vmatpush3.bf16.msra.mxu1 %v12479_v30  ;;  %v12547_v30 = vpack.c.bf16 %v4370_v29, %v4369_v28  ;;  %v4977_v28 = vld [vmem:[#allocation17 + $0x60] sm:$0xff]  ;;  %v4978_v29 = vld [vmem:[#allocation17 + $0x68] sm:$0xff] }
 0x9ce   : > { %12484 = vmatprep.subr.bf16.mxu1 %v12483_v33 }
 0x9d1   : > { %12486 = vmatpush3.bf16.msra.mxu1 %v12483_v33  ;;  %v12551_v33 = vpack.c.bf16 %v4372_v32, %v4371_v31  ;;  %v4979_v31 = vld [vmem:[#allocation17 + $0x70] sm:$0xff]  ;;  %v4980_v32 = vld [vmem:[#allocation17 + $0x78] sm:$0xff] }
 0x9d2   : > { %12488 = vmatprep.subr.bf16.mxu1 %v12487_v36 }
 0x9d5   : > { %12490 = vmatpush3.bf16.msra.mxu1 %v12487_v36  ;;  %v4375_v36 = vld [vmem:[#allocation16 + $0x150] sm:$0xff] }
 0x9d6   : > { %12492 = vmatprep.subr.bf16.mxu1 %v12491_v39  ;;  %v12559_v38 = vpack.c.bf16 %v4376_v37, %v4375_v36  ;;  %v4537_v37 = vld [vmem:[%s16718_s11 + $0x10] sm:$0xff] }
 0x9d9   : > { %12494 = vmatpush3.bf16.msra.mxu1 %v12491_v39  ;;  %v4377_v39 = vld [vmem:[#allocation16 + $0x160] sm:$0xff] }
 0x9da   : > { %12496 = vmatprep.subr.bf16.mxu1 %v12495_v45  ;;  %v12563_v41 = vpack.c.bf16 %v4378_v40, %v4377_v39 }
 0x9dd   : > { %12498 = vmatpush3.bf16.msra.mxu1 %v12495_v45  ;;  %v4379_v45 = vld [vmem:[#allocation16 + $0x170] sm:$0xff] }
 0x9de   : > { %12500 = vmatprep.subr.bf16.mxu1 %v12499_v62  ;;  %v12567_v48 = vpack.c.bf16 %v4380_v46, %v4379_v45  ;;  %v4539_v45 = vld [vmem:[%s16718_s11 + $0x20] sm:$0xff]  ;;  %v4540_v46 = vld [vmem:[%s16718_s11 + $0x28] sm:$0xff] }
 0x9e1   : > { %12502 = vmatpush3.bf16.msra.mxu1 %v12499_v62 }
 0x9e2   : > { %12504 = vmatprep.subr.bf16.mxu1 %v12503_v51 }
 0xa93   : > { %v11153_v52 = vpop.f32.mrb[18].mxu1 }
 0xa94   : > { %v4022_v53 = vpop.f32.mrb[19].mxu1 }
 0xa97   : > { %v11160_v57 = vpop.f32.mrb[20].mxu1 }
 0xa98   : > { %v4113_v58 = vpop.f32.mrb[21].mxu1 }
 0xa99   : > { %11193 = vmatprep.mubr.f32.mxu1 %v4113_v58 }
 0xa9a   : > { %11194 = vmatmul.mubr.f32.vlgmr.msra.gmra.mrb[22].mxu1 %v11160_v57  ;;  %v9970_v57 = vld [vmem:[%s16718_s11 + $0x88] sm:$0xff] }
 0xa9b   : > { %12506 = vmatpush3.bf16.msra.mxu1 %v12503_v51  ;;  %11228 = vmatprep.mubr.f32.mxu1 %v4022_v53  ;;  %v12579_v58 = vpack.c.bf16 %v9970_v57, %v9969_v55  ;;  %v4546_v55 = vld [vmem:[%s16718_s11 + $0x58] sm:$0xff] }
 0xa9c   : > { %12508 = vmatprep.subr.bf16.mxu1 %v12507_v59 }
 0xa9f   : > { %12510 = vmatpush3.bf16.msra.mxu1 %v12507_v59  ;;  %v9972_v59 = vld [vmem:[%s16718_s11 + $0x98] sm:$0xff] }
 0xaa0   : > { %12512 = vmatprep.subr.bf16.mxu1 %v12511_v2 }
 0xaa3   : > { %12514 = vmatpush3.bf16.msra.mxu1 %v12511_v2  ;;  %v9974_v2 = vld [vmem:[%s16718_s11 + $0xa8] sm:$0xff] }
 0xaa4   : > { %12516 = vmatprep.subr.bf16.mxu1 %v12515_v5 }
 0xaa7   : > { %12518 = vmatpush3.bf16.msra.mxu1 %v12515_v5  ;;  %v9978_v5 = vld [vmem:[%s16718_s11 + $0xc8] sm:$0xff] }
 0xaa8   : > { %12520 = vmatprep.subr.bf16.mxu1 %v12519_v8  ;;  %v12595_v6 = vpack.c.bf16 %v9978_v5, %v9977_v4  ;;  %v9990_v4 = vld [vmem:[%s16718_s11 + $0x118] sm:$0xff] }
 0xaab   : > { %12522 = vmatpush3.bf16.msra.mxu1 %v12519_v8  ;;  %v9980_v8 = vld [vmem:[%s16718_s11 + $0xd8] sm:$0xff] }
 0xaac   : > { %12524 = vmatprep.subr.bf16.mxu1 %v12523_v11 }
 0xaaf   : > { %12526 = vmatpush3.bf16.msra.mxu1 %v12523_v11  ;;  %v12603_v11 = vpack.c.bf16 %v9982_v10, %v9981_v9  ;;  %v9994_v9 = vld [vmem:[%s16718_s11 + $0x138] sm:$0xff] }
 0xab0   : > { %12528 = vmatprep.subr.bf16.mxu1 %v12527_v14 }
 0xab3   : > { %12530 = vmatpush3.bf16.msra.mxu1 %v12527_v14  ;;  %v12607_v14 = vpack.c.bf16 %v9984_v13, %v9983_v12  ;;  %v9996_v12 = vld [vmem:[%s16718_s11 + $0x148] sm:$0xff] }
 0xab4   : > { %12532 = vmatprep.subr.bf16.mxu1 %v12531_v19 }
 0xab7   : > { %12534 = vmatpush3.bf16.msra.mxu1 %v12531_v19  ;;  %v12611_v19 = vpack.c.bf16 %v4536_v17, %v4535_v15  ;;  %v9998_v15 = vld [vmem:[%s16718_s11 + $0x158] sm:$0xff] }
 0xab8   : > { %12536 = vmatprep.subr.bf16.mxu1 %v15809_v21 }
 0xaba   : > { %11229 = vmatmul.mubr.f32.vlgmr.msra.gmra.mrb[22].mxu1 %v11153_v52 }
 0xabb   : > { %12538 = vmatpush3.bf16.msra.mxu1 %v15809_v21  ;;  %11235 = vmatprep.mubr.msk.f32.mxu1 %vm2928_vm2, %v15740_v56  ;;  %v4374_v21 = vld [vmem:[#allocation16 + $0x148] sm:$0xff] }
 0xabc   : > { %12540 = vmatprep.subr.bf16.mxu1 %v12539_v25  ;;  %v12555_v35 = vpack.c.bf16 %v4374_v21, %v4373_v34 }
 0xabe   : > { %11236 = vmatmul.mubr.msk.f32.vlgmr.msra.gmra.mrb[24].mxu1 %vm2928_vm2, %v15755_v23 }
 0xabf   : > { %12542 = vmatpush3.bf16.msra.mxu1 %v12539_v25  ;;  %v4975_v25 = vld [vmem:[#allocation17 + $0x50] sm:$0xff] }
 0xac0   : > { %12544 = vmatprep.subr.bf16.mxu1 %v12543_v27 }
 0xac3   : > { %12546 = vmatpush3.bf16.msra.mxu1 %v12543_v27  ;;  %v12683_v27 = vpack.c.bf16 %v4976_v16, %v4975_v25  ;;  %v10001_v25 = vld [vmem:[%s16718_s11 + $0x170] sm:$0xff] }
 0xac4   : > { %12548 = vmatprep.subr.bf16.mxu1 %v12547_v30 }
 0xac7   : > { %12550 = vmatpush3.bf16.msra.mxu1 %v12547_v30  ;;  %v12686_v30 = vpack.c.bf16 %v4978_v29, %v4977_v28  ;;  %v4965_v28 = vld [vmem:[#allocation17 + $0x8] sm:$0xff] }
 0xac8   : > { %12552 = vmatprep.subr.bf16.mxu1 %v12551_v33 }
 0xacb   : > { %12554 = vmatpush3.bf16.msra.mxu1 %v12551_v33  ;;  %v12689_v33 = vpack.c.bf16 %v4980_v32, %v4979_v31 }
 0xacc   : > { %12556 = vmatprep.subr.bf16.mxu1 %v12555_v35 }
 0xacf   : > { %12558 = vmatpush3.bf16.msra.mxu1 %v12555_v35 }
 0xad0   : > { %12560 = vmatprep.subr.bf16.mxu1 %v12559_v38 }
 0xad3   : > { %12562 = vmatpush3.bf16.msra.mxu1 %v12559_v38  ;;  %v4538_v38 = vld [vmem:[%s16718_s11 + $0x18] sm:$0xff] }
 0xad4   : > { %12564 = vmatprep.subr.bf16.mxu1 %v12563_v41 }
 0xad7   : > { %12566 = vmatpush3.bf16.msra.mxu1 %v12563_v41  ;;  %v12615_v41 = vpack.c.bf16 %v4538_v38, %v4537_v37  ;;  %v4970_v38 = vld [vmem:[#allocation17 + $0x30] sm:$0xff] }
 0xad8   : > { %12568 = vmatprep.subr.bf16.mxu1 %v12567_v48 }
 0xadb   : > { %12570 = vmatpush3.bf16.msra.mxu1 %v12567_v48  ;;  %v12619_v48 = vpack.c.bf16 %v4540_v46, %v4539_v45 }
 0xb91   : > { %v11237_v62 = vpop.f32.mrb[24].mxu1 }
 0xb92   : > { %v4355_v50 = vpop.f32.mrb[25].mxu1 }
 0xb93   : > { %11270 = vmatprep.mubr.f32.mxu1 %v4355_v50  ;;  %v4542_v50 = vld [vmem:[%s16718_s11 + $0x38] sm:$0xff] }
 0xb94   : > { %11271 = vmatmul.mubr.f32.vlgmr.msra.gmra.mrb[22].mxu1 %v11237_v62  ;;  %v4541_v62 = vld [vmem:[%s16718_s11 + $0x30] sm:$0xff] }
 0xb95   : > { %11361 = vmatprep.mubr.msk.f32.mxu1 %vm2928_vm2, %v15740_v56  ;;  %v9971_v56 = vld [vmem:[%s16718_s11 + $0x90] sm:$0xff] }
 0xb96   : > { %v12583_v61 = vpack.c.bf16 %v9972_v59, %v9971_v56  ;;  %v4548_v56 = vld [vmem:[%s16718_s11 + $0x68] sm:$0xff] }
 0xc67   : > { %v11272_v60 = vpop.f32.mrb[22].mxu1 }
 0xc68   : > { %v4459_v51 = vmax.f32 %v11272_v60, 0.0  ;;  %v4447_v52 = vpop.f32.mrb[23].mxu1  ;;  %v12623_v60 = vpack.c.bf16 %v4542_v50, %v4541_v62  ;;  %v5127_v62 = vld [vmem:[#allocation19] sm:$0xff] }
 0xc69   : > { %v4458_v53 = vmax.f32 %v4447_v52, 0.0  ;;  %v4544_v52 = vld [vmem:[%s16718_s11 + $0x48] sm:$0xff] }
 0xc6b   : > { %v12571_v54 = vpack.c.bf16 %v4459_v51, %v4458_v53  ;;  %v4543_v51 = vld [vmem:[%s16718_s11 + $0x40] sm:$0xff] }
 0xc6c   : > { %v12627_v53 = vpack.c.bf16 %v4544_v52, %v4543_v51  ;;  %v5158_v52 = vld [vmem:[%s16719_s6 + $0x8] sm:$0xff] }
 0xc6d   : > { %12572 = vmatprep.subr.bf16.mxu0 %v12571_v54  ;;  %12644 = vmatprep.subr.bf16.mxu1 %v12571_v54 }
 0xc6e   : > { %12574 = vmatpush3.bf16.msra.mxu0 %v12571_v54  ;;  %12646 = vmatpush3.bf16.msra.mxu1 %v12571_v54 }
 0xc6f   : > { %12576 = vmatprep.subr.bf16.mxu0 %v12571_v54  ;;  %12679 = vmatprep.subr.bf16.mxu1 %v14859_v47 }
 0xc71   : > { %11278 = vmatmul.mubr.msk.f32.vlgmr.msra.gmra.mrb[12].mxu0 %vm2928_vm2, %v15772_v42  ;;  %11362 = vmatmul.mubr.msk.f32.vlgmr.msra.gmra.mrb[26].mxu1 %vm2928_vm2, %v15755_v23  ;;  %v12587_v23 = vpack.c.bf16 %v9974_v2, %v9973_v1  ;;  %v9975_v42 = vld [vmem:[%s16718_s11 + $0xb0] sm:$0xff]  ;;  %v4550_v1 = vld [vmem:[%s16718_s11 + $0x78] sm:$0xff] }
 0xc72   : > { %12578 = vmatpush3.bf16.msra.mxu0 %v12571_v54  ;;  %11284 = vmatprep.mubr.msk.f32.mxu0 %vm2928_vm2, %v15774_v43  ;;  %v9976_v43 = vld [vmem:[%s16718_s11 + $0xb8] sm:$0xff]  ;;  %v4545_v54 = vld [vmem:[%s16718_s11 + $0x50] sm:$0xff] }
 0xc73   : > { %12580 = vmatprep.subr.bf16.mxu0 %v12579_v58  ;;  %11415 = vmatprep.mubr.msk.f32.mxu1 %vm14860_vm3, %v14861_v20  ;;  %v12591_v3 = vpack.c.bf16 %v9976_v43, %v9975_v42  ;;  %v12631_v57 = vpack.c.bf16 %v4546_v55, %v4545_v54  ;;  %v9988_v42 = vld [vmem:[%s16718_s11 + $0x108] sm:$0xff]  ;;  %v5157_v54 = vld [vmem:[%s16719_s6] sm:$0xff] }
 0xc74   : > { %12681 = vmatpush3.bf16.msra.mxu1 %v12680_v26  ;;  %v10002_v26 = vld [vmem:[%s16718_s11 + $0x178] sm:$0xff] }
 0xc75   : > { %11285 = vmatmul.mubr.msk.f32.vlgmr.msra.gmra.mrb[14].mxu0 %vm2928_vm2, %v15780_v44  ;;  %v12599_v44 = vpack.c.bf16 %v9980_v8, %v9979_v7  ;;  %12682 = vmatprep.subr.bf16.mxu1 %v14859_v47  ;;  %v9992_v7 = vld [vmem:[%s16718_s11 + $0x128] sm:$0xff]  ;;  %v12675_v16 = vpack.c.bf16 %v10002_v26, %v10001_v25  ;;  %v5184_v25 = vld [vmem:[%s16719_s6 + $0xd8] sm:$0xff] }
 0xc76   : > { %12582 = vmatpush3.bf16.msra.mxu0 %v12579_v58  ;;  %v4547_v58 = vld [vmem:[%s16718_s11 + $0x60] sm:$0xff] }
 0xc77   : > { %12584 = vmatprep.subr.bf16.mxu0 %v12583_v61  ;;  %v12635_v59 = vpack.c.bf16 %v4548_v56, %v4547_v58  ;;  %v5164_v58 = vld [vmem:[%s16719_s6 + $0x38] sm:$0xff]  ;;  %v5167_v56 = vld [vmem:[%s16719_s6 + $0x50] sm:$0xff] }
 0xc78   : > { %12684 = vmatpush3.bf16.msra.mxu1 %v12683_v27  ;;  %v4964_v27 = vld [vmem:[#allocation17] sm:$0xff] }
 0xc79   : > { %12685 = vmatprep.subr.bf16.mxu1 %v14859_v47 }
 0xc7a   : > { %12586 = vmatpush3.bf16.msra.mxu0 %v12583_v61  ;;  %v4549_v61 = vld [vmem:[%s16718_s11 + $0x70] sm:$0xff] }
 0xc7b   : > { %12588 = vmatprep.subr.bf16.mxu0 %v12587_v23  ;;  %v12639_v2 = vpack.c.bf16 %v4550_v1, %v4549_v61  ;;  %v12707_v61 = vpack.c.bf16 %v5167_v56, %v5164_v58  ;;  %v5163_v1 = vld [vmem:[%s16719_s6 + $0x30] sm:$0xff]  ;;  %v5165_v56 = vld [vmem:[%s16719_s6 + $0x40] sm:$0xff] }
 0xc7c   : > { %12687 = vmatpush3.bf16.msra.mxu1 %v12686_v30  ;;  %v12692_v30 = vpack.c.bf16 %v4965_v28, %v4964_v27  ;;  %v5191_v27 = vld [vmem:[%s16719_s6 + $0x110] sm:$0xff] }
 0xc7d   : > { %12688 = vmatprep.subr.bf16.mxu1 %v14859_v47  ;;  %v5187_v28 = vld [vmem:[%s16719_s6 + $0xf0] sm:$0xff] }
 0xc7e   : > { %12590 = vmatpush3.bf16.msra.mxu0 %v12587_v23  ;;  %v9987_v23 = vld [vmem:[%s16718_s11 + $0x100] sm:$0xff] }
 0xc7f   : > { %12592 = vmatprep.subr.bf16.mxu0 %v12591_v3  ;;  %v12647_v43 = vpack.c.bf16 %v9988_v42, %v9987_v23  ;;  %v5170_v23 = vld [vmem:[%s16719_s6 + $0x68] sm:$0xff]  ;;  %v5173_v42 = vld [vmem:[%s16719_s6 + $0x80] sm:$0xff] }
 0xc80   : > { %12690 = vmatpush3.bf16.msra.mxu1 %v12689_v33  ;;  %v4966_v33 = vld [vmem:[#allocation17 + $0x10] sm:$0xff] }
 0xc81   : > { %12691 = vmatprep.subr.bf16.mxu1 %v14859_v47 }
 0xc82   : > { %12594 = vmatpush3.bf16.msra.mxu0 %v12591_v3  ;;  %v9989_v3 = vld [vmem:[%s16718_s11 + $0x110] sm:$0xff] }
 0xc83   : > { %12596 = vmatprep.subr.bf16.mxu0 %v12595_v6  ;;  %v12651_v5 = vpack.c.bf16 %v9990_v4, %v9989_v3  ;;  %v12711_v3 = vpack.c.bf16 %v5173_v42, %v5170_v23  ;;  %v5169_v4 = vld [vmem:[%s16719_s6 + $0x60] sm:$0xff] }
 0xc84   : > { %v5177_v42 = vld [vmem:[%s16719_s6 + $0xa0] sm:$0xff] }
 0xc86   : > { %12598 = vmatpush3.bf16.msra.mxu0 %v12595_v6  ;;  %v9991_v6 = vld [vmem:[%s16718_s11 + $0x120] sm:$0xff] }
 0xc87   : > { %12600 = vmatprep.subr.bf16.mxu0 %v12599_v44  ;;  %v12655_v8 = vpack.c.bf16 %v9992_v7, %v9991_v6 }
 0xc8a   : > { %12602 = vmatpush3.bf16.msra.mxu0 %v12599_v44  ;;  %v9993_v44 = vld [vmem:[%s16718_s11 + $0x130] sm:$0xff] }
 0xc8b   : > { %12604 = vmatprep.subr.bf16.mxu0 %v12603_v11  ;;  %v12659_v10 = vpack.c.bf16 %v9994_v9, %v9993_v44 }
 0xc8e   : > { %12606 = vmatpush3.bf16.msra.mxu0 %v12603_v11  ;;  %v9995_v11 = vld [vmem:[%s16718_s11 + $0x140] sm:$0xff] }
 0xc8f   : > { %12608 = vmatprep.subr.bf16.mxu0 %v12607_v14  ;;  %v12663_v13 = vpack.c.bf16 %v9996_v12, %v9995_v11  ;;  %v5179_v11 = vld [vmem:[%s16719_s6 + $0xb0] sm:$0xff] }
 0xc92   : > { %12610 = vmatpush3.bf16.msra.mxu0 %v12607_v14  ;;  %v9997_v14 = vld [vmem:[%s16718_s11 + $0x150] sm:$0xff] }
 0xc93   : > { %12612 = vmatprep.subr.bf16.mxu0 %v12611_v19  ;;  %v12667_v17 = vpack.c.bf16 %v9998_v15, %v9997_v14  ;;  %v5178_v14 = vld [vmem:[%s16719_s6 + $0xa8] sm:$0xff] }
 0xd44   : > { %v11279_v34 = vpop.f32.mrb[12].mxu0  ;;  %v15862_v21 = vpop.f32.mrb[26].mxu1 }
 0xd45   : > { %v4526_v35 = vpop.f32.mrb[13].mxu0  ;;  %v4859_v36 = vpop.f32.mrb[27].mxu1 }
 0xd48   : > { %v11286_v39 = vpop.f32.mrb[14].mxu0 }
 0xd49   : > { %v4617_v40 = vpop.f32.mrb[15].mxu0 }
 0xd4a   : > { %11319 = vmatprep.mubr.f32.mxu0 %v4617_v40 }
 0xd4b   : > { %11320 = vmatmul.mubr.f32.vlgmr.msra.gmra.mrb[16].mxu0 %v11286_v39  ;;  %v4971_v39 = vld [vmem:[#allocation17 + $0x38] sm:$0xff] }
 0xd4c   : > { %12614 = vmatpush3.bf16.msra.mxu0 %v12611_v19  ;;  %11354 = vmatprep.mubr.f32.mxu0 %v4526_v35  ;;  %v9999_v19 = vld [vmem:[%s16718_s11 + $0x160] sm:$0xff]  ;;  %v12701_v40 = vpack.c.bf16 %v4971_v39, %v4970_v38 }
 0xd4d   : > { %12616 = vmatprep.subr.bf16.mxu0 %v12615_v41  ;;  %v12671_v24 = vpack.c.bf16 %v10000_v22, %v9999_v19  ;;  %v5185_v19 = vld [vmem:[%s16719_s6 + $0xe0] sm:$0xff] }
 0xd50   : > { %12618 = vmatpush3.bf16.msra.mxu0 %v12615_v41 }
 0xd51   : > { %12620 = vmatprep.subr.bf16.mxu0 %v12619_v48 }
 0xd54   : > { %12622 = vmatpush3.bf16.msra.mxu0 %v12619_v48 }
 0xd55   : > { %12624 = vmatprep.subr.bf16.mxu0 %v12623_v60 }
 0xd58   : > { %12626 = vmatpush3.bf16.msra.mxu0 %v12623_v60 }
 0xd59   : > { %12628 = vmatprep.subr.bf16.mxu0 %v12627_v53 }
 0xd5c   : > { %12630 = vmatpush3.bf16.msra.mxu0 %v12627_v53  ;;  %v5161_v53 = vld [vmem:[%s16719_s6 + $0x20] sm:$0xff] }
 0xd5d   : > { %12632 = vmatprep.subr.bf16.mxu0 %v12631_v57  ;;  %v12703_v55 = vpack.c.bf16 %v5161_v53, %v5158_v52  ;;  %v5159_v52 = vld [vmem:[%s16719_s6 + $0x10] sm:$0xff]  ;;  %v5162_v53 = vld [vmem:[%s16719_s6 + $0x28] sm:$0xff] }
 0xd60   : > { %12634 = vmatpush3.bf16.msra.mxu0 %v12631_v57  ;;  %v5160_v57 = vld [vmem:[%s16719_s6 + $0x18] sm:$0xff] }
 0xd61   : > { %12636 = vmatprep.subr.bf16.mxu0 %v12635_v59 }
 0xd64   : > { %12638 = vmatpush3.bf16.msra.mxu0 %v12635_v59  ;;  %v12705_v59 = vpack.c.bf16 %v5160_v57, %v5157_v54  ;;  %v10006_v54 = vld [vmem:[#allocation22] ss:$0 sm:$0xff]  ;;  %v12736_v57 = vpack.c.bf16 %v5162_v53, %v5159_v52 }
 0xd65   : > { %12640 = vmatprep.subr.bf16.mxu0 %v12639_v2 }
 0xd68   : > { %12642 = vmatpush3.bf16.msra.mxu0 %v12639_v2  ;;  %v5166_v2 = vld [vmem:[%s16719_s6 + $0x48] sm:$0xff] }
 0xd69   : > { %12648 = vmatprep.subr.bf16.mxu0 %v12647_v43 }
 0xd6b   : > { %11355 = vmatmul.mubr.f32.vlgmr.msra.gmra.mrb[16].mxu0 %v11279_v34  ;;  %v4967_v34 = vld [vmem:[#allocation17 + $0x18] sm:$0xff] }
 0xd6c   : > { %12650 = vmatpush3.bf16.msra.mxu0 %v12647_v43  ;;  %11396 = vmatprep.mubr.f32.mxu0 %v4859_v36  ;;  %v12695_v35 = vpack.c.bf16 %v4967_v34, %v4966_v33  ;;  %v4969_v36 = vld [vmem:[#allocation17 + $0x28] sm:$0xff]  ;;  %v12709_v43 = vpack.c.bf16 %v5166_v2, %v5163_v1  ;;  %v5171_v1 = vld [vmem:[%s16719_s6 + $0x70] sm:$0xff] }
 0xd6d   : > { %12652 = vmatprep.subr.bf16.mxu0 %v12651_v5  ;;  %v5174_v2 = vld [vmem:[%s16719_s6 + $0x88] sm:$0xff] }
 0xd6e   : > { %v12742_v23 = vpack.c.bf16 %v5174_v2, %v5171_v1 }
 0xd70   : > { %12654 = vmatpush3.bf16.msra.mxu0 %v12651_v5  ;;  %v5172_v5 = vld [vmem:[%s16719_s6 + $0x78] sm:$0xff] }
 0xd71   : > { %12656 = vmatprep.subr.bf16.mxu0 %v12655_v8  ;;  %v12713_v6 = vpack.c.bf16 %v5172_v5, %v5169_v4  ;;  %v5183_v4 = vld [vmem:[%s16719_s6 + $0xd0] sm:$0xff]  ;;  %v5186_v5 = vld [vmem:[%s16719_s6 + $0xe8] sm:$0xff] }
 0xd74   : > { %12658 = vmatpush3.bf16.msra.mxu0 %v12655_v8 }
 0xd75   : > { %12660 = vmatprep.subr.bf16.mxu0 %v12659_v10 }
 0xd78   : > { %12662 = vmatpush3.bf16.msra.mxu0 %v12659_v10  ;;  %v5176_v10 = vld [vmem:[%s16719_s6 + $0x98] sm:$0xff] }
 0xd79   : > { %12664 = vmatprep.subr.bf16.mxu0 %v12663_v13  ;;  %v12715_v12 = vpack.c.bf16 %v5179_v11, %v5176_v10  ;;  %v5198_v10 = vld [vmem:[%s16719_s6 + $0x148] sm:$0xff] }
 0xd7c   : > { %12666 = vmatpush3.bf16.msra.mxu0 %v12663_v13  ;;  %v5175_v13 = vld [vmem:[%s16719_s6 + $0x90] sm:$0xff] }
 0xd7d   : > { %12668 = vmatprep.subr.bf16.mxu0 %v12667_v17  ;;  %v12717_v15 = vpack.c.bf16 %v5178_v14, %v5175_v13  ;;  %v5204_v13 = vld [vmem:[%s16719_s6 + $0x178] sm:$0xff] }
 0xd80   : > { %12670 = vmatpush3.bf16.msra.mxu0 %v12667_v17  ;;  %v5182_v17 = vld [vmem:[%s16719_s6 + $0xc8] sm:$0xff] }
 0xd81   : > { %12672 = vmatprep.subr.bf16.mxu0 %v12671_v24  ;;  %v12719_v22 = vpack.c.bf16 %v5185_v19, %v5182_v17 }
 0xd84   : > { %12674 = vmatpush3.bf16.msra.mxu0 %v12671_v24  ;;  %v5181_v24 = vld [vmem:[%s16719_s6 + $0xc0] sm:$0xff] }
 0xd85   : > { %12676 = vmatprep.subr.bf16.mxu0 %v12675_v16  ;;  %v12721_v26 = vpack.c.bf16 %v5184_v25, %v5181_v24 }
 0xd88   : > { %12678 = vmatpush3.bf16.msra.mxu0 %v12675_v16  ;;  %v5188_v16 = vld [vmem:[%s16719_s6 + $0xf8] sm:$0xff] }
 0xd89   : > { %11472 = vmatprep.subr.mxu0 %v14861_v20 }
 0xd8b   : > { %11397 = vmatmul.mubr.f32.vlgmr.msra.gmra.mrb[16].mxu0 %v15862_v21  ;;  %v4968_v21 = vld [vmem:[#allocation17 + $0x20] sm:$0xff] }
 0xd8c   : > { %11474 = vmatprep.mubr.msk.f32.mxu0 %vm14860_vm3, %v14861_v20  ;;  %v12698_v37 = vpack.c.bf16 %v4969_v36, %v4968_v21  ;;  %v5196_v21 = vld [vmem:[%s16719_s6 + $0x138] sm:$0xff] }
 0xd8d   : > { %v5200_v36 = vld [vmem:[%s16719_s6 + $0x158] sm:$0xff] }
 0xe5e   : > { %v11398_v29 = vpop.f32.mrb[16].mxu0 }
 0xe5f   : > { %v4963_v31 = vmax.f32 %v11398_v29, 0.0  ;;  %v4951_v32 = vpop.f32.mrb[17].mxu0  ;;  %v12723_v29 = vpack.c.bf16 %v5191_v27, %v5188_v16 }
 0xe60   : > { %v4962_v41 = vmax.f32 %v4951_v32, 0.0  ;;  %v5197_v32 = vld [vmem:[%s16719_s6 + $0x140] sm:$0xff] }
 0xe61   : > { %11416 = vmatmul.mubr.msk.f32.vlgmr.msra.gmra.mrb[28].mxu1 %vm3111_vm4, %v4963_v31  ;;  %v5194_v31 = vld [vmem:[%s16719_s6 + $0x128] sm:$0xff] }
 0xe62   : > { %12693 = vmatpush3.bf16.msra.mxu1 %v12692_v30  ;;  %11434 = vmatprep.mubr.msk.f32.mxu1 %vm14860_vm3, %v14861_v20  ;;  %v5190_v30 = vld [vmem:[%s16719_s6 + $0x108] sm:$0xff]  ;;  %v12727_v34 = vpack.c.bf16 %v5197_v32, %v5194_v31 }
 0xe63   : > { %12694 = vmatprep.subr.bf16.mxu1 %v14859_v47  ;;  %v12725_v33 = vpack.c.bf16 %v5190_v30, %v5187_v28 }
 0xe66   : > { %12696 = vmatpush3.bf16.msra.mxu1 %v12695_v35  ;;  %v5193_v35 = vld [vmem:[%s16719_s6 + $0x120] sm:$0xff] }
 0xe67   : > { %12697 = vmatprep.subr.bf16.mxu1 %v14859_v47  ;;  %v12729_v38 = vpack.c.bf16 %v5196_v21, %v5193_v35 }
 0xe6a   : > { %12699 = vmatpush3.bf16.msra.mxu1 %v12698_v37  ;;  %v5203_v37 = vld [vmem:[%s16719_s6 + $0x170] sm:$0xff] }
 0xe6b   : > { %12700 = vmatprep.subr.bf16.mxu1 %v14859_v47  ;;  %v12731_v39 = vpack.c.bf16 %v5203_v37, %v5200_v36 }
 0xe6e   : > { %12702 = vmatpush3.bf16.msra.mxu1 %v12701_v40  ;;  %v5199_v40 = vld [vmem:[%s16719_s6 + $0x150] sm:$0xff] }
 0xe6f   : > { %12704 = vmatprep.subr.bf16.mxu1 %v12703_v55 }
 0xe71   : > { %11435 = vmatmul.mubr.msk.f32.vlgmr.msra.gmra.mrb[30].mxu1 %vm3111_vm4, %v4962_v41  ;;  %v5202_v41 = vld [vmem:[%s16719_s6 + $0x168] sm:$0xff] }
 0xe72   : > { %5286 = vmatprep.mubr.f32.mxu1 %v14861_v20  ;;  %12706 = vmatpush1.bf16.msra.mxu1 %v12705_v59  ;;  %v5168_v59 = vld [vmem:[%s16719_s6 + $0x58] sm:$0xff] }
 0xe73   : > { %12708 = vmatprep.subr.bf16.mxu1 %v12707_v61  ;;  %v12739_v61 = vpack.c.bf16 %v5168_v59, %v5165_v56 }
 0xe76   : > { %12710 = vmatpush1.bf16.msra.mxu1 %v12709_v43  ;;  %v5180_v43 = vld [vmem:[%s16719_s6 + $0xb8] sm:$0xff] }
 0xe77   : > { %12712 = vmatprep.subr.bf16.mxu1 %v12711_v3  ;;  %v12745_v3 = vpack.c.bf16 %v5180_v43, %v5177_v42 }
 0xe7a   : > { %12714 = vmatpush1.bf16.msra.mxu1 %v12713_v6  ;;  %v12748_v6 = vpack.c.bf16 %v5186_v5, %v5183_v4 }
 0xe7b   : > { %12716 = vmatprep.subr.bf16.mxu1 %v12715_v12  ;;  %v5201_v12 = vld [vmem:[%s16719_s6 + $0x160] sm:$0xff] }
 0xe7c   : > { %v12757_v14 = vpack.c.bf16 %v5204_v13, %v5201_v12  ;;  %v5525_v13 = vld [vmem:[#allocation25] sm:$0xff] }
 0xe7e   : > { %12718 = vmatpush1.bf16.msra.mxu1 %v12717_v15  ;;  %v5205_v15 = vld [vmem:[#allocation23] sm:$0x7] }
 0xe7f   : > { %12720 = vmatprep.subr.bf16.mxu1 %v12719_v22  ;;  %v5214_v17 = vrot.slane %v5205_v15, %v15748_v0  ;;  %v5210_v22 = vrot.slane %v5205_v15, %v15746_v63  ;;  %v5218_v16 = vrot.slane %v5205_v15, %v15737_v49 }
 0xe82   : > { %12722 = vmatpush1.bf16.msra.mxu1 %v12721_v26 }
 0xe83   : > { %12724 = vmatprep.subr.bf16.mxu1 %v12723_v29 }
 0xe86   : > { %12726 = vmatpush1.bf16.msra.mxu1 %v12725_v33 }
 0xe87   : > { %12728 = vmatprep.subr.bf16.mxu1 %v12727_v34 }
 0xe8a   : > { %12730 = vmatpush1.bf16.msra.mxu1 %v12729_v38 }
 0xe8b   : > { %12732 = vmatprep.subr.bf16.mxu1 %v12731_v39 }
 0xf34   : > { %v5050_v45 = vpop.f32.mrb[28].mxu1 }
 0xf35   : > { %v11417_v46 = vpop.f32.mrb[29].mxu1 }
 0xf44   : > { %v5123_v48 = vpop.f32.mrb[30].mxu1 }
 0xf45   : > { %v5124_v50 = vadd.f32 %v5123_v48, %v5050_v45  ;;  %v11436_v60 = vpop.f32.mrb[31].mxu1  ;;  %v12733_v45 = vpack.c.bf16 %v5202_v41, %v5199_v40 }
 0xf46   : > { %v10005_v60 = vld [vmem:[#allocation20] ss:$0 sm:$0xff] }
 0xf47   : > { %v5128_v51 = vadd.f32 %v5127_v62, %v5124_v50  ;;  %12734 = vmatpush1.bf16.msra.mxu1 %v12733_v45 }
 0xf48   : > { %12735 = vmatprep.subr.bf16.mxu1 %v14859_v47 }
 0xf49   : > { %5131 = vadd.xlane.f32.xlu0 %v5128_v51 }
 0xfd6   : > { %v5132_v7 = vpop.xlane.xlu0 %5131 }
 0xfd7   : > { %v5134_v8 = vmul.f32 0.0078125, %v5132_v7  ;;  %v5189_v7 = vld [vmem:[%s16719_s6 + $0x100] sm:$0xff] }
 0xfd9   : > { %v5135_v44 = vsub.f32 %v5128_v51, %v5134_v8  ;;  %v5192_v8 = vld [vmem:[%s16719_s6 + $0x118] sm:$0xff] }
 0xfdb   : > { %v5136_v9 = vmul.f32 %v5135_v44, %v5135_v44 }
 0xfdd   : > { %5137 = vadd.xlane.f32.xlu0 %v5136_v9  ;;  %v5195_v9 = vld [vmem:[%s16719_s6 + $0x130] sm:$0xff] }
 0xfde   : > { %v12754_v11 = vpack.c.bf16 %v5198_v10, %v5195_v9  ;;  %v5698_v10 = vld [vmem:[#allocation25 + $0x38] sm:$0xff] }
0x106a   : > { %v5138_v46 = vpop.xlane.xlu0 %5137 }
0x106b   : > { %v5139_v48 = vmul.f32 0.0078125, %v5138_v46 }
0x106d   : > { %v5140_v62 = vadd.f32 1e-05, %v5139_v48 }
0x106f   : > { %13613 = vrsqrt.f32 %v5140_v62 }
0x1079   : > { %v13614_v50 = vpop.eup %13613 }
0x107a   : > { %v5142_v51 = vmul.f32 %v13614_v50, %v5135_v44  ;;  %v12751_v44 = vpack.c.bf16 %v5192_v8, %v5189_v7  ;;  %v5695_v7 = vld [vmem:[#allocation25 + $0x20] sm:$0xff]  ;;  %v5696_v8 = vld [vmem:[#allocation25 + $0x28] sm:$0xff] }
0x107b   : > { %v12760_v9 = vpack.c.bf16 %v5696_v8, %v5695_v7 }
0x107c   : > { %v5149_v55 = vmul.f32 %v10005_v60, %v5142_v51 }
0x107e   : > { %v15941_v58 = vadd.f32 %v10006_v54, %v5149_v55 }
0x1080   : > { %5287 = vmatmul.mubr.f32.vlgmr.msra.gmra.mrb[32].mxu1 %v15941_v58 }
0x1081   : > { %12737 = vmatpush3.bf16.msra.mxu1 %v12736_v57  ;;  %11469 = vmatprep.mubr.msk.f32.mxu1 %vm14860_vm3, %v14861_v20 }
0x1082   : > { %12738 = vmatprep.subr.bf16.mxu1 %v14859_v47 }
0x1085   : > { %12740 = vmatpush3.bf16.msra.mxu1 %v12739_v61 }
0x1086   : > { %12741 = vmatprep.subr.bf16.mxu1 %v14859_v47 }
0x1089   : > { %12743 = vmatpush3.bf16.msra.mxu1 %v12742_v23 }
0x108a   : > { %12744 = vmatprep.subr.bf16.mxu1 %v14859_v47 }
0x108d   : > { %12746 = vmatpush3.bf16.msra.mxu1 %v12745_v3 }
0x108e   : > { %12747 = vmatprep.subr.bf16.mxu1 %v14859_v47 }
0x1091   : > { %12749 = vmatpush3.bf16.msra.mxu1 %v12748_v6 }
0x1092   : > { %12750 = vmatprep.subr.bf16.mxu1 %v14859_v47 }
0x1095   : > { %12752 = vmatpush3.bf16.msra.mxu1 %v12751_v44  ;;  %v5697_v44 = vld [vmem:[#allocation25 + $0x30] sm:$0xff] }
0x1096   : > { %12753 = vmatprep.subr.bf16.mxu1 %v14859_v47 }
0x1099   : > { %12755 = vmatpush3.bf16.msra.mxu1 %v12754_v11  ;;  %v12763_v11 = vpack.c.bf16 %v5698_v10, %v5697_v44  ;;  %v10023_v44 = vld [vmem:[#allocation26] ss:$0 sm:$0xff] }
0x109a   : > { %12756 = vmatprep.subr.bf16.mxu1 %v14859_v47 }
0x109d   : > { %12758 = vmatpush3.bf16.msra.mxu1 %v12757_v14  ;;  %v5526_v14 = vld [vmem:[#allocation25 + $0x8] sm:$0xff] }
0x109e   : > { %11514 = vmatprep.subr.mxu1 %v14861_v20  ;;  %v12766_v15 = vpack.c.bf16 %v5526_v14, %v5525_v13  ;;  %v6367_v13 = vld [vmem:[%s16720_s12] sm:$0xff] }
0x10a0   : > { %11470 = vmatmul.mubr.f32.vlgmr.msra.gmra.mrb[34].mxu1 %v15941_v58 }
0x10a1   : > { %11516 = vmatprep.mubr.msk.f32.mxu1 %vm14860_vm3, %v14861_v20 }
0x1153   : > { %v5288_v19 = vpop.f32.mrb[32].mxu1 }
0x1154   : > { %v5290_v24 = vpop.f32.mrb[33].mxu1  ;;  %v5289_v26 = vadd.f32 %v5288_v19, %v5210_v22  ;;  %v5528_v19 = vld [vmem:[#allocation25 + $0x18] sm:$0xff] }
0x1155   : > { %v5291_v25 = vadd.f32 %v5290_v24, %v5214_v17  ;;  %v5527_v17 = vld [vmem:[#allocation25 + $0x10] sm:$0xff] }
0x1157   : > { %5531 = vrot.lane.b32.xlu0 %v5291_v25, %s14862_s16  ;;  %11473 = vmatpush3.xpose.msk.msra.mxu0 %vm5363_vm5, %v5291_v25 }
0x1158   : > { %11477 = vmatprep.subr.mxu0 %v14861_v20 }
0x115a   : > { %11475 = vmatmul.mubr.msk.f32.vlgmr.msra.gmra.mrb[18].mxu0 %vm5363_vm5, %v5289_v26 }
0x115b   : > { %11479 = vmatprep.mubr.msk.f32.mxu0 %vm14860_vm3, %v14861_v20 }
0x1173   : > { %v5359_v27 = vpop.f32.mrb[34].mxu1 }
0x1174   : > { %v15980_v28 = vadd.f32 %v5359_v27, %v5218_v16  ;;  %v11471_v29 = vpop.f32.mrb[35].mxu1 }
0x1176   : > { %11478 = vmatpush3.msra.mxu0 %v15980_v28 }
0x1177   : > { %11482 = vmatprep.subr.mxu0 %v14861_v20 }
0x11c9   : > { %v5532_v46 = vpop.permute.xlu0 %5531 }
0x122d   : > { %v5436_v30 = vpop.f32.mrb[18].mxu0 }
0x122e   : > { %v11476_v31 = vpop.f32.mrb[19].mxu0  ;;  %v5441_v32 = vsel %vm5440_vm6, %v5436_v30, -inf }
0x122f   : > { %5442 = vmax.xlane.f32.xlu1 %v5441_v32  ;;  %v6010_v31 = vld [vmem:[#allocation25 + $0x40] sm:$0xff]  ;;  %v6011_v32 = vld [vmem:[#allocation25 + $0x48] sm:$0xff] }
0x12bc   : > { %v5443_v33 = vpop.xlane.xlu1 %5442 }
0x12bd   : > { %v5444_v34 = vsub.f32 %v5436_v30, %v5443_v33  ;;  %v12772_v33 = vpack.c.bf16 %v6011_v32, %v6010_v31  ;;  %v6377_v31 = vld [vmem:[%s16720_s12 + $0x50] sm:$0xff] }
0x12bf   : > { %v5445_v35 = vmul.f32 1.442695, %v5444_v34  ;;  %v6012_v34 = vld [vmem:[#allocation25 + $0x50] sm:$0xff] }
0x12c1   : > { %13615 = vpow2.f32 %v5445_v35  ;;  %v6013_v35 = vld [vmem:[#allocation25 + $0x58] sm:$0xff] }
0x12cb   : > { %v13616_v21 = vpop.eup %13615 }
0x12cc   : > { %v5447_v36 = vsel %vm5440_vm6, %v13616_v21, 0.0 }
0x12cd   : > { %5448 = vadd.xlane.f32.xlu1 %v5447_v36 }
0x12de   : > { %5529 = vrot.lane.b32.xlu1 %v5289_v26, %s14862_s16 }
0x12e2   : > { %5847 = vrot.lane.b32.xlu1 %v5291_v25, %s14863_s9 }
0x12e6   : > { %5845 = vrot.lane.b32.xlu1 %v5289_v26, %s14863_s9 }
0x135a   : > { %v5449_v37 = vpop.xlane.xlu1 %5448 }
0x135b   : > { %13617 = vrcp.f32 %v5449_v37 }
0x135e   : > { %v5530_v38 = vpop.permute.xlu1 %5529 }
0x1362   : > { %v5848_v39 = vpop.permute.xlu1 %5847 }
0x1363   : > { %11515 = vmatpush3.xpose.msk.msra.mxu1 %vm5363_vm5, %v5848_v39 }
0x1364   : > { %12771 = vmatprep.subr.bf16.mxu1 %v14859_v47 }
0x1365   : > { %v13618_v40 = vpop.eup %13617 }
0x1366   : > { %v5451_v41 = vmul.f32 %v13618_v40, %v13616_v21  ;;  %v5846_v45 = vpop.permute.xlu1 %5845  ;;  %v12775_v21 = vpack.c.bf16 %v6013_v35, %v6012_v34 }
0x1367   : > { %11517 = vmatmul.mubr.msk.f32.vlgmr.msra.gmra.mrb[36].mxu1 %vm5363_vm5, %v5846_v45 }
0x1368   : > { %11480 = vmatmul.mubr.msk.f32.vlgmr.msra.gmra.mrb[20].mxu0 %vm5440_vm6, %v5451_v41  ;;  %11532 = vmatprep.mubr.msk.f32.mxu1 %vm14860_vm3, %v14861_v20 }
0x1369   : > { %11483 = vmatpush3.xpose.msk.msra.mxu0 %vm5363_vm5, %v5532_v46  ;;  %11484 = vmatprep.mubr.msk.f32.mxu0 %vm14860_vm3, %v14861_v20 }
0x136a   : > { %11487 = vmatprep.subr.mxu0 %v14861_v20  ;;  %12773 = vmatpush3.bf16.msra.mxu1 %v12772_v33 }
0x136b   : > { %12774 = vmatprep.subr.bf16.mxu1 %v14859_v47 }
0x136c   : > { %11485 = vmatmul.mubr.msk.f32.vlgmr.msra.gmra.mrb[22].mxu0 %vm5363_vm5, %v5530_v38 }
0x136d   : > { %11489 = vmatprep.mubr.msk.f32.mxu0 %vm14860_vm3, %v14861_v20 }
0x136e   : > { %12776 = vmatpush3.bf16.msra.mxu1 %v12775_v21 }
0x136f   : > { %12777 = vmatprep.subr.bf16.mxu1 %v14859_v47 }
0x143a   : > { %v5919_v48 = vpop.f32.mrb[36].mxu1 }
0x143b   : > { %v16002_v62 = vpop.f32.mrb[20].mxu0  ;;  %v11518_v50 = vpop.f32.mrb[37].mxu1  ;;  %v5923_v1 = vsel %vm5440_vm6, %v5919_v48, -inf }
0x143c   : > { %v11481_v60 = vpop.f32.mrb[21].mxu0 }
0x143f   : > { %v5603_v51 = vpop.f32.mrb[22].mxu0 }
0x1440   : > { %v11486_v52 = vpop.f32.mrb[23].mxu0  ;;  %v5607_v53 = vsel %vm5440_vm6, %v5603_v51, -inf }
0x1441   : > { %5608 = vmax.xlane.f32.xlu0 %v5607_v53 }
0x1457   : > { %5619 = vrot.lane.b32.xlu0 %v15980_v28, %s14862_s16 }
0x145b   : > { %6090 = vrot.lane.b32.xlu0 %v5291_v25, %s14864_s26  ;;  %v12769_v25 = vpack.c.bf16 %v5528_v19, %v5527_v17  ;;  %v6372_v17 = vld [vmem:[%s16720_s12 + $0x28] sm:$0xff]  ;;  %v6374_v19 = vld [vmem:[%s16720_s12 + $0x38] sm:$0xff] }
0x145f   : > { %6088 = vrot.lane.b32.xlu0 %v5289_v26, %s14864_s26 }
0x14ce   : > { %v5609_v54 = vpop.xlane.xlu0 %5608 }
0x14cf   : > { %v5610_v55 = vsub.f32 %v5603_v51, %v5609_v54 }
0x14d1   : > { %v5611_v57 = vmul.f32 1.442695, %v5610_v55  ;;  %v6253_v55 = vld [vmem:[#allocation25 + $0x60] sm:$0xff] }
0x14d2   : > { %v5620_v56 = vpop.permute.xlu0 %5619 }
0x14d3   : > { %13619 = vpow2.f32 %v5611_v57  ;;  %11488 = vmatpush3.msra.mxu0 %v5620_v56  ;;  %v6254_v57 = vld [vmem:[#allocation25 + $0x68] sm:$0xff]  ;;  %v6255_v56 = vld [vmem:[#allocation25 + $0x70] sm:$0xff] }
0x14d4   : > { %12759 = vmatprep.subr.bf16.mxu0 %v14859_v47 }
0x14d6   : > { %v6091_v29 = vpop.permute.xlu0 %6090 }
0x14da   : > { %v6089_v30 = vpop.permute.xlu0 %6088 }
0x14dd   : > { %v13620_v59 = vpop.eup %13619 }
0x14de   : > { %v5613_v61 = vsel %vm5440_vm6, %v13620_v59, 0.0 }
0x14df   : > { %5614 = vadd.xlane.f32.xlu1 %v5613_v61  ;;  %v6256_v61 = vld [vmem:[#allocation25 + $0x78] sm:$0xff] }
0x14e3   : > { %5924 = vmax.xlane.f32.xlu1 %v5923_v1  ;;  %v12781_v1 = vpack.c.bf16 %v6256_v61, %v6255_v56  ;;  %v6394_v56 = vld [vmem:[%s16720_s12 + $0xd8] sm:$0xff] }
0x156c   : > { %v5615_v2 = vpop.xlane.xlu1 %5614 }
0x156d   : > { %13621 = vrcp.f32 %v5615_v2 }
0x1570   : > { %v5925_v23 = vpop.xlane.xlu1 %5924 }
0x1571   : > { %v5926_v42 = vsub.f32 %v5919_v48, %v5925_v23 }
0x1573   : > { %v5927_v43 = vmul.f32 1.442695, %v5926_v42 }
0x1575   : > { %13623 = vpow2.f32 %v5927_v43 }
0x1577   : > { %v13622_v3 = vpop.eup %13621 }
0x1578   : > { %v5617_v4 = vmul.f32 %v13622_v3, %v13620_v59  ;;  %v12778_v59 = vpack.c.bf16 %v6254_v57, %v6253_v55  ;;  %v6389_v55 = vld [vmem:[%s16720_s12 + $0xb0] sm:$0xff]  ;;  %v6392_v57 = vld [vmem:[%s16720_s12 + $0xc8] sm:$0xff] }
0x1579   : > { %v12807_v61 = vpack.c.bf16 %v6394_v56, %v6392_v57  ;;  %v10025_v56 = vld [vmem:[#allocation29] ss:$0 sm:$0xff] }
0x157a   : > { %11490 = vmatmul.mubr.msk.f32.vlgmr.msra.gmra.mrb[24].mxu0 %vm5440_vm6, %v5617_v4 }
0x157b   : > { %11500 = vmatprep.mubr.msk.f32.mxu0 %vm14860_vm3, %v14861_v20  ;;  %12761 = vmatpush3.bf16.msra.mxu0 %v12760_v9 }
0x157c   : > { %12762 = vmatprep.subr.bf16.mxu0 %v14859_v47 }
0x157f   : > { %v13624_v5 = vpop.eup %13623  ;;  %12764 = vmatpush3.bf16.msra.mxu0 %v12763_v11  ;;  %v6368_v11 = vld [vmem:[%s16720_s12 + $0x8] sm:$0xff] }
0x1580   : > { %v5929_v6 = vsel %vm5440_vm6, %v13624_v5, 0.0  ;;  %12765 = vmatprep.subr.bf16.mxu0 %v14859_v47 }
0x1581   : > { %5930 = vadd.xlane.f32.xlu1 %v5929_v6 }
0x1592   : > { %5934 = vrot.lane.b32.xlu1 %v15980_v28, %s14863_s9 }
0x160e   : > { %v5931_v12 = vpop.xlane.xlu1 %5930 }
0x160f   : > { %13625 = vrcp.f32 %v5931_v12  ;;  %v6370_v12 = vld [vmem:[%s16720_s12 + $0x18] sm:$0xff] }
0x1610   : > { %v12783_v14 = vpack.c.bf16 %v6370_v12, %v6368_v11  ;;  %v6503_v11 = vld [vmem:[%s16721_s2 + $0x98] sm:$0xff] }
0x1612   : > { %v5935_v16 = vpop.permute.xlu1 %5934 }
0x1619   : > { %v13626_v26 = vpop.eup %13625 }
0x161a   : > { %v5933_v27 = vmul.f32 %v13626_v26, %v13624_v5  ;;  %v6373_v26 = vld [vmem:[%s16720_s12 + $0x30] sm:$0xff] }
0x164d   : > { %v5691_v22 = vpop.f32.mrb[24].mxu0 }
0x164e   : > { %v11491_v24 = vpop.f32.mrb[25].mxu0  ;;  %11501 = vmatmul.mubr.msk.f32.vlgmr.msra.gmra.mrb[26].mxu0 %vm5363_vm5, %v5691_v22 }
0x164f   : > { %12767 = vmatpush3.bf16.msra.mxu0 %v12766_v15  ;;  %11511 = vmatprep.mubr.msk.f32.mxu0 %vm14860_vm3, %v14861_v20  ;;  %v6369_v15 = vld [vmem:[%s16720_s12 + $0x10] sm:$0xff]  ;;  %v12787_v24 = vpack.c.bf16 %v6374_v19, %v6372_v17  ;;  %v6504_v17 = vld [vmem:[%s16721_s2 + $0xa0] sm:$0xff]  ;;  %v6505_v19 = vld [vmem:[%s16721_s2 + $0xa8] sm:$0xff] }
0x1650   : > { %12768 = vmatprep.subr.bf16.mxu0 %v14859_v47  ;;  %v12785_v22 = vpack.c.bf16 %v6369_v15, %v6367_v13  ;;  %v6487_v15 = vld [vmem:[%s16721_s2 + $0x18] sm:$0xff] }
0x1653   : > { %12770 = vmatpush3.bf16.msra.mxu0 %v12769_v25  ;;  %v6371_v25 = vld [vmem:[%s16720_s12 + $0x20] sm:$0xff] }
0x1654   : > { %11519 = vmatprep.subr.mxu0 %v14861_v20 }
0x1656   : > { %11512 = vmatmul.mubr.msk.f32.vlgmr.msra.gmra.mrb[28].mxu0 %vm5363_vm5, %v16002_v62 }
0x1657   : > { %11520 = vmatpush3.msra.mxu0 %v5935_v16  ;;  %11521 = vmatprep.mubr.msk.f32.mxu0 %vm14860_vm3, %v14861_v20  ;;  %v6376_v16 = vld [vmem:[%s16720_s12 + $0x48] sm:$0xff] }
0x1658   : > { %11535 = vmatprep.subr.mxu0 %v14861_v20 }
0x165a   : > { %11522 = vmatmul.mubr.msk.f32.vlgmr.msra.gmra.mrb[30].mxu0 %vm5440_vm6, %v5933_v27  ;;  %v6378_v27 = vld [vmem:[%s16720_s12 + $0x58] sm:$0xff] }
0x165b   : > { %11537 = vmatprep.mubr.msk.f32.mxu0 %vm14860_vm3, %v14861_v20 }
0x165e   : > { %11536 = vmatpush3.xpose.msk.msra.mxu0 %vm5363_vm5, %v6091_v29  ;;  %v12791_v29 = vpack.c.bf16 %v6378_v27, %v6376_v16  ;;  %v6506_v16 = vld [vmem:[%s16721_s2 + $0xb0] sm:$0xff]  ;;  %v6507_v27 = vld [vmem:[%s16721_s2 + $0xb8] sm:$0xff] }
0x165f   : > { %11540 = vmatprep.subr.mxu0 %v14861_v20 }
0x1661   : > { %11538 = vmatmul.mubr.msk.f32.vlgmr.msra.gmra.mrb[32].mxu0 %vm5363_vm5, %v6089_v30  ;;  %v6375_v30 = vld [vmem:[%s16720_s12 + $0x40] sm:$0xff] }
0x1662   : > { %11542 = vmatprep.mubr.msk.f32.mxu0 %vm14860_vm3, %v14861_v20  ;;  %v12793_v32 = vpack.c.bf16 %v6377_v31, %v6375_v30  ;;  %v6490_v30 = vld [vmem:[%s16721_s2 + $0x30] sm:$0xff]  ;;  %v6491_v31 = vld [vmem:[%s16721_s2 + $0x38] sm:$0xff] }
0x1721   : > { %v5768_v36 = vpop.f32.mrb[26].mxu0 }
0x1722   : > { %v11502_v37 = vpop.f32.mrb[27].mxu0 }
0x1723   : > { %v6382_v37 = vld [vmem:[%s16720_s12 + $0x78] sm:$0xff] }
0x1729   : > { %v5841_v38 = vpop.f32.mrb[28].mxu0 }
0x172a   : > { %v5842_v39 = vadd.f32 %v5841_v38, %v5768_v36  ;;  %v11513_v40 = vpop.f32.mrb[29].mxu0  ;;  %v6380_v36 = vld [vmem:[%s16720_s12 + $0x68] sm:$0xff] }
0x172b   : > { %v12795_v38 = vpack.c.bf16 %v6382_v37, %v6380_v36  ;;  %v6381_v40 = vld [vmem:[%s16720_s12 + $0x70] sm:$0xff]  ;;  %v6492_v36 = vld [vmem:[%s16721_s2 + $0x40] sm:$0xff]  ;;  %v6493_v37 = vld [vmem:[%s16721_s2 + $0x48] sm:$0xff] }
0x172d   : > { %v6006_v41 = vpop.f32.mrb[30].mxu0 }
0x172e   : > { %v11523_v45 = vpop.f32.mrb[31].mxu0  ;;  %11533 = vmatmul.mubr.msk.f32.vlgmr.msra.gmra.mrb[38].mxu1 %vm5363_vm5, %v6006_v41 }
0x172f   : > { %11553 = vmatprep.mubr.msk.f32.mxu1 %vm14860_vm3, %v14861_v20  ;;  %12779 = vmatpush3.bf16.msra.mxu1 %v12778_v59  ;;  %v6384_v45 = vld [vmem:[%s16720_s12 + $0x88] sm:$0xff] }
0x1730   : > { %12780 = vmatprep.subr.bf16.mxu1 %v14859_v47 }
0x1733   : > { %12782 = vmatpush3.bf16.msra.mxu1 %v12781_v1  ;;  %v6391_v1 = vld [vmem:[%s16720_s12 + $0xc0] sm:$0xff] }
0x1734   : > { %v6162_v46 = vpop.f32.mrb[32].mxu0 }
0x1735   : > { %v11539_v48 = vpop.f32.mrb[33].mxu0  ;;  %v6166_v62 = vsel %vm5440_vm6, %v6162_v46, -inf }
0x1736   : > { %6167 = vmax.xlane.f32.xlu0 %v6166_v62  ;;  %v6383_v62 = vld [vmem:[%s16720_s12 + $0x80] sm:$0xff] }
0x174c   : > { %6177 = vrot.lane.b32.xlu0 %v15980_v28, %s14864_s26 }
0x17c3   : > { %v6168_v50 = vpop.xlane.xlu0 %6167 }
0x17c4   : > { %v6169_v60 = vsub.f32 %v6162_v46, %v6168_v50  ;;  %v6386_v46 = vld [vmem:[%s16720_s12 + $0x98] sm:$0xff]  ;;  %v6385_v50 = vld [vmem:[%s16720_s12 + $0x90] sm:$0xff] }
0x17c5   : > { %v12799_v48 = vpack.c.bf16 %v6386_v46, %v6384_v45  ;;  %v6494_v45 = vld [vmem:[%s16721_s2 + $0x50] sm:$0xff]  ;;  %v6495_v46 = vld [vmem:[%s16721_s2 + $0x58] sm:$0xff] }
0x17c6   : > { %v6170_v51 = vmul.f32 1.442695, %v6169_v60  ;;  %v12801_v60 = vpack.c.bf16 %v6385_v50, %v6383_v62  ;;  %v6513_v62 = vld [vmem:[%s16721_s2 + $0xe8] sm:$0xff]  ;;  %v12837_v50 = vpack.c.bf16 %v6495_v46, %v6494_v45  ;;  %v10045_v45 = vld [vmem:[%s16719_s6 + $0x200] sm:$0xff] }
0x17c7   : > { %v6178_v52 = vpop.permute.xlu0 %6177  ;;  %v10041_v46 = vld [vmem:[%s16719_s6 + $0x1e0] sm:$0xff] }
0x17c8   : > { %13627 = vpow2.f32 %v6170_v51  ;;  %11541 = vmatpush3.msra.mxu0 %v6178_v52  ;;  %v6388_v51 = vld [vmem:[%s16720_s12 + $0xa8] sm:$0xff]  ;;  %v6390_v52 = vld [vmem:[%s16720_s12 + $0xb8] sm:$0xff] }
0x17c9   : > { %12784 = vmatprep.subr.bf16.mxu0 %v12783_v14  ;;  %v6486_v14 = vld [vmem:[%s16721_s2 + $0x10] sm:$0xff] }
0x17d2   : > { %v13628_v53 = vpop.eup %13627 }
0x17d3   : > { %v6172_v54 = vsel %vm5440_vm6, %v13628_v53, 0.0 }
0x17d4   : > { %6173 = vadd.xlane.f32.xlu1 %v6172_v54  ;;  %v12803_v54 = vpack.c.bf16 %v6390_v52, %v6388_v51 }
0x1801   : > { %v6083_v28 = vpop.f32.mrb[38].mxu1 }
0x1802   : > { %v6087_v2 = vadd.f32 %v6083_v28, %v5842_v39  ;;  %v11534_v23 = vpop.f32.mrb[39].mxu1  ;;  %v6379_v39 = vld [vmem:[%s16720_s12 + $0x60] sm:$0xff]  ;;  %v6393_v28 = vld [vmem:[%s16720_s12 + $0xd0] sm:$0xff] }
0x1803   : > { %v12797_v41 = vpack.c.bf16 %v6381_v40, %v6379_v39  ;;  %v6398_v23 = vld [vmem:[%s16720_s12 + $0xf8] sm:$0xff]  ;;  %v12833_v40 = vpack.c.bf16 %v6493_v37, %v6492_v36  ;;  %v10038_v36 = vld [vmem:[%s16719_s6 + $0x1c8] sm:$0xff]  ;;  %v10037_v37 = vld [vmem:[%s16719_s6 + $0x1c0] sm:$0xff] }
0x1804   : > { %v6511_v39 = vld [vmem:[%s16721_s2 + $0xd8] sm:$0xff] }
0x1861   : > { %v6174_v42 = vpop.xlane.xlu1 %6173 }
0x1862   : > { %13629 = vrcp.f32 %v6174_v42  ;;  %v12809_v42 = vpack.c.bf16 %v6393_v28, %v6391_v1  ;;  %v6496_v1 = vld [vmem:[%s16721_s2 + $0x60] sm:$0xff]  ;;  %v6497_v28 = vld [vmem:[%s16721_s2 + $0x68] sm:$0xff] }
0x186c   : > { %v13630_v43 = vpop.eup %13629 }
0x186d   : > { %v6176_v3 = vmul.f32 %v13630_v43, %v13628_v53  ;;  %v6387_v53 = vld [vmem:[%s16720_s12 + $0xa0] sm:$0xff] }
0x186e   : > { %v12805_v59 = vpack.c.bf16 %v6389_v55, %v6387_v53  ;;  %v10024_v55 = vld [vmem:[#allocation28] ss:$0 sm:$0xff] }
0x186f   : > { %11543 = vmatmul.mubr.msk.f32.vlgmr.msra.gmra.mrb[34].mxu0 %vm5440_vm6, %v6176_v3  ;;  %v6395_v3 = vld [vmem:[%s16720_s12 + $0xe0] sm:$0xff] }
0x1870   : > { %6475 = vmatprep.mubr.f32.mxu0 %v14861_v20  ;;  %12786 = vmatpush1.bf16.msra.mxu0 %v12785_v22  ;;  %v12821_v22 = vpack.c.bf16 %v6487_v15, %v6486_v14  ;;  %v10026_v14 = vld [vmem:[#allocation32] ss:$0 sm:$0xff] }
0x1871   : > { %12788 = vmatprep.subr.bf16.mxu0 %v12787_v24  ;;  %v12823_v24 = vpack.c.bf16 %v6505_v19, %v6504_v17 }
0x1942   : > { %v6249_v4 = vpop.f32.mrb[34].mxu0 }
0x1943   : > { %v11544_v5 = vpop.f32.mrb[35].mxu0  ;;  %11554 = vmatmul.mubr.msk.f32.vlgmr.msra.gmra.mrb[40].mxu1 %vm5363_vm5, %v6249_v4  ;;  %v6397_v4 = vld [vmem:[%s16720_s12 + $0xf0] sm:$0xff] }
0x1944   : > { %v12813_v5 = vpack.c.bf16 %v6397_v4, %v6395_v3  ;;  %v6498_v3 = vld [vmem:[%s16721_s2 + $0x70] sm:$0xff]  ;;  %v6499_v4 = vld [vmem:[%s16721_s2 + $0x78] sm:$0xff] }
0x1a16   : > { %v6326_v6 = vpop.f32.mrb[40].mxu1 }
0x1a17   : > { %v6330_v7 = vadd.f32 %v6326_v6, %v6087_v2  ;;  %v11555_v8 = vpop.f32.mrb[41].mxu1  ;;  %v6396_v2 = vld [vmem:[%s16720_s12 + $0xe8] sm:$0xff]  ;;  %v6500_v6 = vld [vmem:[%s16721_s2 + $0x80] sm:$0xff] }
0x1a18   : > { %v12811_v43 = vpack.c.bf16 %v6398_v23, %v6396_v2  ;;  %v6484_v8 = vld [vmem:[%s16721_s2] sm:$0xff]  ;;  %v12841_v2 = vpack.c.bf16 %v6497_v28, %v6496_v1  ;;  %v6514_v23 = vld [vmem:[%s16721_s2 + $0xf0] sm:$0xff]  ;;  %v10050_v28 = vld [vmem:[%s16719_s6 + $0x228] sm:$0xff] }
0x1a19   : > { %v6331_v9 = vadd.f32 %v6330_v7, %v15941_v58  ;;  %v12789_v58 = vpack.c.bf16 %v6373_v26, %v6371_v25  ;;  %v6501_v7 = vld [vmem:[%s16721_s2 + $0x88] sm:$0xff]  ;;  %v6488_v25 = vld [vmem:[%s16721_s2 + $0x20] sm:$0xff]  ;;  %v10047_v1 = vld [vmem:[%s16719_s6 + $0x210] sm:$0xff] }
0x1a1a   : > { %v6489_v26 = vld [vmem:[%s16721_s2 + $0x28] sm:$0xff] }
0x1a1b   : > { %v6339_v10 = vadd.f32 %v10023_v44, %v6331_v9  ;;  %12790 = vmatpush1.bf16.msra.mxu0 %v12789_v58  ;;  %v12815_v44 = vpack.c.bf16 %v6501_v7, %v6500_v6  ;;  %v6485_v9 = vld [vmem:[%s16721_s2 + $0x8] sm:$0xff]  ;;  %v12825_v58 = vpack.c.bf16 %v6489_v26, %v6488_v25  ;;  %v10033_v25 = vld [vmem:[%s16719_s6 + $0x1a0] sm:$0xff] }
0x1a1c   : > { %12792 = vmatprep.subr.bf16.mxu0 %v12791_v29  ;;  %v12817_v12 = vpack.c.bf16 %v6485_v9, %v6484_v8  ;;  %v12827_v29 = vpack.c.bf16 %v6507_v27, %v6506_v16  ;;  %v10029_v26 = vld [vmem:[%s16719_s6 + $0x180] sm:$0xff]  ;;  %v10032_v27 = vld [vmem:[%s16719_s6 + $0x198] sm:$0xff] }
0x1a1d   : > { %6342 = vadd.xlane.f32.xlu1 %v6339_v10  ;;  %12816 = vmatprep.subr.bf16.mxu1 %v12815_v44 }
0x1a1e   : > { %12818 = vmatpush3.bf16.msra.mxu1 %v12817_v12 }
0x1a1f   : > { %12794 = vmatpush1.bf16.msra.mxu0 %v12793_v32  ;;  %v6508_v32 = vld [vmem:[%s16721_s2 + $0xc0] sm:$0xff] }
0x1a20   : > { %12796 = vmatprep.subr.bf16.mxu0 %v12795_v38  ;;  %v6510_v38 = vld [vmem:[%s16721_s2 + $0xd0] sm:$0xff] }
0x1a23   : > { %12798 = vmatpush1.bf16.msra.mxu0 %v12797_v41  ;;  %v12835_v41 = vpack.c.bf16 %v6511_v39, %v6510_v38  ;;  %v10040_v38 = vld [vmem:[%s16719_s6 + $0x1d8] sm:$0xff] }
0x1a24   : > { %12800 = vmatprep.subr.bf16.mxu0 %v12799_v48  ;;  %v6512_v48 = vld [vmem:[%s16721_s2 + $0xe0] sm:$0xff] }
0x1a27   : > { %12802 = vmatpush1.bf16.msra.mxu0 %v12801_v60  ;;  %v12839_v60 = vpack.c.bf16 %v6513_v62, %v6512_v48  ;;  %v10044_v62 = vld [vmem:[%s16719_s6 + $0x1f8] sm:$0xff] }
0x1a28   : > { %12804 = vmatprep.subr.bf16.mxu0 %v12803_v54 }
0x1a2b   : > { %12806 = vmatpush1.bf16.msra.mxu0 %v12805_v59 }
0x1a2c   : > { %12808 = vmatprep.subr.bf16.mxu0 %v12807_v61 }
0x1a2f   : > { %12810 = vmatpush1.bf16.msra.mxu0 %v12809_v42  ;;  %v6515_v42 = vld [vmem:[%s16721_s2 + $0xf8] sm:$0xff] }
0x1a30   : > { %12812 = vmatprep.subr.bf16.mxu0 %v12811_v43  ;;  %v12843_v43 = vpack.c.bf16 %v6515_v42, %v6514_v23  ;;  %v12861_v23 = vpack.c.bf16 %v10050_v28, %v10047_v1  ;;  %v10052_v42 = vld [vmem:[%s16719_s6 + $0x238] sm:$0xff] }
0x1a33   : > { %12814 = vmatpush1.bf16.msra.mxu0 %v12813_v5  ;;  %v12845_v5 = vpack.c.bf16 %v6499_v4, %v6498_v3  ;;  %v10054_v3 = vld [vmem:[%s16719_s6 + $0x248] sm:$0xff]  ;;  %v10057_v4 = vld [vmem:[%s16719_s6 + $0x260] sm:$0xff] }
0x1aaa   : > { %v6343_v33 = vpop.xlane.xlu1 %6342 }
0x1aab   : > { %v6344_v34 = vmul.f32 0.0078125, %v6343_v33  ;;  %v6509_v33 = vld [vmem:[%s16721_s2 + $0xc8] sm:$0xff] }
0x1aad   : > { %v16064_v35 = vsub.f32 %v6339_v10, %v6344_v34  ;;  %v6502_v10 = vld [vmem:[%s16721_s2 + $0x90] sm:$0xff]  ;;  %v12829_v34 = vpack.c.bf16 %v6491_v31, %v6490_v30  ;;  %v12849_v30 = vpack.c.bf16 %v10032_v27, %v10029_v26  ;;  %v10068_v27 = vld [vmem:[%s16719_s6 + $0x2b8] sm:$0xff] }
0x1aae   : > { %v12819_v13 = vpack.c.bf16 %v6503_v11, %v6502_v10 }
0x1aaf   : > { %v6346_v21 = vmul.f32 %v16064_v35, %v16064_v35 }
0x1ab0   : > { %12820 = vmatprep.subr.bf16.mxu1 %v12819_v13 }
0x1ab1   : > { %6347 = vadd.xlane.f32.xlu1 %v6346_v21  ;;  %12822 = vmatpush3.bf16.msra.mxu1 %v12821_v22  ;;  %v12831_v21 = vpack.c.bf16 %v6509_v33, %v6508_v32  ;;  %v10036_v32 = vld [vmem:[%s16719_s6 + $0x1b8] sm:$0xff]  ;;  %v10039_v33 = vld [vmem:[%s16719_s6 + $0x1d0] sm:$0xff] }
0x1ab2   : > { %12824 = vmatprep.subr.bf16.mxu1 %v12823_v24  ;;  %v10030_v24 = vld [vmem:[%s16719_s6 + $0x188] sm:$0xff] }
0x1ab3   : > { %v12847_v16 = vpack.c.bf16 %v10033_v25, %v10030_v24  ;;  %v10069_v24 = vld [vmem:[%s16719_s6 + $0x2c0] sm:$0xff] }
0x1ab5   : > { %12826 = vmatpush3.bf16.msra.mxu1 %v12825_v58  ;;  %v10031_v58 = vld [vmem:[%s16719_s6 + $0x190] sm:$0xff]  ;;  %12848 = vmatprep.subr.bf16.mxu0 %v12847_v16  ;;  %v10065_v16 = vld [vmem:[%s16719_s6 + $0x2a0] sm:$0xff] }
0x1ab6   : > { %12828 = vmatprep.subr.bf16.mxu1 %v12827_v29  ;;  %v10034_v29 = vld [vmem:[%s16719_s6 + $0x1a8] sm:$0xff] }
0x1ab7   : > { %v12880_v31 = vpack.c.bf16 %v10034_v29, %v10031_v58  ;;  %v10067_v58 = vld [vmem:[%s16719_s6 + $0x2b0] sm:$0xff]  ;;  %v10070_v29 = vld [vmem:[%s16719_s6 + $0x2c8] sm:$0xff] }
0x1ab9   : > { %12830 = vmatpush3.bf16.msra.mxu1 %v12829_v34  ;;  %v10035_v34 = vld [vmem:[%s16719_s6 + $0x1b0] sm:$0xff] }
0x1aba   : > { %12832 = vmatprep.subr.bf16.mxu1 %v12831_v21  ;;  %v12851_v21 = vpack.c.bf16 %v10039_v33, %v10036_v32  ;;  %v12853_v39 = vpack.c.bf16 %v10038_v36, %v10035_v34  ;;  %v12873_v32 = vpack.c.bf16 %v10068_v27, %v10065_v16  ;;  %v12898_v33 = vpack.c.bf16 %v10070_v29, %v10067_v58  ;;  %v10074_v36 = vld [vmem:[%s16719_s6 + $0x2e8] sm:$0xff] }
0x1abb   : > { %v7163_v27 = vld [vmem:[#allocation25 + $0xb8] sm:$0xff] }
0x1abd   : > { %12834 = vmatpush3.bf16.msra.mxu1 %v12833_v40  ;;  %v12883_v40 = vpack.c.bf16 %v10040_v38, %v10037_v37  ;;  %v10073_v37 = vld [vmem:[%s16719_s6 + $0x2e0] sm:$0xff]  ;;  %v10076_v38 = vld [vmem:[%s16719_s6 + $0x2f8] sm:$0xff] }
0x1abe   : > { %12836 = vmatprep.subr.bf16.mxu1 %v12835_v41  ;;  %v10042_v41 = vld [vmem:[%s16719_s6 + $0x1e8] sm:$0xff] }
0x1abf   : > { %v12855_v48 = vpack.c.bf16 %v10045_v45, %v10042_v41 }
0x1ac1   : > { %12838 = vmatpush3.bf16.msra.mxu1 %v12837_v50  ;;  %v10043_v50 = vld [vmem:[%s16719_s6 + $0x1f0] sm:$0xff] }
0x1ac2   : > { %12840 = vmatprep.subr.bf16.mxu1 %v12839_v60  ;;  %v10046_v60 = vld [vmem:[%s16719_s6 + $0x208] sm:$0xff] }
0x1ac5   : > { %12842 = vmatpush3.bf16.msra.mxu1 %v12841_v2  ;;  %v10049_v2 = vld [vmem:[%s16719_s6 + $0x220] sm:$0xff] }
0x1ac6   : > { %12844 = vmatprep.subr.bf16.mxu1 %v12843_v43  ;;  %v12889_v43 = vpack.c.bf16 %v10052_v42, %v10049_v2 }
0x1ac9   : > { %12846 = vmatpush3.bf16.msra.mxu1 %v12845_v5  ;;  %v12863_v5 = vpack.c.bf16 %v10057_v4, %v10054_v3 }
0x1aca   : > { %12879 = vmatprep.subr.bf16.mxu1 %v14859_v47 }
0x1b3e   : > { %v6348_v51 = vpop.xlane.xlu1 %6347 }
0x1b3f   : > { %v6349_v52 = vmul.f32 0.0078125, %v6348_v51  ;;  %v12857_v51 = vpack.c.bf16 %v10044_v62, %v10041_v46  ;;  %v10027_v62 = vld [vmem:[#allocation34] ss:$0 sm:$0xff] }
0x1b41   : > { %v6350_v53 = vadd.f32 1e-05, %v6349_v52  ;;  %v12886_v52 = vpack.c.bf16 %v10046_v60, %v10043_v50  ;;  %v10028_v60 = vld [vmem:[#allocation35] ss:$0 sm:$0xff] }
0x1b43   : > { %13631 = vrsqrt.f32 %v6350_v53 }
0x1b4d   : > { %v13632_v54 = vpop.eup %13631 }
0x1b4e   : > { %v6352_v57 = vmul.f32 %v13632_v54, %v16064_v35  ;;  %v6399_v35 = vld [vmem:[#allocation31] sm:$0x3] }
0x1b4f   : > { %v6404_v6 = vrot.slane %v6399_v35, %v15746_v63  ;;  %v6408_v7 = vrot.slane %v6399_v35, %v15748_v0  ;;  %v10053_v35 = vld [vmem:[%s16719_s6 + $0x240] sm:$0xff] }
0x1b50   : > { %v6359_v59 = vmul.f32 %v10024_v55, %v6352_v57 }
0x1b52   : > { %v6366_v61 = vadd.f32 %v10025_v56, %v6359_v59  ;;  %v10048_v56 = vld [vmem:[%s16719_s6 + $0x218] sm:$0xff]  ;;  %v10051_v59 = vld [vmem:[%s16719_s6 + $0x230] sm:$0xff] }
0x1b54   : > { %6476 = vmatmul.mubr.f32.vlgmr.msra.gmra.mrb[36].mxu0 %v6366_v61 }
0x1b55   : > { %6752 = vmatprep.mubr.f32.mxu0 %v14861_v20  ;;  %12850 = vmatpush1.bf16.msra.mxu0 %v12849_v30  ;;  %v10072_v30 = vld [vmem:[%s16719_s6 + $0x2d8] sm:$0xff] }
0x1b56   : > { %12852 = vmatprep.subr.bf16.mxu0 %v12851_v21  ;;  %v10071_v21 = vld [vmem:[%s16719_s6 + $0x2d0] sm:$0xff] }
0x1b59   : > { %12854 = vmatpush1.bf16.msra.mxu0 %v12853_v39  ;;  %v12877_v39 = vpack.c.bf16 %v10074_v36, %v10071_v21  ;;  %v6992_v36 = vld [vmem:[#allocation25 + $0x90] sm:$0xff] }
0x1b5a   : > { %12856 = vmatprep.subr.bf16.mxu0 %v12855_v48 }
0x1b5d   : > { %12858 = vmatpush1.bf16.msra.mxu0 %v12857_v51 }
0x1c27   : > { %v6477_v8 = vpop.f32.mrb[36].mxu0 }
0x1c28   : > { %v6478_v44 = vadd.f32 %v6477_v8, %v6404_v6  ;;  %v6479_v9 = vpop.f32.mrb[37].mxu0  ;;  %v10056_v6 = vld [vmem:[%s16719_s6 + $0x258] sm:$0xff] }
0x1c29   : > { %v6480_v10 = vadd.f32 %v6479_v9, %v6408_v7  ;;  %v10055_v7 = vld [vmem:[%s16719_s6 + $0x250] sm:$0xff]  ;;  %v12865_v8 = vpack.c.bf16 %v10056_v6, %v10053_v35  ;;  %v10060_v9 = vld [vmem:[%s16719_s6 + $0x278] sm:$0xff] }
0x1c2a   : > { %v6482_v12 = vmax.f32 %v6478_v44, 0.0  ;;  %v10058_v44 = vld [vmem:[%s16719_s6 + $0x268] sm:$0xff] }
0x1c2b   : > { %v6483_v11 = vmax.f32 %v6480_v10, 0.0  ;;  %v10063_v10 = vld [vmem:[%s16719_s6 + $0x290] sm:$0xff] }
0x1c2d   : > { %6587 = vmatprep.mubr.f32.mxu1 %v6483_v11  ;;  %v12892_v11 = vpack.c.bf16 %v10058_v44, %v10055_v7 }
0x1c2e   : > { %6588 = vmatmul.mubr.f32.vlgmr.msra.gmra.mrb[42].mxu1 %v6482_v12  ;;  %v12867_v12 = vpack.c.bf16 %v10063_v10, %v10060_v9 }
0x1c2f   : > { %11588 = vmatprep.mubr.msk.f32.mxu1 %vm14860_vm3, %v14861_v20  ;;  %12881 = vmatpush3.bf16.msra.mxu1 %v12880_v31  ;;  %v10075_v31 = vld [vmem:[%s16719_s6 + $0x2f0] sm:$0xff] }
0x1c30   : > { %12882 = vmatprep.subr.bf16.mxu1 %v14859_v47  ;;  %v12875_v34 = vpack.c.bf16 %v10075_v31, %v10072_v30  ;;  %v6990_v31 = vld [vmem:[#allocation25 + $0x80] sm:$0xff] }
0x1c33   : > { %12884 = vmatpush3.bf16.msra.mxu1 %v12883_v40  ;;  %v12901_v40 = vpack.c.bf16 %v10076_v38, %v10073_v37  ;;  %v6993_v37 = vld [vmem:[#allocation25 + $0x98] sm:$0xff] }
0x1c34   : > { %12885 = vmatprep.subr.bf16.mxu1 %v14859_v47  ;;  %v12913_v38 = vpack.c.bf16 %v6993_v37, %v6992_v36 }
0x1c37   : > { %12887 = vmatpush3.bf16.msra.mxu1 %v12886_v52 }
0x1c38   : > { %12888 = vmatprep.subr.bf16.mxu1 %v14859_v47 }
0x1c3b   : > { %12890 = vmatpush3.bf16.msra.mxu1 %v12889_v43 }
0x1c3c   : > { %12891 = vmatprep.subr.bf16.mxu1 %v14859_v47 }
0x1c3f   : > { %12893 = vmatpush3.bf16.msra.mxu1 %v12892_v11 }
0x1c40   : > { %12894 = vmatprep.subr.bf16.mxu1 %v14859_v47 }
0x1d01   : > { %v10680_v13 = vpop.f32.mrb[42].mxu1 }
0x1d02   : > { %v10681_v15 = vpop.f32.mrb[43].mxu1 }
0x1d03   : > { %v10682_v17 = vadd.f32 %v10681_v15, %v10680_v13  ;;  %v10059_v13 = vld [vmem:[%s16719_s6 + $0x270] sm:$0xff]  ;;  %v10061_v15 = vld [vmem:[%s16719_s6 + $0x280] sm:$0xff] }
0x1d05   : > { %v6590_v19 = vadd.f32 %v10682_v17, %v10026_v14  ;;  %v10062_v14 = vld [vmem:[%s16719_s6 + $0x288] sm:$0xff] }
0x1d06   : > { %v12869_v17 = vpack.c.bf16 %v10062_v14, %v10059_v13 }
0x1d07   : > { %v6593_v22 = vadd.f32 %v6590_v19, %v6366_v61  ;;  %v12859_v61 = vpack.c.bf16 %v10051_v59, %v10048_v56  ;;  %v10064_v19 = vld [vmem:[%s16719_s6 + $0x298] sm:$0xff] }
0x1d08   : > { %v12895_v25 = vpack.c.bf16 %v10064_v19, %v10061_v15 }
0x1d09   : > { %6596 = vadd.xlane.f32.xlu1 %v6593_v22  ;;  %12860 = vmatprep.subr.bf16.mxu0 %v12859_v61 }
0x1d0a   : > { %12862 = vmatpush1.bf16.msra.mxu0 %v12861_v23  ;;  %12896 = vmatpush3.bf16.msra.mxu1 %v12895_v25  ;;  %v7161_v25 = vld [vmem:[#allocation25 + $0xa8] sm:$0xff] }
0x1d0b   : > { %12864 = vmatprep.subr.bf16.mxu0 %v12863_v5  ;;  %12897 = vmatprep.subr.bf16.mxu1 %v14859_v47 }
0x1d0e   : > { %12866 = vmatpush1.bf16.msra.mxu0 %v12865_v8  ;;  %12899 = vmatpush3.bf16.msra.mxu1 %v12898_v33 }
0x1d0f   : > { %12868 = vmatprep.subr.bf16.mxu0 %v12867_v12  ;;  %12900 = vmatprep.subr.bf16.mxu1 %v14859_v47 }
0x1d12   : > { %12870 = vmatpush1.bf16.msra.mxu0 %v12869_v17  ;;  %12902 = vmatpush3.bf16.msra.mxu1 %v12901_v40 }
0x1d13   : > { %11601 = vmatprep.subr.mxu1 %v14861_v20 }
0x1d96   : > { %v6597_v53 = vpop.xlane.xlu1 %6596 }
0x1d97   : > { %v6598_v54 = vmul.f32 0.0078125, %v6597_v53  ;;  %v6671_v53 = vld [vmem:[#allocation23 + $0x3] sm:$0x7] }
0x1d98   : > { %v6684_v28 = vrot.slane %v6671_v53, %v15737_v49 }
0x1d99   : > { %v16148_v55 = vsub.f32 %v6593_v22, %v6598_v54  ;;  %v10066_v22 = vld [vmem:[%s16719_s6 + $0x2a8] sm:$0xff]  ;;  %v6676_v54 = vrot.slane %v6671_v53, %v15746_v63 }
0x1d9a   : > { %v12871_v26 = vpack.c.bf16 %v10069_v24, %v10066_v22  ;;  %v7160_v24 = vld [vmem:[#allocation25 + $0xa0] sm:$0xff] }
0x1d9b   : > { %v6600_v57 = vmul.f32 %v16148_v55, %v16148_v55  ;;  %v12904_v16 = vpack.c.bf16 %v7161_v25, %v7160_v24  ;;  %v7718_v24 = vld [vmem:[#allocation25 + $0xe0] sm:$0xff]  ;;  %v7719_v25 = vld [vmem:[#allocation25 + $0xe8] sm:$0xff] }
0x1d9c   : > { %12872 = vmatprep.subr.bf16.mxu0 %v12871_v26  ;;  %v7162_v26 = vld [vmem:[#allocation25 + $0xb0] sm:$0xff] }
0x1d9d   : > { %6601 = vadd.xlane.f32.xlu1 %v6600_v57  ;;  %12874 = vmatpush1.bf16.msra.mxu0 %v12873_v32  ;;  %v6680_v57 = vrot.slane %v6671_v53, %v15748_v0  ;;  %v12907_v58 = vpack.c.bf16 %v7163_v27, %v7162_v26  ;;  %v6991_v32 = vld [vmem:[#allocation25 + $0x88] sm:$0xff]  ;;  %v7720_v26 = vld [vmem:[#allocation25 + $0xf0] sm:$0xff]  ;;  %v7721_v27 = vld [vmem:[#allocation25 + $0xf8] sm:$0xff] }
0x1d9e   : > { %12876 = vmatprep.subr.bf16.mxu0 %v12875_v34  ;;  %v12910_v34 = vpack.c.bf16 %v6991_v32, %v6990_v31 }
0x1da1   : > { %12878 = vmatpush1.bf16.msra.mxu0 %v12877_v39 }
0x1da2   : > { %11591 = vmatprep.subr.mxu0 %v14861_v20 }
0x1e2a   : > { %v6602_v41 = vpop.xlane.xlu1 %6601 }
0x1e2b   : > { %v6603_v45 = vmul.f32 0.0078125, %v6602_v41 }
0x1e2d   : > { %v6604_v46 = vadd.f32 1e-05, %v6603_v45 }
0x1e2f   : > { %13633 = vrsqrt.f32 %v6604_v46 }
0x1e39   : > { %v13634_v48 = vpop.eup %13633 }
0x1e3a   : > { %v6606_v50 = vmul.f32 %v13634_v48, %v16148_v55 }
0x1e3c   : > { %v6613_v51 = vmul.f32 %v10027_v62, %v6606_v50 }
0x1e3e   : > { %v16189_v52 = vadd.f32 %v10028_v60, %v6613_v51 }
0x1e40   : > { %6753 = vmatmul.mubr.f32.vlgmr.msra.gmra.mrb[38].mxu0 %v16189_v52  ;;  %11589 = vmatmul.mubr.f32.vlgmr.msra.gmra.mrb[44].mxu1 %v16189_v52 }
0x1e41   : > { %11593 = vmatprep.mubr.msk.f32.mxu0 %vm14860_vm3, %v14861_v20  ;;  %11603 = vmatprep.mubr.msk.f32.mxu1 %vm14860_vm3, %v14861_v20 }
0x1f13   : > { %v6754_v55 = vpop.f32.mrb[38].mxu0  ;;  %v6825_v56 = vpop.f32.mrb[44].mxu1 }
0x1f14   : > { %v16199_v59 = vadd.f32 %v6754_v55, %v6676_v54  ;;  %v6756_v61 = vpop.f32.mrb[39].mxu0  ;;  %v11590_v1 = vpop.f32.mrb[45].mxu1  ;;  %v16211_v23 = vadd.f32 %v6825_v56, %v6684_v28 }
0x1f15   : > { %v16202_v2 = vadd.f32 %v6756_v61, %v6680_v57 }
0x1f16   : > { %6994 = vrot.lane.b32.xlu1 %v16199_v59, %s14862_s16 }
0x1f17   : > { %6996 = vrot.lane.b32.xlu0 %v16202_v2, %s14862_s16  ;;  %11592 = vmatpush3.xpose.msk.msra.mxu0 %vm5363_vm5, %v16202_v2 }
0x1f18   : > { %11596 = vmatprep.subr.mxu0 %v14861_v20 }
0x1f1a   : > { %11594 = vmatmul.mubr.msk.f32.vlgmr.msra.gmra.mrb[40].mxu0 %vm5363_vm5, %v16199_v59 }
0x1f1b   : > { %11597 = vmatpush3.msra.mxu0 %v16211_v23  ;;  %11598 = vmatprep.mubr.msk.f32.mxu0 %vm14860_vm3, %v14861_v20 }
0x1f1c   : > { %11606 = vmatprep.subr.mxu0 %v14861_v20 }
0x1f88   : > { %v6995_v42 = vpop.permute.xlu1 %6994 }
0x1f89   : > { %v6997_v49 = vpop.permute.xlu0 %6996 }
0x1f8a   : > { %11602 = vmatpush3.xpose.msk.msra.mxu1 %vm5363_vm5, %v6997_v49 }
0x1f8b   : > { %12903 = vmatprep.subr.bf16.mxu1 %v14859_v47 }
0x1f8d   : > { %11604 = vmatmul.mubr.msk.f32.vlgmr.msra.gmra.mrb[46].mxu1 %vm5363_vm5, %v6995_v42 }
0x1f8e   : > { %11619 = vmatprep.mubr.msk.f32.mxu1 %vm14860_vm3, %v14861_v20  ;;  %12905 = vmatpush3.bf16.msra.mxu1 %v12904_v16  ;;  %v12922_v16 = vpack.c.bf16 %v7719_v25, %v7718_v24  ;;  %v10118_v24 = vld [vmem:[%s16720_s12 + $0x1b0] sm:$0xff]  ;;  %v10121_v25 = vld [vmem:[%s16720_s12 + $0x1c8] sm:$0xff] }
0x1f8f   : > { %12906 = vmatprep.subr.bf16.mxu1 %v14859_v47 }
0x1f92   : > { %12908 = vmatpush3.bf16.msra.mxu1 %v12907_v58  ;;  %v12925_v58 = vpack.c.bf16 %v7721_v27, %v7720_v26  ;;  %v10123_v26 = vld [vmem:[%s16720_s12 + $0x1d8] sm:$0xff] }
0x1f93   : > { %11633 = vmatprep.subr.mxu1 %v14861_v20  ;;  %v12951_v27 = vpack.c.bf16 %v10123_v26, %v10121_v25  ;;  %v8095_v25 = vld [vmem:[#allocation37] sm:$0xff]  ;;  %v8096_v26 = vld [vmem:[#allocation37 + $0x8] sm:$0xff] }
0x1fed   : > { %v6901_v43 = vpop.f32.mrb[40].mxu0 }
0x1fee   : > { %v11595_v3 = vpop.f32.mrb[41].mxu0  ;;  %v6905_v4 = vsel %vm5440_vm6, %v6901_v43, -inf }
0x1fef   : > { %6906 = vmax.xlane.f32.xlu0 %v6905_v4  ;;  %v7476_v3 = vld [vmem:[#allocation25 + $0xc8] sm:$0xff]  ;;  %v7477_v4 = vld [vmem:[#allocation25 + $0xd0] sm:$0xff] }
0x2060   : > { %v7068_v5 = vpop.f32.mrb[46].mxu1 }
0x2061   : > { %v11605_v35 = vpop.f32.mrb[47].mxu1  ;;  %v7072_v6 = vsel %vm5440_vm6, %v7068_v5, -inf }
0x2062   : > { %7073 = vmax.xlane.f32.xlu1 %v7072_v6 }
0x2073   : > { %7312 = vrot.lane.b32.xlu1 %v16202_v2, %s14863_s9 }
0x207c   : > { %v6907_v7 = vpop.xlane.xlu0 %6906 }
0x207d   : > { %v6908_v8 = vsub.f32 %v6901_v43, %v6907_v7  ;;  %v7475_v43 = vld [vmem:[#allocation25 + $0xc0] sm:$0xff] }
0x207f   : > { %v6909_v44 = vmul.f32 1.442695, %v6908_v8 }
0x2081   : > { %13635 = vpow2.f32 %v6909_v44 }
0x208b   : > { %v13636_v9 = vpop.eup %13635 }
0x208c   : > { %v6911_v10 = vsel %vm5440_vm6, %v13636_v9, 0.0 }
0x208d   : > { %6912 = vadd.xlane.f32.xlu0 %v6911_v10 }
0x20ef   : > { %v7074_v11 = vpop.xlane.xlu1 %7073 }
0x20f0   : > { %v7075_v12 = vsub.f32 %v7068_v5, %v7074_v11  ;;  %v12916_v5 = vpack.c.bf16 %v7476_v3, %v7475_v43 }
0x20f2   : > { %v7076_v13 = vmul.f32 1.442695, %v7075_v12 }
0x20f3   : > { %v7313_v45 = vpop.permute.xlu1 %7312 }
0x20f4   : > { %13637 = vpow2.f32 %v7076_v13 }
0x20fe   : > { %v13638_v14 = vpop.eup %13637 }
0x20ff   : > { %v7078_v15 = vsel %vm5440_vm6, %v13638_v14, 0.0 }
0x2100   : > { %7079 = vadd.xlane.f32.xlu0 %v7078_v15 }
0x2116   : > { %7084 = vrot.lane.b32.xlu0 %v16211_v23, %s14862_s16  ;;  %s16722_s16 = sld [smem:[#allocation107_spill]] }
0x211a   : > { %7310 = vrot.lane.b32.xlu0 %v16199_v59, %s14863_s9  ;;  %v6913_v17 = vpop.xlane.xlu0 %6912 }
0x211b   : > { %13639 = vrcp.f32 %v6913_v17 }
0x2125   : > { %v13640_v19 = vpop.eup %13639 }
0x2126   : > { %v6915_v22 = vmul.f32 %v13640_v19, %v13636_v9 }
0x2128   : > { %11599 = vmatmul.mubr.msk.f32.vlgmr.msra.gmra.mrb[42].mxu0 %vm5440_vm6, %v6915_v22 }
0x2129   : > { %11608 = vmatprep.mubr.msk.f32.mxu0 %vm14860_vm3, %v14861_v20 }
0x218d   : > { %v7080_v29 = vpop.xlane.xlu0 %7079 }
0x218e   : > { %13641 = vrcp.f32 %v7080_v29 }
0x2191   : > { %v7085_v30 = vpop.permute.xlu0 %7084 }
0x2192   : > { %11607 = vmatpush3.msra.mxu0 %v7085_v30 }
0x2193   : > { %12909 = vmatprep.subr.bf16.mxu0 %v14859_v47 }
0x2195   : > { %v7311_v48 = vpop.permute.xlu0 %7310 }
0x2198   : > { %v13642_v33 = vpop.eup %13641 }
0x2199   : > { %v7082_v21 = vmul.f32 %v13642_v33, %v13638_v14 }
0x219b   : > { %11609 = vmatmul.mubr.msk.f32.vlgmr.msra.gmra.mrb[44].mxu0 %vm5440_vm6, %v7082_v21 }
0x219c   : > { %12911 = vmatpush3.bf16.msra.mxu0 %v12910_v34  ;;  %11630 = vmatprep.mubr.msk.f32.mxu0 %vm14860_vm3, %v14861_v20 }
0x219d   : > { %12912 = vmatprep.subr.bf16.mxu0 %v14859_v47 }
0x21a0   : > { %12914 = vmatpush3.bf16.msra.mxu0 %v12913_v38 }
0x21a1   : > { %11638 = vmatprep.subr.mxu0 %v14861_v20 }
0x21fb   : > { %v6985_v39 = vpop.f32.mrb[42].mxu0 }
0x21fc   : > { %v11600_v40 = vpop.f32.mrb[43].mxu0  ;;  %11631 = vmatmul.mubr.msk.f32.vlgmr.msra.gmra.mrb[46].mxu0 %vm5363_vm5, %v6985_v39 }
0x21fd   : > { %11640 = vmatprep.mubr.msk.f32.mxu0 %vm14860_vm3, %v14861_v20  ;;  %v10093_v40 = vld [vmem:[#allocation26 + $0x1] ss:$0 sm:$0xff] }
0x226e   : > { %v7156_v41 = vpop.f32.mrb[44].mxu0 }
0x226f   : > { %v11610_v46 = vpop.f32.mrb[45].mxu0  ;;  %11620 = vmatmul.mubr.msk.f32.vlgmr.msra.gmra.mrb[48].mxu1 %vm5363_vm5, %v7156_v41 }
0x2270   : > { %11634 = vmatpush3.xpose.msk.msra.mxu1 %vm5363_vm5, %v7313_v45  ;;  %11635 = vmatprep.mubr.msk.f32.mxu1 %vm14860_vm3, %v14861_v20  ;;  %v10097_v46 = vld [vmem:[%s16720_s12 + $0x108] sm:$0xff] }
0x2271   : > { %12915 = vmatprep.subr.bf16.mxu1 %v14859_v47 }
0x2273   : > { %11636 = vmatmul.mubr.msk.f32.vlgmr.msra.gmra.mrb[50].mxu1 %vm5363_vm5, %v7311_v48  ;;  %v10099_v48 = vld [vmem:[%s16720_s12 + $0x118] sm:$0xff] }
0x2274   : > { %11651 = vmatprep.mubr.msk.f32.mxu1 %vm14860_vm3, %v14861_v20  ;;  %12917 = vmatpush3.bf16.msra.mxu1 %v12916_v5 }
0x2275   : > { %12918 = vmatprep.subr.bf16.mxu1 %v14859_v47 }
0x22cf   : > { %v7306_v62 = vpop.f32.mrb[46].mxu0 }
0x22d0   : > { %v11632_v50 = vpop.f32.mrb[47].mxu0 }
0x22d1   : > { %v12927_v50 = vpack.c.bf16 %v10099_v48, %v10097_v46 }
0x2342   : > { %v7233_v60 = vpop.f32.mrb[48].mxu1 }
0x2343   : > { %v16256_v51 = vadd.f32 %v7306_v62, %v7233_v60  ;;  %v11621_v53 = vpop.f32.mrb[49].mxu1  ;;  %v10096_v62 = vld [vmem:[%s16720_s12 + $0x100] sm:$0xff]  ;;  %v10098_v60 = vld [vmem:[%s16720_s12 + $0x110] sm:$0xff] }
0x2344   : > { %v10103_v53 = vld [vmem:[%s16720_s12 + $0x138] sm:$0xff] }
0x2346   : > { %v7384_v54 = vpop.f32.mrb[50].mxu1 }
0x2347   : > { %v11637_v57 = vpop.f32.mrb[51].mxu1  ;;  %v7388_v55 = vsel %vm5440_vm6, %v7384_v54, -inf }
0x2348   : > { %7389 = vmax.xlane.f32.xlu0 %v7388_v55  ;;  %v10100_v55 = vld [vmem:[%s16720_s12 + $0x120] sm:$0xff] }
0x235e   : > { %7399 = vrot.lane.b32.xlu0 %v16211_v23, %s14863_s9  ;;  %s16723_s9 = smov %s16722_s16 }
0x2362   : > { %7553 = vrot.lane.b32.xlu0 %v16199_v59, %s14864_s26  ;;  %v7478_v59 = vld [vmem:[#allocation25 + $0xd8] sm:$0xff] }
0x2363   : > { %v12919_v35 = vpack.c.bf16 %v7478_v59, %v7477_v4 }
0x2365   : > { %12920 = vmatpush3.bf16.msra.mxu1 %v12919_v35  ;;  %v10109_v35 = vld [vmem:[%s16720_s12 + $0x168] sm:$0xff] }
0x2366   : > { %12921 = vmatprep.subr.bf16.mxu1 %v14859_v47 }
0x23d5   : > { %v7390_v56 = vpop.xlane.xlu0 %7389 }
0x23d6   : > { %v7391_v61 = vsub.f32 %v7384_v54, %v7390_v56  ;;  %v12929_v54 = vpack.c.bf16 %v10098_v60, %v10096_v62  ;;  %v10102_v56 = vld [vmem:[%s16720_s12 + $0x130] sm:$0xff]  ;;  %v10148_v60 = vld [vmem:[%s16721_s2 + $0x1a0] sm:$0xff] }
0x23d7   : > { %v10130_v62 = vld [vmem:[%s16721_s2 + $0x110] sm:$0xff] }
0x23d8   : > { %v7392_v1 = vmul.f32 1.442695, %v7391_v61  ;;  %v10105_v61 = vld [vmem:[%s16720_s12 + $0x148] sm:$0xff] }
0x23d9   : > { %v7400_v28 = vpop.permute.xlu0 %7399 }
0x23da   : > { %13643 = vpow2.f32 %v7392_v1  ;;  %11639 = vmatpush3.msra.mxu0 %v7400_v28  ;;  %v10107_v1 = vld [vmem:[%s16720_s12 + $0x158] sm:$0xff] }
0x23db   : > { %11654 = vmatprep.subr.mxu0 %v14861_v20  ;;  %v12935_v28 = vpack.c.bf16 %v10107_v1, %v10105_v61  ;;  %v10151_v61 = vld [vmem:[%s16721_s2 + $0x1b8] sm:$0xff] }
0x23e4   : > { %v13644_v49 = vpop.eup %13643 }
0x23e5   : > { %v7394_v42 = vsel %vm5440_vm6, %v13644_v49, 0.0 }
0x23e6   : > { %7395 = vadd.xlane.f32.xlu1 %v7394_v42  ;;  %v10106_v42 = vld [vmem:[%s16720_s12 + $0x150] sm:$0xff] }
0x23f7   : > { %7555 = vrot.lane.b32.xlu1 %v16202_v2, %s14864_s26  ;;  %v7554_v2 = vpop.permute.xlu0 %7553 }
0x2473   : > { %v7396_v6 = vpop.xlane.xlu1 %7395 }
0x2474   : > { %13645 = vrcp.f32 %v7396_v6  ;;  %v10111_v6 = vld [vmem:[%s16720_s12 + $0x178] sm:$0xff] }
0x2477   : > { %v7556_v44 = vpop.permute.xlu1 %7555 }
0x247e   : > { %v13646_v7 = vpop.eup %13645 }
0x247f   : > { %v7398_v8 = vmul.f32 %v13646_v7, %v13644_v49  ;;  %v10104_v49 = vld [vmem:[%s16720_s12 + $0x140] sm:$0xff]  ;;  %v12939_v7 = vpack.c.bf16 %v10111_v6, %v10109_v35  ;;  %v10137_v35 = vld [vmem:[%s16721_s2 + $0x148] sm:$0xff]  ;;  %v10154_v6 = vld [vmem:[%s16721_s2 + $0x1d0] sm:$0xff] }
0x2480   : > { %v12937_v43 = vpack.c.bf16 %v10106_v42, %v10104_v49  ;;  %v10135_v49 = vld [vmem:[%s16721_s2 + $0x138] sm:$0xff]  ;;  %v10152_v42 = vld [vmem:[%s16721_s2 + $0x1c0] sm:$0xff] }
0x2481   : > { %11641 = vmatmul.mubr.msk.f32.vlgmr.msra.gmra.mrb[48].mxu0 %vm5440_vm6, %v7398_v8  ;;  %v10108_v8 = vld [vmem:[%s16720_s12 + $0x160] sm:$0xff] }
0x2482   : > { %11655 = vmatpush3.xpose.msk.msra.mxu0 %vm5363_vm5, %v7556_v44  ;;  %11656 = vmatprep.mubr.msk.f32.mxu0 %vm14860_vm3, %v14861_v20  ;;  %v10110_v44 = vld [vmem:[%s16720_s12 + $0x170] sm:$0xff] }
0x2483   : > { %11659 = vmatprep.subr.mxu0 %v14861_v20 }
0x2485   : > { %11657 = vmatmul.mubr.msk.f32.vlgmr.msra.gmra.mrb[50].mxu0 %vm5363_vm5, %v7554_v2  ;;  %v12941_v2 = vpack.c.bf16 %v10110_v44, %v10108_v8 }
0x2486   : > { %11661 = vmatprep.mubr.msk.f32.mxu0 %vm14860_vm3, %v14861_v20 }
0x2554   : > { %v7471_v9 = vpop.f32.mrb[48].mxu0 }
0x2555   : > { %v11642_v10 = vpop.f32.mrb[49].mxu0  ;;  %11652 = vmatmul.mubr.msk.f32.vlgmr.msra.gmra.mrb[52].mxu1 %vm5363_vm5, %v7471_v9  ;;  %v10113_v9 = vld [vmem:[%s16720_s12 + $0x188] sm:$0xff] }
0x2556   : > { %11672 = vmatprep.mubr.msk.f32.mxu1 %vm14860_vm3, %v14861_v20  ;;  %12923 = vmatpush3.bf16.msra.mxu1 %v12922_v16  ;;  %v10115_v10 = vld [vmem:[%s16720_s12 + $0x198] sm:$0xff] }
0x2557   : > { %12924 = vmatprep.subr.bf16.mxu1 %v14859_v47 }
0x2558   : > { %v7627_v11 = vpop.f32.mrb[50].mxu0 }
0x2559   : > { %v11658_v12 = vpop.f32.mrb[51].mxu0  ;;  %v7631_v13 = vsel %vm5440_vm6, %v7627_v11, -inf }
0x255a   : > { %7632 = vmax.xlane.f32.xlu1 %v7631_v13  ;;  %12926 = vmatpush3.bf16.msra.mxu1 %v12925_v58  ;;  %v10112_v12 = vld [vmem:[%s16720_s12 + $0x180] sm:$0xff]  ;;  %v10114_v13 = vld [vmem:[%s16720_s12 + $0x190] sm:$0xff] }
0x255b   : > { %v10120_v58 = vld [vmem:[%s16720_s12 + $0x1c0] sm:$0xff] }
0x25e7   : > { %v7633_v14 = vpop.xlane.xlu1 %7632 }
0x25e8   : > { %v7634_v15 = vsub.f32 %v7627_v11, %v7633_v14  ;;  %v12943_v11 = vpack.c.bf16 %v10115_v10, %v10113_v9  ;;  %v12945_v14 = vpack.c.bf16 %v10114_v13, %v10112_v12  ;;  %v10139_v9 = vld [vmem:[%s16721_s2 + $0x158] sm:$0xff]  ;;  %v10156_v10 = vld [vmem:[%s16721_s2 + $0x1e0] sm:$0xff] }
0x25ea   : > { %v7635_v17 = vmul.f32 1.442695, %v7634_v15  ;;  %v10117_v15 = vld [vmem:[%s16720_s12 + $0x1a8] sm:$0xff] }
0x25ec   : > { %13647 = vpow2.f32 %v7635_v17  ;;  %v10119_v17 = vld [vmem:[%s16720_s12 + $0x1b8] sm:$0xff] }
0x25f6   : > { %v13648_v19 = vpop.eup %13647 }
0x25f7   : > { %v7637_v22 = vsel %vm5440_vm6, %v13648_v19, 0.0 }
0x25f8   : > { %7638 = vadd.xlane.f32.xlu0 %v7637_v22  ;;  %v12947_v22 = vpack.c.bf16 %v10119_v17, %v10117_v15 }
0x260e   : > { %7642 = vrot.lane.b32.xlu0 %v16211_v23, %s14864_s26  ;;  %s16724_s26 = sld [smem:[#allocation117_spill]] }
0x2628   : > { %v7548_v29 = vpop.f32.mrb[52].mxu1 }
0x2629   : > { %v7552_v30 = vadd.f32 %v7548_v29, %v16256_v51  ;;  %v11653_v31 = vpop.f32.mrb[53].mxu1  ;;  %v10101_v51 = vld [vmem:[%s16720_s12 + $0x128] sm:$0xff]  ;;  %v10122_v29 = vld [vmem:[%s16720_s12 + $0x1d0] sm:$0xff] }
0x262a   : > { %v12931_v57 = vpack.c.bf16 %v10103_v53, %v10101_v51  ;;  %v10127_v31 = vld [vmem:[%s16720_s12 + $0x1f8] sm:$0xff]  ;;  %v10149_v51 = vld [vmem:[%s16721_s2 + $0x1a8] sm:$0xff] }
0x2685   : > { %v7639_v32 = vpop.xlane.xlu0 %7638 }
0x2686   : > { %13649 = vrcp.f32 %v7639_v32  ;;  %v12953_v32 = vpack.c.bf16 %v10122_v29, %v10120_v58  ;;  %v12992_v58 = vpack.c.bf16 %v8096_v26, %v8095_v25  ;;  %v8195_v25 = vld [vmem:[%s16723_s9 + $0x38] sm:$0xff] }
0x2689   : > { %v7643_v33 = vpop.permute.xlu0 %7642 }
0x268a   : > { %11660 = vmatpush3.msra.mxu0 %v7643_v33 }
0x268b   : > { %12928 = vmatprep.subr.bf16.mxu0 %v12927_v50  ;;  %v10131_v50 = vld [vmem:[%s16721_s2 + $0x118] sm:$0xff] }
0x268c   : > { %v12965_v53 = vpack.c.bf16 %v10131_v50, %v10130_v62  ;;  %v8109_v50 = vld [vmem:[#allocation37 + $0x70] sm:$0xff] }
0x2690   : > { %v13650_v23 = vpop.eup %13649 }
0x2691   : > { %v7641_v34 = vmul.f32 %v13650_v23, %v13648_v19  ;;  %v10116_v19 = vld [vmem:[%s16720_s12 + $0x1a0] sm:$0xff] }
0x2692   : > { %v12949_v16 = vpack.c.bf16 %v10118_v24, %v10116_v19  ;;  %v10124_v23 = vld [vmem:[%s16720_s12 + $0x1e0] sm:$0xff] }
0x2693   : > { %11662 = vmatmul.mubr.msk.f32.vlgmr.msra.gmra.mrb[52].mxu0 %vm5440_vm6, %v7641_v34  ;;  %v10126_v34 = vld [vmem:[%s16720_s12 + $0x1f0] sm:$0xff] }
0x2694   : > { %7945 = vmatprep.mubr.f32.mxu0 %v14861_v20  ;;  %12930 = vmatpush1.bf16.msra.mxu0 %v12929_v54  ;;  %v12967_v54 = vpack.c.bf16 %v10149_v51, %v10148_v60  ;;  %v8110_v60 = vld [vmem:[#allocation37 + $0x78] sm:$0xff] }
0x2695   : > { %12932 = vmatprep.subr.bf16.mxu0 %v12931_v57  ;;  %v10132_v57 = vld [vmem:[%s16721_s2 + $0x120] sm:$0xff]  ;;  %v13013_v51 = vpack.c.bf16 %v8110_v60, %v8109_v50 }
0x2696   : > { %v8204_v60 = vld [vmem:[%s16723_s9 + $0x80] sm:$0xff] }
0x2766   : > { %v7714_v21 = vpop.f32.mrb[52].mxu0 }
0x2767   : > { %v11663_v36 = vpop.f32.mrb[53].mxu0  ;;  %11673 = vmatmul.mubr.msk.f32.vlgmr.msra.gmra.mrb[54].mxu1 %vm5363_vm5, %v7714_v21  ;;  %v12957_v21 = vpack.c.bf16 %v10126_v34, %v10124_v23  ;;  %v8101_v34 = vld [vmem:[#allocation37 + $0x30] sm:$0xff] }
0x2768   : > { %v10144_v36 = vld [vmem:[%s16721_s2 + $0x180] sm:$0xff] }
0x283a   : > { %v7791_v37 = vpop.f32.mrb[54].mxu1 }
0x283b   : > { %v7795_v38 = vadd.f32 %v7791_v37, %v7552_v30  ;;  %v11674_v39 = vpop.f32.mrb[55].mxu1  ;;  %v10125_v30 = vld [vmem:[%s16720_s12 + $0x1e8] sm:$0xff] }
0x283c   : > { %v12955_v33 = vpack.c.bf16 %v10127_v31, %v10125_v30  ;;  %v10145_v37 = vld [vmem:[%s16721_s2 + $0x188] sm:$0xff]  ;;  %v8097_v30 = vld [vmem:[#allocation37 + $0x10] sm:$0xff]  ;;  %v8098_v31 = vld [vmem:[#allocation37 + $0x18] sm:$0xff] }
0x283d   : > { %v7796_v41 = vadd.f32 %v7795_v38, %v16189_v52  ;;  %v12933_v52 = vpack.c.bf16 %v10102_v56, %v10100_v55  ;;  %v10128_v38 = vld [vmem:[%s16721_s2 + $0x100] sm:$0xff]  ;;  %v12959_v39 = vpack.c.bf16 %v10145_v37, %v10144_v36  ;;  %v10133_v55 = vld [vmem:[%s16721_s2 + $0x128] sm:$0xff]  ;;  %v10150_v56 = vld [vmem:[%s16721_s2 + $0x1b0] sm:$0xff] }
0x283e   : > { %v12969_v1 = vpack.c.bf16 %v10133_v55, %v10132_v57  ;;  %v8103_v37 = vld [vmem:[#allocation37 + $0x40] sm:$0xff]  ;;  %v10158_v55 = vld [vmem:[%s16721_s2 + $0x1f0] sm:$0xff] }
0x283f   : > { %v7805_v45 = vadd.f32 %v10093_v40, %v7796_v41  ;;  %12934 = vmatpush1.bf16.msra.mxu0 %v12933_v52  ;;  %v10129_v40 = vld [vmem:[%s16721_s2 + $0x108] sm:$0xff]  ;;  %v10146_v41 = vld [vmem:[%s16721_s2 + $0x190] sm:$0xff]  ;;  %12960 = vmatprep.subr.bf16.mxu1 %v12959_v39  ;;  %v12971_v52 = vpack.c.bf16 %v10151_v61, %v10150_v56  ;;  %v10159_v56 = vld [vmem:[%s16721_s2 + $0x1f8] sm:$0xff] }
0x2840   : > { %12936 = vmatprep.subr.bf16.mxu0 %v12935_v28  ;;  %v12961_v46 = vpack.c.bf16 %v10129_v40, %v10128_v38  ;;  %v10134_v28 = vld [vmem:[%s16721_s2 + $0x130] sm:$0xff]  ;;  %v8104_v38 = vld [vmem:[#allocation37 + $0x48] sm:$0xff]  ;;  %v12987_v61 = vpack.c.bf16 %v10159_v56, %v10158_v55  ;;  %v8208_v55 = vld [vmem:[%s16723_s9 + $0xa0] sm:$0xff] }
0x2841   : > { %7810 = vadd.xlane.f32.xlu1 %v7805_v45  ;;  %v13004_v39 = vpack.c.bf16 %v8104_v38, %v8103_v37  ;;  %v8105_v40 = vld [vmem:[#allocation37 + $0x50] sm:$0xff]  ;;  %v8201_v38 = vld [vmem:[%s16723_s9 + $0x68] sm:$0xff] }
0x2842   : > { %12962 = vmatpush3.bf16.msra.mxu1 %v12961_v46  ;;  %v8107_v46 = vld [vmem:[#allocation37 + $0x60] sm:$0xff]  ;;  %v8210_v56 = vld [vmem:[%s16723_s9 + $0xb0] sm:$0xff] }
0x2843   : > { %12938 = vmatpush1.bf16.msra.mxu0 %v12937_v43  ;;  %v10153_v43 = vld [vmem:[%s16721_s2 + $0x1c8] sm:$0xff] }
0x2844   : > { %12940 = vmatprep.subr.bf16.mxu0 %v12939_v7  ;;  %v10155_v7 = vld [vmem:[%s16721_s2 + $0x1d8] sm:$0xff] }
0x2845   : > { %v12979_v44 = vpack.c.bf16 %v10155_v7, %v10154_v6 }
0x2847   : > { %12942 = vmatpush1.bf16.msra.mxu0 %v12941_v2  ;;  %v10138_v2 = vld [vmem:[%s16721_s2 + $0x150] sm:$0xff] }
0x2848   : > { %12944 = vmatprep.subr.bf16.mxu0 %v12943_v11  ;;  %v10157_v11 = vld [vmem:[%s16721_s2 + $0x1e8] sm:$0xff]  ;;  %v12981_v12 = vpack.c.bf16 %v10139_v9, %v10138_v2  ;;  %v10160_v9 = vld [vmem:[#allocation32 + $0x1] ss:$0 sm:$0xff] }
0x2849   : > { %v12983_v13 = vpack.c.bf16 %v10157_v11, %v10156_v10 }
0x284b   : > { %12946 = vmatpush1.bf16.msra.mxu0 %v12945_v14 }
0x284c   : > { %12948 = vmatprep.subr.bf16.mxu0 %v12947_v22  ;;  %v10094_v22 = vld [vmem:[#allocation28 + $0x1] ss:$0 sm:$0xff] }
0x284f   : > { %12950 = vmatpush1.bf16.msra.mxu0 %v12949_v16  ;;  %v10095_v16 = vld [vmem:[#allocation29 + $0x1] ss:$0 sm:$0xff] }
0x2850   : > { %12952 = vmatprep.subr.bf16.mxu0 %v12951_v27 }
0x2853   : > { %12954 = vmatpush1.bf16.msra.mxu0 %v12953_v32  ;;  %v12995_v32 = vpack.c.bf16 %v8098_v31, %v8097_v30  ;;  %v8197_v30 = vld [vmem:[%s16723_s9 + $0x48] sm:$0xff]  ;;  %v8199_v31 = vld [vmem:[%s16723_s9 + $0x58] sm:$0xff] }
0x2854   : > { %12956 = vmatprep.subr.bf16.mxu0 %v12955_v33  ;;  %v8099_v33 = vld [vmem:[#allocation37 + $0x20] sm:$0xff] }
0x2857   : > { %12958 = vmatpush1.bf16.msra.mxu0 %v12957_v21  ;;  %v8102_v21 = vld [vmem:[#allocation37 + $0x38] sm:$0xff] }
0x2858   : > { %12991 = vmatprep.subr.bf16.mxu0 %v14859_v47  ;;  %v13001_v36 = vpack.c.bf16 %v8102_v21, %v8101_v34 }
0x28ce   : > { %v7811_v3 = vpop.xlane.xlu1 %7810 }
0x28cf   : > { %v7812_v4 = vmul.f32 0.0078125, %v7811_v3  ;;  %v12973_v3 = vpack.c.bf16 %v10135_v49, %v10134_v28  ;;  %v7869_v49 = vld [vmem:[#allocation31 + $0x2] sm:$0x3] }
0x28d1   : > { %v16302_v5 = vsub.f32 %v7805_v45, %v7812_v4  ;;  %v10147_v45 = vld [vmem:[%s16721_s2 + $0x198] sm:$0xff]  ;;  %v12975_v4 = vpack.c.bf16 %v10153_v43, %v10152_v42  ;;  %v7874_v42 = vrot.slane %v7869_v49, %v15746_v63  ;;  %v7878_v43 = vrot.slane %v7869_v49, %v15748_v0 }
0x28d2   : > { %v12963_v48 = vpack.c.bf16 %v10147_v45, %v10146_v41  ;;  %v8106_v41 = vld [vmem:[#allocation37 + $0x58] sm:$0xff] }
0x28d3   : > { %v7814_v59 = vmul.f32 %v16302_v5, %v16302_v5  ;;  %v13007_v45 = vpack.c.bf16 %v8106_v41, %v8105_v40  ;;  %v8200_v41 = vld [vmem:[%s16723_s9 + $0x60] sm:$0xff] }
0x28d4   : > { %12964 = vmatprep.subr.bf16.mxu1 %v12963_v48  ;;  %v8108_v48 = vld [vmem:[#allocation37 + $0x68] sm:$0xff] }
0x28d5   : > { %7815 = vadd.xlane.f32.xlu1 %v7814_v59  ;;  %12966 = vmatpush3.bf16.msra.mxu1 %v12965_v53  ;;  %v10136_v59 = vld [vmem:[%s16721_s2 + $0x140] sm:$0xff]  ;;  %v13010_v62 = vpack.c.bf16 %v8108_v48, %v8107_v46  ;;  %v8205_v48 = vld [vmem:[%s16723_s9 + $0x88] sm:$0xff] }
0x28d6   : > { %12968 = vmatprep.subr.bf16.mxu1 %v12967_v54  ;;  %v12977_v8 = vpack.c.bf16 %v10137_v35, %v10136_v59  ;;  %v10140_v53 = vld [vmem:[%s16721_s2 + $0x160] sm:$0xff]  ;;  %v10141_v54 = vld [vmem:[%s16721_s2 + $0x168] sm:$0xff] }
0x28d7   : > { %v12985_v57 = vpack.c.bf16 %v10141_v54, %v10140_v53  ;;  %v8209_v53 = vld [vmem:[%s16723_s9 + $0xa8] sm:$0xff] }
0x28d9   : > { %12970 = vmatpush3.bf16.msra.mxu1 %v12969_v1  ;;  %v10142_v1 = vld [vmem:[%s16721_s2 + $0x170] sm:$0xff] }
0x28da   : > { %12972 = vmatprep.subr.bf16.mxu1 %v12971_v52  ;;  %v10143_v52 = vld [vmem:[%s16721_s2 + $0x178] sm:$0xff] }
0x28db   : > { %v12989_v28 = vpack.c.bf16 %v10143_v52, %v10142_v1  ;;  %v8213_v1 = vld [vmem:[%s16723_s9 + $0xc8] sm:$0xff]  ;;  %v8215_v52 = vld [vmem:[%s16723_s9 + $0xd8] sm:$0xff] }
0x28dc   : > { %v13039_v49 = vpack.c.bf16 %v8215_v52, %v8213_v1  ;;  %v8471_v52 = vld [vmem:[#allocation41 + $0x70] sm:$0xff] }
0x28dd   : > { %12974 = vmatpush3.bf16.msra.mxu1 %v12973_v3 }
0x28de   : > { %12976 = vmatprep.subr.bf16.mxu1 %v12975_v4 }
0x28e1   : > { %12978 = vmatpush3.bf16.msra.mxu1 %v12977_v8 }
0x28e2   : > { %12980 = vmatprep.subr.bf16.mxu1 %v12979_v44 }
0x28e5   : > { %12982 = vmatpush3.bf16.msra.mxu1 %v12981_v12 }
0x28e6   : > { %12984 = vmatprep.subr.bf16.mxu1 %v12983_v13 }
0x28e9   : > { %12986 = vmatpush3.bf16.msra.mxu1 %v12985_v57  ;;  %v8211_v57 = vld [vmem:[%s16723_s9 + $0xb8] sm:$0xff] }
0x28ea   : > { %12988 = vmatprep.subr.bf16.mxu1 %v12987_v61  ;;  %v13035_v61 = vpack.c.bf16 %v8211_v57, %v8209_v53  ;;  %v8468_v57 = vld [vmem:[#allocation41 + $0x58] sm:$0xff] }
0x28ed   : > { %12990 = vmatpush3.bf16.msra.mxu1 %v12989_v28  ;;  %v13037_v28 = vpack.c.bf16 %v8210_v56, %v8208_v55  ;;  %v8469_v56 = vld [vmem:[#allocation41 + $0x60] sm:$0xff] }
0x2962   : > { %v7816_v14 = vpop.xlane.xlu1 %7815 }
0x2963   : > { %v7817_v15 = vmul.f32 0.0078125, %v7816_v14  ;;  %v8189_v14 = vld [vmem:[%s16722_s16 + $0x8] sm:$0xff]  ;;  %s1891_s16 = sand.u32 1, %s14755_s15  }
0x2964   : > { %s1892_s2 = scalar_lea.vmem [#allocation59], %s1891_s16  ;;  %s9377_s5 = scalar_lea.sflag [#allocation4], %s1891_s16 }
0x2965   : > { %v7818_v17 = vadd.f32 1e-05, %v7817_v15  ;;  %v8191_v15 = vld [vmem:[%s16723_s9 + $0x18] sm:$0xff]  ;;  %s9389_s3 = sshll.u32 %s1892_s2, 4  ;;  %s16530_s3 = int_to_ptr.vmem [resolvable:$true] %s9389_s3 }
0x2966   : > { %s14625_s6 = scalar_lea.vmem %s16530_s3, 16  ;;  %p14632_p1 = scmp.lt.s32.totalorder %s16530_s3, %s14630_s8 }
0x2967   : > { %13651 = vrsqrt.f32 %v7818_v17  ;;  %v8188_v17 = vld [vmem:[%s16723_s9] sm:$0xff]  ;;  %p14626_p10 = scmp.ne.s32.totalorder %s16530_s3, %s14625_s6 }
0x2969   : > { %p14627_p13 = pnand %p14626_p10, %p16725_p12 }
0x296b   : > { %p14628_p0 = pneg %p14627_p13 }
0x2971   : > { %v13652_v19 = vpop.eup %13651 }
0x2972   : > { %v7820_v24 = vmul.f32 %v13652_v19, %v16302_v5  ;;  %v8100_v5 = vld [vmem:[#allocation37 + $0x28] sm:$0xff]  ;;  %v13015_v19 = vpack.c.bf16 %v8191_v15, %v8189_v14  ;;  %v10162_v14 = vld [vmem:[#allocation35 + $0x1] ss:$0 sm:$0xff] }
0x2973   : > { %v12998_v23 = vpack.c.bf16 %v8100_v5, %v8099_v33  ;;  %v8196_v33 = vld [vmem:[%s16723_s9 + $0x40] sm:$0xff]  ;;  %v8198_v5 = vld [vmem:[%s16723_s9 + $0x50] sm:$0xff] }
0x2974   : > { %v7827_v27 = vmul.f32 %v10094_v22, %v7820_v24  ;;  %v8190_v22 = vld [vmem:[%s16723_s9 + $0x10] sm:$0xff]  ;;  %v8193_v24 = vld [vmem:[%s16723_s9 + $0x28] sm:$0xff]  ;;  %13016 = vmatprep.subr.bf16.mxu1 %v13015_v19  ;;  %v8220_v19 = vld [vmem:[#allocation40] sm:$0x3] }
0x2975   : > { %v13017_v26 = vpack.c.bf16 %v8190_v22, %v8188_v17  ;;  %v8225_v22 = vrot.slane %v8220_v19, %v15746_v63 }
0x2976   : > { %v16354_v29 = vadd.f32 %v10095_v16, %v7827_v27  ;;  %v13019_v16 = vpack.c.bf16 %v8195_v25, %v8193_v24  ;;  %v8192_v27 = vld [vmem:[%s16723_s9 + $0x20] sm:$0xff] }
0x2977   : > { %v10163_v25 = vld [vmem:[#allocation38] ss:$0 sm:$0xff] }
0x2978   : > { %7946 = vmatmul.mubr.f32.vlgmr.msra.gmra.mrb[54].mxu0 %v16354_v29 }
0x2979   : > { %12993 = vmatpush3.bf16.msra.mxu0 %v12992_v58  ;;  %11707 = vmatprep.mubr.msk.f32.mxu0 %vm14860_vm3, %v14861_v20  ;;  %v8194_v58 = vld [vmem:[%s16723_s9 + $0x30] sm:$0xff] }
0x297a   : > { %12994 = vmatprep.subr.bf16.mxu0 %v14859_v47 }
0x297d   : > { %12996 = vmatpush3.bf16.msra.mxu0 %v12995_v32  ;;  %v13023_v32 = vpack.c.bf16 %v8199_v31, %v8197_v30 }
0x297e   : > { %12997 = vmatprep.subr.bf16.mxu0 %v14859_v47 }
0x2981   : > { %12999 = vmatpush3.bf16.msra.mxu0 %v12998_v23  ;;  %v13025_v23 = vpack.c.bf16 %v8198_v5, %v8196_v33 }
0x2982   : > { %13000 = vmatprep.subr.bf16.mxu0 %v14859_v47 }
0x2985   : > { %13002 = vmatpush3.bf16.msra.mxu0 %v13001_v36 }
0x2986   : > { %13003 = vmatprep.subr.bf16.mxu0 %v14859_v47 }
0x2989   : > { %13005 = vmatpush3.bf16.msra.mxu0 %v13004_v39  ;;  %v8203_v39 = vld [vmem:[%s16723_s9 + $0x78] sm:$0xff] }
0x298a   : > { %13006 = vmatprep.subr.bf16.mxu0 %v14859_v47  ;;  %v13027_v40 = vpack.c.bf16 %v8203_v39, %v8201_v38  ;;  %v8460_v39 = vld [vmem:[#allocation41 + $0x18] sm:$0xff] }
0x298d   : > { %13008 = vmatpush3.bf16.msra.mxu0 %v13007_v45  ;;  %v8202_v45 = vld [vmem:[%s16723_s9 + $0x70] sm:$0xff] }
0x298e   : > { %13009 = vmatprep.subr.bf16.mxu0 %v14859_v47  ;;  %v13029_v46 = vpack.c.bf16 %v8202_v45, %v8200_v41  ;;  %v8461_v41 = vld [vmem:[#allocation41 + $0x20] sm:$0xff]  ;;  %v8462_v45 = vld [vmem:[#allocation41 + $0x28] sm:$0xff] }
0x2991   : > { %13011 = vmatpush3.bf16.msra.mxu0 %v13010_v62  ;;  %v8207_v62 = vld [vmem:[%s16723_s9 + $0x98] sm:$0xff] }
0x2992   : > { %13012 = vmatprep.subr.bf16.mxu0 %v14859_v47  ;;  %v13031_v50 = vpack.c.bf16 %v8207_v62, %v8205_v48  ;;  %v8463_v48 = vld [vmem:[#allocation41 + $0x30] sm:$0xff]  ;;  %v8464_v62 = vld [vmem:[#allocation41 + $0x38] sm:$0xff] }
0x2995   : > { %13014 = vmatpush3.bf16.msra.mxu0 %v13013_v51  ;;  %v8206_v51 = vld [vmem:[%s16723_s9 + $0x90] sm:$0xff] }
0x2996   : > { %11710 = vmatprep.subr.mxu0 %v14861_v20  ;;  %v13033_v54 = vpack.c.bf16 %v8206_v51, %v8204_v60  ;;  %v8465_v60 = vld [vmem:[#allocation41 + $0x40] sm:$0xff]  ;;  %v8466_v51 = vld [vmem:[#allocation41 + $0x48] sm:$0xff] }
0x2997   : > { %v13060_v53 = vpack.c.bf16 %v8466_v51, %v8465_v60  ;;  %v8655_v60 = vld [vmem:[#allocation47 + $0x60] sm:$0xff]  ;;  %v8657_v51 = vld [vmem:[#allocation47 + $0x70] sm:$0xff] }
0x2998   : > { %11708 = vmatmul.mubr.f32.vlgmr.msra.gmra.mrb[56].mxu0 %v15784_v18 }
0x2999   : > { %11712 = vmatprep.mubr.msk.f32.mxu0 %vm14860_vm3, %v14861_v20 }
0x2a4b   : > { %v7947_v3 = vpop.f32.mrb[54].mxu0 }
0x2a4c   : > { %v7948_v4 = vadd.f32 %v7947_v3, %v7874_v42  ;;  %v7949_v59 = vpop.f32.mrb[55].mxu0  ;;  %v8212_v42 = vld [vmem:[%s16723_s9 + $0xc0] sm:$0xff]  ;;  %v8217_v3 = vld [vmem:[%s16723_s9 + $0xe8] sm:$0xff] }
0x2a4d   : > { %v7950_v35 = vadd.f32 %v7949_v59, %v7878_v43  ;;  %v8214_v43 = vld [vmem:[%s16723_s9 + $0xd0] sm:$0xff] }
0x2a4e   : > { %v7952_v7 = vmax.f32 %v7948_v4, 0.0  ;;  %v8219_v4 = vld [vmem:[%s16723_s9 + $0xf8] sm:$0xff]  ;;  %v13041_v59 = vpack.c.bf16 %v8214_v43, %v8212_v42 }
0x2a4f   : > { %v7953_v6 = vmax.f32 %v7950_v35, 0.0  ;;  %v13043_v35 = vpack.c.bf16 %v8219_v4, %v8217_v3  ;;  %v8644_v4 = vld [vmem:[#allocation47 + $0x8] sm:$0xff] }
0x2a51   : > { %8059 = vmatprep.mubr.f32.mxu1 %v7953_v6  ;;  %v8216_v6 = vld [vmem:[%s16723_s9 + $0xe0] sm:$0xff] }
0x2a52   : > { %8060 = vmatmul.mubr.f32.vlgmr.msra.gmra.mrb[56].mxu1 %v7952_v7  ;;  %v8218_v7 = vld [vmem:[%s16723_s9 + $0xf0] sm:$0xff]  ;;  %s14631_s9 = scalar_lea.vmem %s14630_s8, 32 }
0x2a53   : > { %8296 = vmatprep.mubr.f32.mxu1 %v14861_v20  ;;  %13018 = vmatpush1.bf16.msra.mxu1 %v13017_v26  ;;  %p14633_p5 = scmp.lt.s32.totalorder %s14631_s9, %s14625_s6 }
0x2a54   : > { %13020 = vmatprep.subr.bf16.mxu1 %v13019_v16  ;;  %v8229_v16 = vrot.slane %v8220_v19, %v15748_v0  ;;  %v8558_v19 = vld [vmem:[#allocation44 + $0x40] sm:$0xff] }
0x2a55   : > { %p14634_p6 = por %p14633_p5, %p14632_p1 }
0x2a57   : > { %p14635_p2 = pnand %p14634_p6, %p14628_p0 }
0x2a6b   : > { %v16379_v8 = vpop.f32.mrb[56].mxu0 }
0x2a6c   : > { %v11709_v44 = vpop.f32.mrb[57].mxu0 }
0x2a6d   : > { %v13045_v44 = vpack.c.bf16 %v8218_v7, %v8216_v6  ;;  %v8550_v6 = vld [vmem:[#allocation44] sm:$0xff]  ;;  %v8551_v7 = vld [vmem:[#allocation44 + $0x8] sm:$0xff] }
0x2b25   : > { %v10768_v2 = vpop.f32.mrb[56].mxu1 }
0x2b26   : > { %v10769_v10 = vpop.f32.mrb[57].mxu1 }
0x2b27   : > { %v10770_v11 = vadd.f32 %v10769_v10, %v10768_v2 }
0x2b29   : > { %v8062_v12 = vadd.f32 %v10770_v11, %v10160_v9 }
0x2b2b   : > { %v8065_v13 = vadd.f32 %v8062_v12, %v16354_v29  ;;  %v13021_v29 = vpack.c.bf16 %v8194_v58, %v8192_v27  ;;  %v10161_v12 = vld [vmem:[#allocation34 + $0x1] ss:$0 sm:$0xff]  ;;  %v8185_v58 = vadd.f32 %v10163_v25, %v16379_v8 }
0x2b2c   : > { %v8560_v25 = vld [vmem:[#allocation44 + $0x50] sm:$0xff] }
0x2b2d   : > { %8070 = vadd.xlane.f32.xlu1 %v8065_v13  ;;  %13022 = vmatpush1.bf16.msra.mxu1 %v13021_v29 }
0x2b2e   : > { %13024 = vmatprep.subr.bf16.mxu1 %v13023_v32 }
0x2b31   : > { %13026 = vmatpush1.bf16.msra.mxu1 %v13025_v23 }
0x2b32   : > { %13028 = vmatprep.subr.bf16.mxu1 %v13027_v40 }
0x2b35   : > { %13030 = vmatpush1.bf16.msra.mxu1 %v13029_v46  ;;  %v13054_v46 = vpack.c.bf16 %v8462_v45, %v8461_v41  ;;  %v8651_v41 = vld [vmem:[#allocation47 + $0x40] sm:$0xff]  ;;  %v8653_v45 = vld [vmem:[#allocation47 + $0x50] sm:$0xff] }
0x2b36   : > { %13032 = vmatprep.subr.bf16.mxu1 %v13031_v50  ;;  %v13057_v50 = vpack.c.bf16 %v8464_v62, %v8463_v48  ;;  %v8658_v48 = vld [vmem:[#allocation47 + $0x78] sm:$0xff]  ;;  %v13105_v62 = vpack.c.bf16 %v8653_v45, %v8651_v41 }
0x2b39   : > { %13034 = vmatpush1.bf16.msra.mxu1 %v13033_v54  ;;  %v8467_v54 = vld [vmem:[#allocation41 + $0x50] sm:$0xff] }
0x2b3a   : > { %13036 = vmatprep.subr.bf16.mxu1 %v13035_v61  ;;  %v13063_v55 = vpack.c.bf16 %v8468_v57, %v8467_v54  ;;  %v8470_v61 = vld [vmem:[#allocation41 + $0x68] sm:$0xff]  ;;  %v8662_v54 = vld [vmem:[#allocation47 + $0x98] sm:$0xff]  ;;  %v13109_v57 = vpack.c.bf16 %v8657_v51, %v8655_v60 }
0x2b3b   : > { %v13066_v1 = vpack.c.bf16 %v8470_v61, %v8469_v56  ;;  %v8659_v56 = vld [vmem:[#allocation47 + $0x80] sm:$0xff]  ;;  %v8661_v61 = vld [vmem:[#allocation47 + $0x90] sm:$0xff] }
0x2b3c   : > { %v8916_v60 = vld [vmem:[#allocation50 + $0x20] sm:$0xff]  ;;  %v8917_v51 = vld [vmem:[#allocation50 + $0x28] sm:$0xff] }
0x2b3d   : > { %13038 = vmatpush1.bf16.msra.mxu1 %v13037_v28  ;;  %v8472_v28 = vld [vmem:[#allocation41 + $0x78] sm:$0xff] }
0x2b3e   : > { %13040 = vmatprep.subr.bf16.mxu1 %v13039_v49  ;;  %v13069_v49 = vpack.c.bf16 %v8472_v28, %v8471_v52  ;;  %v8666_v52 = vld [vmem:[#allocation47 + $0xb8] sm:$0xff]  ;;  %v13113_v28 = vpack.c.bf16 %v8661_v61, %v8659_v56  ;;  %v8920_v56 = vld [vmem:[#allocation50 + $0x40] sm:$0xff]  ;;  %v8921_v61 = vld [vmem:[#allocation50 + $0x48] sm:$0xff] }
0x2b41   : > { %13042 = vmatpush1.bf16.msra.mxu1 %v13041_v59  ;;  %v8646_v59 = vld [vmem:[#allocation47 + $0x18] sm:$0xff] }
0x2b42   : > { %13044 = vmatprep.subr.bf16.mxu1 %v13043_v35  ;;  %v13095_v35 = vpack.c.bf16 %v8646_v59, %v8644_v4  ;;  %v8670_v4 = vld [vmem:[#allocation47 + $0xd8] sm:$0xff] }
0x2b45   : > { %13046 = vmatpush1.bf16.msra.mxu1 %v13045_v44  ;;  %v8552_v44 = vld [vmem:[#allocation44 + $0x10] sm:$0xff] }
0x2b46   : > { %13047 = vmatprep.subr.bf16.mxu1 %v14859_v47 }
0x2bba   : > { %v8071_v34 = vpop.xlane.xlu1 %8070 }
0x2bbb   : > { %v8072_v21 = vmul.f32 0.0078125, %v8071_v34 }
0x2bbd   : > { %v8073_v36 = vsub.f32 %v8065_v13, %v8072_v21  ;;  %v8457_v21 = vld [vmem:[#allocation41] sm:$0xff] }
0x2bbf   : > { %v8074_v37 = vmul.f32 %v8073_v36, %v8073_v36 }
0x2bc1   : > { %8075 = vadd.xlane.f32.xlu1 %v8074_v37  ;;  %v8459_v37 = vld [vmem:[#allocation41 + $0x10] sm:$0xff] }
0x2bc2   : > { %v13051_v40 = vpack.c.bf16 %v8460_v39, %v8459_v37  ;;  %v8654_v37 = vld [vmem:[#allocation47 + $0x58] sm:$0xff] }
0x2c4e   : > { %v8076_v2 = vpop.xlane.xlu1 %8075 }
0x2c4f   : > { %v8077_v9 = vmul.f32 0.0078125, %v8076_v2  ;;  %v13072_v2 = vpack.c.bf16 %v8551_v7, %v8550_v6  ;;  %v8667_v6 = vld [vmem:[#allocation47 + $0xc0] sm:$0xff]  ;;  %v8669_v7 = vld [vmem:[#allocation47 + $0xd0] sm:$0xff] }
0x2c51   : > { %v8078_v10 = vadd.f32 1e-05, %v8077_v9  ;;  %v8553_v9 = vld [vmem:[#allocation44 + $0x18] sm:$0xff] }
0x2c53   : > { %13653 = vrsqrt.f32 %v8078_v10  ;;  %v13075_v10 = vpack.c.bf16 %v8553_v9, %v8552_v44  ;;  %v8672_v44 = vld [vmem:[#allocation47 + $0xe8] sm:$0xff]  ;;  %v13121_v9 = vpack.c.bf16 %v8669_v7, %v8667_v6 }
0x2c54   : > { %v9021_v6 = vld [vmem:[#allocation53 + $0x80] sm:$0xff]  ;;  %v9022_v7 = vld [vmem:[#allocation53 + $0x88] sm:$0xff] }
0x2c5d   : > { %v13654_v11 = vpop.eup %13653 }
0x2c5e   : > { %v8080_v13 = vmul.f32 %v13654_v11, %v8073_v36  ;;  %v8458_v36 = vld [vmem:[#allocation41 + $0x8] sm:$0xff] }
0x2c5f   : > { %v13048_v38 = vpack.c.bf16 %v8458_v36, %v8457_v21  ;;  %v8554_v11 = vld [vmem:[#allocation44 + $0x20] sm:$0xff]  ;;  %v8652_v36 = vld [vmem:[#allocation47 + $0x48] sm:$0xff] }
0x2c60   : > { %v8087_v15 = vmul.f32 %v10161_v12, %v8080_v13  ;;  %v8555_v12 = vld [vmem:[#allocation44 + $0x28] sm:$0xff] }
0x2c61   : > { %v13078_v13 = vpack.c.bf16 %v8555_v12, %v8554_v11  ;;  %v8671_v11 = vld [vmem:[#allocation47 + $0xe0] sm:$0xff]  ;;  %v8673_v12 = vld [vmem:[#allocation47 + $0xf0] sm:$0xff] }
0x2c62   : > { %v8094_v17 = vadd.f32 %v10162_v14, %v8087_v15  ;;  %v8556_v14 = vld [vmem:[#allocation44 + $0x30] sm:$0xff]  ;;  %v8557_v15 = vld [vmem:[#allocation44 + $0x38] sm:$0xff] }
0x2c64   : > { %8297 = vmatmul.mubr.f32.vlgmr.msra.gmra.mrb[58].mxu1 %v8094_v17  ;;  %v13081_v17 = vpack.c.bf16 %v8557_v15, %v8556_v14  ;;  %v8564_v14 = vld [vmem:[#allocation44 + $0x70] sm:$0xff]  ;;  %v8565_v15 = vld [vmem:[#allocation44 + $0x78] sm:$0xff] }
0x2c65   : > { %11752 = vmatprep.mubr.msk.f32.mxu1 %vm14860_vm3, %v14861_v20  ;;  %13049 = vmatpush3.bf16.msra.mxu1 %v13048_v38 }
0x2c66   : > { %13050 = vmatprep.subr.bf16.mxu1 %v14859_v47 }
0x2c69   : > { %13052 = vmatpush3.bf16.msra.mxu1 %v13051_v40  ;;  %v13103_v40 = vpack.c.bf16 %v8654_v37, %v8652_v36 }
0x2c6a   : > { %13053 = vmatprep.subr.bf16.mxu1 %v14859_v47 }
0x2c6d   : > { %13055 = vmatpush3.bf16.msra.mxu1 %v13054_v46  ;;  %v8656_v46 = vld [vmem:[#allocation47 + $0x68] sm:$0xff] }
0x2c6e   : > { %13056 = vmatprep.subr.bf16.mxu1 %v14859_v47 }
0x2c71   : > { %13058 = vmatpush3.bf16.msra.mxu1 %v13057_v50  ;;  %v13107_v50 = vpack.c.bf16 %v8658_v48, %v8656_v46  ;;  %v8914_v48 = vld [vmem:[#allocation50 + $0x10] sm:$0xff] }
0x2c72   : > { %13059 = vmatprep.subr.bf16.mxu1 %v14859_v47 }
0x2c75   : > { %13061 = vmatpush3.bf16.msra.mxu1 %v13060_v53  ;;  %v8660_v53 = vld [vmem:[#allocation47 + $0x88] sm:$0xff] }
0x2c76   : > { %13062 = vmatprep.subr.bf16.mxu1 %v14859_v47 }
0x2c79   : > { %13064 = vmatpush3.bf16.msra.mxu1 %v13063_v55  ;;  %v13111_v55 = vpack.c.bf16 %v8662_v54, %v8660_v53  ;;  %v13134_v53 = vpack.c.bf16 %v8917_v51, %v8916_v60  ;;  %v8918_v54 = vld [vmem:[#allocation50 + $0x30] sm:$0xff] }
0x2c7a   : > { %13065 = vmatprep.subr.bf16.mxu1 %v14859_v47  ;;  %v9019_v51 = vld [vmem:[#allocation53 + $0x70] sm:$0xff] }
0x2c7d   : > { %13067 = vmatpush3.bf16.msra.mxu1 %v13066_v1  ;;  %v8664_v1 = vld [vmem:[#allocation47 + $0xa8] sm:$0xff] }
0x2c7e   : > { %13068 = vmatprep.subr.bf16.mxu1 %v14859_v47 }
0x2c81   : > { %13070 = vmatpush3.bf16.msra.mxu1 %v13069_v49  ;;  %v13115_v49 = vpack.c.bf16 %v8666_v52, %v8664_v1  ;;  %v13140_v1 = vpack.c.bf16 %v8921_v61, %v8920_v56  ;;  %v8922_v52 = vld [vmem:[#allocation50 + $0x50] sm:$0xff] }
0x2c82   : > { %13096 = vmatprep.subr.bf16.mxu1 %v13095_v35  ;;  %v9186_v61 = vld [vmem:[%s16724_s26] sm:$0xff] }
0x2d37   : > { %v8298_v24 = vpop.f32.mrb[58].mxu1 }
0x2d38   : > { %v8299_v26 = vadd.f32 %v8298_v24, %v8225_v22  ;;  %v8300_v27 = vpop.f32.mrb[59].mxu1  ;;  %v8559_v22 = vld [vmem:[#allocation44 + $0x48] sm:$0xff] }
0x2d39   : > { %v8301_v30 = vadd.f32 %v8300_v27, %v8229_v16  ;;  %v13084_v24 = vpack.c.bf16 %v8559_v22, %v8558_v19  ;;  %v8562_v27 = vld [vmem:[#allocation44 + $0x60] sm:$0xff]  ;;  %v10165_v19 = vld [vmem:[#allocation43] ss:$0 sm:$0xff] }
0x2d3a   : > { %11711 = vmatpush3.xpose.msra.mxu0 %v8299_v26  ;;  %v8561_v26 = vld [vmem:[#allocation44 + $0x58] sm:$0xff] }
0x2d3b   : > { %11715 = vmatprep.subr.mxu0 %v14861_v20  ;;  %v13087_v16 = vpack.c.bf16 %v8561_v26, %v8560_v25 }
0x2d3d   : > { %11713 = vmatmul.mubr.f32.vlgmr.msra.gmra.mrb[58].mxu0 %v8185_v58  ;;  %v8563_v58 = vld [vmem:[#allocation44 + $0x68] sm:$0xff] }
0x2d3e   : > { %11716 = vmatpush3.msra.mxu0 %v8301_v30  ;;  %11717 = vmatprep.mubr.msk.f32.mxu0 %vm14860_vm3, %v14861_v20  ;;  %v13090_v30 = vpack.c.bf16 %v8563_v58, %v8562_v27 }
0x2d3f   : > { %13071 = vmatprep.subr.bf16.mxu0 %v14859_v47 }
0x2e10   : > { %v8369_v31 = vpop.f32.mrb[58].mxu0 }
0x2e11   : > { %v11714_v29 = vpop.f32.mrb[59].mxu0  ;;  %v8373_v32 = vsel %vm5440_vm6, %v8369_v31, -inf }
0x2e12   : > { %8374 = vmax.xlane.f32.xlu1 %v8373_v32  ;;  %v8645_v29 = vld [vmem:[#allocation47 + $0x10] sm:$0xff]  ;;  %v8648_v32 = vld [vmem:[#allocation47 + $0x28] sm:$0xff] }
0x2e9f   : > { %v8375_v33 = vpop.xlane.xlu1 %8374 }
0x2ea0   : > { %v8376_v5 = vsub.f32 %v8369_v31, %v8375_v33  ;;  %v8643_v31 = vld [vmem:[#allocation47] sm:$0xff]  ;;  %v8650_v33 = vld [vmem:[#allocation47 + $0x38] sm:$0xff] }
0x2ea2   : > { %v8377_v23 = vmul.f32 1.442695, %v8376_v5  ;;  %v13097_v5 = vpack.c.bf16 %v8645_v29, %v8643_v31  ;;  %v10166_v29 = vld [vmem:[#allocation46] ss:$0 sm:$0xff] }
0x2ea4   : > { %13655 = vpow2.f32 %v8377_v23  ;;  %v13099_v23 = vpack.c.bf16 %v8650_v33, %v8648_v32 }
0x2eae   : > { %v13656_v8 = vpop.eup %13655 }
0x2eaf   : > { %v8379_v34 = vsel %vm5440_vm6, %v13656_v8, 0.0 }
0x2eb0   : > { %8380 = vadd.xlane.f32.xlu0 %v8379_v34  ;;  %v8649_v34 = vld [vmem:[#allocation47 + $0x30] sm:$0xff] }
0x2f3d   : > { %v8381_v42 = vpop.xlane.xlu0 %8380 }
0x2f3e   : > { %13657 = vrcp.f32 %v8381_v42  ;;  %v8663_v42 = vld [vmem:[#allocation47 + $0xa0] sm:$0xff] }
0x2f48   : > { %v13658_v43 = vpop.eup %13657 }
0x2f49   : > { %v8383_v3 = vmul.f32 %v13658_v43, %v13656_v8  ;;  %v8647_v8 = vld [vmem:[#allocation47 + $0x20] sm:$0xff]  ;;  %v8665_v43 = vld [vmem:[#allocation47 + $0xb0] sm:$0xff] }
0x2f4a   : > { %v13101_v39 = vpack.c.bf16 %v8649_v34, %v8647_v8  ;;  %v13117_v59 = vpack.c.bf16 %v8665_v43, %v8663_v42  ;;  %v8924_v42 = vld [vmem:[#allocation50 + $0x60] sm:$0xff]  ;;  %v8925_v43 = vld [vmem:[#allocation50 + $0x68] sm:$0xff] }
0x2f4b   : > { %11718 = vmatmul.mubr.msk.f32.vlgmr.msra.gmra.mrb[60].mxu0 %vm5440_vm6, %v8383_v3  ;;  %v8668_v3 = vld [vmem:[#allocation47 + $0xc8] sm:$0xff] }
0x2f4c   : > { %11787 = vmatprep.mubr.msk.f32.mxu0 %vm14860_vm3, %v14861_v20  ;;  %13073 = vmatpush3.bf16.msra.mxu0 %v13072_v2  ;;  %v13119_v35 = vpack.c.bf16 %v8670_v4, %v8668_v3  ;;  %v8674_v2 = vld [vmem:[#allocation47 + $0xf8] sm:$0xff]  ;;  %v13146_v3 = vpack.c.bf16 %v8925_v43, %v8924_v42  ;;  %v9188_v43 = vld [vmem:[%s16724_s26 + $0x10] sm:$0xff] }
0x2f4d   : > { %13074 = vmatprep.subr.bf16.mxu0 %v14859_v47  ;;  %v8926_v4 = vld [vmem:[#allocation50 + $0x70] sm:$0xff] }
0x2f50   : > { %13076 = vmatpush3.bf16.msra.mxu0 %v13075_v10  ;;  %v13123_v10 = vpack.c.bf16 %v8674_v2, %v8672_v44  ;;  %v9023_v44 = vld [vmem:[#allocation53 + $0x90] sm:$0xff]  ;;  %v13152_v2 = vpack.c.bf16 %v9022_v7, %v9021_v6  ;;  %v9192_v7 = vld [vmem:[%s16724_s26 + $0x30] sm:$0xff] }
0x2f51   : > { %13077 = vmatprep.subr.bf16.mxu0 %v14859_v47 }
0x2f54   : > { %13079 = vmatpush3.bf16.msra.mxu0 %v13078_v13  ;;  %v13125_v13 = vpack.c.bf16 %v8673_v12, %v8671_v11  ;;  %v9025_v11 = vld [vmem:[#allocation53 + $0xa0] sm:$0xff]  ;;  %v9026_v12 = vld [vmem:[#allocation53 + $0xa8] sm:$0xff] }
0x2f55   : > { %13080 = vmatprep.subr.bf16.mxu0 %v14859_v47 }
0x2f58   : > { %13082 = vmatpush3.bf16.msra.mxu0 %v13081_v17  ;;  %v13093_v17 = vpack.c.bf16 %v8565_v15, %v8564_v14  ;;  %v9027_v14 = vld [vmem:[#allocation53 + $0xb0] sm:$0xff]  ;;  %v9028_v15 = vld [vmem:[#allocation53 + $0xb8] sm:$0xff] }
0x2f59   : > { %13083 = vmatprep.subr.bf16.mxu0 %v14859_v47 }
0x2f5c   : > { %13085 = vmatpush3.bf16.msra.mxu0 %v13084_v24 }
0x2f5d   : > { %13086 = vmatprep.subr.bf16.mxu0 %v14859_v47 }
0x2f60   : > { %13088 = vmatpush3.bf16.msra.mxu0 %v13087_v16 }
0x2f61   : > { %13089 = vmatprep.subr.bf16.mxu0 %v14859_v47 }
0x2f64   : > { %13091 = vmatpush3.bf16.msra.mxu0 %v13090_v30 }
0x2f65   : > { %13092 = vmatprep.subr.bf16.mxu0 %v14859_v47 }
0x2f68   : > { %13094 = vmatpush3.bf16.msra.mxu0 %v13093_v17  ;;  %v13161_v17 = vpack.c.bf16 %v9028_v15, %v9027_v14 }
0x2f69   : > { %11790 = vmatprep.subr.mxu0 %v14861_v20 }
0x301e   : > { %v8453_v21 = vpop.f32.mrb[60].mxu0 }
0x301f   : > { %v11719_v38 = vpop.f32.mrb[61].mxu0  ;;  %11753 = vmatmul.mubr.f32.vlgmr.msra.gmra.mrb[60].mxu1 %v8453_v21 }
0x3020   : > { %13098 = vmatpush1.bf16.msra.mxu1 %v13097_v5  ;;  %8751 = vmatprep.mubr.f32.mxu1 %v14861_v20 }
0x3021   : > { %13100 = vmatprep.subr.bf16.mxu1 %v13099_v23 }
0x3024   : > { %13102 = vmatpush1.bf16.msra.mxu1 %v13101_v39  ;;  %v8912_v39 = vld [vmem:[#allocation50] sm:$0xff] }
0x3025   : > { %13104 = vmatprep.subr.bf16.mxu1 %v13103_v40  ;;  %v8913_v40 = vld [vmem:[#allocation50 + $0x8] sm:$0xff] }
0x3026   : > { %v13128_v45 = vpack.c.bf16 %v8913_v40, %v8912_v39  ;;  %v9013_v39 = vld [vmem:[#allocation53 + $0x40] sm:$0xff]  ;;  %v9014_v40 = vld [vmem:[#allocation53 + $0x48] sm:$0xff] }
0x3028   : > { %13106 = vmatpush1.bf16.msra.mxu1 %v13105_v62  ;;  %v8915_v62 = vld [vmem:[#allocation50 + $0x18] sm:$0xff] }
0x3029   : > { %13108 = vmatprep.subr.bf16.mxu1 %v13107_v50  ;;  %v13131_v50 = vpack.c.bf16 %v8915_v62, %v8914_v48  ;;  %v9017_v62 = vld [vmem:[#allocation53 + $0x60] sm:$0xff] }
0x302c   : > { %13110 = vmatpush1.bf16.msra.mxu1 %v13109_v57  ;;  %v8919_v57 = vld [vmem:[#allocation50 + $0x38] sm:$0xff] }
0x302d   : > { %13112 = vmatprep.subr.bf16.mxu1 %v13111_v55  ;;  %v13137_v55 = vpack.c.bf16 %v8919_v57, %v8918_v54  ;;  %v9035_v57 = vld [vmem:[#allocation53 + $0xf0] sm:$0xff] }
0x3030   : > { %13114 = vmatpush1.bf16.msra.mxu1 %v13113_v28  ;;  %v8923_v28 = vld [vmem:[#allocation50 + $0x58] sm:$0xff] }
0x3031   : > { %13116 = vmatprep.subr.bf16.mxu1 %v13115_v49  ;;  %v13143_v49 = vpack.c.bf16 %v8923_v28, %v8922_v52  ;;  %v10168_v52 = vld [vmem:[#allocation52] ss:$0 sm:$0xff] }
0x3034   : > { %13118 = vmatpush1.bf16.msra.mxu1 %v13117_v59  ;;  %v8927_v59 = vld [vmem:[#allocation50 + $0x78] sm:$0xff] }
0x3035   : > { %13120 = vmatprep.subr.bf16.mxu1 %v13119_v35  ;;  %v13149_v35 = vpack.c.bf16 %v8927_v59, %v8926_v4  ;;  %v9190_v59 = vld [vmem:[%s16724_s26 + $0x20] sm:$0xff] }
0x3038   : > { %13122 = vmatpush1.bf16.msra.mxu1 %v13121_v9  ;;  %v9024_v9 = vld [vmem:[#allocation53 + $0x98] sm:$0xff] }
0x3039   : > { %13124 = vmatprep.subr.bf16.mxu1 %v13123_v10  ;;  %v13155_v10 = vpack.c.bf16 %v9024_v9, %v9023_v44  ;;  %v9193_v44 = vld [vmem:[%s16724_s26 + $0x38] sm:$0xff]  ;;  %v9194_v9 = vld [vmem:[%s16724_s26 + $0x40] sm:$0xff] }
0x303c   : > { %13126 = vmatpush1.bf16.msra.mxu1 %v13125_v13  ;;  %v13158_v13 = vpack.c.bf16 %v9026_v12, %v9025_v11  ;;  %v9196_v11 = vld [vmem:[%s16724_s26 + $0x50] sm:$0xff]  ;;  %v9197_v12 = vld [vmem:[%s16724_s26 + $0x58] sm:$0xff] }
0x303d   : > { %13151 = vmatprep.subr.bf16.mxu1 %v14859_v47 }
0x303f   : > { %8752 = vmatmul.mubr.f32.vlgmr.msra.gmra.mrb[62].mxu1 %v15784_v18  ;;  %v8675_v18 = vld [vmem:[#allocation49] sm:$0x3] }
0x3040   : > { %11867 = vmatprep.mubr.msk.f32.mxu1 %vm14860_vm3, %v14861_v20  ;;  %v8680_v26 = vrot.slane %v8675_v18, %v15746_v63  ;;  %v8684_v16 = vrot.slane %v8675_v18, %v15748_v0  ;;  %13153 = vmatpush3.bf16.msra.mxu1 %v13152_v2  ;;  %v9031_v18 = vld [vmem:[#allocation53 + $0xd0] sm:$0xff]  ;;  %v13209_v2 = vpack.c.bf16 %v9193_v44, %v9192_v7 }
0x3041   : > { %13154 = vmatprep.subr.bf16.mxu1 %v14859_v47 }
0x3044   : > { %13156 = vmatpush3.bf16.msra.mxu1 %v13155_v10 }
0x3045   : > { %13157 = vmatprep.subr.bf16.mxu1 %v14859_v47 }
0x3048   : > { %13159 = vmatpush3.bf16.msra.mxu1 %v13158_v13  ;;  %v13215_v13 = vpack.c.bf16 %v9197_v12, %v9196_v11 }
0x3049   : > { %13160 = vmatprep.subr.bf16.mxu1 %v14859_v47 }
0x304c   : > { %13162 = vmatpush3.bf16.msra.mxu1 %v13161_v17  ;;  %v9198_v17 = vld [vmem:[%s16724_s26 + $0x60] sm:$0xff] }
0x304d   : > { %13163 = vmatprep.subr.bf16.mxu1 %v14859_v47 }
0x30f2   : > { %v8546_v22 = vpop.f32.mrb[60].mxu1 }
0x30f3   : > { %v16449_v24 = vadd.f32 %v10165_v19, %v8546_v22  ;;  %v11754_v25 = vpop.f32.mrb[61].mxu1  ;;  %v9029_v19 = vld [vmem:[#allocation53 + $0xc0] sm:$0xff]  ;;  %v9030_v22 = vld [vmem:[#allocation53 + $0xc8] sm:$0xff] }
0x30f4   : > { %v13164_v25 = vpack.c.bf16 %v9030_v22, %v9029_v19  ;;  %v9199_v19 = vld [vmem:[%s16724_s26 + $0x68] sm:$0xff] }
0x30f5   : > { %11788 = vmatmul.mubr.f32.vlgmr.msra.gmra.mrb[62].mxu0 %v16449_v24  ;;  %v13218_v22 = vpack.c.bf16 %v9199_v19, %v9198_v17 }
0x30f6   : > { %11792 = vmatprep.mubr.msk.f32.mxu0 %vm14860_vm3, %v14861_v20  ;;  %13165 = vmatpush3.bf16.msra.mxu1 %v13164_v25  ;;  %v9200_v25 = vld [vmem:[%s16724_s26 + $0x70] sm:$0xff] }
0x30f7   : > { %13166 = vmatprep.subr.bf16.mxu1 %v14859_v47 }
0x3112   : > { %v8753_v27 = vpop.f32.mrb[62].mxu1 }
0x3113   : > { %v8754_v58 = vadd.f32 %v8753_v27, %v8680_v26  ;;  %v8755_v30 = vpop.f32.mrb[63].mxu1  ;;  %v9032_v26 = vld [vmem:[#allocation53 + $0xd8] sm:$0xff]  ;;  %v9033_v27 = vld [vmem:[#allocation53 + $0xe0] sm:$0xff] }
0x3114   : > { %v8756_v31 = vadd.f32 %v8755_v30, %v8684_v16  ;;  %v13167_v16 = vpack.c.bf16 %v9032_v26, %v9031_v18  ;;  %v9201_v18 = vld [vmem:[%s16724_s26 + $0x78] sm:$0xff] }
0x3115   : > { %11791 = vmatpush3.xpose.msra.mxu0 %v8754_v58  ;;  %v9034_v58 = vld [vmem:[#allocation53 + $0xe8] sm:$0xff]  ;;  %v13221_v26 = vpack.c.bf16 %v9201_v18, %v9200_v25 }
0x3116   : > { %11795 = vmatprep.subr.mxu0 %v14861_v20  ;;  %13168 = vmatpush3.bf16.msra.mxu1 %v13167_v16  ;;  %v13170_v30 = vpack.c.bf16 %v9034_v58, %v9033_v27  ;;  %v9280_v16 = vld [vmem:[%s15094_s21] sm:$0xff]  ;;  %v9281_v27 = vld [vmem:[%s15094_s21 + $0x8] sm:$0xff] }
0x3117   : > { %13169 = vmatprep.subr.bf16.mxu1 %v14859_v47  ;;  %v13224_v58 = vpack.c.bf16 %v9281_v27, %v9280_v16 }
0x311a   : > { %13171 = vmatpush3.bf16.msra.mxu1 %v13170_v30 }
0x311b   : > { %13172 = vmatprep.subr.bf16.mxu1 %v14859_v47 }
0x31c8   : > { %v8639_v32 = vpop.f32.mrb[62].mxu0 }
0x31c9   : > { %v8640_v33 = vadd.f32 %v10166_v29, %v8639_v32  ;;  %v11789_v5 = vpop.f32.mrb[63].mxu0  ;;  %v9006_v29 = vld [vmem:[#allocation53 + $0x8] sm:$0xff] }
0x31ca   : > { %v9008_v5 = vld [vmem:[#allocation53 + $0x18] sm:$0xff] }
0x31cb   : > { %11793 = vmatmul.mubr.f32.vlgmr.msra.gmra.mrb[64].mxu0 %v8640_v33  ;;  %v9007_v33 = vld [vmem:[#allocation53 + $0x10] sm:$0xff] }
0x31cc   : > { %11796 = vmatpush3.msra.mxu0 %v8756_v31  ;;  %11797 = vmatprep.mubr.msk.f32.mxu0 %vm14860_vm3, %v14861_v20  ;;  %v9005_v31 = vld [vmem:[#allocation53] sm:$0xff] }
0x31cd   : > { %13127 = vmatprep.subr.bf16.mxu0 %v14859_v47  ;;  %v13176_v32 = vpack.c.bf16 %v9006_v29, %v9005_v31  ;;  %v10169_v31 = vld [vmem:[#allocation55] ss:$0 sm:$0xff] }
0x329e   : > { %v8824_v63 = vpop.f32.mrb[64].mxu0 }
0x329f   : > { %v11794_v0 = vpop.f32.mrb[65].mxu0  ;;  %v8828_v23 = vsel %vm5440_vm6, %v8824_v63, -inf }
0x32a0   : > { %8829 = vmax.xlane.f32.xlu1 %v8828_v23  ;;  %v13179_v23 = vpack.c.bf16 %v9008_v5, %v9007_v33 }
0x332d   : > { %v8830_v8 = vpop.xlane.xlu1 %8829 }
0x332e   : > { %v8831_v34 = vsub.f32 %v8824_v63, %v8830_v8  ;;  %v9009_v8 = vld [vmem:[#allocation53 + $0x20] sm:$0xff] }
0x3330   : > { %v8832_v21 = vmul.f32 1.442695, %v8831_v34  ;;  %v9010_v34 = vld [vmem:[#allocation53 + $0x28] sm:$0xff] }
0x3332   : > { %13659 = vpow2.f32 %v8832_v21  ;;  %v13182_v21 = vpack.c.bf16 %v9010_v34, %v9009_v8  ;;  %v10170_v8 = vld [vmem:[#allocation56] ss:$0 sm:$0xff] }
0x333c   : > { %v13660_v36 = vpop.eup %13659 }
0x333d   : > { %v8834_v37 = vsel %vm5440_vm6, %v13660_v36, 0.0 }
0x333e   : > { %8835 = vadd.xlane.f32.xlu1 %v8834_v37  ;;  %v9012_v37 = vld [vmem:[#allocation53 + $0x38] sm:$0xff] }
0x33cb   : > { %v8836_v38 = vpop.xlane.xlu1 %8835 }
0x33cc   : > { %13661 = vrcp.f32 %v8836_v38 }
0x33d6   : > { %v13662_v41 = vpop.eup %13661 }
0x33d7   : > { %v8838_v46 = vmul.f32 %v13662_v41, %v13660_v36  ;;  %v9011_v36 = vld [vmem:[#allocation53 + $0x30] sm:$0xff]  ;;  %v13188_v41 = vpack.c.bf16 %v9014_v40, %v9013_v39 }
0x33d8   : > { %v13185_v38 = vpack.c.bf16 %v9012_v37, %v9011_v36 }
0x33d9   : > { %11798 = vmatmul.mubr.msk.f32.vlgmr.msra.gmra.mrb[66].mxu0 %vm5440_vm6, %v8838_v46  ;;  %v9016_v46 = vld [vmem:[#allocation53 + $0x58] sm:$0xff] }
0x33da   : > { %13129 = vmatpush3.bf16.msra.mxu0 %v13128_v45  ;;  %11832 = vmatprep.mubr.msk.f32.mxu0 %vm14860_vm3, %v14861_v20  ;;  %v9015_v45 = vld [vmem:[#allocation53 + $0x50] sm:$0xff] }
0x33db   : > { %13130 = vmatprep.subr.bf16.mxu0 %v14859_v47  ;;  %v13191_v48 = vpack.c.bf16 %v9016_v46, %v9015_v45 }
0x33de   : > { %13132 = vmatpush3.bf16.msra.mxu0 %v13131_v50  ;;  %v9018_v50 = vld [vmem:[#allocation53 + $0x68] sm:$0xff] }
0x33df   : > { %13133 = vmatprep.subr.bf16.mxu0 %v14859_v47  ;;  %v13194_v60 = vpack.c.bf16 %v9018_v50, %v9017_v62 }
0x33e2   : > { %13135 = vmatpush3.bf16.msra.mxu0 %v13134_v53  ;;  %v9020_v53 = vld [vmem:[#allocation53 + $0x78] sm:$0xff] }
0x33e3   : > { %13136 = vmatprep.subr.bf16.mxu0 %v14859_v47  ;;  %v13197_v54 = vpack.c.bf16 %v9020_v53, %v9019_v51 }
0x33e6   : > { %13138 = vmatpush3.bf16.msra.mxu0 %v13137_v55  ;;  %v9036_v55 = vld [vmem:[#allocation53 + $0xf8] sm:$0xff] }
0x33e7   : > { %13139 = vmatprep.subr.bf16.mxu0 %v14859_v47  ;;  %v13173_v56 = vpack.c.bf16 %v9036_v55, %v9035_v57 }
0x33e9   : > { %13174 = vmatpush3.bf16.msra.mxu1 %v13173_v56 }
0x33ea   : > { %13141 = vmatpush3.bf16.msra.mxu0 %v13140_v1  ;;  %13199 = vmatprep.subr.bf16.mxu1 %v14859_v47  ;;  %v9187_v1 = vld [vmem:[%s16724_s26 + $0x8] sm:$0xff] }
0x33eb   : > { %13142 = vmatprep.subr.bf16.mxu0 %v14859_v47 }
0x33ee   : > { %13144 = vmatpush3.bf16.msra.mxu0 %v13143_v49  ;;  %v13200_v49 = vpack.c.bf16 %v9187_v1, %v9186_v61 }
0x33ef   : > { %13145 = vmatprep.subr.bf16.mxu0 %v14859_v47 }
0x33f2   : > { %13147 = vmatpush3.bf16.msra.mxu0 %v13146_v3  ;;  %v9189_v3 = vld [vmem:[%s16724_s26 + $0x18] sm:$0xff] }
0x33f3   : > { %13148 = vmatprep.subr.bf16.mxu0 %v14859_v47  ;;  %v13203_v4 = vpack.c.bf16 %v9189_v3, %v9188_v43 }
0x33f6   : > { %13150 = vmatpush3.bf16.msra.mxu0 %v13149_v35  ;;  %v9191_v35 = vld [vmem:[%s16724_s26 + $0x28] sm:$0xff] }
0x33f7   : > { %13175 = vmatprep.subr.bf16.mxu0 %v14859_v47  ;;  %v13206_v6 = vpack.c.bf16 %v9191_v35, %v9190_v59 }
0x34ac   : > { %v8908_v63 = vpop.f32.mrb[66].mxu0 }
0x34ad   : > { %v11799_v0 = vpop.f32.mrb[67].mxu0  ;;  %11833 = vmatmul.mubr.f32.vlgmr.msra.gmra.mrb[68].mxu0 %v8908_v63  ;;  %v9282_v63 = vld [vmem:[%s15094_s21 + $0x10] sm:$0xff] }
0x34ae   : > { %13177 = vmatpush3.bf16.msra.mxu0 %v13176_v32  ;;  %11902 = vmatprep.mubr.msk.f32.mxu0 %vm14860_vm3, %v14861_v20  ;;  %v9283_v0 = vld [vmem:[%s15094_s21 + $0x18] sm:$0xff] }
0x34af   : > { %13178 = vmatprep.subr.bf16.mxu0 %v14859_v47 }
0x34b2   : > { %13180 = vmatpush3.bf16.msra.mxu0 %v13179_v23  ;;  %v13227_v23 = vpack.c.bf16 %v9283_v0, %v9282_v63 }
0x34b3   : > { %13181 = vmatprep.subr.bf16.mxu0 %v14859_v47 }
0x34b6   : > { %13183 = vmatpush3.bf16.msra.mxu0 %v13182_v21 }
0x34b7   : > { %13184 = vmatprep.subr.bf16.mxu0 %v14859_v47 }
0x34ba   : > { %13186 = vmatpush3.bf16.msra.mxu0 %v13185_v38 }
0x34bb   : > { %13187 = vmatprep.subr.bf16.mxu0 %v14859_v47 }
0x34be   : > { %13189 = vmatpush3.bf16.msra.mxu0 %v13188_v41 }
0x34bf   : > { %13190 = vmatprep.subr.bf16.mxu0 %v14859_v47 }
0x34c2   : > { %13192 = vmatpush3.bf16.msra.mxu0 %v13191_v48 }
0x34c3   : > { %13193 = vmatprep.subr.bf16.mxu0 %v14859_v47 }
0x34c6   : > { %13195 = vmatpush3.bf16.msra.mxu0 %v13194_v60 }
0x34c7   : > { %13196 = vmatprep.subr.bf16.mxu0 %v14859_v47 }
0x34ca   : > { %13198 = vmatpush3.bf16.msra.mxu0 %v13197_v54 }
0x34cb   : > { %13223 = vmatprep.subr.bf16.mxu0 %v14859_v47 }
0x34cd   : > { %11903 = vmatmul.mubr.f32.vlgmr.msra.gmra.mrb[70].mxu0 %v16449_v24 }
0x34ce   : > { %11948 = vmatprep.mubr.msk.f32.mxu0 %vm14860_vm3, %v14861_v20  ;;  %13225 = vmatpush3.bf16.msra.mxu0 %v13224_v58 }
0x34cf   : > { %13226 = vmatprep.subr.bf16.mxu0 %v14859_v47 }
0x34d2   : > { %13228 = vmatpush3.bf16.msra.mxu0 %v13227_v23 }
0x3580   : > { %v9001_v28 = vpop.f32.mrb[68].mxu0 }
0x3581   : > { %v9002_v42 = vadd.f32 %v10168_v52, %v9001_v28  ;;  %v11834_v24 = vpop.f32.mrb[69].mxu0 }
0x3583   : > { %11868 = vmatmul.mubr.f32.vlgmr.msra.gmra.mrb[64].mxu1 %v9002_v42 }
0x3584   : > { %13201 = vmatpush3.bf16.msra.mxu1 %v13200_v49  ;;  %11937 = vmatprep.mubr.msk.f32.mxu1 %vm14860_vm3, %v14861_v20  ;;  %v9195_v20 = vld [vmem:[%s16724_s26 + $0x48] sm:$0xff] }
0x3585   : > { %13202 = vmatprep.subr.bf16.mxu1 %v14859_v47  ;;  %v13212_v10 = vpack.c.bf16 %v9195_v20, %v9194_v9 }
0x3588   : > { %13204 = vmatpush3.bf16.msra.mxu1 %v13203_v4 }
0x3589   : > { %13205 = vmatprep.subr.bf16.mxu1 %v14859_v47 }
0x358c   : > { %13207 = vmatpush3.bf16.msra.mxu1 %v13206_v6 }
0x358d   : > { %13208 = vmatprep.subr.bf16.mxu1 %v14859_v47 }
0x3590   : > { %13210 = vmatpush3.bf16.msra.mxu1 %v13209_v2 }
0x3591   : > { %13211 = vmatprep.subr.bf16.mxu1 %v14859_v47 }
0x3594   : > { %13213 = vmatpush3.bf16.msra.mxu1 %v13212_v10 }
0x3595   : > { %13214 = vmatprep.subr.bf16.mxu1 %v14859_v47 }
0x3598   : > { %13216 = vmatpush3.bf16.msra.mxu1 %v13215_v13 }
0x3599   : > { %13217 = vmatprep.subr.bf16.mxu1 %v14859_v47 }
0x359c   : > { %13219 = vmatpush3.bf16.msra.mxu1 %v13218_v22 }
0x359d   : > { %13220 = vmatprep.subr.bf16.mxu1 %v14859_v47  ;;  %v10171_v47 = vld [vmem:[#allocation58] ss:$0 sm:$0xff] }
0x35a0   : > { %v9173_v14 = vpop.f32.mrb[70].mxu0  ;;  %13222 = vmatpush3.bf16.msra.mxu1 %v13221_v26 }
0x35a1   : > { %v11904_v15 = vpop.f32.mrb[71].mxu0 }
0x3656   : > { %v9103_v30 = vpop.f32.mrb[64].mxu1 }
0x3657   : > { %v9174_v29 = vadd.f32 %v9173_v14, %v9103_v30  ;;  %v11869_v32 = vpop.f32.mrb[65].mxu1 }
0x3659   : > { %v9184_v33 = vadd.f32 %v10169_v31, %v9174_v29 }
0x365b   : > { %v9185_v5 = vmax.f32 %v9184_v33, 0.0 }
0x365d   : > { %11938 = vmatmul.mubr.f32.vlgmr.msra.gmra.mrb[66].mxu1 %v9185_v5 }
0x3730   : > { %v9275_v34 = vpop.f32.mrb[66].mxu1 }
0x3731   : > { %v9276_v21 = vadd.f32 %v10170_v8, %v9275_v34  ;;  %v11939_v36 = vpop.f32.mrb[67].mxu1 }
0x3733   : > { %v9279_v37 = vmax.f32 %v9276_v21, 0.0 }
0x3735   : > { %11949 = vmatmul.mubr.msk.f32.vlgmr.msra.gmra.mrb[72].mxu0 %vm5363_vm5, %v9279_v37 }
0x3808   : > { %v9360_v38 = vpop.f32.mrb[72].mxu0 }
0x3809   : > { %v9361_v39 = vadd.f32 %v10171_v47, %v9360_v38  ;;  %v11950_v40 = vpop.f32.mrb[73].mxu0 }
0x380b   : > { %v9365_v41 = vsel %vm9364_vm7, %v9361_v39, 0.0 }
0x380c   : > { %v9366_v45 = vrot.slane %v9365_v41, 4 }
0x380e   : > { %v9367_v46 = vadd.f32 %v9366_v45, %v9365_v41 }
0x3810   : > { %v9368_v48 = vrot.slane %v9367_v46, 2 }
0x3812   : > { %v9369_v62 = vadd.f32 %v9368_v48, %v9367_v46 }
0x3814   : > { %v9370_v50 = vrot.slane %v9369_v62, 1 }
0x3816   : > { %v9371_v60 = vadd.f32 %v9370_v50, %v9369_v62 }
0x3818   : > { %v9373_v51 = vmul.f32 0.125, %v9371_v60 }
0x381a   : > { %9375 = vst.msk [vmem:[%s1892_s2] sm:$0x1] %vm9374_vm8, %v9373_v51 }
0x381b   : > { %14638 = shalt.err (!%p14635_p2)
}
0x381c   : > { %s14639_s1 = scalar_lea.hbm %s16528_s4, 16  ;;  %s14643_s2 = scalar_lea.hbm %s15104_s13, 32 }
0x381d   : > { %p14640_p3 = scmp.ne.s32.totalorder %s16528_s4, %s14639_s1  ;;  %p14644_p8 = scmp.lt.u32.totalorder %s16528_s4, %s15104_s13 }
0x381e   : > { %p14645_p11 = scmp.lt.u32.totalorder %s14643_s2, %s14639_s1  ;;  %p14647_p10 = scmp.lt.u32.totalorder %s14639_s1, %s16528_s4 }
0x381f   : > { %p14641_p4 = pnand %p14640_p3, %p16725_p12 }
0x3820   : > { %p14646_p9 = por %p14645_p11, %p14644_p8 }
0x3821   : > { %p14642_p7 = pneg %p14641_p4 }
0x3822   : > { %p14648_p13 = por %p14647_p10, %p14646_p9 }
0x3824   : > { %p14649_p0 = pnand %p14648_p13, %p14642_p7 }
0x3826   : > { %14652 = shalt.err (!%p14649_p0)
}
0x3827   : > { %13400 = dma.vmem_to_hbm [thread:$0]  (%p16725_p12), %s16530_s3, 16, %s16528_s4, %s9377_s5  }
0x3828 PF: > { %s16726_s8 = sld [smem:[#allocation122_spill]]  ;;  %p13480_p1 = scmp.ge.s32.totalorder %s14763_s18, 2 }
0x3829   : > { %s9401_s6 = sand.u32 1, %s14751_s0  }
0x382a   : > { %s9402_s9 = scalar_lea.sflag [#allocation4], %s9401_s6 }
0x382e   : > { %p16727_p5 = scmp.ne.s32.totalorder %s16726_s8, 0 }
0x3830   : > { %p13403_p6 = pnand %p13480_p1, %p16727_p5 }
0x3832   : > { %14746 = dma.done.wait (!%p13403_p6), %s9402_s9, 16  }
0x3833   : > { %14748 = vsyncadd (!%p13403_p6), %s9402_s9, 4294967280  ;;  %s16728_s18 = sld [smem:[#allocation120_spill]]  ;;  %s16729_s16 = sld [smem:[#allocation119_spill]] }
0x3834   : > { %s16730_s22 = sld [smem:[#allocation121_spill]]  ;;  %s16731_s0 = smov %s14755_s15 }
0x3839   : > { %p122_p2 = scmp.ge.s32.totalorder %s16728_s18, 4   ;;  %s16732_s15 = smov %s16729_s16 }
0x383a   : > { %s16733_s16 = smov %s16730_s22 }
0x383b   :  { %124 = sbr.rel (!%p122_p2) target bundleno = 111 (0x6f), region = 460 }
0x3842   :  { %9406 = vsyncpa [#allocation3], 1 }
0x3843   :  { %9408 = vsyncpa [#allocation3 + $0x1], 1 }
0x3844   :  { %9409 = vsyncpa [#allocation6], 1 }
0x3845   :  { %9410 = vsyncpa [#allocation9], 1 }
0x3846   :  { %9411 = vsyncpa [#allocation12], 1 }
0x3847   :  { %9412 = vsyncpa [#allocation15], 1 }
0x3848   :  { %9413 = vsyncpa [#allocation18], 1 }
0x3849   :  { %9414 = vsyncpa [#allocation21], 1 }
0x384a   :  { %9415 = vsyncpa [#allocation24], 1 }
0x384b   :  { %9416 = vsyncpa [#allocation27], 1 }
0x384c   :  { %9417 = vsyncpa [#allocation30], 1 }
0x384d   :  { %9418 = vsyncpa [#allocation33], 1 }
0x384e   :  { %9419 = vsyncpa [#allocation36], 1 }
0x384f   :  { %9420 = vsyncpa [#allocation39], 1 }
0x3850   :  { %9421 = vsyncpa [#allocation42], 1 }
0x3851   :  { %9422 = vsyncpa [#allocation45], 1 }
0x3852   :  { %9423 = vsyncpa [#allocation48], 1 }
0x3853   :  { %9424 = vsyncpa [#allocation51], 1 }
0x3854   :  { %9425 = vsyncpa [#allocation54], 1 }
0x3855   :  { %9426 = vsyncpa [#allocation57], 1 }
0x3856   :  { %9427 = vsyncpa [#allocation4], 1 }
0x3857   :  { %9429 = vsyncpa [#allocation4 + $0x1], 1 }

</bundles_post_ra>
